<compile_context>
chip_gen: v7x
topology: tpu7x:2x2x1
jax: 0.10.0
libtpu: 0.0.40
codegen_flags: <defaults>
</compile_context>

<pallas_src>
import functools

import jax
import jax.numpy as jnp
from jax.experimental import pallas as pl
from jax.experimental.pallas import tpu as pltpu

IN_EPS = 1e-5   # nn.InstanceNorm2d default eps
LANE = 128


def _round_up(x, m):
    return ((x + m - 1) // m) * m


# ----------------------------------------------------------------------------
# In-kernel halo construction (reflect | replicate | zeros), all in VMEM.
# ----------------------------------------------------------------------------
def _fill_padded(dst_ref, src, padding_type, h, w):
    """Write `src` (h, w, Cp) into dst_ref (h+2, >=w+2, Cp) with a 1-px halo."""
    dst_ref[1:h + 1, 1:w + 1, :] = src
    if padding_type == 'reflect':
        top, bot = src[1:2], src[h - 2:h - 1]
    elif padding_type == 'replicate':
        top, bot = src[0:1], src[h - 1:h]
    elif padding_type == 'zeros':
        top = bot = jnp.zeros_like(src[0:1])
    else:
        raise NotImplementedError('padding [%s] is not implemented' % padding_type)
    dst_ref[0:1, 1:w + 1, :] = top
    dst_ref[h + 1:h + 2, 1:w + 1, :] = bot
    # Left/right halo columns.  Corners come out right because the top/bottom
    # halo rows above are already written.
    if padding_type == 'zeros':
        zcol = jnp.zeros((h + 2, 1, src.shape[-1]), src.dtype)
        dst_ref[:, 0:1, :] = zcol
        dst_ref[:, w + 1:w + 2, :] = zcol
    elif padding_type == 'reflect':
        dst_ref[:, 0:1, :] = dst_ref[:, 2:3, :]
        dst_ref[:, w + 1:w + 2, :] = dst_ref[:, w - 1:w, :]
    else:  # replicate
        dst_ref[:, 0:1, :] = dst_ref[:, 1:2, :]
        dst_ref[:, w + 1:w + 2, :] = dst_ref[:, w:w + 1, :]
    # NOTE: columns >= w+2 of the scratch are never written; they only feed
    # output columns >= w, which are sliced away before the stats/output.


# ----------------------------------------------------------------------------
# 3x3 VALID conv over the padded scratch + InstanceNorm (+ ReLU), f32 result.
# ----------------------------------------------------------------------------
def _conv3x3_instnorm(pad_ref, w_ref, *, h, w, w8, cp, relu):
    """pad_ref: (h+2, w8+8, Cp) bf16 scratch (halo built).
       w_ref:   (3, 3*Cp, Cp)  bf16, rows ordered [kx*Cp + cin] per ky.
       Returns (h, w, Cp) float32 (normalized, optionally ReLU'd)."""
    hp = h + 2
    # Fold the 3 kx taps into the contraction: lane-concat of 3 column-shifted
    # reads of the padded image.  w8 % 8 == 0, so the reshape is a free view
    # and the per-ky slices below are sublane-aligned (no relayout copies).
    xc = jnp.concatenate([pad_ref[:, kx:kx + w8, :] for kx in range(3)], axis=2)
    xc = xc.reshape(hp * w8, 3 * cp)

    acc = jnp.zeros((h * w8, cp), jnp.float32)
    for ky in range(3):                       # 3 MXU matmuls, K = 3*Cp
        acc = acc + jnp.dot(xc[ky * w8:(ky + h) * w8, :], w_ref[ky],
                            preferred_element_type=jnp.float32)

    val = acc.reshape(h, w8, cp)[:, :w, :]    # valid (h, w, Cp) window

    # InstanceNorm2d (affine=False, biased variance, eps=1e-5), single pass:
    # per-channel sum + sum-of-squares, then y = val*inv_std - mean*inv_std.
    inv_m = 1.0 / (h * w)
    s1 = jnp.sum(val, axis=(0, 1), keepdims=True)
    s2 = jnp.sum(val * val, axis=(0, 1), keepdims=True)
    mean = s1 * inv_m
    var = jnp.maximum(s2 * inv_m - mean * mean, 0.0)
    inv_std = jax.lax.rsqrt(var + IN_EPS)
    y = val * inv_std - mean * inv_std
    if relu:
        y = jnp.maximum(y, 0.0)
    return y


# ----------------------------------------------------------------------------
# Fused ResnetBlock kernel: one grid step == one image.
# ----------------------------------------------------------------------------
def _resnet_block_kernel(x_ref, w1_ref, w2_ref, o_ref, xpad_ref, hpad_ref, *,
                         h, w, w8, cp, padding_type):
    xv = x_ref[0]                                            # (h, w, Cp) bf16

    # conv1: pad -> 3x3 conv -> InstanceNorm -> ReLU  (bias cancelled by IN)
    _fill_padded(xpad_ref, xv, padding_type, h, w)
    h1 = _conv3x3_instnorm(xpad_ref, w1_ref, h=h, w=w, w8=w8, cp=cp, relu=True)

    # conv2: pad -> 3x3 conv -> InstanceNorm, then residual add (x already in
    # VMEM; bf16 residual is a small documented precision delta vs fp32).
    _fill_padded(hpad_ref, h1.astype(jnp.bfloat16), padding_type, h, w)
    y2 = _conv3x3_instnorm(hpad_ref, w2_ref, h=h, w=w, w8=w8, cp=cp, relu=False)

    o_ref[0] = (y2 + xv.astype(jnp.float32)).astype(o_ref.dtype)


def _vmem_limit_bytes():
    cap = 128 * 1024 * 1024
    try:
        cap = int(getattr(pltpu.get_tpu_info(), "vmem_capacity_bytes", cap))
    except Exception:
        pass
    # Leave headroom for compiler-internal scratch; cap at ~100 MiB on big parts.
    return max(32 * 1024 * 1024, min(cap - 12 * 1024 * 1024, 100 * 1024 * 1024))


def _resnet_block_call(x, w1p, w2p, padding_type):
    # x: (N, H, W, Cp) bf16 ; w1p/w2p: (3, 3*Cp, Cp) bf16
    n, h, w, cp = x.shape
    hp = h + 2
    w8 = _round_up(w, 8)
    wbuf = w8 + 8                      # padded-scratch width (>= w+2, mult of 8)

    kernel = functools.partial(_resnet_block_kernel, h=h, w=w, w8=w8, cp=cp,
                               padding_type=padding_type)

    flops = 2 * 2 * n * h * w * 9 * cp * cp          # two 3x3 convs
    bytes_accessed = (x.size * x.dtype.itemsize
                      + w1p.size * w1p.dtype.itemsize
                      + w2p.size * w2p.dtype.itemsize
                      + n * h * w * cp * 4)
    cost = pl.CostEstimate(flops=flops, transcendentals=2 * n * cp,
                           bytes_accessed=bytes_accessed)

    return pl.pallas_call(
        kernel,
        out_shape=jax.ShapeDtypeStruct((n, h, w, cp), jnp.float32),
        grid=(n,),
        in_specs=[
            pl.BlockSpec((1, h, w, cp), lambda i: (i, 0, 0, 0)),
            pl.BlockSpec((3, 3 * cp, cp), lambda i: (0, 0, 0)),
            pl.BlockSpec((3, 3 * cp, cp), lambda i: (0, 0, 0)),
        ],
        out_specs=pl.BlockSpec((1, h, w, cp), lambda i: (i, 0, 0, 0)),
        scratch_shapes=[
            pltpu.VMEM((hp, wbuf, cp), jnp.bfloat16),   # padded x
            pltpu.VMEM((hp, wbuf, cp), jnp.bfloat16),   # padded h1
        ],
        compiler_params=pltpu.CompilerParams(
            dimension_semantics=("parallel",),          # shard images across TCs
            vmem_limit_bytes=_vmem_limit_bytes(),
        ),
        cost_estimate=cost,
    )(x, w1p, w2p)


# ----------------------------------------------------------------------------
# Wrapper: out = x + conv_block(x), matching the PyTorch ResnetBlock forward.
# ----------------------------------------------------------------------------
def resnet_block_forward(x_nchw, w1p, w2p, *, padding_type='reflect',
                         use_dropout=False):
    # TODO(synk): train-mode Dropout(0.5) (use_dropout=True) not implemented.
    # TODO(synk): only InstanceNorm2d norm_layer implemented (BatchNorm2d would
    #             need cross-image statistics; affine norms need the bias back).
    # TODO(synk): whole-image-per-grid-step; very large H*W*Cp would need an
    #             H-tiled two-pass InstanceNorm variant to fit v7x's 64 MiB VMEM.
    assert not use_dropout
    n, dim, h, w = x_nchw.shape
    cp = w1p.shape[-1]

    x = jnp.transpose(x_nchw, (0, 2, 3, 1))                       # NHWC
    # Channel pad to lane-dense Cp (padded channels stay exactly zero).
    x = jnp.pad(x, ((0, 0), (0, 0), (0, 0), (0, cp - dim))).astype(jnp.bfloat16)

    out = _resnet_block_call(x, w1p, w2p, padding_type)           # (N,H,W,Cp) f32
    return jnp.transpose(out[..., :dim], (0, 3, 1, 2))            # NCHW f32


# ----------------------------------------------------------------------------
# Parameters (synthetic, deterministic).  Conv bias omitted: exactly cancelled
# by InstanceNorm's mean subtraction.
# ----------------------------------------------------------------------------
def make_params(key, dim):
    k1, k2 = jax.random.split(key)
    w1 = 0.02 * jax.random.normal(k1, (3, 3, dim, dim), dtype=jnp.float32)
    w2 = 0.02 * jax.random.normal(k2, (3, 3, dim, dim), dtype=jnp.float32)
    return w1, w2


def pack_weights(w, cp):
    """(3,3,Cin,Cout) f32 -> (3, 3*Cp, Cp) bf16, zero-padded, kx folded into K."""
    ci, co = w.shape[2], w.shape[3]
    wp = jnp.zeros((3, 3, cp, cp), jnp.float32).at[:, :, :ci, :co].set(w)
    return wp.reshape(3, 3 * cp, cp).astype(jnp.bfloat16)


# ----------------------------------------------------------------------------
# Pure-JAX fp32 reference (for a loose bf16-tolerance check).
# ----------------------------------------------------------------------------
def _reference(x_nchw, w1, w2, padding_type):
    mode = {'reflect': 'reflect', 'replicate': 'edge', 'zeros': 'constant'}[padding_type]

    def conv_in(x, wt, relu):
        xp = jnp.pad(x, ((0, 0), (1, 1), (1, 1), (0, 0)), mode=mode)
        y = jax.lax.conv_general_dilated(
            xp, wt, (1, 1), 'VALID',
            dimension_numbers=('NHWC', 'HWIO', 'NHWC'))
        mean = jnp.mean(y, axis=(1, 2), keepdims=True)
        var = jnp.var(y, axis=(1, 2), keepdims=True)
        y = (y - mean) * jax.lax.rsqrt(var + IN_EPS)
        return jnp.maximum(y, 0.0) if relu else y

    xh = jnp.transpose(x_nchw, (0, 2, 3, 1))
    out = xh + conv_in(conv_in(xh, w1, True), w2, False)
    return jnp.transpose(out, (0, 3, 1, 2))


if __name__ == "__main__":
    key = jax.random.PRNGKey(0)
    k_in, k_par = jax.random.split(key)

    batch, dim, spatial = 2, 32, 16
    x = jax.random.normal(k_in, (batch, dim, spatial, spatial),
                          dtype=jnp.float32)                  # NCHW, like PyTorch
    w1, w2 = make_params(k_par, dim)
    cp = max(LANE, _round_up(dim, LANE))
    w1p, w2p = pack_weights(w1, cp), pack_weights(w2, cp)

    fwd = jax.jit(functools.partial(resnet_block_forward,
                                    padding_type='reflect', use_dropout=False))
    out = jax.block_until_ready(fwd(x, w1p, w2p))

    assert out.shape == (batch, dim, spatial, spatial), out.shape
    assert bool(jnp.all(jnp.isfinite(out)))

    # Loose tolerance: kernel runs activations/weights in bf16 (fp32 reference).
    ref = jax.block_until_ready(
        jax.jit(functools.partial(_reference, padding_type='reflect'))(x, w1, w2))
    max_err = float(jnp.max(jnp.abs(out - ref)))
    assert max_err < 0.2, f"max abs error vs reference: {max_err}"

    print("KERNEL_OK")
</pallas_src>

<mosaic_0001>
module attributes {stable_mosaic.version = 11 : i64} {
  func.func @_resnet_block_kernel(%arg0: i32, %arg1: memref<1x16x16x128xbf16, #tpu.memory_space<vmem>>, %arg2: memref<3x384x128xbf16, #tpu.memory_space<vmem>>, %arg3: memref<3x384x128xbf16, #tpu.memory_space<vmem>>, %arg4: memref<1x16x16x128xf32, #tpu.memory_space<vmem>>, %arg5: memref<18x24x128xbf16, #tpu.memory_space<vmem>>, %arg6: memref<18x24x128xbf16, #tpu.memory_space<vmem>>) attributes {dimension_semantics = [#tpu.dimension_semantics<parallel>], iteration_bounds = array<i64: 2>, scalar_prefetch = 0 : i64, scratch_operands = 2 : i64, tpu.core_type = #tpu.core_type<tc>, window_params = [{transform_indices = @transform_0, window_bounds = array<i64: 1, 16, 16, 128>}, {pipeline_mode = #tpu.pipeline_mode<synchronous>, transform_indices = @transform_1, window_bounds = array<i64: 3, 384, 128>}, {pipeline_mode = #tpu.pipeline_mode<synchronous>, transform_indices = @transform_2, window_bounds = array<i64: 3, 384, 128>}, {transform_indices = @transform_3, window_bounds = array<i64: 1, 16, 16, 128>}]} {
    %c0 = arith.constant 0 : index
    %c0_0 = arith.constant 0 : index
    %c0_1 = arith.constant 0 : index
    %c0_2 = arith.constant 0 : index
    %0 = vector.load %arg1[%c0, %c0_0, %c0_1, %c0_2] : memref<1x16x16x128xbf16, #tpu.memory_space<vmem>>, vector<1x16x16x128xbf16>
    %1 = vector.shape_cast %0 : vector<1x16x16x128xbf16> to vector<16x16x128xbf16>
    %c1 = arith.constant 1 : index
    %c1_3 = arith.constant 1 : index
    %c0_4 = arith.constant 0 : index
    %2 = vector.load %arg5[%c1, %c1_3, %c0_4] : memref<18x24x128xbf16, #tpu.memory_space<vmem>>, vector<16x16x128xbf16>
    tpu.vector_store %arg5[%c1, %c1_3, %c0_4], %1 {strides = array<i32>} : memref<18x24x128xbf16, #tpu.memory_space<vmem>>, vector<16x16x128xbf16>,
    %3 = vector.extract_strided_slice %1 {offsets = [1, 0, 0], sizes = [1, 16, 128], strides = [1, 1, 1]} : vector<16x16x128xbf16> to vector<1x16x128xbf16>
    %4 = vector.extract_strided_slice %1 {offsets = [14, 0, 0], sizes = [1, 16, 128], strides = [1, 1, 1]} : vector<16x16x128xbf16> to vector<1x16x128xbf16>
    %c0_5 = arith.constant 0 : index
    %c1_6 = arith.constant 1 : index
    %c0_7 = arith.constant 0 : index
    %5 = vector.load %arg5[%c0_5, %c1_6, %c0_7] : memref<18x24x128xbf16, #tpu.memory_space<vmem>>, vector<1x16x128xbf16>
    tpu.vector_store %arg5[%c0_5, %c1_6, %c0_7], %3 {strides = array<i32>} : memref<18x24x128xbf16, #tpu.memory_space<vmem>>, vector<1x16x128xbf16>,
    %c17 = arith.constant 17 : index
    %c1_8 = arith.constant 1 : index
    %c0_9 = arith.constant 0 : index
    %6 = vector.load %arg5[%c17, %c1_8, %c0_9] : memref<18x24x128xbf16, #tpu.memory_space<vmem>>, vector<1x16x128xbf16>
    tpu.vector_store %arg5[%c17, %c1_8, %c0_9], %4 {strides = array<i32>} : memref<18x24x128xbf16, #tpu.memory_space<vmem>>, vector<1x16x128xbf16>,
    %c0_10 = arith.constant 0 : index
    %c2 = arith.constant 2 : index
    %c0_11 = arith.constant 0 : index
    %7 = vector.load %arg5[%c0_10, %c2, %c0_11] : memref<18x24x128xbf16, #tpu.memory_space<vmem>>, vector<18x1x128xbf16>
    %c0_12 = arith.constant 0 : index
    %c0_13 = arith.constant 0 : index
    %c0_14 = arith.constant 0 : index
    %8 = vector.load %arg5[%c0_12, %c0_13, %c0_14] : memref<18x24x128xbf16, #tpu.memory_space<vmem>>, vector<18x1x128xbf16>
    tpu.vector_store %arg5[%c0_12, %c0_13, %c0_14], %7 {strides = array<i32>} : memref<18x24x128xbf16, #tpu.memory_space<vmem>>, vector<18x1x128xbf16>,
    %c0_15 = arith.constant 0 : index
    %c15 = arith.constant 15 : index
    %c0_16 = arith.constant 0 : index
    %9 = vector.load %arg5[%c0_15, %c15, %c0_16] : memref<18x24x128xbf16, #tpu.memory_space<vmem>>, vector<18x1x128xbf16>
    %c0_17 = arith.constant 0 : index
    %c17_18 = arith.constant 17 : index
    %c0_19 = arith.constant 0 : index
    %10 = vector.load %arg5[%c0_17, %c17_18, %c0_19] : memref<18x24x128xbf16, #tpu.memory_space<vmem>>, vector<18x1x128xbf16>
    tpu.vector_store %arg5[%c0_17, %c17_18, %c0_19], %9 {strides = array<i32>} : memref<18x24x128xbf16, #tpu.memory_space<vmem>>, vector<18x1x128xbf16>,
    %c0_20 = arith.constant 0 : index
    %c0_21 = arith.constant 0 : index
    %c0_22 = arith.constant 0 : index
    %11 = vector.load %arg5[%c0_20, %c0_21, %c0_22] : memref<18x24x128xbf16, #tpu.memory_space<vmem>>, vector<18x16x128xbf16>
    %c0_23 = arith.constant 0 : index
    %c1_24 = arith.constant 1 : index
    %c0_25 = arith.constant 0 : index
    %12 = vector.load %arg5[%c0_23, %c1_24, %c0_25] : memref<18x24x128xbf16, #tpu.memory_space<vmem>>, vector<18x16x128xbf16>
    %c0_26 = arith.constant 0 : index
    %c2_27 = arith.constant 2 : index
    %c0_28 = arith.constant 0 : index
    %13 = vector.load %arg5[%c0_26, %c2_27, %c0_28] : memref<18x24x128xbf16, #tpu.memory_space<vmem>>, vector<18x16x128xbf16>
    %14 = tpu.concatenate %11, %12, %13 in 2 : vector<18x16x128xbf16>, vector<18x16x128xbf16>, vector<18x16x128xbf16> -> vector<18x16x384xbf16>
    %15 = vector.shape_cast %14 : vector<18x16x384xbf16> to vector<288x384xbf16>
    %cst = arith.constant 0.000000e+00 : f32
    %16 = vector.broadcast %cst : f32 to vector<256x128xf32>
    %17 = vector.extract_strided_slice %15 {offsets = [0, 0], sizes = [256, 384], strides = [1, 1]} : vector<288x384xbf16> to vector<256x384xbf16>
    %c0_29 = arith.constant 0 : index
    %c0_30 = arith.constant 0 : index
    %c0_31 = arith.constant 0 : index
    %18 = vector.load %arg2[%c0_29, %c0_30, %c0_31] : memref<3x384x128xbf16, #tpu.memory_space<vmem>>, vector<1x384x128xbf16>
    %19 = vector.shape_cast %18 : vector<1x384x128xbf16> to vector<384x128xbf16>
    %cst_32 = arith.constant dense<0.000000e+00> : vector<256x128xf32>
    %20 = tpu.matmul %17, %19, %cst_32 {dimension_numbers = #tpu.dot_dimension_numbers<[1], [0], [0], [1], [0, 0, 1, 1], [], []>} : vector<256x384xbf16>, vector<384x128xbf16>, vector<256x128xf32> -> vector<256x128xf32>
    %21 = arith.addf %16, %20 : vector<256x128xf32>
    %22 = vector.extract_strided_slice %15 {offsets = [16, 0], sizes = [256, 384], strides = [1, 1]} : vector<288x384xbf16> to vector<256x384xbf16>
    %c1_33 = arith.constant 1 : index
    %c0_34 = arith.constant 0 : index
    %c0_35 = arith.constant 0 : index
    %23 = vector.load %arg2[%c1_33, %c0_34, %c0_35] : memref<3x384x128xbf16, #tpu.memory_space<vmem>>, vector<1x384x128xbf16>
    %24 = vector.shape_cast %23 : vector<1x384x128xbf16> to vector<384x128xbf16>
    %cst_36 = arith.constant dense<0.000000e+00> : vector<256x128xf32>
    %25 = tpu.matmul %22, %24, %cst_36 {dimension_numbers = #tpu.dot_dimension_numbers<[1], [0], [0], [1], [0, 0, 1, 1], [], []>} : vector<256x384xbf16>, vector<384x128xbf16>, vector<256x128xf32> -> vector<256x128xf32>
    %26 = arith.addf %21, %25 : vector<256x128xf32>
    %27 = vector.extract_strided_slice %15 {offsets = [32, 0], sizes = [256, 384], strides = [1, 1]} : vector<288x384xbf16> to vector<256x384xbf16>
    %c2_37 = arith.constant 2 : index
    %c0_38 = arith.constant 0 : index
    %c0_39 = arith.constant 0 : index
    %28 = vector.load %arg2[%c2_37, %c0_38, %c0_39] : memref<3x384x128xbf16, #tpu.memory_space<vmem>>, vector<1x384x128xbf16>
    %29 = vector.shape_cast %28 : vector<1x384x128xbf16> to vector<384x128xbf16>
    %cst_40 = arith.constant dense<0.000000e+00> : vector<256x128xf32>
    %30 = tpu.matmul %27, %29, %cst_40 {dimension_numbers = #tpu.dot_dimension_numbers<[1], [0], [0], [1], [0, 0, 1, 1], [], []>} : vector<256x384xbf16>, vector<384x128xbf16>, vector<256x128xf32> -> vector<256x128xf32>
    %31 = arith.addf %26, %30 : vector<256x128xf32>
    %32 = vector.shape_cast %31 : vector<256x128xf32> to vector<16x16x128xf32>
    %cst_41 = arith.constant dense<0.000000e+00> : vector<128xf32>
    %33 = vector.multi_reduction <add>, %32, %cst_41 [0, 1] : vector<16x16x128xf32> to vector<128xf32>
    %34 = vector.shape_cast %33 : vector<128xf32> to vector<1x1x128xf32>
    %35 = arith.mulf %32, %32 : vector<16x16x128xf32>
    %cst_42 = arith.constant dense<0.000000e+00> : vector<128xf32>
    %36 = vector.multi_reduction <add>, %35, %cst_42 [0, 1] : vector<16x16x128xf32> to vector<128xf32>
    %37 = vector.shape_cast %36 : vector<128xf32> to vector<1x1x128xf32>
    %cst_43 = arith.constant 3.906250e-03 : f32
    %38 = vector.broadcast %cst_43 : f32 to vector<1x1x128xf32>
    %39 = arith.mulf %34, %38 : vector<1x1x128xf32>
    %cst_44 = arith.constant 3.906250e-03 : f32
    %40 = vector.broadcast %cst_44 : f32 to vector<1x1x128xf32>
    %41 = arith.mulf %37, %40 : vector<1x1x128xf32>
    %42 = arith.mulf %39, %39 : vector<1x1x128xf32>
    %43 = arith.subf %41, %42 : vector<1x1x128xf32>
    %cst_45 = arith.constant 0.000000e+00 : f32
    %44 = vector.broadcast %cst_45 : f32 to vector<1x1x128xf32>
    %45 = arith.maximumf %43, %44 : vector<1x1x128xf32>
    %cst_46 = arith.constant 9.99999974E-6 : f32
    %46 = vector.broadcast %cst_46 : f32 to vector<1x1x128xf32>
    %47 = arith.addf %45, %46 : vector<1x1x128xf32>
    %48 = math.rsqrt %47 : vector<1x1x128xf32>
    %49 = vector.broadcast %48 : vector<1x1x128xf32> to vector<16x16x128xf32>
    %50 = arith.mulf %32, %49 : vector<16x16x128xf32>
    %51 = arith.mulf %39, %48 : vector<1x1x128xf32>
    %52 = vector.broadcast %51 : vector<1x1x128xf32> to vector<16x16x128xf32>
    %53 = arith.subf %50, %52 : vector<16x16x128xf32>
    %cst_47 = arith.constant 0.000000e+00 : f32
    %54 = vector.broadcast %cst_47 : f32 to vector<16x16x128xf32>
    %55 = arith.maximumf %53, %54 : vector<16x16x128xf32>
    %56 = arith.truncf %55 : vector<16x16x128xf32> to vector<16x16x128xbf16>
    %c1_48 = arith.constant 1 : index
    %c1_49 = arith.constant 1 : index
    %c0_50 = arith.constant 0 : index
    %57 = vector.load %arg6[%c1_48, %c1_49, %c0_50] : memref<18x24x128xbf16, #tpu.memory_space<vmem>>, vector<16x16x128xbf16>
    tpu.vector_store %arg6[%c1_48, %c1_49, %c0_50], %56 {strides = array<i32>} : memref<18x24x128xbf16, #tpu.memory_space<vmem>>, vector<16x16x128xbf16>,
    %58 = vector.extract_strided_slice %56 {offsets = [1, 0, 0], sizes = [1, 16, 128], strides = [1, 1, 1]} : vector<16x16x128xbf16> to vector<1x16x128xbf16>
    %59 = vector.extract_strided_slice %56 {offsets = [14, 0, 0], sizes = [1, 16, 128], strides = [1, 1, 1]} : vector<16x16x128xbf16> to vector<1x16x128xbf16>
    %c0_51 = arith.constant 0 : index
    %c1_52 = arith.constant 1 : index
    %c0_53 = arith.constant 0 : index
    %60 = vector.load %arg6[%c0_51, %c1_52, %c0_53] : memref<18x24x128xbf16, #tpu.memory_space<vmem>>, vector<1x16x128xbf16>
    tpu.vector_store %arg6[%c0_51, %c1_52, %c0_53], %58 {strides = array<i32>} : memref<18x24x128xbf16, #tpu.memory_space<vmem>>, vector<1x16x128xbf16>,
    %c17_54 = arith.constant 17 : index
    %c1_55 = arith.constant 1 : index
    %c0_56 = arith.constant 0 : index
    %61 = vector.load %arg6[%c17_54, %c1_55, %c0_56] : memref<18x24x128xbf16, #tpu.memory_space<vmem>>, vector<1x16x128xbf16>
    tpu.vector_store %arg6[%c17_54, %c1_55, %c0_56], %59 {strides = array<i32>} : memref<18x24x128xbf16, #tpu.memory_space<vmem>>, vector<1x16x128xbf16>,
    %c0_57 = arith.constant 0 : index
    %c2_58 = arith.constant 2 : index
    %c0_59 = arith.constant 0 : index
    %62 = vector.load %arg6[%c0_57, %c2_58, %c0_59] : memref<18x24x128xbf16, #tpu.memory_space<vmem>>, vector<18x1x128xbf16>
    %c0_60 = arith.constant 0 : index
    %c0_61 = arith.constant 0 : index
    %c0_62 = arith.constant 0 : index
    %63 = vector.load %arg6[%c0_60, %c0_61, %c0_62] : memref<18x24x128xbf16, #tpu.memory_space<vmem>>, vector<18x1x128xbf16>
    tpu.vector_store %arg6[%c0_60, %c0_61, %c0_62], %62 {strides = array<i32>} : memref<18x24x128xbf16, #tpu.memory_space<vmem>>, vector<18x1x128xbf16>,
    %c0_63 = arith.constant 0 : index
    %c15_64 = arith.constant 15 : index
    %c0_65 = arith.constant 0 : index
    %64 = vector.load %arg6[%c0_63, %c15_64, %c0_65] : memref<18x24x128xbf16, #tpu.memory_space<vmem>>, vector<18x1x128xbf16>
    %c0_66 = arith.constant 0 : index
    %c17_67 = arith.constant 17 : index
    %c0_68 = arith.constant 0 : index
    %65 = vector.load %arg6[%c0_66, %c17_67, %c0_68] : memref<18x24x128xbf16, #tpu.memory_space<vmem>>, vector<18x1x128xbf16>
    tpu.vector_store %arg6[%c0_66, %c17_67, %c0_68], %64 {strides = array<i32>} : memref<18x24x128xbf16, #tpu.memory_space<vmem>>, vector<18x1x128xbf16>,
    %c0_69 = arith.constant 0 : index
    %c0_70 = arith.constant 0 : index
    %c0_71 = arith.constant 0 : index
    %66 = vector.load %arg6[%c0_69, %c0_70, %c0_71] : memref<18x24x128xbf16, #tpu.memory_space<vmem>>, vector<18x16x128xbf16>
    %c0_72 = arith.constant 0 : index
    %c1_73 = arith.constant 1 : index
    %c0_74 = arith.constant 0 : index
    %67 = vector.load %arg6[%c0_72, %c1_73, %c0_74] : memref<18x24x128xbf16, #tpu.memory_space<vmem>>, vector<18x16x128xbf16>
    %c0_75 = arith.constant 0 : index
    %c2_76 = arith.constant 2 : index
    %c0_77 = arith.constant 0 : index
    %68 = vector.load %arg6[%c0_75, %c2_76, %c0_77] : memref<18x24x128xbf16, #tpu.memory_space<vmem>>, vector<18x16x128xbf16>
    %69 = tpu.concatenate %66, %67, %68 in 2 : vector<18x16x128xbf16>, vector<18x16x128xbf16>, vector<18x16x128xbf16> -> vector<18x16x384xbf16>
    %70 = vector.shape_cast %69 : vector<18x16x384xbf16> to vector<288x384xbf16>
    %cst_78 = arith.constant 0.000000e+00 : f32
    %71 = vector.broadcast %cst_78 : f32 to vector<256x128xf32>
    %72 = vector.extract_strided_slice %70 {offsets = [0, 0], sizes = [256, 384], strides = [1, 1]} : vector<288x384xbf16> to vector<256x384xbf16>
    %c0_79 = arith.constant 0 : index
    %c0_80 = arith.constant 0 : index
    %c0_81 = arith.constant 0 : index
    %73 = vector.load %arg3[%c0_79, %c0_80, %c0_81] : memref<3x384x128xbf16, #tpu.memory_space<vmem>>, vector<1x384x128xbf16>
    %74 = vector.shape_cast %73 : vector<1x384x128xbf16> to vector<384x128xbf16>
    %cst_82 = arith.constant dense<0.000000e+00> : vector<256x128xf32>
    %75 = tpu.matmul %72, %74, %cst_82 {dimension_numbers = #tpu.dot_dimension_numbers<[1], [0], [0], [1], [0, 0, 1, 1], [], []>} : vector<256x384xbf16>, vector<384x128xbf16>, vector<256x128xf32> -> vector<256x128xf32>
    %76 = arith.addf %71, %75 : vector<256x128xf32>
    %77 = vector.extract_strided_slice %70 {offsets = [16, 0], sizes = [256, 384], strides = [1, 1]} : vector<288x384xbf16> to vector<256x384xbf16>
    %c1_83 = arith.constant 1 : index
    %c0_84 = arith.constant 0 : index
    %c0_85 = arith.constant 0 : index
    %78 = vector.load %arg3[%c1_83, %c0_84, %c0_85] : memref<3x384x128xbf16, #tpu.memory_space<vmem>>, vector<1x384x128xbf16>
    %79 = vector.shape_cast %78 : vector<1x384x128xbf16> to vector<384x128xbf16>
    %cst_86 = arith.constant dense<0.000000e+00> : vector<256x128xf32>
    %80 = tpu.matmul %77, %79, %cst_86 {dimension_numbers = #tpu.dot_dimension_numbers<[1], [0], [0], [1], [0, 0, 1, 1], [], []>} : vector<256x384xbf16>, vector<384x128xbf16>, vector<256x128xf32> -> vector<256x128xf32>
    %81 = arith.addf %76, %80 : vector<256x128xf32>
    %82 = vector.extract_strided_slice %70 {offsets = [32, 0], sizes = [256, 384], strides = [1, 1]} : vector<288x384xbf16> to vector<256x384xbf16>
    %c2_87 = arith.constant 2 : index
    %c0_88 = arith.constant 0 : index
    %c0_89 = arith.constant 0 : index
    %83 = vector.load %arg3[%c2_87, %c0_88, %c0_89] : memref<3x384x128xbf16, #tpu.memory_space<vmem>>, vector<1x384x128xbf16>
    %84 = vector.shape_cast %83 : vector<1x384x128xbf16> to vector<384x128xbf16>
    %cst_90 = arith.constant dense<0.000000e+00> : vector<256x128xf32>
    %85 = tpu.matmul %82, %84, %cst_90 {dimension_numbers = #tpu.dot_dimension_numbers<[1], [0], [0], [1], [0, 0, 1, 1], [], []>} : vector<256x384xbf16>, vector<384x128xbf16>, vector<256x128xf32> -> vector<256x128xf32>
    %86 = arith.addf %81, %85 : vector<256x128xf32>
    %87 = vector.shape_cast %86 : vector<256x128xf32> to vector<16x16x128xf32>
    %cst_91 = arith.constant dense<0.000000e+00> : vector<128xf32>
    %88 = vector.multi_reduction <add>, %87, %cst_91 [0, 1] : vector<16x16x128xf32> to vector<128xf32>
    %89 = vector.shape_cast %88 : vector<128xf32> to vector<1x1x128xf32>
    %90 = arith.mulf %87, %87 : vector<16x16x128xf32>
    %cst_92 = arith.constant dense<0.000000e+00> : vector<128xf32>
    %91 = vector.multi_reduction <add>, %90, %cst_92 [0, 1] : vector<16x16x128xf32> to vector<128xf32>
    %92 = vector.shape_cast %91 : vector<128xf32> to vector<1x1x128xf32>
    %cst_93 = arith.constant 3.906250e-03 : f32
    %93 = vector.broadcast %cst_93 : f32 to vector<1x1x128xf32>
    %94 = arith.mulf %89, %93 : vector<1x1x128xf32>
    %cst_94 = arith.constant 3.906250e-03 : f32
    %95 = vector.broadcast %cst_94 : f32 to vector<1x1x128xf32>
    %96 = arith.mulf %92, %95 : vector<1x1x128xf32>
    %97 = arith.mulf %94, %94 : vector<1x1x128xf32>
    %98 = arith.subf %96, %97 : vector<1x1x128xf32>
    %cst_95 = arith.constant 0.000000e+00 : f32
    %99 = vector.broadcast %cst_95 : f32 to vector<1x1x128xf32>
    %100 = arith.maximumf %98, %99 : vector<1x1x128xf32>
    %cst_96 = arith.constant 9.99999974E-6 : f32
    %101 = vector.broadcast %cst_96 : f32 to vector<1x1x128xf32>
    %102 = arith.addf %100, %101 : vector<1x1x128xf32>
    %103 = math.rsqrt %102 : vector<1x1x128xf32>
    %104 = vector.broadcast %103 : vector<1x1x128xf32> to vector<16x16x128xf32>
    %105 = arith.mulf %87, %104 : vector<16x16x128xf32>
    %106 = arith.mulf %94, %103 : vector<1x1x128xf32>
    %107 = vector.broadcast %106 : vector<1x1x128xf32> to vector<16x16x128xf32>
    %108 = arith.subf %105, %107 : vector<16x16x128xf32>
    %109 = arith.extf %1 : vector<16x16x128xbf16> to vector<16x16x128xf32>
    %110 = arith.addf %108, %109 : vector<16x16x128xf32>
    %c0_97 = arith.constant 0 : index
    %c0_98 = arith.constant 0 : index
    %c0_99 = arith.constant 0 : index
    %c0_100 = arith.constant 0 : index
    %111 = vector.load %arg4[%c0_97, %c0_98, %c0_99, %c0_100] : memref<1x16x16x128xf32, #tpu.memory_space<vmem>>, vector<1x16x16x128xf32>
    %112 = vector.shape_cast %111 : vector<1x16x16x128xf32> to vector<16x16x128xf32>
    %113 = vector.shape_cast %110 : vector<16x16x128xf32> to vector<1x16x16x128xf32>
    tpu.vector_store %arg4[%c0_97, %c0_98, %c0_99, %c0_100], %113 {strides = array<i32>} : memref<1x16x16x128xf32, #tpu.memory_space<vmem>>, vector<1x16x16x128xf32>,
    return
  }
  func.func @transform_0(%arg0: i32) -> (i32, i32, i32, i32) {
    %c0_i32 = arith.constant 0 : i32
    %c0_i32_0 = arith.constant 0 : i32
    %c0_i32_1 = arith.constant 0 : i32
    %c0_i32_2 = arith.constant 0 : i32
    return %arg0, %c0_i32, %c0_i32_0, %c0_i32_1 : i32, i32, i32, i32
  }
  func.func @transform_1(%arg0: i32) -> (i32, i32, i32) {
    %c0_i32 = arith.constant 0 : i32
    %c0_i32_0 = arith.constant 0 : i32
    %c0_i32_1 = arith.constant 0 : i32
    %c0_i32_2 = arith.constant 0 : i32
    return %c0_i32, %c0_i32_0, %c0_i32_1 : i32, i32, i32
  }
  func.func @transform_2(%arg0: i32) -> (i32, i32, i32) {
    %c0_i32 = arith.constant 0 : i32
    %c0_i32_0 = arith.constant 0 : i32
    %c0_i32_1 = arith.constant 0 : i32
    %c0_i32_2 = arith.constant 0 : i32
    return %c0_i32, %c0_i32_0, %c0_i32_1 : i32, i32, i32
  }
  func.func @transform_3(%arg0: i32) -> (i32, i32, i32, i32) {
    %c0_i32 = arith.constant 0 : i32
    %c0_i32_0 = arith.constant 0 : i32
    %c0_i32_1 = arith.constant 0 : i32
    %c0_i32_2 = arith.constant 0 : i32
    return %arg0, %c0_i32, %c0_i32_0, %c0_i32_1 : i32, i32, i32, i32
  }
}

</mosaic_0001>

<bundles_post_ra>
// kernel: resnet_block_forward.1
= control target key start
LH: loop header
LB: loop body
LE: loop exit
PB: predicated region body
PF: predicated region fallthrough
CT: control target
= control target key end

     0   :  { %8 = vsyncpa [#allocation5], 0  ;;  %s12639_s0 = inlined_call_operand.hbm [shape: bf16[2,16,16,128], index: 0, kind: input, shape index: {}]   ;;  %s12640_s1 = inlined_call_operand.hbm [shape: bf16[3,384,128], index: 1, kind: input, shape index: {}]   ;;  %s12641_s2 = inlined_call_operand.hbm [shape: bf16[3,384,128], index: 2, kind: input, shape index: {}]   ;;  %s12642_s3 = inlined_call_operand.hbm [shape: f32[2,16,16,128], index: 3, kind: output, shape index: {}]  }
   0x1   :  { %10 = vsyncpa [#allocation5 + $0x1], 0 }
   0x2   :  { %11 = vsyncpa [#allocation8], 0 }
   0x3   :  { %12 = vsyncpa [#allocation6], 0 }
   0x4   :  { %14 = vsyncpa [#allocation6 + $0x1], 0  ;;  %s9491_s12 = smov 0   ;;  %s9493_s13 = smov 0  }
   0x5   :  { %s9495_s14 = smov 0   ;;  %s9497_s15 = smov 0  }
   0x6 LB: > { %s9512_s16 = sadd.s32 4294967295, %s9461_s15   ;;  %s7012_s17 = sadd.s32 4294967294, %s9461_s15   ;;  %s9461_s15 = sphi %s9497_s15, %s12856_s15   ;;  %s9457_s14 = sphi %s9495_s14, %s12855_s14   ;;  %s9453_s13 = sphi %s9493_s13, %s12854_s13   ;;  %s9449_s12 = sphi %s9491_s12, %s12853_s12  }
   0x7   : > { %p40_p0 = scmp.ne.s32.totalorder %s9453_s13, %s9449_s12  ;;  %p12643_p1 = scmp.eq.s32.totalorder %s9512_s16, 0 }
   0x8   : > { %p112_p3 = scmp.eq.s32.totalorder %s7012_s17, 1  ;;  %p7013_p5 = scmp.ge.s32.totalorder %s9461_s15, 1 }
   0x9   : > { %p9521_p4 = por %p12643_p1, %p40_p0  ;;  %p119_p7 = scmp.lt.s32.totalorder %s9461_s15, 3 }
   0xa   : > { %p9526_p6 = por %p112_p3, %p40_p0  ;;  %s9463_s21 = smov [#allocation7]  }
   0xb   : > { %s12689_s18 = scalar_select %p9521_p4, 1, 0 }
   0xc   : > { %s12690_s19 = scalar_select %p9526_p6, 1, 0 }
   0xd   : > { %p9531_p8 = pnand %p7013_p5, %p119_p7  ;;  %s131_s22 = sshll.u32 %s9463_s21, 4  ;;  %s9535_s22 = int_to_ptr.vmem [resolvable:$true] %s131_s22 }
   0xe   : > { %s9464_s24 = smov [#allocation9]   ;;  %s9305_s28 = scalar_lea.hbm %s12640_s1, 9216 }
   0xf   : > { %p8892_p9 = pneg %p9531_p8  ;;  %s144_s25 = sshll.u32 %s9464_s24, 4  ;;  %s9546_s25 = int_to_ptr.vmem [resolvable:$true] %s144_s25 }
  0x10   : > { %p9306_p12 = scmp.ne.s32.totalorder %s12640_s1, %s9305_s28  ;;  %p9312_p5 = scmp.lt.u32.totalorder %s9305_s28, %s12640_s1 }
  0x11   : > { %p9542_p11 = pnand %p8892_p9, %p12643_p1 }
  0x13   : > { %p9307_p13 = pneg %p9542_p11 }
  0x15   : > { %p9308_p0 = pnand %p9307_p13, %p9306_p12 }
  0x17   : > { %p9309_p3 = pneg %p9308_p0 }
  0x19   : > { %p9314_p7 = pnand %p9312_p5, %p9309_p3 }
  0x1b   : > { %9317 = shalt.err (!%p9314_p7)
}
  0x1c   : > { %s9318_s6 = scalar_lea.vmem %s9535_s22, 9216  ;;  %p9326_p2 = scmp.lt.s32.totalorder %s9535_s22, %s9535_s22 }
  0x1d   : > { %p9319_p9 = scmp.ne.s32.totalorder %s9535_s22, %s9318_s6  ;;  %p9327_p12 = scmp.lt.s32.totalorder %s9318_s6, %s9318_s6 }
  0x1f   : > { %p9321_p10 = pnand %p9319_p9, %p9307_p13  ;;  %p9328_p0 = por %p9327_p12, %p9326_p2 }
  0x21   : > { %p9322_p1 = pneg %p9321_p10 }
  0x23   : > { %p9329_p6 = pnand %p9328_p0, %p9322_p1 }
  0x25   : > { %9332 = shalt.err (!%p9329_p6)
}
  0x26   : > { %s9465_s7 = smov 64   ;;  %s9466_s8 = smov 4  }
  0x27   : > { %8895 = dma.hbm_to_vmem [thread:$0]  (!%p9542_p11), %s12640_s1, 9216, %s9535_s22, [#allocation8], %s9465_s7, %s9465_s7, %s9466_s8  }
  0x28   : > { %s9333_s21 = scalar_lea.hbm %s12641_s2, 9216 }
  0x29   : > { %p9334_p1 = scmp.ne.s32.totalorder %s12641_s2, %s9333_s21  ;;  %p9340_p10 = scmp.lt.u32.totalorder %s9333_s21, %s12641_s2 }
  0x2b   : > { %p9336_p2 = pnand %p9334_p1, %p9307_p13 }
  0x2d   : > { %p9337_p6 = pneg %p9336_p2 }
  0x2f   : > { %p9342_p3 = pnand %p9340_p10, %p9337_p6 }
  0x31   : > { %9345 = shalt.err (!%p9342_p3)
}
  0x32   : > { %s9346_s22 = scalar_lea.vmem %s9546_s25, 9216  ;;  %p9354_p12 = scmp.lt.s32.totalorder %s9546_s25, %s9546_s25 }
  0x33   : > { %p9347_p5 = scmp.ne.s32.totalorder %s9546_s25, %s9346_s22  ;;  %p9355_p0 = scmp.lt.s32.totalorder %s9346_s22, %s9346_s22 }
  0x35   : > { %p9349_p7 = pnand %p9347_p5, %p9307_p13  ;;  %p9356_p1 = por %p9355_p0, %p9354_p12 }
  0x37   : > { %p9350_p9 = pneg %p9349_p7 }
  0x39   : > { %p9357_p2 = pnand %p9356_p1, %p9350_p9 }
  0x3b   : > { %9360 = shalt.err (!%p9357_p2)
}
  0x3c   : > { %8898 = dma.hbm_to_vmem [thread:$0]  (!%p9542_p11), %s12641_s2, 9216, %s9546_s25, [#allocation8], %s9465_s7, %s9465_s7, %s9466_s8  }
  0x3d   : > { %s9607_s23 = sadd.s32 1, %s9461_s15   ;;  %s27_s4 = sadd.s32 1, %s9457_s14 }
  0x3e   : > { %s24_s5 = ssub.s32 %s9461_s15, %s9607_s23  ;;  %p34_p13 = scmp.ne.s32.totalorder %s9457_s14, %s9453_s13 }
  0x3f   : > { %p25_p6 = scmp.eq.s32.totalorder %s24_s5, 0  ;;  %p35_p10 = scmp.eq.s32.totalorder %s9461_s15, 0 }
  0x40   : > { %p12693_p3 = scmp.eq.s32.totalorder %s9512_s16, 1  ;;  %p8909_p7 = scmp.lt.s32.totalorder %s9461_s15, 2 }
  0x41   : > { %s9623_s9 = scalar_select %p25_p6, %s9457_s14, %s27_s4  }
  0x42   : > { %p9617_p5 = por %p12693_p3, %p34_p13  ;;  %p36_p9 = por %p35_p10, %p34_p13 }
  0x43   : > { %s158_s10 = sand.u32 1, %s9457_s14   ;;  %s7422_s25 = sshll.u32 %s9461_s15, 11 }
  0x44   : > { %s12694_s6 = scalar_select %p9617_p5, 1, 0 }
  0x45   : > { %s7017_s11 = sshll.u32 %s158_s10, 7  ;;  %s9630_s24 = scalar_lea.hbm %s12639_s0, %s7422_s25 }
  0x46   : > { %s162_s26 = scalar_lea.vmem [#allocation4], %s7017_s11  ;;  %p9634_p11 = pnand %p8909_p7, %p36_p9 }
  0x47   : > { %s169_s27 = sshll.u32 %s162_s26, 4  ;;  %s9638_s22 = scalar_lea.sflag [#allocation5], %s158_s10  ;;  %s9632_s27 = int_to_ptr.vmem [resolvable:$true] %s169_s27 }
  0x48   : > { %s9361_s29 = scalar_lea.hbm %s9630_s24, 2048  ;;  %p9363_p0 = pneg %p9634_p11 }
  0x49   : > { %p9362_p12 = scmp.ne.s32.totalorder %s9630_s24, %s9361_s29  ;;  %s9366_s5 = scalar_lea.hbm %s12639_s0, 4096 }
  0x4a   : > { %p9367_p13 = scmp.lt.u32.totalorder %s9630_s24, %s12639_s0  ;;  %p9368_p6 = scmp.lt.u32.totalorder %s9366_s5, %s9361_s29 }
  0x4b   : > { %p9364_p1 = pnand %p9363_p0, %p9362_p12  ;;  %p9370_p3 = scmp.lt.u32.totalorder %s9361_s29, %s9630_s24 }
  0x4c   : > { %p9369_p10 = por %p9368_p6, %p9367_p13 }
  0x4d   : > { %p9365_p2 = pneg %p9364_p1 }
  0x4e   : > { %p9371_p7 = por %p9370_p3, %p9369_p10 }
  0x50   : > { %p9372_p9 = pnand %p9371_p7, %p9365_p2 }
  0x52   : > { %9375 = shalt.err (!%p9372_p9)
}
  0x53   : > { %s9376_s10 = scalar_lea.vmem %s9632_s27, 2048  ;;  %s9467_s17 = smov [#allocation4]  }
  0x54   : > { %p9377_p12 = scmp.ne.s32.totalorder %s9632_s27, %s9376_s10  ;;  %s9381_s21 = sshll.u32 %s9467_s17, 4  ;;  %s9382_s21 = int_to_ptr.vmem [resolvable:$false] %s9381_s21 }
  0x55   : > { %s9383_s26 = scalar_lea.vmem %s9382_s21, 4096  ;;  %p9384_p4 = scmp.lt.s32.totalorder %s9632_s27, %s9382_s21 }
  0x56   : > { %p9379_p1 = pnand %p9377_p12, %p9363_p0  ;;  %p9385_p13 = scmp.lt.s32.totalorder %s9383_s26, %s9376_s10 }
  0x58   : > { %p9380_p5 = pneg %p9379_p1  ;;  %p9386_p6 = por %p9385_p13, %p9384_p4 }
  0x5a   : > { %p9387_p10 = pnand %p9386_p6, %p9380_p5 }
  0x5c   : > { %9390 = shalt.err (!%p9387_p10)
}
  0x5d   : > { %8902 = dma.hbm_to_vmem [thread:$0]  (!%p9634_p11), %s9630_s24, 2048, %s9632_s27, %s9638_s22, %s9465_s7, %s9465_s7, %s9466_s8  }
  0x5e   : > { %181 = sbr.rel (%p9531_p8) target bundleno = 1497 (0x5d9), region = 32 }
  0x65   : > { %s9672_s29 = sand.u32 1, %s9453_s13   ;;  %p12696_p4 = scmp.ne.s32.totalorder %s12689_s18, 0 }
  0x66   : > { %s7021_s30 = sshll.u32 %s9672_s29, 7  ;;  %s184_s4 = scalar_lea.sflag [#allocation5], %s9672_s29 }
  0x67   : > { %s9676_s5 = scalar_lea.vmem [#allocation4], %s7021_s30 }
  0x68   : > { %9436 = dma.done.wait (%p12696_p4), %s184_s4, 2048  }
  0x69   : > { %9438 = vsyncadd (%p12696_p4), %s184_s4, 4294965248  ;;  %p12697_p5 = scmp.eq.s32.totalorder %s9512_s16, 0 }
  0x6b   : > { %9440 = dma.done.wait (%p12697_p5), [#allocation8], 18432   ;;  %p12698_p8 = pmov %p12697_p5 }
  0x6c   : > { %v8951_v0 = vld [vmem:[#allocation7 + $0x100] sm:$0xff]   ;;  %v8955_v4 = vld [vmem:[#allocation7 + $0x108] sm:$0xff]   ;;  %v8959_v8 = vld [vmem:[#allocation7 + $0x110] sm:$0xff]   ;;  %vm251_vm0 = vsmask.f32 256  ;;  %vm575_vm3 = vcmask 1043456  }
  0x6d   : > { %9442 = vsyncadd (%p12698_p8), [#allocation8], 4294948864  ;;  %v8952_v1 = vld [vmem:[#allocation7 + $0xc0] sm:$0xff]   ;;  %7456 = vmatprep.subr.bf16.mxu0 %v8951_v0  ;;  %v8956_v5 = vld [vmem:[#allocation7 + $0xc8] sm:$0xff]   ;;  %vm252_vm1 = vsmask.f32 4368 }
  0x6e   : > { %v8953_v2 = vld [vmem:[#allocation7 + $0x40] sm:$0xff]   ;;  %7457 = vmatpush3.bf16.msra.mxu0 %v8952_v1  ;;  %v8957_v6 = vld [vmem:[#allocation7 + $0x48] sm:$0xff]   ;;  %v8960_v9 = vld [vmem:[#allocation7 + $0xd0] sm:$0xff]   ;;  %vm576_vm2 = vsmask.f32 7938  ;;  %vm582_vm4 = vcmask 1040384  }
  0x6f   : > { %v8954_v3 = vld [vmem:[#allocation7] sm:$0xff]   ;;  %7592 = vmatprep.subr.bf16.mxu1 %v8953_v2  ;;  %7458 = vmatprep.subr.bf16.mxu0 %v8955_v4  ;;  %v8958_v7 = vld [vmem:[#allocation7 + $0x8] sm:$0xff]   ;;  %v8961_v10 = vld [vmem:[#allocation7 + $0x50] sm:$0xff]   ;;  %v12699_v34 = vmov 0  ;;  %v12702_v43 = vmov 0  ;;  %v12705_v46 = vmov 0 }
  0x70   : > { %7593 = vmatpush3.bf16.msra.mxu1 %v8954_v3  ;;  %v8962_v11 = vld [vmem:[#allocation7 + $0x10] sm:$0xff]   ;;  %v8963_v12 = vld [vmem:[#allocation7 + $0x118] sm:$0xff]   ;;  %v8967_v16 = vld [vmem:[#allocation7 + $0x120] sm:$0xff]   ;;  %vm1356_vm9 = vsmask.f32 7424  ;;  %vm1645_vm10 = vcmask 1046528  }
  0x71   : > { %7594 = vmatprep.subr.bf16.mxu1 %v8957_v6  ;;  %v8964_v13 = vld [vmem:[#allocation7 + $0xd8] sm:$0xff]   ;;  %v8968_v17 = vld [vmem:[#allocation7 + $0xe0] sm:$0xff]   ;;  %v8971_v20 = vld [vmem:[#allocation7 + $0x128] sm:$0xff]   ;;  %s7024_s18 = sshll.u32 %s9672_s29, 8  ;;  %s7455_s7 = sshll.u32 %s9512_s16, 12 }
  0x72   : > { %7459 = vmatpush3.bf16.msra.mxu0 %v8956_v5  ;;  %v8965_v14 = vld [vmem:[#allocation7 + $0x58] sm:$0xff]   ;;  %v8969_v18 = vld [vmem:[#allocation7 + $0x60] sm:$0xff]   ;;  %v8972_v21 = vld [vmem:[#allocation7 + $0xe8] sm:$0xff]   ;;  %s12397_s20 = scalar_lea.vmem [#allocation10], %s7024_s18  ;;  %s12582_s27 = scalar_lea.hbm %s12642_s3, %s7455_s7 }
  0x73   : > { %7460 = vmatprep.subr.bf16.mxu0 %v8959_v8  ;;  %v8966_v15 = vld [vmem:[#allocation7 + $0x18] sm:$0xff]   ;;  %v8970_v19 = vld [vmem:[#allocation7 + $0x20] sm:$0xff]   ;;  %v8973_v22 = vld [vmem:[#allocation7 + $0x68] sm:$0xff]   ;;  %s6920_s8 = sshll.u32 %s12397_s20, 4  ;;  %s6907_s28 = scalar_lea.sflag [#allocation6], %s9672_s29  ;;  %s12584_s8 = int_to_ptr.vmem [resolvable:$true] %s6920_s8 }
  0x74   : > { %7595 = vmatpush3.bf16.msra.mxu1 %v8958_v7  ;;  %v8974_v23 = vld [vmem:[#allocation7 + $0x28] sm:$0xff]   ;;  %v8975_v24 = vld [vmem:[#allocation7 + $0x130] sm:$0xff]   ;;  %v8979_v28 = vld [vmem:[#allocation7 + $0x138] sm:$0xff]   ;;  %s9391_s22 = scalar_lea.vmem %s12584_s8, 4096  ;;  %p12850_p0 = scmp.ne.s32.totalorder %s12694_s6, 0 }
  0x75   : > { %7596 = vmatprep.subr.bf16.mxu1 %v8961_v10  ;;  %v8976_v25 = vld [vmem:[#allocation7 + $0xf0] sm:$0xff]   ;;  %v8980_v29 = vld [vmem:[#allocation7 + $0xf8] sm:$0xff]   ;;  %v219_v32 = vld [vmem:[%s9676_s5] sm:$0xf]  ;;  %p9392_p11 = scmp.ne.s32.totalorder %s12584_s8, %s9391_s22  ;;  %s9468_s11 = smov [#allocation10]  }
  0x76   : > { %7461 = vmatpush3.bf16.msra.mxu0 %v8960_v9  ;;  %v8977_v26 = vld [vmem:[#allocation7 + $0x70] sm:$0xff]   ;;  %v8981_v30 = vld [vmem:[#allocation7 + $0x78] sm:$0xff]   ;;  %v220_v33 = vld [vmem:[%s9676_s5 + $0x4] sm:$0xf]  ;;  %v255_v35 = vshrl.u32 %v219_v32, 16  ;;  %v258_v36 = vshll.u32 %v219_v32, 16 }
  0x77   : > { %7462 = vmatprep.subr.bf16.mxu0 %v8963_v12  ;;  %v8978_v27 = vld [vmem:[#allocation7 + $0x30] sm:$0xff]   ;;  %v8982_v31 = vld [vmem:[#allocation7 + $0x38] sm:$0xff]   ;;  %vm9690_vm5 = vmor %vm251_vm0, %vm252_vm1  ;;  %v263_v37 = vshrl.u32 %v220_v33, 16  ;;  %v266_v38 = vshll.u32 %v220_v33, 16  ;;  %p9393_p2 = pnand %p9392_p11, %p12850_p0  ;;  %s9395_s25 = sshll.u32 %s9468_s11, 4  ;;  %s9396_s25 = int_to_ptr.vmem [resolvable:$false] %s9395_s25 }
  0x78   : > { %7597 = vmatpush3.bf16.msra.mxu1 %v8962_v11  ;;  %v12700_v34 = vsel %vm9690_vm5, 4294967295, %v12699_v34  ;;  %v578_v39 = vld [vmem:[#allocation2 + $0xc] sm:$0xf]  ;;  %v9694_v40 = vld [vmem:[#allocation7 + $0x140] sm:$0xff]   ;;  %v257_v41 = vrot.slane %v255_v35, 7  ;;  %vm9697_vm6 = vmand %vm575_vm3, %vm576_vm2  ;;  %s9397_s10 = scalar_lea.vmem %s9396_s25, 8192  ;;  %p9398_p7 = scmp.lt.s32.totalorder %s12584_s8, %s9396_s25 }
  0x79   : > { %7598 = vmatprep.subr.bf16.mxu1 %v8965_v14  ;;  %12701 = vst [vmem:[#allocation14_spill] sm:$0xff] %v12700_v34  ;;  %v265_v42 = vrot.slane %v263_v37, 7  ;;  %v12703_v43 = vsel %vm9697_vm6, 4294967295, %v12702_v43  ;;  %v221_v44 = vld [vmem:[%s9676_s5 + $0x8] sm:$0xf]  ;;  %vm9705_vm7 = vmand %vm582_vm4, %vm251_vm0  ;;  %p9394_p3 = pneg %p9393_p2  ;;  %p9399_p9 = scmp.lt.s32.totalorder %s9397_s10, %s9391_s22 }
  0x7a   : > { %7463 = vmatpush3.bf16.msra.mxu0 %v8964_v13  ;;  %12704 = vst [vmem:[#allocation15_spill] sm:$0xff] %v12703_v43  ;;  %v222_v45 = vld [vmem:[%s9676_s5 + $0xc] sm:$0xf]  ;;  %v12706_v46 = vsel %vm9705_vm7, 4294967295, %v12705_v46  ;;  %v584_v47 = vld [vmem:[#allocation2 + $0x14] sm:$0x1]  ;;  %v260_v52 = vor.u32 %v258_v36, %v257_v41  ;;  %vm9738_vm8 = vmand %vm582_vm4, %vm576_vm2 }
  0x7b   : > { %7464 = vmatprep.subr.bf16.mxu0 %v8967_v16  ;;  %12707 = vst [vmem:[#allocation16_spill] sm:$0xff] %v12706_v46  ;;  %v272_v48 = vshrl.u32 %v221_v44, 16  ;;  %v275_v49 = vshll.u32 %v221_v44, 16  ;;  %v280_v50 = vshrl.u32 %v222_v45, 16  ;;  %v283_v51 = vshll.u32 %v222_v45, 16  ;;  %p9400_p12 = por %p9399_p9, %p9398_p7 }
  0x7c   : > { %7599 = vmatpush3.bf16.msra.mxu1 %v8966_v15  ;;  %v261_v53 = vrot.slane %v257_v41, 4  ;;  %v268_v54 = vor.u32 %v266_v38, %v265_v42  ;;  %v270_v55 = vrot.slane %v265_v42, 4  ;;  %v692_v56 = vld [vmem:[#allocation2] sm:$0xf]  ;;  %v696_v59 = vld [vmem:[#allocation2 + $0x8] sm:$0x1]  ;;  %v579_v62 = vsel %vm9697_vm6, %v260_v52, %v578_v39 }
  0x7d   : > { %7600 = vmatprep.subr.bf16.mxu1 %v8969_v18  ;;  %v274_v57 = vrot.slane %v272_v48, 7  ;;  %v282_v58 = vrot.slane %v280_v50, 7  ;;  %v223_v60 = vld [vmem:[%s9676_s5 + $0x10] sm:$0xf]  ;;  %v587_v0 = vld [vmem:[#allocation2 + $0x18] sm:$0xf]  ;;  %p9401_p1 = pnand %p9400_p12, %p9394_p3 }
  0x7e   : > { %7465 = vmatpush3.bf16.msra.mxu0 %v8968_v17  ;;  %v269_v61 = vsel %vm9690_vm5, %v261_v53, %v268_v54  ;;  %v585_v63 = vsel %vm9705_vm7, %v270_v55, %v584_v47  ;;  %v224_v1 = vld [vmem:[%s9676_s5 + $0x14] sm:$0xf]  ;;  %v289_v2 = vshrl.u32 %v223_v60, 16  ;;  %580 = vst [vmem:[#allocation2 + $0xc] sm:$0xf] %v579_v62  ;;  %v292_v9 = vshll.u32 %v223_v60, 16 }
  0x7f   : > { %7466 = vmatprep.subr.bf16.mxu0 %v8971_v20  ;;  %581 = vst [vmem:[#allocation2 + $0x10] sm:$0xf] %v269_v61  ;;  %586 = vst [vmem:[#allocation2 + $0x14] sm:$0x1] %v585_v63  ;;  %v277_v3 = vor.u32 %v275_v49, %v274_v57  ;;  %v278_v4 = vrot.slane %v274_v57, 4  ;;  %v285_v5 = vor.u32 %v283_v51, %v282_v58  ;;  %v287_v6 = vrot.slane %v282_v58, 4 }
  0x80   : > { %7601 = vmatpush3.bf16.msra.mxu1 %v8970_v19  ;;  %v591_v7 = vld [vmem:[#allocation2 + $0x20] sm:$0x1]  ;;  %v291_v8 = vrot.slane %v289_v2, 7  ;;  %v297_v10 = vshrl.u32 %v224_v1, 16  ;;  %v300_v11 = vshll.u32 %v224_v1, 16  ;;  %v12708_v36 = vmov 0 }
  0x81   : > { %7602 = vmatprep.subr.bf16.mxu1 %v8973_v22  ;;  %v286_v12 = vsel %vm9690_vm5, %v278_v4, %v285_v5  ;;  %v693_v13 = vsel %vm9697_vm6, %v277_v3, %v692_v56  ;;  %v697_v14 = vsel %vm9705_vm7, %v287_v6, %v696_v59  ;;  %v588_v15 = vsel %vm9697_vm6, %v277_v3, %v587_v0  ;;  %v594_v16 = vld [vmem:[#allocation2 + $0x24] sm:$0xf]  ;;  %v225_v17 = vld [vmem:[%s9676_s5 + $0x18] sm:$0xf]  ;;  %v226_v18 = vld [vmem:[%s9676_s5 + $0x1c] sm:$0xf] }
  0x82   : > { %7467 = vmatpush3.bf16.msra.mxu0 %v8972_v21  ;;  %694 = vst [vmem:[#allocation2] sm:$0xf] %v693_v13  ;;  %695 = vst [vmem:[#allocation2 + $0x4] sm:$0xf] %v286_v12  ;;  %v592_v19 = vsel %vm9705_vm7, %v287_v6, %v591_v7  ;;  %v294_v20 = vor.u32 %v292_v9, %v291_v8  ;;  %v295_v21 = vrot.slane %v291_v8, 4  ;;  %v299_v22 = vrot.slane %v297_v10, 7 }
  0x83   : > { %7468 = vmatprep.subr.bf16.mxu0 %v8975_v24  ;;  %698 = vst [vmem:[#allocation2 + $0x8] sm:$0x1] %v697_v14  ;;  %590 = vst [vmem:[#allocation2 + $0x1c] sm:$0xf] %v286_v12  ;;  %v227_v24 = vld [vmem:[%s9676_s5 + $0x20] sm:$0xf] }
  0x84   : > { %7603 = vmatpush3.bf16.msra.mxu1 %v8974_v23  ;;  %589 = vst [vmem:[#allocation2 + $0x18] sm:$0xf] %v588_v15  ;;  %v598_v23 = vld [vmem:[#allocation2 + $0x2c] sm:$0x1]  ;;  %593 = vst [vmem:[#allocation2 + $0x20] sm:$0x1] %v592_v19  ;;  %v595_v32 = vsel %vm9697_vm6, %v294_v20, %v594_v16 }
  0x85   : > { %7604 = vmatprep.subr.bf16.mxu1 %v8977_v26  ;;  %v309_v26 = vshll.u32 %v225_v17, 16  ;;  %v601_v33 = vld [vmem:[#allocation2 + $0x30] sm:$0xf]  ;;  %v323_v35 = vshrl.u32 %v227_v24, 16  ;;  %v12709_v36 = vsel %vm9738_vm8, 4294967295, %v12708_v36  ;;  %v326_v39 = vshll.u32 %v227_v24, 16 }
  0x86   : > { %7469 = vmatpush3.bf16.msra.mxu0 %v8976_v25  ;;  %v306_v25 = vshrl.u32 %v225_v17, 16  ;;  %12710 = vst [vmem:[#allocation17_spill] sm:$0xff] %v12709_v36  ;;  %596 = vst [vmem:[#allocation2 + $0x24] sm:$0xf] %v595_v32  ;;  %v708_v42 = vld [vmem:[#allocation2 + $0xc] sm:$0x2] }
  0x87   : > { %7470 = vmatprep.subr.bf16.mxu0 %v8979_v28  ;;  %v317_v28 = vshll.u32 %v226_v18, 16  ;;  %v800_v44 = vld [vmem:[#allocation2 + $0xc] sm:$0x1]  ;;  %v852_v45 = vld [vmem:[#allocation2 + $0x10] sm:$0x8]  ;;  %v7026_v49 = vrot.slane %v708_v42, 9 }
  0x88   : > { %7605 = vmatpush3.bf16.msra.mxu1 %v8978_v27  ;;  %v314_v27 = vshrl.u32 %v226_v18, 16  ;;  %v308_v37 = vrot.slane %v306_v25, 7  ;;  %v7044_v50 = vrot.slane %v852_v45, 11  ;;  %v945_v51 = vld [vmem:[#allocation2 + $0x14] sm:$0x1]  ;;  %v325_v57 = vrot.slane %v323_v35, 7 }
  0x89   : > { %7606 = vmatprep.subr.bf16.mxu1 %v8981_v30  ;;  %v302_v30 = vor.u32 %v300_v11, %v299_v22  ;;  %v605_v54 = vld [vmem:[#allocation2 + $0x38] sm:$0x1]  ;;  %v801_v59 = vsel %vm9705_vm7, %v7026_v49, %v800_v44  ;;  %v707_v61 = vld [vmem:[#allocation2] sm:$0x2]  ;;  %v797_v62 = vld [vmem:[#allocation2] sm:$0x1] }
  0x8a   : > { %7471 = vmatpush3.bf16.msra.mxu0 %v8980_v29  ;;  %v9732_v29 = vld [vmem:[%s9676_s5 + $0x24] sm:$0xf]  ;;  %v316_v38 = vrot.slane %v314_v27, 7  ;;  %v311_v52 = vor.u32 %v309_v26, %v308_v37  ;;  %v312_v55 = vrot.slane %v308_v37, 4  ;;  %v946_v60 = vsel %vm9738_vm8, %v7044_v50, %v945_v51  ;;  %v851_v63 = vld [vmem:[#allocation2 + $0x4] sm:$0x8] }
  0x8b   : > { %8272 = vmatprep.subr.bf16.mxu0 %v9694_v40  ;;  %v331_v41 = vshrl.u32 %v9732_v29, 16  ;;  %v303_v47 = vsel %vm9690_vm5, %v295_v21, %v302_v30  ;;  %802 = vst [vmem:[#allocation2 + $0xc] sm:$0x1] %v801_v59  ;;  %947 = vst [vmem:[#allocation2 + $0x14] sm:$0x1] %v946_v60  ;;  %v7025_v1 = vrot.slane %v707_v61, 9  ;;  %v328_v9 = vor.u32 %v326_v39, %v325_v57 }
  0x8c   : > { %7607 = vmatpush3.bf16.msra.mxu1 %v8982_v31  ;;  %v304_v31 = vrot.slane %v299_v22, 4  ;;  %597 = vst [vmem:[#allocation2 + $0x28] sm:$0xf] %v303_v47  ;;  %v319_v53 = vor.u32 %v317_v28, %v316_v38  ;;  %v321_v56 = vrot.slane %v316_v38, 4  ;;  %v602_v0 = vsel %vm9697_vm6, %v311_v52, %v601_v33  ;;  %v942_v3 = vld [vmem:[#allocation2 + $0x8] sm:$0x1] }
  0x8d   : > { %v333_v58 = vrot.slane %v331_v41, 7  ;;  %v7043_v2 = vrot.slane %v851_v63, 11  ;;  %603 = vst [vmem:[#allocation2 + $0x30] sm:$0xf] %v602_v0  ;;  %v608_v6 = vld [vmem:[#allocation2 + $0x3c] sm:$0xf]  ;;  %v798_v10 = vsel %vm9705_vm7, %v7025_v1, %v797_v62 }
  0x8e   : > { %v599_v48 = vsel %vm9705_vm7, %v304_v31, %v598_v23  ;;  %v320_v4 = vsel %vm9690_vm5, %v312_v55, %v319_v53  ;;  %v606_v5 = vsel %vm9705_vm7, %v321_v56, %v605_v54  ;;  %v709_v7 = vld [vmem:[#allocation2 + $0x18] sm:$0x2]  ;;  %v803_v8 = vld [vmem:[#allocation2 + $0x18] sm:$0x1]  ;;  %v853_v13 = vld [vmem:[#allocation2 + $0x1c] sm:$0x8]  ;;  %v609_v18 = vsel %vm9697_vm6, %v328_v9, %v608_v6 }
  0x8f   : > { %600 = vst [vmem:[#allocation2 + $0x2c] sm:$0x1] %v599_v48  ;;  %604 = vst [vmem:[#allocation2 + $0x34] sm:$0xf] %v320_v4  ;;  %v943_v11 = vsel %vm9738_vm8, %v7043_v2, %v942_v3  ;;  %v7027_v12 = vrot.slane %v709_v7, 9  ;;  %v7045_v15 = vrot.slane %v853_v13, 11 }
  0x90   : > { %607 = vst [vmem:[#allocation2 + $0x38] sm:$0x1] %v606_v5  ;;  %v948_v14 = vld [vmem:[#allocation2 + $0x20] sm:$0x1]  ;;  %799 = vst [vmem:[#allocation2] sm:$0x1] %v798_v10 }
  0x91   : > { %944 = vst [vmem:[#allocation2 + $0x8] sm:$0x1] %v943_v11  ;;  %v329_v16 = vrot.slane %v325_v57, 4  ;;  %v334_v17 = vshll.u32 %v9732_v29, 16  ;;  %v612_v19 = vld [vmem:[#allocation2 + $0x44] sm:$0x1]  ;;  %v804_v20 = vsel %vm9705_vm7, %v7027_v12, %v803_v8  ;;  %v949_v25 = vsel %vm9738_vm8, %v7045_v15, %v948_v14 }
  0x92   : > { %v710_v21 = vld [vmem:[#allocation2 + $0x24] sm:$0x2]  ;;  %v806_v22 = vld [vmem:[#allocation2 + $0x24] sm:$0x1]  ;;  %610 = vst [vmem:[#allocation2 + $0x3c] sm:$0xf] %v609_v18 }
  0x93   : > { %v854_v23 = vld [vmem:[#allocation2 + $0x28] sm:$0x8]  ;;  %v1036_v24 = vld [vmem:[#allocation2 + $0x10] sm:$0xf]  ;;  %805 = vst [vmem:[#allocation2 + $0x18] sm:$0x1] %v804_v20  ;;  %v336_v29 = vor.u32 %v334_v17, %v333_v58 }
  0x94   : > { %v7028_v26 = vrot.slane %v710_v21, 9  ;;  %v7046_v27 = vrot.slane %v854_v23, 11  ;;  %v1033_v30 = vld [vmem:[#allocation2 + $0x4] sm:$0xf]  ;;  %950 = vst [vmem:[#allocation2 + $0x20] sm:$0x1] %v949_v25 }
  0x95   : > { %v338_v31 = vrot.slane %v333_v58, 4  ;;  %v1035_v32 = vld [vmem:[#allocation2 + $0xc] sm:$0xf]  ;;  %v337_v37 = vsel %vm9690_vm5, %v329_v16, %v336_v29  ;;  %v8984_v39 = vld [vmem:[#allocation2 + $0x14] ss:$0 sps:$4 sm:$0x11]  }
  0x96   : > { %v951_v28 = vld [vmem:[#allocation2 + $0x2c] sm:$0x1]  ;;  %v807_v33 = vsel %vm9705_vm7, %v7028_v26, %v806_v22  ;;  %v7081_v38 = vcombine.low %v1035_v32, %v1036_v24  ;;  %v1039_v41 = vld [vmem:[#allocation2 + $0x1c] sm:$0xf]  ;;  %v711_v42 = vld [vmem:[#allocation2 + $0x30] sm:$0x2] }
  0x97   : > { %v952_v35 = vsel %vm9738_vm8, %v7046_v27, %v951_v28  ;;  %808 = vst [vmem:[#allocation2 + $0x24] sm:$0x1] %v807_v33  ;;  %611 = vst [vmem:[#allocation2 + $0x40] sm:$0xf] %v337_v37  ;;  %v613_v44 = vsel %vm9705_vm7, %v338_v31, %v612_v19  ;;  %v7029_v45 = vrot.slane %v711_v42, 9  ;;  %v1377_v51 = vshll.u32 %v8984_v39, 16 }
  0x98   : > { %953 = vst [vmem:[#allocation2 + $0x2c] sm:$0x1] %v952_v35  ;;  %v809_v47 = vld [vmem:[#allocation2 + $0x30] sm:$0x1]  ;;  %v855_v48 = vld [vmem:[#allocation2 + $0x34] sm:$0x8] }
  0x99   : > { %614 = vst [vmem:[#allocation2 + $0x44] sm:$0x1] %v613_v44  ;;  %v1370_v49 = vshrl.u32 %v7081_v38, 16  ;;  %v1372_v50 = vshll.u32 %v7081_v38, 16  ;;  %v1032_v52 = vld [vmem:[#allocation2] sm:$0xf]  ;;  %v810_v56 = vsel %vm9705_vm7, %v7029_v45, %v809_v47 }
  0x9a   : > { %v7079_v53 = vcombine.low %v1032_v52, %v1033_v30  ;;  %v8987_v54 = vld [vmem:[#allocation2 + $0x8] ss:$0 sps:$4 sm:$0x11]   ;;  %v1379_v58 = vrot.slane %v1377_v51, 1  ;;  %v1038_v59 = vld [vmem:[#allocation2 + $0x18] sm:$0xf] }
  0x9b   : > { %v1042_v55 = vld [vmem:[#allocation2 + $0x28] sm:$0xf]  ;;  %v1374_v57 = vrot.slane %v1372_v50, 1  ;;  %811 = vst [vmem:[#allocation2 + $0x30] sm:$0x1] %v810_v56  ;;  %v1365_v62 = vshll.u32 %v8987_v54, 16  ;;  %v7083_v0 = vcombine.low %v1038_v59, %v1039_v41 }
  0x9c   : > { %v1358_v60 = vshrl.u32 %v7079_v53, 16  ;;  %v1360_v61 = vshll.u32 %v7079_v53, 16  ;;  %v9778_v63 = vld [vmem:[#allocation2 + $0xc] sm:$0xff]   ;;  %v8991_v2 = vld [vmem:[#allocation2 + $0x20] ss:$0 sps:$4 sm:$0x11]  }
  0x9d   : > { %v1375_v1 = vor.u32 %v1374_v57, %v1370_v49  ;;  %v8995_v3 = vld [vmem:[#allocation7 + $0x148] sm:$0xff]   ;;  %v7047_v4 = vrot.slane %v855_v48, 11  ;;  %v1367_v6 = vrot.slane %v1365_v62, 1  ;;  %v1382_v7 = vshrl.u32 %v7083_v0, 16  ;;  %v8989_v15 = vld [vmem:[#allocation2] sm:$0xff]   ;;  %v9017_v32 = vld [vmem:[#allocation7 + $0x80] sm:$0xff]  }
  0x9e   : > { %v1362_v5 = vrot.slane %v1360_v61, 1  ;;  %v1384_v8 = vshll.u32 %v7083_v0, 16  ;;  %v1041_v9 = vld [vmem:[#allocation2 + $0x24] sm:$0xf]  ;;  %v1389_v11 = vshll.u32 %v8991_v2, 16  ;;  %v9790_v38 = vld [vmem:[#allocation2 + $0x18] sm:$0xff]   ;;  %8320 = vmatprep.subr.bf16.mxu1 %v9017_v32 }
  0x9f   : > { %v1380_v10 = vsel %vm1356_vm9, %v1375_v1, %v1379_v58  ;;  %v7085_v12 = vcombine.low %v1041_v9, %v1042_v55  ;;  %v8994_v13 = vld [vmem:[#allocation2 + $0x2c] ss:$0 sps:$4 sm:$0x11]   ;;  %v954_v17 = vld [vmem:[#allocation2 + $0x38] sm:$0x1]  ;;  %v9002_v31 = vld [vmem:[#allocation7 + $0x150] sm:$0xff]  }
  0xa0   : > { %1991 = vmatprep.mubr.bf16.mxu0 %v1380_v10  ;;  %v1363_v14 = vor.u32 %v1362_v5, %v1358_v60  ;;  %v1386_v16 = vrot.slane %v1384_v8, 1  ;;  %v1391_v18 = vrot.slane %v1389_v11, 1  ;;  %v1401_v21 = vshll.u32 %v8994_v13, 16  ;;  %v1045_v22 = vld [vmem:[#allocation2 + $0x34] sm:$0xf]  ;;  %v9025_v45 = vld [vmem:[#allocation7 + $0x88] sm:$0xff]  }
  0xa1   : > { %1992 = vmatmul.mubr.bf16.vlgmr.msra.gmra.mrb[0].mxu0 %v9778_v63  ;;  %v1394_v19 = vshrl.u32 %v7085_v12, 16  ;;  %v1396_v20 = vshll.u32 %v7085_v12, 16  ;;  %v955_v25 = vsel %vm9738_vm8, %v7047_v4, %v954_v17  ;;  %v712_v30 = vld [vmem:[#allocation2 + $0x3c] sm:$0x2]  ;;  %v812_v35 = vld [vmem:[#allocation2 + $0x3c] sm:$0x1] }
  0xa2   : > { %v1368_v23 = vsel %vm1356_vm9, %v1363_v14, %v1367_v6  ;;  %8273 = vmatpush3.bf16.msra.mxu0 %v9694_v40  ;;  %v1387_v24 = vor.u32 %v1386_v16, %v1382_v7  ;;  %v1044_v26 = vld [vmem:[#allocation2 + $0x30] sm:$0xf]  ;;  %v1403_v28 = vrot.slane %v1401_v21, 1  ;;  %956 = vst [vmem:[#allocation2 + $0x38] sm:$0x1] %v955_v25  ;;  %v7030_v40 = vrot.slane %v712_v30, 9 }
  0xa3   : > { %2457 = vmatprep.mubr.bf16.mxu1 %v1368_v23  ;;  %v1398_v27 = vrot.slane %v1396_v20, 1  ;;  %8274 = vmatprep.subr.bf16.mxu0 %v8995_v3  ;;  %v7087_v29 = vcombine.low %v1044_v26, %v1045_v22  ;;  %v856_v37 = vld [vmem:[#allocation2 + $0x40] sm:$0x8]  ;;  %v957_v44 = vld [vmem:[#allocation2 + $0x44] sm:$0x1]  ;;  %v9009_v55 = vld [vmem:[#allocation7 + $0x158] sm:$0xff]  }
  0xa4   : > { %2458 = vmatmul.mubr.bf16.vlgmr.msra.gmra.mrb[0].mxu1 %v8989_v15  ;;  %v9787_v33 = vsel %vm1356_vm9, %v1387_v24, %v1391_v18  ;;  %v7048_v42 = vrot.slane %v856_v37, 11  ;;  %v813_v48 = vsel %vm9705_vm7, %v7030_v40, %v812_v35  ;;  %v229_v49 = vld [vmem:[%s9676_s5 + $0x28] sm:$0xf]  ;;  %v230_v53 = vld [vmem:[%s9676_s5 + $0x2c] sm:$0xf]  ;;  %v9016_v0 = vld [vmem:[#allocation7 + $0x160] sm:$0xff]  }
  0xa5   : > { %1999 = vmatprep.mubr.bf16.mxu0 %v9787_v33  ;;  %2465 = vmatprep.mubr.bf16.mxu1 %v1380_v10  ;;  %v1399_v39 = vor.u32 %v1398_v27, %v1394_v19  ;;  %v1408_v41 = vshll.u32 %v7087_v29, 16  ;;  %v1406_v47 = vshrl.u32 %v7087_v29, 16  ;;  %814 = vst [vmem:[#allocation2 + $0x3c] sm:$0x1] %v813_v48  ;;  %v340_v54 = vshrl.u32 %v229_v49, 16  ;;  %v9033_v1 = vld [vmem:[#allocation7 + $0x90] sm:$0xff]  }
  0xa6   : > { %8275 = vmatpush3.bf16.msra.mxu0 %v8995_v3  ;;  %v958_v52 = vsel %vm9738_vm8, %v7048_v42, %v957_v44  ;;  %8321 = vmatpush3.bf16.msra.mxu1 %v9017_v32  ;;  %v343_v56 = vshll.u32 %v229_v49, 16  ;;  %v348_v57 = vshrl.u32 %v230_v53, 16  ;;  %v351_v58 = vshll.u32 %v230_v53, 16  ;;  %v615_v59 = vld [vmem:[#allocation2 + $0x48] sm:$0xf]  ;;  %v9811_v20 = vld [vmem:[#allocation7 + $0x168] sm:$0xff]  }
  0xa7   : > { %v9796_v50 = vsel %vm1356_vm9, %v1399_v39, %v1403_v28  ;;  %v1410_v51 = vrot.slane %v1408_v41, 1  ;;  %8276 = vmatprep.subr.bf16.mxu0 %v9002_v31  ;;  %959 = vst [vmem:[#allocation2 + $0x44] sm:$0x1] %v958_v52  ;;  %8322 = vmatprep.subr.bf16.mxu1 %v9025_v45  ;;  %v342_v60 = vrot.slane %v340_v54, 7  ;;  %v231_v61 = vld [vmem:[%s9676_s5 + $0x30] sm:$0xf] }
  0xa8   : > { %v232_v62 = vld [vmem:[%s9676_s5 + $0x34] sm:$0xf]  ;;  %v1048_v4 = vld [vmem:[#allocation2 + $0x40] sm:$0xf]  ;;  %v350_v5 = vrot.slane %v348_v57, 7  ;;  %v357_v10 = vshrl.u32 %v231_v61, 16 }
  0xa9   : > { %2000 = vmatmul.mubr.bf16.gmra.mrb[4].mxu0 %v9790_v38  ;;  %v8998_v2 = vld [vmem:[#allocation2 + $0x38] ss:$0 sps:$4 sm:$0x11]   ;;  %v1411_v3 = vor.u32 %v1410_v51, %v1406_v47  ;;  %v9805_v6 = vld [vmem:[#allocation2 + $0x24] sm:$0xff]   ;;  %v345_v7 = vor.u32 %v343_v56, %v342_v60  ;;  %v346_v8 = vrot.slane %v342_v60, 4  ;;  %v360_v11 = vshll.u32 %v231_v61, 16 }
  0xaa   : > { %2007 = vmatprep.mubr.bf16.mxu0 %v9796_v50  ;;  %8277 = vmatpush3.bf16.msra.mxu0 %v9002_v31  ;;  %v619_v9 = vld [vmem:[#allocation2 + $0x50] sm:$0x1]  ;;  %v1413_v12 = vshll.u32 %v8998_v2, 16  ;;  %v353_v13 = vor.u32 %v351_v58, %v350_v5  ;;  %v355_v14 = vrot.slane %v350_v5, 4  ;;  %v365_v15 = vshrl.u32 %v232_v62, 16  ;;  %v9038_v17 = vld [vmem:[#allocation7 + $0x98] sm:$0xff]  }
  0xab   : > { %8278 = vmatprep.subr.bf16.mxu0 %v9009_v55  ;;  %8323 = vmatpush3.bf16.msra.mxu1 %v9025_v45  ;;  %v622_v16 = vld [vmem:[#allocation2 + $0x54] sm:$0xf]  ;;  %v616_v18 = vsel %vm9697_vm6, %v345_v7, %v615_v59  ;;  %v359_v19 = vrot.slane %v357_v10, 7  ;;  %v368_v24 = vshll.u32 %v232_v62, 16  ;;  %v233_v31 = vld [vmem:[%s9676_s5 + $0x38] sm:$0xf] }
  0xac   : > { %2466 = vmatmul.mubr.bf16.gmra.mrb[4].mxu1 %v9778_v63  ;;  %8324 = vmatprep.subr.bf16.mxu1 %v9033_v1  ;;  %v1415_v21 = vrot.slane %v1413_v12, 1  ;;  %v1047_v22 = vld [vmem:[#allocation2 + $0x3c] sm:$0xf]  ;;  %v354_v63 = vsel %vm9690_vm5, %v346_v8, %v353_v13  ;;  %617 = vst [vmem:[#allocation2 + $0x48] sm:$0xf] %v616_v18  ;;  %v620_v23 = vsel %vm9705_vm7, %v355_v14, %v619_v9  ;;  %v367_v30 = vrot.slane %v365_v15, 7 }
  0xad   : > { %2473 = vmatprep.mubr.bf16.mxu1 %v9787_v33  ;;  %v7089_v25 = vcombine.low %v1047_v22, %v1048_v4  ;;  %618 = vst [vmem:[#allocation2 + $0x4c] sm:$0xf] %v354_v63  ;;  %621 = vst [vmem:[#allocation2 + $0x50] sm:$0x1] %v620_v23  ;;  %v362_v27 = vor.u32 %v360_v11, %v359_v19  ;;  %v363_v28 = vrot.slane %v359_v19, 4  ;;  %v9043_v40 = vld [vmem:[#allocation7 + $0xa0] sm:$0xff]  }
  0xae   : > { %8279 = vmatpush3.bf16.msra.mxu0 %v9009_v55  ;;  %v9001_v26 = vld [vmem:[#allocation2 + $0x44] ss:$0 sps:$4 sm:$0x11]   ;;  %v9818_v29 = vsel %vm1356_vm9, %v1411_v3, %v1415_v21  ;;  %v234_v32 = vld [vmem:[%s9676_s5 + $0x3c] sm:$0xf]  ;;  %v370_v44 = vor.u32 %v368_v24, %v367_v30  ;;  %v372_v45 = vrot.slane %v367_v30, 4 }
  0xaf   : > { %8280 = vmatprep.subr.bf16.mxu0 %v9016_v0  ;;  %8325 = vmatpush3.bf16.msra.mxu1 %v9033_v1  ;;  %v1418_v35 = vshrl.u32 %v7089_v25, 16  ;;  %v1420_v37 = vshll.u32 %v7089_v25, 16  ;;  %v1425_v39 = vshll.u32 %v9001_v26, 16  ;;  %v623_v41 = vsel %vm9697_vm6, %v362_v27, %v622_v16  ;;  %v626_v42 = vld [vmem:[#allocation2 + $0x5c] sm:$0x1]  ;;  %v9826_v49 = vld [vmem:[#allocation7 + $0x170] sm:$0xff]  }
  0xb0   : > { %8326 = vmatprep.subr.bf16.mxu1 %v9038_v17  ;;  %624 = vst [vmem:[#allocation2 + $0x54] sm:$0xf] %v623_v41  ;;  %v374_v47 = vshrl.u32 %v233_v31, 16  ;;  %v377_v48 = vshll.u32 %v233_v31, 16  ;;  %v9828_v51 = vld [vmem:[#allocation7 + $0xa8] sm:$0xff]   ;;  %v9830_v52 = vld [vmem:[#allocation2 + $0x30] sm:$0xff]   ;;  %v371_v59 = vsel %vm9690_vm5, %v363_v28, %v370_v44  ;;  %v627_v60 = vsel %vm9705_vm7, %v372_v45, %v626_v42 }
  0xb1   : > { %2008 = vmatmul.mubr.bf16.gmra.mrb[8].mxu0 %v9805_v6  ;;  %v1422_v53 = vrot.slane %v1420_v37, 1  ;;  %v1427_v54 = vrot.slane %v1425_v39, 1  ;;  %v382_v55 = vshrl.u32 %v234_v32, 16  ;;  %v385_v56 = vshll.u32 %v234_v32, 16  ;;  %v629_v57 = vld [vmem:[#allocation2 + $0x60] sm:$0xf] }
  0xb2   : > { %2015 = vmatprep.mubr.bf16.mxu0 %v9818_v29  ;;  %8281 = vmatpush3.bf16.msra.mxu0 %v9016_v0  ;;  %v235_v58 = vld [vmem:[%s9676_s5 + $0x40] sm:$0xf]  ;;  %v376_v61 = vrot.slane %v374_v47, 7  ;;  %v633_v62 = vld [vmem:[#allocation2 + $0x68] sm:$0x1]  ;;  %v9860_v37 = vld [vmem:[#allocation2 + $0x3c] sm:$0xff]  }
  0xb3   : > { %8282 = vmatprep.subr.bf16.mxu0 %v9811_v20  ;;  %8327 = vmatpush3.bf16.msra.mxu1 %v9038_v17  ;;  %v236_v0 = vld [vmem:[%s9676_s5 + $0x44] sm:$0xf]  ;;  %v391_v1 = vshrl.u32 %v235_v58, 16  ;;  %v1423_v2 = vor.u32 %v1422_v53, %v1418_v35  ;;  %v713_v3 = vld [vmem:[#allocation2 + $0x48] sm:$0x2]  ;;  %v384_v5 = vrot.slane %v382_v55, 7 }
  0xb4   : > { %2474 = vmatmul.mubr.bf16.gmra.mrb[8].mxu1 %v9790_v38  ;;  %8328 = vmatprep.subr.bf16.mxu1 %v9043_v40  ;;  %v815_v4 = vld [vmem:[#allocation2 + $0x48] sm:$0x1]  ;;  %625 = vst [vmem:[#allocation2 + $0x58] sm:$0xf] %v371_v59  ;;  %628 = vst [vmem:[#allocation2 + $0x5c] sm:$0x1] %v627_v60  ;;  %v379_v10 = vor.u32 %v377_v48, %v376_v61 }
  0xb5   : > { %2481 = vmatprep.mubr.bf16.mxu1 %v9796_v50  ;;  %v394_v38 = vshll.u32 %v235_v58, 16  ;;  %v7031_v7 = vrot.slane %v713_v3, 9  ;;  %v857_v8 = vld [vmem:[#allocation2 + $0x4c] sm:$0x8]  ;;  %v960_v9 = vld [vmem:[#allocation2 + $0x50] sm:$0x1]  ;;  %v9843_v12 = vsel %vm1356_vm9, %v1423_v2, %v1427_v54  ;;  %v387_v14 = vor.u32 %v385_v56, %v384_v5 }
  0xb6   : > { %v380_v11 = vrot.slane %v376_v61, 4  ;;  %8283 = vmatpush3.bf16.msra.mxu0 %v9811_v20  ;;  %v7049_v13 = vrot.slane %v857_v8, 11  ;;  %v389_v15 = vrot.slane %v384_v5, 4  ;;  %v9041_v16 = vld [vmem:[#allocation7 + $0x178] sm:$0xff]   ;;  %v9048_v17 = vld [vmem:[#allocation7 + $0xb0] sm:$0xff]   ;;  %v630_v19 = vsel %vm9697_vm6, %v379_v10, %v629_v57  ;;  %v9051_v35 = vld [vmem:[#allocation7 + $0x1c0] sm:$0xff]  }
  0xb7   : > { %8284 = vmatprep.subr.bf16.mxu0 %v9826_v49  ;;  %8329 = vmatpush3.bf16.msra.mxu1 %v9043_v40  ;;  %v816_v18 = vsel %vm9705_vm7, %v7031_v7, %v815_v4  ;;  %v393_v21 = vrot.slane %v391_v1, 7  ;;  %v399_v22 = vshrl.u32 %v236_v0, 16  ;;  %v636_v20 = vld [vmem:[#allocation2 + $0x6c] sm:$0xf]  ;;  %v714_v23 = vld [vmem:[#allocation2 + $0x54] sm:$0x2] }
  0xb8   : > { %8330 = vmatprep.subr.bf16.mxu1 %v9828_v51  ;;  %817 = vst [vmem:[#allocation2 + $0x48] sm:$0x1] %v816_v18  ;;  %v961_v63 = vsel %vm9738_vm8, %v7049_v13, %v960_v9  ;;  %v818_v24 = vld [vmem:[#allocation2 + $0x54] sm:$0x1]  ;;  %v388_v25 = vsel %vm9690_vm5, %v380_v11, %v387_v14  ;;  %631 = vst [vmem:[#allocation2 + $0x60] sm:$0xf] %v630_v19  ;;  %v634_v26 = vsel %vm9705_vm7, %v389_v15, %v633_v62 }
  0xb9   : > { %2016 = vmatmul.mubr.bf16.gmra.mrb[12].mxu0 %v9830_v52  ;;  %v402_v27 = vshll.u32 %v236_v0, 16  ;;  %962 = vst [vmem:[#allocation2 + $0x50] sm:$0x1] %v961_v63  ;;  %v7032_v28 = vrot.slane %v714_v23, 9  ;;  %632 = vst [vmem:[#allocation2 + $0x64] sm:$0xf] %v388_v25  ;;  %v396_v30 = vor.u32 %v394_v38, %v393_v21 }
  0xba   : > { %2023 = vmatprep.mubr.bf16.mxu0 %v9843_v12  ;;  %635 = vst [vmem:[#allocation2 + $0x68] sm:$0x1] %v634_v26  ;;  %v397_v31 = vrot.slane %v393_v21, 4  ;;  %v401_v32 = vrot.slane %v399_v22, 7  ;;  %v640_v40 = vld [vmem:[#allocation2 + $0x74] sm:$0x1]  ;;  %8285 = vmatpush3.bf16.msra.mxu0 %v9826_v49 }
  0xbb   : > { %v237_v39 = vld [vmem:[%s9676_s5 + $0x48] sm:$0xf]  ;;  %8286 = vmatprep.subr.bf16.mxu0 %v9041_v16  ;;  %8331 = vmatpush3.bf16.msra.mxu1 %v9828_v51  ;;  %v819_v41 = vsel %vm9705_vm7, %v7032_v28, %v818_v24  ;;  %v963_v44 = vld [vmem:[#allocation2 + $0x5c] sm:$0x1]  ;;  %v637_v47 = vsel %vm9697_vm6, %v396_v30, %v636_v20  ;;  %v9049_v48 = vld [vmem:[#allocation7 + $0xb8] sm:$0xff]  }
  0xbc   : > { %2482 = vmatmul.mubr.bf16.gmra.mrb[12].mxu1 %v9805_v6  ;;  %v858_v42 = vld [vmem:[#allocation2 + $0x58] sm:$0x8]  ;;  %v404_v45 = vor.u32 %v402_v27, %v401_v32  ;;  %8332 = vmatprep.subr.bf16.mxu1 %v9048_v17  ;;  %820 = vst [vmem:[#allocation2 + $0x54] sm:$0x1] %v819_v41  ;;  %v406_v53 = vrot.slane %v401_v32, 4  ;;  %v408_v55 = vshrl.u32 %v237_v39, 16 }
  0xbd   : > { %2489 = vmatprep.mubr.bf16.mxu1 %v9818_v29  ;;  %v7050_v49 = vrot.slane %v858_v42, 11  ;;  %638 = vst [vmem:[#allocation2 + $0x6c] sm:$0xf] %v637_v47  ;;  %v238_v51 = vld [vmem:[%s9676_s5 + $0x4c] sm:$0xf]  ;;  %v411_v56 = vshll.u32 %v237_v39, 16 }
  0xbe   : > { %v1051_v54 = vld [vmem:[#allocation2 + $0x4c] sm:$0xf]  ;;  %v405_v6 = vsel %vm9690_vm5, %v397_v31, %v404_v45  ;;  %v416_v57 = vshrl.u32 %v238_v51, 16  ;;  %8287 = vmatpush3.bf16.msra.mxu0 %v9041_v16  ;;  %v641_v59 = vsel %vm9705_vm7, %v406_v53, %v640_v40  ;;  %v643_v60 = vld [vmem:[#allocation2 + $0x78] sm:$0xf]  ;;  %v410_v0 = vrot.slane %v408_v55, 7 }
  0xbf   : > { %v964_v58 = vsel %vm9738_vm8, %v7050_v49, %v963_v44  ;;  %639 = vst [vmem:[#allocation2 + $0x70] sm:$0xf] %v405_v6  ;;  %8333 = vmatpush3.bf16.msra.mxu1 %v9048_v17  ;;  %7728 = vmatprep.subr.bf16.mxu0 %v9051_v35  ;;  %v1050_v61 = vld [vmem:[#allocation2 + $0x48] sm:$0xf]  ;;  %v1054_v62 = vld [vmem:[#allocation2 + $0x58] sm:$0xf] }
  0xc0   : > { %965 = vst [vmem:[#allocation2 + $0x5c] sm:$0x1] %v964_v58  ;;  %642 = vst [vmem:[#allocation2 + $0x74] sm:$0x1] %v641_v59  ;;  %v419_v1 = vshll.u32 %v238_v51, 16  ;;  %8334 = vmatprep.subr.bf16.mxu1 %v9049_v48  ;;  %v7091_v2 = vcombine.low %v1050_v61, %v1051_v54  ;;  %v418_v4 = vrot.slane %v416_v57, 7  ;;  %v413_v8 = vor.u32 %v411_v56, %v410_v0 }
  0xc1   : > { %2024 = vmatmul.mubr.bf16.gmra.mrb[16].mxu0 %v9860_v37  ;;  %v9878_v3 = vld [vmem:[#allocation2 + $0x50] ss:$0 sps:$4 sm:$0x11]   ;;  %v715_v5 = vld [vmem:[#allocation2 + $0x60] sm:$0x2]  ;;  %v9885_v21 = vld [vmem:[#allocation2 + $0x48] sm:$0xff]  }
  0xc2   : > { %v821_v38 = vld [vmem:[#allocation2 + $0x60] sm:$0x1]  ;;  %v859_v7 = vld [vmem:[#allocation2 + $0x64] sm:$0x8]  ;;  %v1430_v9 = vshrl.u32 %v7091_v2, 16  ;;  %v1432_v10 = vshll.u32 %v7091_v2, 16  ;;  %v644_v17 = vsel %vm9697_vm6, %v413_v8, %v643_v60  ;;  %v421_v25 = vor.u32 %v419_v1, %v418_v4 }
  0xc3   : > { %v1437_v11 = vshll.u32 %v9878_v3, 16  ;;  %v7033_v13 = vrot.slane %v715_v5, 9  ;;  %v966_v14 = vld [vmem:[#allocation2 + $0x68] sm:$0x1]  ;;  %8335 = vmatpush3.bf16.msra.mxu1 %v9049_v48  ;;  %v1053_v15 = vld [vmem:[#allocation2 + $0x54] sm:$0xf] }
  0xc4   : > { %2490 = vmatmul.mubr.bf16.gmra.mrb[16].mxu1 %v9830_v52  ;;  %v7051_v16 = vrot.slane %v859_v7, 11  ;;  %v1434_v18 = vrot.slane %v1432_v10, 1  ;;  %v7093_v22 = vcombine.low %v1053_v15, %v1054_v62  ;;  %645 = vst [vmem:[#allocation2 + $0x78] sm:$0xf] %v644_v17  ;;  %v716_v63 = vld [vmem:[#allocation2 + $0x6c] sm:$0x2] }
  0xc5   : > { %v1439_v19 = vrot.slane %v1437_v11, 1  ;;  %2497 = vmatprep.mubr.bf16.mxu1 %v9843_v12  ;;  %v822_v20 = vsel %vm9705_vm7, %v7033_v13, %v821_v38  ;;  %v824_v23 = vld [vmem:[#allocation2 + $0x6c] sm:$0x1]  ;;  %v647_v26 = vld [vmem:[#allocation2 + $0x80] sm:$0x1]  ;;  %v7034_v40 = vrot.slane %v716_v63, 9 }
  0xc6   : > { %823 = vst [vmem:[#allocation2 + $0x60] sm:$0x1] %v822_v20  ;;  %v967_v52 = vsel %vm9738_vm8, %v7051_v16, %v966_v14  ;;  %v860_v24 = vld [vmem:[#allocation2 + $0x70] sm:$0x8]  ;;  %v239_v27 = vld [vmem:[%s9676_s5 + $0x50] sm:$0xf]  ;;  %v1435_v28 = vor.u32 %v1434_v18, %v1430_v9 }
  0xc7   : > { %v9892_v30 = vld [vmem:[#allocation2 + $0x5c] ss:$0 sps:$4 sm:$0x11]   ;;  %v1442_v31 = vshrl.u32 %v7093_v22, 16  ;;  %968 = vst [vmem:[#allocation2 + $0x68] sm:$0x1] %v967_v52  ;;  %v825_v48 = vsel %vm9705_vm7, %v7034_v40, %v824_v23 }
  0xc8   : > { %v1444_v32 = vshll.u32 %v7093_v22, 16  ;;  %v7052_v35 = vrot.slane %v860_v24, 11  ;;  %v969_v39 = vld [vmem:[#allocation2 + $0x74] sm:$0x1]  ;;  %v414_v41 = vrot.slane %v410_v0, 4  ;;  %v9895_v42 = vsel %vm1356_vm9, %v1435_v28, %v1439_v19 }
  0xc9   : > { %v1449_v44 = vshll.u32 %v9892_v30, 16  ;;  %v423_v45 = vrot.slane %v418_v4, 4  ;;  %2031 = vmatprep.mubr.bf16.mxu0 %v9895_v42  ;;  %v240_v51 = vld [vmem:[%s9676_s5 + $0x54] sm:$0xf]  ;;  %826 = vst [vmem:[#allocation2 + $0x6c] sm:$0x1] %v825_v48 }
  0xca   : > { %v1446_v47 = vrot.slane %v1444_v32, 1  ;;  %v970_v49 = vsel %vm9738_vm8, %v7052_v35, %v969_v39  ;;  %v422_v53 = vsel %vm9690_vm5, %v414_v41, %v421_v25  ;;  %2032 = vmatmul.mubr.bf16.gmra.mrb[20].mxu0 %v9885_v21  ;;  %v1057_v6 = vld [vmem:[#allocation2 + $0x64] sm:$0xf]  ;;  %v425_v56 = vshrl.u32 %v239_v27, 16  ;;  %v654_v8 = vld [vmem:[#allocation2 + $0x8c] sm:$0x1] }
  0xcb   : > { %v1451_v54 = vrot.slane %v1449_v44, 1  ;;  %971 = vst [vmem:[#allocation2 + $0x74] sm:$0x1] %v970_v49  ;;  %646 = vst [vmem:[#allocation2 + $0x7c] sm:$0xf] %v422_v53  ;;  %v648_v55 = vsel %vm9705_vm7, %v423_v45, %v647_v26  ;;  %v428_v60 = vshll.u32 %v239_v27, 16 }
  0xcc   : > { %2498 = vmatmul.mubr.bf16.gmra.mrb[20].mxu1 %v9860_v37  ;;  %v1447_v57 = vor.u32 %v1446_v47, %v1442_v31  ;;  %649 = vst [vmem:[#allocation2 + $0x80] sm:$0x1] %v648_v55  ;;  %v717_v58 = vld [vmem:[#allocation2 + $0x78] sm:$0x2]  ;;  %v827_v59 = vld [vmem:[#allocation2 + $0x78] sm:$0x1] }
  0xcd   : > { %v433_v61 = vshrl.u32 %v240_v51, 16  ;;  %2505 = vmatprep.mubr.bf16.mxu1 %v9895_v42  ;;  %v1056_v62 = vld [vmem:[#allocation2 + $0x60] sm:$0xf]  ;;  %v7035_v0 = vrot.slane %v717_v58, 9  ;;  %v436_v1 = vshll.u32 %v240_v51, 16  ;;  %v427_v7 = vrot.slane %v425_v56, 7 }
  0xce   : > { %v650_v2 = vld [vmem:[#allocation2 + $0x84] sm:$0xf]  ;;  %v9912_v4 = vsel %vm1356_vm9, %v1447_v57, %v1451_v54  ;;  %v7095_v5 = vcombine.low %v1056_v62, %v1057_v6  ;;  %v9914_v38 = vld [vmem:[#allocation2 + $0x68] ss:$0 sps:$4 sm:$0x11]   ;;  %v9010_v9 = vld [vmem:[#allocation2 + $0x54] sm:$0xff]  }
  0xcf   : > { %v9916_v37 = vld [vmem:[#allocation2 + $0x70] sm:$0xf]  ;;  %2039 = vmatprep.mubr.bf16.mxu0 %v9912_v4  ;;  %v828_v10 = vsel %vm9705_vm7, %v7035_v0, %v827_v59  ;;  %v435_v11 = vrot.slane %v433_v61, 7  ;;  %v1461_v15 = vshll.u32 %v9914_v38, 16  ;;  %v430_v16 = vor.u32 %v428_v60, %v427_v7  ;;  %v241_v22 = vld [vmem:[%s9676_s5 + $0x58] sm:$0xf] }
  0xd0   : > { %v1454_v13 = vshrl.u32 %v7095_v5, 16  ;;  %v1456_v14 = vshll.u32 %v7095_v5, 16  ;;  %829 = vst [vmem:[#allocation2 + $0x78] sm:$0x1] %v828_v10  ;;  %v431_v17 = vrot.slane %v427_v7, 4  ;;  %v9940_v47 = vld [vmem:[#allocation2 + $0x60] sm:$0xff]  }
  0xd1   : > { %v438_v18 = vor.u32 %v436_v1, %v435_v11  ;;  %v440_v19 = vrot.slane %v435_v11, 4  ;;  %v1463_v52 = vrot.slane %v1461_v15, 1  ;;  %v1059_v63 = vld [vmem:[#allocation2 + $0x6c] sm:$0xf]  ;;  %v651_v23 = vsel %vm9697_vm6, %v430_v16, %v650_v2  ;;  %v657_v57 = vld [vmem:[#allocation2 + $0x90] sm:$0xf] }
  0xd2   : > { %v1458_v20 = vrot.slane %v1456_v14, 1  ;;  %2040 = vmatmul.mubr.bf16.gmra.mrb[24].mxu0 %v9010_v9  ;;  %v7097_v24 = vcombine.low %v1059_v63, %v9916_v37  ;;  %v9926_v25 = vld [vmem:[#allocation2 + $0x74] ss:$0 sps:$4 sm:$0x11]   ;;  %652 = vst [vmem:[#allocation2 + $0x84] sm:$0xf] %v651_v23 }
  0xd3   : > { %v439_v26 = vsel %vm9690_vm5, %v431_v17, %v438_v18  ;;  %v655_v27 = vsel %vm9705_vm7, %v440_v19, %v654_v8  ;;  %v861_v31 = vld [vmem:[#allocation2 + $0x7c] sm:$0x8]  ;;  %v972_v32 = vld [vmem:[#allocation2 + $0x80] sm:$0x1]  ;;  %v1473_v41 = vshll.u32 %v9926_v25, 16  ;;  %v442_v48 = vshrl.u32 %v241_v22, 16 }
  0xd4   : > { %2506 = vmatmul.mubr.bf16.gmra.mrb[24].mxu1 %v9885_v21  ;;  %v1459_v28 = vor.u32 %v1458_v20, %v1454_v13  ;;  %v9933_v40 = vld [vmem:[#allocation2 + $0x7c] sm:$0xf]  ;;  %653 = vst [vmem:[#allocation2 + $0x88] sm:$0xf] %v439_v26  ;;  %656 = vst [vmem:[#allocation2 + $0x8c] sm:$0x1] %v655_v27 }
  0xd5   : > { %2513 = vmatprep.mubr.bf16.mxu1 %v9912_v4  ;;  %v1466_v35 = vshrl.u32 %v7097_v24, 16  ;;  %v1468_v39 = vshll.u32 %v7097_v24, 16  ;;  %v7053_v44 = vrot.slane %v861_v31, 11  ;;  %v242_v21 = vld [vmem:[%s9676_s5 + $0x5c] sm:$0xf]  ;;  %v445_v49 = vshll.u32 %v241_v22, 16 }
  0xd6   : > { %v9938_v45 = vsel %vm1356_vm9, %v1459_v28, %v1463_v52  ;;  %v1475_v51 = vrot.slane %v1473_v41, 1  ;;  %v444_v56 = vrot.slane %v442_v48, 7  ;;  %v450_v59 = vshrl.u32 %v242_v21, 16  ;;  %v243_v60 = vld [vmem:[%s9676_s5 + $0x60] sm:$0xf] }
  0xd7   : > { %2047 = vmatprep.mubr.bf16.mxu0 %v9938_v45  ;;  %v1470_v53 = vrot.slane %v1468_v39, 1  ;;  %v973_v54 = vsel %vm9738_vm8, %v7053_v44, %v972_v32  ;;  %v1062_v6 = vld [vmem:[#allocation2 + $0x78] sm:$0xf]  ;;  %v244_v61 = vld [vmem:[%s9676_s5 + $0x64] sm:$0xf]  ;;  %v453_v5 = vshll.u32 %v242_v21, 16 }
  0xd8   : > { %974 = vst [vmem:[#allocation2 + $0x80] sm:$0x1] %v973_v54  ;;  %v7099_v55 = vcombine.low %v1062_v6, %v9933_v40  ;;  %v447_v2 = vor.u32 %v445_v49, %v444_v56  ;;  %v448_v16 = vrot.slane %v444_v56, 4  ;;  %v9957_v18 = vld [vmem:[#allocation2 + $0x6c] sm:$0xff]   ;;  %v452_v22 = vrot.slane %v450_v59, 7 }
  0xd9   : > { %v1471_v58 = vor.u32 %v1470_v53, %v1466_v35  ;;  %v718_v0 = vld [vmem:[#allocation2 + $0x84] sm:$0x2]  ;;  %v830_v1 = vld [vmem:[#allocation2 + $0x84] sm:$0x1]  ;;  %v661_v20 = vld [vmem:[#allocation2 + $0x98] sm:$0x1] }
  0xda   : > { %v1480_v62 = vshll.u32 %v7099_v55, 16  ;;  %2048 = vmatmul.mubr.bf16.gmra.mrb[28].mxu0 %v9940_v47  ;;  %v1478_v8 = vshrl.u32 %v7099_v55, 16  ;;  %v7036_v10 = vrot.slane %v718_v0, 9  ;;  %v658_v17 = vsel %vm9697_vm6, %v447_v2, %v657_v57  ;;  %v664_v31 = vld [vmem:[#allocation2 + $0x9c] sm:$0xf] }
  0xdb   : > { %v9951_v7 = vsel %vm1356_vm9, %v1471_v58, %v1475_v51  ;;  %v862_v11 = vld [vmem:[#allocation2 + $0x88] sm:$0x8]  ;;  %v975_v13 = vld [vmem:[#allocation2 + $0x8c] sm:$0x1]  ;;  %659 = vst [vmem:[#allocation2 + $0x90] sm:$0xf] %v658_v17  ;;  %v455_v27 = vor.u32 %v453_v5, %v452_v22 }
  0xdc   : > { %2514 = vmatmul.mubr.bf16.gmra.mrb[28].mxu1 %v9010_v9  ;;  %2055 = vmatprep.mubr.bf16.mxu0 %v9951_v7  ;;  %v1482_v14 = vrot.slane %v1480_v62, 1  ;;  %v7054_v15 = vrot.slane %v862_v11, 11  ;;  %v831_v19 = vsel %vm9705_vm7, %v7036_v10, %v830_v1  ;;  %v459_v52 = vshrl.u32 %v243_v60, 16  ;;  %v668_v32 = vld [vmem:[#allocation2 + $0xa4] sm:$0x1] }
  0xdd   : > { %2521 = vmatprep.mubr.bf16.mxu1 %v9938_v45  ;;  %v462_v9 = vshll.u32 %v243_v60, 16  ;;  %832 = vst [vmem:[#allocation2 + $0x84] sm:$0x1] %v831_v19  ;;  %v467_v23 = vshrl.u32 %v244_v61, 16  ;;  %v470_v24 = vshll.u32 %v244_v61, 16  ;;  %v457_v28 = vrot.slane %v452_v22, 4 }
  0xde   : > { %v976_v63 = vsel %vm9738_vm8, %v7054_v15, %v975_v13  ;;  %v461_v35 = vrot.slane %v459_v52, 7  ;;  %v1483_v41 = vor.u32 %v1482_v14, %v1478_v8  ;;  %v456_v21 = vsel %vm9690_vm5, %v448_v16, %v455_v27  ;;  %v245_v49 = vld [vmem:[%s9676_s5 + $0x68] sm:$0xf]  ;;  %v246_v53 = vld [vmem:[%s9676_s5 + $0x6c] sm:$0xf] }
  0xdf   : > { %v9963_v26 = vld [vmem:[#allocation2 + $0x80] ss:$0 sps:$4 sm:$0x11]   ;;  %977 = vst [vmem:[#allocation2 + $0x8c] sm:$0x1] %v976_v63  ;;  %v469_v39 = vrot.slane %v467_v23, 7  ;;  %v662_v48 = vsel %vm9705_vm7, %v457_v28, %v661_v20 }
  0xe0   : > { %v1485_v44 = vshll.u32 %v9963_v26, 16  ;;  %v9972_v51 = vld [vmem:[#allocation2 + $0x88] sm:$0xf]  ;;  %660 = vst [vmem:[#allocation2 + $0x94] sm:$0xf] %v456_v21  ;;  %v464_v54 = vor.u32 %v462_v9, %v461_v35  ;;  %v465_v6 = vrot.slane %v461_v35, 4 }
  0xe1   : > { %663 = vst [vmem:[#allocation2 + $0x98] sm:$0x1] %v662_v48  ;;  %v472_v55 = vor.u32 %v470_v24, %v469_v39  ;;  %v474_v56 = vrot.slane %v469_v39, 4  ;;  %v476_v58 = vshrl.u32 %v245_v49, 16  ;;  %v484_v59 = vshrl.u32 %v246_v53, 16  ;;  %v9990_v15 = vld [vmem:[#allocation2 + $0x78] sm:$0xff]  }
  0xe2   : > { %2056 = vmatmul.mubr.bf16.gmra.mrb[32].mxu0 %v9957_v18  ;;  %v1487_v57 = vrot.slane %v1485_v44, 1  ;;  %v719_v60 = vld [vmem:[#allocation2 + $0x90] sm:$0x2]  ;;  %v833_v61 = vld [vmem:[#allocation2 + $0x90] sm:$0x1]  ;;  %v665_v0 = vsel %vm9697_vm6, %v464_v54, %v664_v31  ;;  %v479_v2 = vshll.u32 %v245_v49, 16 }
  0xe3   : > { %v473_v62 = vsel %vm9690_vm5, %v465_v6, %v472_v55  ;;  %v669_v1 = vsel %vm9705_vm7, %v474_v56, %v668_v32  ;;  %v7037_v10 = vrot.slane %v719_v60, 9  ;;  %666 = vst [vmem:[#allocation2 + $0x9c] sm:$0xf] %v665_v0  ;;  %v478_v14 = vrot.slane %v476_v58, 7  ;;  %v671_v19 = vld [vmem:[#allocation2 + $0xa8] sm:$0xf] }
  0xe4   : > { %2522 = vmatmul.mubr.bf16.gmra.mrb[32].mxu1 %v9940_v47  ;;  %v9983_v5 = vsel %vm1356_vm9, %v1483_v41, %v1487_v57  ;;  %v1065_v8 = vld [vmem:[#allocation2 + $0x84] sm:$0xf]  ;;  %667 = vst [vmem:[#allocation2 + $0xa0] sm:$0xf] %v473_v62  ;;  %670 = vst [vmem:[#allocation2 + $0xa4] sm:$0x1] %v669_v1 }
  0xe5   : > { %2529 = vmatprep.mubr.bf16.mxu1 %v9951_v7  ;;  %v487_v47 = vshll.u32 %v246_v53, 16  ;;  %2063 = vmatprep.mubr.bf16.mxu0 %v9983_v5  ;;  %v7101_v11 = vcombine.low %v1065_v8, %v9972_v51  ;;  %v834_v16 = vsel %vm9705_vm7, %v7037_v10, %v833_v61  ;;  %v486_v17 = vrot.slane %v484_v59, 7  ;;  %v247_v63 = vld [vmem:[%s9676_s5 + $0x70] sm:$0xf]  ;;  %v675_v28 = vld [vmem:[#allocation2 + $0xb0] sm:$0x1] }
  0xe6   : > { %v9988_v13 = vld [vmem:[#allocation2 + $0x8c] ss:$0 sps:$4 sm:$0x11]   ;;  %835 = vst [vmem:[#allocation2 + $0x90] sm:$0x1] %v834_v16  ;;  %v481_v9 = vor.u32 %v479_v2, %v478_v14  ;;  %v482_v39 = vrot.slane %v478_v14, 4 }
  0xe7   : > { %v1490_v22 = vshrl.u32 %v7101_v11, 16  ;;  %v1492_v20 = vshll.u32 %v7101_v11, 16  ;;  %v1497_v52 = vshll.u32 %v9988_v13, 16  ;;  %v863_v23 = vld [vmem:[#allocation2 + $0x94] sm:$0x8]  ;;  %v489_v27 = vor.u32 %v487_v47, %v486_v17  ;;  %v10013_v0 = vld [vmem:[#allocation2 + $0x84] sm:$0xff]  }
  0xe8   : > { %v978_v24 = vld [vmem:[#allocation2 + $0x98] sm:$0x1]  ;;  %v7055_v35 = vrot.slane %v863_v23, 11  ;;  %v491_v41 = vrot.slane %v486_v17, 4  ;;  %v672_v44 = vsel %vm9697_vm6, %v481_v9, %v671_v19  ;;  %v248_v21 = vld [vmem:[%s9676_s5 + $0x74] sm:$0xf] }
  0xe9   : > { %v1494_v31 = vrot.slane %v1492_v20, 1  ;;  %v1499_v32 = vrot.slane %v1497_v52, 1  ;;  %v493_v48 = vshrl.u32 %v247_v63, 16  ;;  %v496_v49 = vshll.u32 %v247_v63, 16  ;;  %673 = vst [vmem:[#allocation2 + $0xa8] sm:$0xf] %v672_v44 }
  0xea   : > { %2064 = vmatmul.mubr.bf16.gmra.mrb[36].mxu0 %v9990_v15  ;;  %v979_v54 = vsel %vm9738_vm8, %v7055_v35, %v978_v24  ;;  %v720_v6 = vld [vmem:[#allocation2 + $0x9c] sm:$0x2]  ;;  %v836_v55 = vld [vmem:[#allocation2 + $0x9c] sm:$0x1]  ;;  %v490_v57 = vsel %vm9690_vm5, %v482_v39, %v489_v27  ;;  %v10006_v58 = vld [vmem:[#allocation2 + $0x94] sm:$0xf] }
  0xeb   : > { %v1495_v53 = vor.u32 %v1494_v31, %v1490_v22  ;;  %v864_v56 = vld [vmem:[#allocation2 + $0xa0] sm:$0x8]  ;;  %980 = vst [vmem:[#allocation2 + $0x98] sm:$0x1] %v979_v54  ;;  %v7038_v59 = vrot.slane %v720_v6, 9  ;;  %v495_v1 = vrot.slane %v493_v48, 7 }
  0xec   : > { %2530 = vmatmul.mubr.bf16.gmra.mrb[36].mxu1 %v9957_v18  ;;  %v7056_v60 = vrot.slane %v864_v56, 11  ;;  %v981_v61 = vld [vmem:[#allocation2 + $0xa4] sm:$0x1]  ;;  %674 = vst [vmem:[#allocation2 + $0xac] sm:$0xf] %v490_v57  ;;  %v676_v18 = vsel %vm9705_vm7, %v491_v41, %v675_v28  ;;  %v501_v2 = vshrl.u32 %v248_v21, 16 }
  0xed   : > { %2537 = vmatprep.mubr.bf16.mxu1 %v9983_v5  ;;  %v10011_v62 = vsel %vm1356_vm9, %v1495_v53, %v1499_v32  ;;  %677 = vst [vmem:[#allocation2 + $0xb0] sm:$0x1] %v676_v18  ;;  %v504_v8 = vshll.u32 %v248_v21, 16  ;;  %v1068_v10 = vld [vmem:[#allocation2 + $0x90] sm:$0xf]  ;;  %v837_v47 = vsel %vm9705_vm7, %v7038_v59, %v836_v55  ;;  %v10021_v17 = vor.u32 %v496_v49, %v495_v1 }
  0xee   : > { %12711 = vst [vmem:[#allocation18_spill] sm:$0xff] %v10011_v62  ;;  %2071 = vmatprep.mubr.bf16.mxu0 %v10011_v62  ;;  %v982_v11 = vsel %vm9738_vm8, %v7056_v60, %v981_v61  ;;  %v678_v14 = vld [vmem:[#allocation2 + $0xb4] sm:$0xf]  ;;  %v7103_v16 = vcombine.low %v1068_v10, %v10006_v58  ;;  %838 = vst [vmem:[#allocation2 + $0x9c] sm:$0x1] %v837_v47  ;;  %v499_v19 = vrot.slane %v495_v1, 4 }
  0xef   : > { %983 = vst [vmem:[#allocation2 + $0xa4] sm:$0x1] %v982_v11  ;;  %v10023_v22 = vrot.slane %v501_v2, 7  ;;  %v682_v20 = vld [vmem:[#allocation2 + $0xbc] sm:$0x1]  ;;  %v10027_v24 = vld [vmem:[#allocation7 + $0x200] sm:$0xff]   ;;  %v679_v32 = vsel %vm9697_vm6, %v10021_v17, %v678_v14 }
  0xf0   : > { %v1502_v52 = vshrl.u32 %v7103_v16, 16  ;;  %v1504_v9 = vshll.u32 %v7103_v16, 16  ;;  %v10030_v27 = vld [vmem:[#allocation2 + $0xa0] sm:$0xf]  ;;  %v721_v28 = vld [vmem:[#allocation2 + $0xa8] sm:$0x2]  ;;  %8368 = vmatprep.subr.bf16.mxu1 %v10027_v24 }
  0xf1   : > { %v506_v63 = vor.u32 %v504_v8, %v10023_v22  ;;  %v12646_v23 = vrot.slane %v10023_v22, 4  ;;  %v839_v31 = vld [vmem:[#allocation2 + $0xa8] sm:$0x1]  ;;  %680 = vst [vmem:[#allocation2 + $0xb4] sm:$0xf] %v679_v32  ;;  %v7039_v21 = vrot.slane %v721_v28, 9 }
  0xf2   : > { %2072 = vmatmul.mubr.bf16.gmra.mrb[40].mxu0 %v10013_v0  ;;  %v10036_v35 = vld [vmem:[#allocation2 + $0x98] ss:$0 sps:$4 sm:$0x11]   ;;  %v1506_v39 = vrot.slane %v1504_v9, 1  ;;  %v9029_v57 = vld [vmem:[#allocation2 + $0x90] sm:$0xff]  }
  0xf3   : > { %v507_v41 = vsel %vm9690_vm5, %v499_v19, %v506_v63  ;;  %v683_v44 = vsel %vm9705_vm7, %v12646_v23, %v682_v20  ;;  %v865_v48 = vld [vmem:[#allocation2 + $0xac] sm:$0x8]  ;;  %v1509_v53 = vshll.u32 %v10036_v35, 16  ;;  %v840_v55 = vsel %vm9705_vm7, %v7039_v21, %v839_v31  ;;  %v249_v18 = vld [vmem:[%s9676_s5 + $0x78] sm:$0xf] }
  0xf4   : > { %2538 = vmatmul.mubr.bf16.gmra.mrb[40].mxu1 %v9990_v15  ;;  %v984_v49 = vld [vmem:[#allocation2 + $0xb0] sm:$0x1]  ;;  %681 = vst [vmem:[#allocation2 + $0xb8] sm:$0xf] %v507_v41  ;;  %684 = vst [vmem:[#allocation2 + $0xbc] sm:$0x1] %v683_v44  ;;  %v1507_v15 = vor.u32 %v1506_v39, %v1502_v52 }
  0xf5   : > { %2545 = vmatprep.mubr.bf16.mxu1 %v10011_v62  ;;  %703 = vst [vmem:[#allocation2 + $0xd0] sm:$0xf] %v507_v41  ;;  %v7057_v54 = vrot.slane %v865_v48, 11  ;;  %v1071_v6 = vld [vmem:[#allocation2 + $0x9c] sm:$0xf]  ;;  %v1511_v56 = vrot.slane %v1509_v53, 1 }
  0xf6   : > { %v7105_v59 = vcombine.low %v1071_v6, %v10030_v27  ;;  %v10050_v60 = vld [vmem:[#allocation2 + $0xa4] ss:$0 sps:$4 sm:$0x11]   ;;  %841 = vst [vmem:[#allocation2 + $0xa8] sm:$0x1] %v840_v55  ;;  %v510_v19 = vshrl.u32 %v249_v18, 16 }
  0xf7   : > { %v985_v61 = vsel %vm9738_vm8, %v7057_v54, %v984_v49  ;;  %v250_v1 = vld [vmem:[%s9676_s5 + $0x7c] sm:$0xf]  ;;  %v10057_v2 = vsel %vm1356_vm9, %v1507_v15, %v1511_v56  ;;  %v1521_v47 = vshll.u32 %v10050_v60, 16  ;;  %v513_v20 = vshll.u32 %v249_v18, 16  ;;  %v685_v44 = vld [vmem:[#allocation2 + $0xc0] sm:$0xf] }
  0xf8   : > { %986 = vst [vmem:[#allocation2 + $0xb0] sm:$0x1] %v985_v61  ;;  %12712 = vst [vmem:[#allocation19_spill] sm:$0xff] %v10057_v2  ;;  %v1514_v8 = vshrl.u32 %v7105_v59, 16  ;;  %v1516_v10 = vshll.u32 %v7105_v59, 16  ;;  %2079 = vmatprep.mubr.bf16.mxu0 %v10057_v2  ;;  %v518_v31 = vshrl.u32 %v250_v1, 16 }
  0xf9   : > { %v10061_v11 = vld [vmem:[#allocation2 + $0xac] sm:$0xf]  ;;  %v722_v14 = vld [vmem:[#allocation2 + $0xb4] sm:$0x2]  ;;  %v842_v16 = vld [vmem:[#allocation2 + $0xb4] sm:$0x1] }
  0xfa   : > { %2080 = vmatmul.mubr.bf16.gmra.mrb[44].mxu0 %v9029_v57  ;;  %v1518_v52 = vrot.slane %v1516_v10, 1  ;;  %v1523_v9 = vrot.slane %v1521_v47, 1  ;;  %v7040_v63 = vrot.slane %v722_v14, 9  ;;  %v512_v41 = vrot.slane %v510_v19, 7  ;;  %v689_v53 = vld [vmem:[#allocation2 + $0xc8] sm:$0x1] }
  0xfb   : > { %v866_v28 = vld [vmem:[#allocation2 + $0xb8] sm:$0x8]  ;;  %v987_v39 = vld [vmem:[#allocation2 + $0xbc] sm:$0x1]  ;;  %v520_v49 = vrot.slane %v518_v31, 7  ;;  %v521_v15 = vshll.u32 %v250_v1, 16 }
  0xfc   : > { %2546 = vmatmul.mubr.bf16.gmra.mrb[44].mxu1 %v10013_v0  ;;  %v7058_v32 = vrot.slane %v866_v28, 11  ;;  %v1519_v21 = vor.u32 %v1518_v52, %v1514_v8  ;;  %v843_v48 = vsel %vm9705_vm7, %v7040_v63, %v842_v16  ;;  %v9034_v54 = vld [vmem:[#allocation2 + $0x9c] sm:$0xff]   ;;  %v515_v55 = vor.u32 %v513_v20, %v512_v41  ;;  %v10083_v63 = vld [vmem:[#allocation2 + $0xb8] sm:$0xf]  ;;  %v1090_v62 = vld [vmem:[#allocation2 + $0x30] sm:$0xe] }
  0xfd   : > { %2553 = vmatprep.mubr.bf16.mxu1 %v10057_v2  ;;  %v1074_v0 = vld [vmem:[#allocation2 + $0xa8] sm:$0xf]  ;;  %844 = vst [vmem:[#allocation2 + $0xb4] sm:$0x1] %v843_v48  ;;  %v516_v56 = vrot.slane %v512_v41, 4  ;;  %v523_v8 = vor.u32 %v521_v15, %v520_v49  ;;  %v525_v10 = vrot.slane %v520_v49, 4 }
  0xfe   : > { %v988_v6 = vsel %vm9738_vm8, %v7058_v32, %v987_v39  ;;  %v10070_v59 = vsel %vm1356_vm9, %v1519_v21, %v1523_v9  ;;  %v7107_v61 = vcombine.low %v1074_v0, %v10061_v11  ;;  %v686_v1 = vsel %vm9697_vm6, %v515_v55, %v685_v44  ;;  %v9037_v32 = vld [vmem:[#allocation2 + $0xa8] sm:$0xff]   ;;  %v1086_v48 = vld [vmem:[#allocation2] sm:$0xe] }
  0xff   : > { %12713 = vst [vmem:[#allocation20_spill] sm:$0xff] %v10070_v59  ;;  %v10073_v18 = vld [vmem:[#allocation2 + $0xb0] ss:$0 sps:$4 sm:$0x11]   ;;  %989 = vst [vmem:[#allocation2 + $0xbc] sm:$0x1] %v988_v6  ;;  %2087 = vmatprep.mubr.bf16.mxu0 %v10070_v59  ;;  %v524_v19 = vsel %vm9690_vm5, %v516_v56, %v523_v8  ;;  %v690_v20 = vsel %vm9705_vm7, %v525_v10, %v689_v53 }
 0x100   : > { %v1526_v47 = vshrl.u32 %v7107_v61, 16  ;;  %v1528_v14 = vshll.u32 %v7107_v61, 16  ;;  %v1533_v16 = vshll.u32 %v10073_v18, 16  ;;  %687 = vst [vmem:[#allocation2 + $0xc0] sm:$0xf] %v686_v1 }
 0x101   : > { %688 = vst [vmem:[#allocation2 + $0xc4] sm:$0xf] %v524_v19  ;;  %691 = vst [vmem:[#allocation2 + $0xc8] sm:$0x1] %v690_v20  ;;  %v1087_v21 = vld [vmem:[#allocation2 + $0xc] sm:$0xe] }
 0x102   : > { %2088 = vmatmul.mubr.bf16.gmra.mrb[48].mxu0 %v9034_v54  ;;  %v1530_v52 = vrot.slane %v1528_v14, 1  ;;  %v1535_v9 = vrot.slane %v1533_v16, 1  ;;  %v9242_v16 = vld [vmem:[#allocation2 + $0x10] sm:$0xf]  ;;  %v9243_v20 = vld [vmem:[#allocation2 + $0x4] sm:$0xf] }
 0x103   : > { %v7116_v19 = vcombine.low %v1087_v21, %v9242_v16 }
 0x104   : > { %2554 = vmatmul.mubr.bf16.gmra.mrb[48].mxu1 %v9029_v57  ;;  %v1531_v28 = vor.u32 %v1530_v52, %v1526_v47  ;;  %v1077_v31 = vld [vmem:[#allocation2 + $0xb4] sm:$0xf]  ;;  %v7115_v52 = vcombine.low %v1086_v48, %v9243_v20  ;;  %v10109_v48 = vld [vmem:[#allocation2 + $0x38] ss:$0 sps:$4 sm:$0x11]   ;;  %v1680_v20 = vrot.slane %v9988_v13, 1 }
 0x105   : > { %2561 = vmatprep.mubr.bf16.mxu1 %v10070_v59  ;;  %v7109_v39 = vcombine.low %v1077_v31, %v10083_v63  ;;  %v9245_v31 = vld [vmem:[#allocation2 + $0x8] ss:$0 sps:$4 sm:$0x11]  }
 0x106   : > { %v10087_v41 = vld [vmem:[#allocation2 + $0xbc] ss:$0 sps:$4 sm:$0x11]   ;;  %v10090_v44 = vsel %vm1356_vm9, %v1531_v28, %v1535_v9  ;;  %v9244_v9 = vld [vmem:[#allocation2 + $0x14] ss:$0 sps:$4 sm:$0x11]  }
 0x107   : > { %12714 = vst [vmem:[#allocation21_spill] sm:$0xff] %v10090_v44  ;;  %2095 = vmatprep.mubr.bf16.mxu0 %v10090_v44  ;;  %v1538_v57 = vshrl.u32 %v7109_v39, 16  ;;  %v1540_v49 = vshll.u32 %v7109_v39, 16  ;;  %v1545_v15 = vshll.u32 %v10087_v41, 16  ;;  %v723_v53 = vld [vmem:[#allocation2 + $0xc0] sm:$0x2] }
 0x108   : > { %v7041_v0 = vrot.slane %v723_v53, 9  ;;  %v845_v6 = vld [vmem:[#allocation2 + $0xc0] sm:$0x1]  ;;  %v867_v55 = vld [vmem:[#allocation2 + $0xc4] sm:$0x8]  ;;  %v1650_v28 = vrot.slane %v9244_v9, 1 }
 0x109   : > { %v1542_v56 = vrot.slane %v1540_v49, 1  ;;  %v1547_v61 = vrot.slane %v1545_v15, 1  ;;  %v7059_v8 = vrot.slane %v867_v55, 11  ;;  %v990_v10 = vld [vmem:[#allocation2 + $0xc8] sm:$0x1]  ;;  %v1647_v39 = vrot.slane %v9245_v31, 1 }
 0x10a   : > { %2096 = vmatmul.mubr.bf16.gmra.mrb[52].mxu0 %v9037_v32  ;;  %v846_v1 = vsel %vm9705_vm7, %v7041_v0, %v845_v6  ;;  %v9042_v15 = vld [vmem:[#allocation2 + $0xb4] sm:$0xff]   ;;  %v10106_v53 = vld [vmem:[#allocation2 + $0x2c] ss:$0 sps:$4 sm:$0x11]   ;;  %v1683_v9 = vrot.slane %v10036_v35, 1 }
 0x10b   : > { %v1543_v47 = vor.u32 %v1542_v56, %v1538_v57  ;;  %847 = vst [vmem:[#allocation2 + $0xc0] sm:$0x1] %v846_v1  ;;  %v991_v14 = vsel %vm9738_vm8, %v7059_v8, %v990_v10  ;;  %v10102_v57 = vld [vmem:[#allocation2 + $0x20] ss:$0 sps:$4 sm:$0x11]   ;;  %v1646_v8 = vrot.slane %v7115_v52, 1 }
 0x10c   : > { %2562 = vmatmul.mubr.bf16.gmra.mrb[52].mxu1 %v9034_v54  ;;  %992 = vst [vmem:[#allocation2 + $0xc8] sm:$0x1] %v991_v14  ;;  %v10112_v6 = vld [vmem:[#allocation2 + $0x44] ss:$0 sps:$4 sm:$0x11]   ;;  %v1677_v14 = vrot.slane %v9963_v26, 1 }
 0x10d   : > { %2569 = vmatprep.mubr.bf16.mxu1 %v10090_v44  ;;  %v10100_v54 = vsel %vm1356_vm9, %v1543_v47, %v1547_v61  ;;  %v10115_v56 = vld [vmem:[#allocation2 + $0xc4] sm:$0xf]  ;;  %v1649_v61 = vrot.slane %v7116_v19, 1  ;;  %v1095_v10 = vld [vmem:[#allocation2 + $0x6c] sm:$0xe]  ;;  %v1674_v47 = vrot.slane %v9926_v25, 1  ;;  %v1648_v49 = vsel %vm1645_vm10, %v1646_v8, %v1647_v39 }
 0x10e   : > { %12715 = vst [vmem:[#allocation22_spill] sm:$0xff] %v10100_v54  ;;  %2103 = vmatprep.mubr.bf16.mxu0 %v10100_v54  ;;  %v7124_v1 = vcombine.low %v1095_v10, %v9916_v37  ;;  %v1088_v52 = vld [vmem:[#allocation2 + $0x18] sm:$0xe]  ;;  %v1089_v0 = vld [vmem:[#allocation2 + $0x24] sm:$0xe] }
 0x10f   : > { %v1096_v37 = vld [vmem:[#allocation2 + $0x78] sm:$0xe] }
 0x110   : > { %v1673_v19 = vrot.slane %v7124_v1, 1  ;;  %v7125_v13 = vcombine.low %v1096_v37, %v9933_v40  ;;  %v1665_v40 = vrot.slane %v9878_v3, 1  ;;  %v9079_v3 = vld [vmem:[#allocation7 + $0x1f0] sm:$0xff]  }
 0x112   : > { %2104 = vmatmul.mubr.bf16.gmra.mrb[56].mxu0 %v9042_v15  ;;  %v1080_v16 = vld [vmem:[#allocation2 + $0xc0] sm:$0xf]  ;;  %v1676_v34 = vrot.slane %v7125_v13, 1 }
 0x113   : > { %v7111_v31 = vcombine.low %v1080_v16, %v10115_v56  ;;  %v10123_v55 = vld [vmem:[#allocation2 + $0xc8] ss:$0 sps:$4 sm:$0x11]   ;;  %v1097_v16 = vld [vmem:[#allocation2 + $0x84] sm:$0xe] }
 0x114   : > { %2570 = vmatmul.mubr.bf16.gmra.mrb[56].mxu1 %v9037_v32  ;;  %v1557_v26 = vshll.u32 %v10123_v55, 16  ;;  %v10128_v32 = vsel %vm1645_vm10, %v1673_v19, %v1674_v47  ;;  %v9047_v21 = vld [vmem:[#allocation2 + $0xc0] sm:$0xff]   ;;  %v7126_v1 = vcombine.low %v1097_v16, %v9972_v51  ;;  %v9251_v47 = vld [vmem:[#allocation2 + $0x28] sm:$0xf]  ;;  %v10136_v37 = vsel %vm1645_vm10, %v1676_v34, %v1677_v14  ;;  %v1091_v14 = vld [vmem:[#allocation2 + $0x3c] sm:$0xe] }
 0x115   : > { %2577 = vmatprep.mubr.bf16.mxu1 %v10100_v54  ;;  %v1550_v10 = vshrl.u32 %v7111_v31, 16  ;;  %v1552_v25 = vshll.u32 %v7111_v31, 16  ;;  %v1098_v54 = vld [vmem:[#allocation2 + $0x90] sm:$0xe]  ;;  %v9250_v31 = vld [vmem:[#allocation2 + $0x1c] sm:$0xf]  ;;  %v7118_v19 = vcombine.low %v1089_v0, %v9251_v47  ;;  %v1651_v51 = vsel %vm1645_vm10, %v1649_v61, %v1650_v28 }
 0x116   : > { %v1559_v23 = vrot.slane %v1557_v26, 1  ;;  %v7117_v59 = vcombine.low %v1088_v52, %v9250_v31  ;;  %v7127_v2 = vcombine.low %v1098_v54, %v10006_v58  ;;  %v1099_v52 = vld [vmem:[#allocation2 + $0x9c] sm:$0xe]  ;;  %v1686_v58 = vrot.slane %v10050_v60, 1  ;;  %v1100_v34 = vld [vmem:[#allocation2 + $0xa8] sm:$0xe] }
 0x117   : > { %v1554_v35 = vrot.slane %v1552_v25, 1  ;;  %v1679_v25 = vrot.slane %v7126_v1, 1  ;;  %v1655_v60 = vrot.slane %v7118_v19, 1  ;;  %v9071_v28 = vld [vmem:[#allocation7 + $0x208] sm:$0xff]   ;;  %v9252_v61 = vld [vmem:[#allocation2 + $0x34] sm:$0xf] }
 0x118   : > { %v1682_v8 = vrot.slane %v7127_v2, 1  ;;  %v1652_v0 = vrot.slane %v7117_v59, 1  ;;  %v1689_v2 = vrot.slane %v10073_v18, 1  ;;  %v9053_v26 = vld [vmem:[#allocation7 + $0x180] sm:$0xff]   ;;  %v9055_v18 = vld [vmem:[#allocation7 + $0x1c8] sm:$0xff]   ;;  %v1671_v47 = vrot.slane %v9914_v38, 1 }
 0x119   : > { %v1555_v44 = vor.u32 %v1554_v35, %v1550_v10  ;;  %v10145_v54 = vsel %vm1645_vm10, %v1679_v25, %v1680_v20  ;;  %v7119_v20 = vcombine.low %v1090_v62, %v9252_v61  ;;  %v1668_v10 = vrot.slane %v9892_v30, 1  ;;  %v1102_v16 = vld [vmem:[#allocation2 + $0xc0] sm:$0xe]  ;;  %v9257_v38 = vld [vmem:[#allocation2 + $0x18] sm:$0xff]  }
 0x11a   : > { %v1692_v62 = vrot.slane %v10087_v41, 1  ;;  %v9253_v1 = vld [vmem:[#allocation2 + $0x40] sm:$0xf]  ;;  %v7131_v19 = vcombine.low %v1102_v16, %v10115_v56  ;;  %v12717_v25 = vrot.slane %v10106_v53, 1  ;;  %v1093_v56 = vld [vmem:[#allocation2 + $0x54] sm:$0xe] }
 0x11b   : > { %v10139_v39 = vsel %vm1356_vm9, %v1555_v44, %v1559_v23  ;;  %v10149_v23 = vsel %vm1645_vm10, %v1682_v8, %v1683_v9  ;;  %v7129_v44 = vcombine.low %v1100_v34, %v10061_v11  ;;  %v12716_v9 = vrot.slane %v10102_v57, 1  ;;  %v700_v34 = vld [vmem:[#allocation2 + $0xcc] sm:$0xf]  ;;  %v9271_v46 = vld [vmem:[#allocation2 + $0xc0] sm:$0xff]  }
 0x11c   : > { %2578 = vmatmul.mubr.bf16.gmra.mrb[60].mxu1 %v9042_v15  ;;  %2111 = vmatprep.mubr.bf16.mxu0 %v10139_v39  ;;  %v7128_v15 = vcombine.low %v1099_v52, %v10030_v27  ;;  %v7120_v31 = vcombine.low %v1091_v14, %v9253_v1  ;;  %v1695_v57 = vrot.slane %v10123_v55, 1  ;;  %v10173_v8 = vsel %vm1645_vm10, %v1655_v60, %v12717_v25  ;;  %v1092_v52 = vld [vmem:[#allocation2 + $0x48] sm:$0xe]  ;;  %v9059_v55 = vld [vmem:[#allocation7 + $0x1d0] sm:$0xff]   ;;  %v704_v14 = vld [vmem:[#allocation2 + $0xd4] sm:$0x1] }
 0x11d   : > { %8336 = vmatprep.mubr.bf16.mxu1 %v1648_v49  ;;  %2112 = vmatmul.mubr.bf16.gmra.mrb[60].mxu0 %v9047_v21  ;;  %v1688_v27 = vrot.slane %v7129_v44, 1  ;;  %v1101_v21 = vld [vmem:[#allocation2 + $0xb4] sm:$0xe]  ;;  %v10160_v11 = vsel %vm1645_vm10, %v1652_v0, %v12716_v9  ;;  %v701_v0 = vsel %vm9697_vm6, %v10021_v17, %v700_v34  ;;  %v12718_v60 = vrot.slane %v10023_v22, 4  ;;  %v9077_v17 = vld [vmem:[#allocation7 + $0x218] sm:$0xff]  }
 0x11e   : > { %8288 = vmatprep.mubr.bf16.mxu0 %v1651_v51  ;;  %v1685_v49 = vrot.slane %v7128_v15, 1  ;;  %v7130_v35 = vcombine.low %v1101_v21, %v10083_v63  ;;  %v1658_v63 = vrot.slane %v7119_v20, 1  ;;  %v1694_v15 = vrot.slane %v7131_v19, 1  ;;  %702 = vst [vmem:[#allocation2 + $0xcc] sm:$0xf] %v701_v0  ;;  %v9063_v9 = vld [vmem:[#allocation7 + $0x1d8] sm:$0xff]  }
 0x11f   : > { %v10163_v13 = vsel %vm1645_vm10, %v1688_v27, %v1689_v2  ;;  %v1661_v44 = vrot.slane %v7120_v31, 1  ;;  %v1094_v20 = vld [vmem:[#allocation2 + $0x60] sm:$0xe]  ;;  %v9255_v22 = vld [vmem:[#allocation2 + $0x58] sm:$0xf]  ;;  %v9065_v19 = vld [vmem:[#allocation7 + $0x198] sm:$0xff]  }
 0x120   : > { %v10155_v59 = vsel %vm1645_vm10, %v1685_v49, %v1686_v58  ;;  %v1691_v41 = vrot.slane %v7130_v35, 1  ;;  %v9076_v58 = vld [vmem:[#allocation7 + $0x210] sm:$0xff]   ;;  %v10186_v2 = vsel %vm1645_vm10, %v1694_v15, %v1695_v57  ;;  %v705_v49 = vsel %vm9705_vm7, %v12718_v60, %v704_v14  ;;  %v9067_v57 = vld [vmem:[#allocation7 + $0x1e0] sm:$0xff]   ;;  %v9073_v0 = vld [vmem:[#allocation7 + $0x1e8] sm:$0xff]  }
 0x121   : > { %706 = vst [vmem:[#allocation2 + $0xd4] sm:$0x1] %v705_v49  ;;  %v9061_v27 = vld [vmem:[#allocation7 + $0x190] sm:$0xff]   ;;  %v12719_v35 = vrot.slane %v10109_v48, 1  ;;  %v7122_v16 = vcombine.low %v1093_v56, %v9255_v22  ;;  %v9082_v25 = vld [vmem:[#allocation7 + $0x220] sm:$0xff]   ;;  %v9075_v60 = vld [vmem:[#allocation7 + $0x1a8] sm:$0xff]  }
 0x122   : > { %v10179_v53 = vsel %vm1645_vm10, %v1691_v41, %v1692_v62  ;;  %v9256_v1 = vld [vmem:[#allocation2 + $0x64] sm:$0xf] }
 0x123   : > { %v10195_v62 = vsel %vm1645_vm10, %v1658_v63, %v12719_v35  ;;  %v7123_v31 = vcombine.low %v1094_v20, %v9256_v1  ;;  %v9081_v49 = vld [vmem:[#allocation7 + $0x1b0] sm:$0xff]  }
 0x124   : > { %8337 = vmatmul.mubr.bf16.vlgmr.msra.gmra.mrb[64].mxu1 %v1651_v51  ;;  %v9057_v51 = vld [vmem:[#allocation7 + $0x188] sm:$0xff]  }
 0x125   : > { %8340 = vmatprep.mubr.bf16.mxu1 %v10160_v11  ;;  %8369 = vmatpush3.bf16.msra.mxu1 %v10027_v24  ;;  %v868_v24 = vld [vmem:[#allocation2 + $0xd0] sm:$0x8]  ;;  %v724_v63 = vld [vmem:[#allocation2 + $0xcc] sm:$0x2]  ;;  %v848_v41 = vld [vmem:[#allocation2 + $0xcc] sm:$0x1] }
 0x126   : > { %8370 = vmatprep.subr.bf16.mxu1 %v9071_v28  ;;  %8289 = vmatmul.mubr.bf16.vlgmr.msra.gmra.mrb[64].mxu0 %v10160_v11  ;;  %v7060_v61 = vrot.slane %v868_v24, 11  ;;  %v1670_v34 = vrot.slane %v7123_v31, 1  ;;  %v9260_v1 = vld [vmem:[#allocation2 + $0x3c] sm:$0xff]  }
 0x127   : > { %7729 = vmatpush3.bf16.msra.mxu0 %v9053_v26  ;;  %8292 = vmatprep.mubr.bf16.mxu0 %v10173_v8  ;;  %v9254_v26 = vld [vmem:[#allocation2 + $0x4c] sm:$0xf] }
 0x128   : > { %7730 = vmatprep.subr.bf16.mxu0 %v9055_v18  ;;  %v7121_v21 = vcombine.low %v1092_v52, %v9254_v26  ;;  %v12720_v18 = vrot.slane %v10112_v6, 1  ;;  %v1667_v6 = vrot.slane %v7122_v16, 1  ;;  %v993_v52 = vld [vmem:[#allocation2 + $0xd4] sm:$0x1]  ;;  %v1672_v30 = vsel %vm1645_vm10, %v1670_v34, %v1671_v47  ;;  %v9258_v47 = vld [vmem:[#allocation2 + $0x24] sm:$0xff]  }
 0x129   : > { %8371 = vmatpush3.bf16.msra.mxu1 %v9071_v28  ;;  %v994_v15 = vsel %vm9738_vm8, %v7060_v61, %v993_v52  ;;  %v9089_v61 = vld [vmem:[#allocation7 + $0x238] sm:$0xff]  }
 0x12a   : > { %8372 = vmatprep.subr.bf16.mxu1 %v9076_v58  ;;  %v10201_v28 = vsel %vm1645_vm10, %v1661_v44, %v12720_v18  ;;  %v1664_v48 = vrot.slane %v7121_v21, 1  ;;  %995 = vst [vmem:[#allocation2 + $0xd4] sm:$0x1] %v994_v15  ;;  %v1669_v24 = vsel %vm1645_vm10, %v1667_v6, %v1668_v10  ;;  %v9088_v44 = vld [vmem:[#allocation7 + $0x230] sm:$0xff]   ;;  %v9087_v10 = vld [vmem:[#allocation7 + $0x1b8] sm:$0xff]  }
 0x12b   : > { %7731 = vmatpush3.bf16.msra.mxu0 %v9057_v51  ;;  %v7042_v51 = vrot.slane %v724_v63, 9  ;;  %v9261_v52 = vld [vmem:[#allocation2 + $0x48] sm:$0xff]  }
 0x12c   : > { %8341 = vmatmul.mubr.bf16.gmra.mrb[68].mxu1 %v10173_v8  ;;  %7732 = vmatprep.subr.bf16.mxu0 %v9059_v55  ;;  %v9083_v55 = vld [vmem:[#allocation7 + $0x228] sm:$0xff]   ;;  %v1666_v14 = vsel %vm1645_vm10, %v1664_v48, %v1665_v40  ;;  %v9085_v40 = vld [vmem:[#allocation7 + $0x1f8] sm:$0xff]  }
 0x12d   : > { %8344 = vmatprep.mubr.bf16.mxu1 %v10195_v62  ;;  %8373 = vmatpush3.bf16.msra.mxu1 %v9076_v58  ;;  %v9069_v58 = vld [vmem:[#allocation7 + $0x1a0] sm:$0xff]   ;;  %v849_v56 = vsel %vm9705_vm7, %v7042_v51, %v848_v41 }
 0x12e   : > { %8293 = vmatmul.mubr.bf16.gmra.mrb[68].mxu0 %v10195_v62  ;;  %8374 = vmatprep.subr.bf16.mxu1 %v9077_v17  ;;  %850 = vst [vmem:[#allocation2 + $0xcc] sm:$0x1] %v849_v56 }
 0x12f   : > { %8296 = vmatprep.mubr.bf16.mxu0 %v10201_v28  ;;  %7733 = vmatpush3.bf16.msra.mxu0 %v9061_v27 }
 0x130   : > { %7734 = vmatprep.subr.bf16.mxu0 %v9063_v9 }
 0x131   : > { %8375 = vmatpush3.bf16.msra.mxu1 %v9077_v17 }
 0x132   : > { %8376 = vmatprep.subr.bf16.mxu1 %v9082_v25 }
 0x133   : > { %7735 = vmatpush3.bf16.msra.mxu0 %v9065_v19 }
 0x134   : > { %8345 = vmatmul.mubr.bf16.gmra.mrb[72].mxu1 %v10201_v28  ;;  %7736 = vmatprep.subr.bf16.mxu0 %v9067_v57 }
 0x135   : > { %8348 = vmatprep.mubr.bf16.mxu1 %v1666_v14  ;;  %8377 = vmatpush3.bf16.msra.mxu1 %v9082_v25 }
 0x136   : > { %8297 = vmatmul.mubr.bf16.gmra.mrb[72].mxu0 %v1666_v14  ;;  %8378 = vmatprep.subr.bf16.mxu1 %v9083_v55 }
 0x137   : > { %8300 = vmatprep.mubr.bf16.mxu0 %v1669_v24  ;;  %7737 = vmatpush3.bf16.msra.mxu0 %v9069_v58 }
 0x138   : > { %7738 = vmatprep.subr.bf16.mxu0 %v9073_v0 }
 0x139   : > { %8379 = vmatpush3.bf16.msra.mxu1 %v9083_v55 }
 0x13a   : > { %8380 = vmatprep.subr.bf16.mxu1 %v9088_v44 }
 0x13b   : > { %7739 = vmatpush3.bf16.msra.mxu0 %v9075_v60  ;;  %v1103_v60 = vld [vmem:[#allocation2 + $0xcc] sm:$0xe] }
 0x13c   : > { %8349 = vmatmul.mubr.bf16.gmra.mrb[76].mxu1 %v1669_v24  ;;  %7740 = vmatprep.subr.bf16.mxu0 %v9079_v3  ;;  %v9262_v3 = vld [vmem:[#allocation2 + $0x54] sm:$0xff]  }
 0x13d   : > { %8352 = vmatprep.mubr.bf16.mxu1 %v1672_v30  ;;  %8381 = vmatpush3.bf16.msra.mxu1 %v9088_v44  ;;  %v10275_v44 = vld [vmem:[#allocation2 + $0xd0] sm:$0xf] }
 0x13e   : > { %8301 = vmatmul.mubr.bf16.gmra.mrb[76].mxu0 %v1672_v30  ;;  %8382 = vmatprep.subr.bf16.mxu1 %v9089_v61 }
 0x13f   : > { %8304 = vmatprep.mubr.bf16.mxu0 %v10128_v32  ;;  %7741 = vmatpush3.bf16.msra.mxu0 %v9081_v49 }
 0x140   : > { %7742 = vmatprep.subr.bf16.mxu0 %v9085_v40 }
 0x141   : > { %8383 = vmatpush3.bf16.msra.mxu1 %v9089_v61 }
 0x143   : > { %7743 = vmatpush3.bf16.msra.mxu0 %v9087_v10  ;;  %v7132_v10 = vcombine.low %v1103_v60, %v10275_v44 }
 0x144   : > { %8353 = vmatmul.mubr.bf16.gmra.mrb[80].mxu1 %v10128_v32 }
 0x145   : > { %8356 = vmatprep.mubr.bf16.mxu1 %v10136_v37 }
 0x146   : > { %8305 = vmatmul.mubr.bf16.gmra.mrb[80].mxu0 %v10136_v37 }
 0x147   : > { %8308 = vmatprep.mubr.bf16.mxu0 %v10145_v54 }
 0x14c   : > { %8357 = vmatmul.mubr.bf16.gmra.mrb[84].mxu1 %v10145_v54 }
 0x14d   : > { %8360 = vmatprep.mubr.bf16.mxu1 %v10149_v23 }
 0x14e   : > { %8309 = vmatmul.mubr.bf16.gmra.mrb[84].mxu0 %v10149_v23 }
 0x14f   : > { %8312 = vmatprep.mubr.bf16.mxu0 %v10155_v59 }
 0x154   : > { %8361 = vmatmul.mubr.bf16.gmra.mrb[88].mxu1 %v10155_v59 }
 0x155   : > { %8364 = vmatprep.mubr.bf16.mxu1 %v10163_v13 }
 0x156   : > { %8313 = vmatmul.mubr.bf16.gmra.mrb[88].mxu0 %v10163_v13 }
 0x157   : > { %8316 = vmatprep.mubr.bf16.mxu0 %v10179_v53 }
 0x15c   : > { %8365 = vmatmul.mubr.bf16.gmra.mrb[92].mxu1 %v10179_v53 }
 0x15d   : > { %8384 = vmatprep.mubr.bf16.mxu1 %v10160_v11 }
 0x15e   : > { %8317 = vmatmul.mubr.bf16.gmra.mrb[92].mxu0 %v10186_v2 }
 0x15f   : > { %2972 = vmatprep.mubr.bf16.mxu0 %v9787_v33 }
 0x164   : > { %8385 = vmatmul.mubr.bf16.vlgmr.msra.gmra.mrb[64].mxu1 %v10173_v8  ;;  %v9259_v8 = vld [vmem:[#allocation2 + $0x30] sm:$0xff]  }
 0x165   : > { %8388 = vmatprep.mubr.bf16.mxu1 %v10195_v62 }
 0x166   : > { %2973 = vmatmul.mubr.bf16.vlgmr.msra.gmra.mrb[96].mxu0 %v9257_v38 }
 0x167   : > { %2980 = vmatprep.mubr.bf16.mxu0 %v9796_v50 }
 0x16c   : > { %8389 = vmatmul.mubr.bf16.gmra.mrb[68].mxu1 %v10201_v28 }
 0x16d   : > { %8392 = vmatprep.mubr.bf16.mxu1 %v1666_v14 }
 0x16e   : > { %2981 = vmatmul.mubr.bf16.gmra.mrb[100].mxu0 %v9258_v47 }
 0x16f   : > { %2988 = vmatprep.mubr.bf16.mxu0 %v9818_v29 }
 0x174   : > { %8393 = vmatmul.mubr.bf16.gmra.mrb[72].mxu1 %v1669_v24  ;;  %v7472_v11 = vpop.f32.mrb[0].mxu0 }
 0x175   : > { %v7473_v20 = vpop.f32.mrb[1].mxu0  ;;  %8396 = vmatprep.mubr.bf16.mxu1 %v1672_v30 }
 0x176   : > { %v7475_v33 = vpop.f32.mrb[2].mxu0  ;;  %v10242_v17 = vadd.f32 %v7473_v20, %v7472_v11  ;;  %2989 = vmatmul.mubr.bf16.gmra.mrb[104].mxu0 %v9259_v8 }
 0x177   : > { %v7476_v27 = vpop.f32.mrb[3].mxu0  ;;  %v7608_v26 = vpop.f32.mrb[0].mxu1  ;;  %2996 = vmatprep.mubr.bf16.mxu0 %v9843_v12 }
 0x178   : > { %v7609_v50 = vpop.f32.mrb[1].mxu1  ;;  %v10245_v21 = vadd.f32 %v7476_v27, %v7475_v33 }
 0x179   : > { %v10247_v9 = vadd.f32 %v7609_v50, %v7608_v26  ;;  %v7611_v35 = vpop.f32.mrb[2].mxu1  ;;  %v9263_v50 = vld [vmem:[#allocation2 + $0x60] sm:$0xff]  }
 0x17a   : > { %v7612_v29 = vpop.f32.mrb[3].mxu1 }
 0x17b   : > { %v10249_v62 = vadd.f32 %v7612_v29, %v7611_v35 }
 0x17c   : > { %8397 = vmatmul.mubr.bf16.gmra.mrb[76].mxu1 %v10128_v32  ;;  %v7478_v22 = vpop.f32.mrb[4].mxu0 }
 0x17d   : > { %v7479_v16 = vpop.f32.mrb[5].mxu0  ;;  %8400 = vmatprep.mubr.bf16.mxu1 %v10136_v37 }
 0x17e   : > { %v7481_v18 = vpop.f32.mrb[6].mxu0  ;;  %v10253_v28 = vadd.f32 %v7479_v16, %v7478_v22  ;;  %2997 = vmatmul.mubr.bf16.gmra.mrb[108].mxu0 %v9260_v1 }
 0x17f   : > { %v7482_v12 = vpop.f32.mrb[7].mxu0  ;;  %v7614_v31 = vpop.f32.mrb[4].mxu1  ;;  %3004 = vmatprep.mubr.bf16.mxu0 %v9895_v42 }
 0x180   : > { %v7615_v19 = vpop.f32.mrb[5].mxu1  ;;  %v10256_v48 = vadd.f32 %v7482_v12, %v7481_v18 }
 0x181   : > { %v10258_v57 = vadd.f32 %v7615_v19, %v7614_v31  ;;  %v7617_v25 = vpop.f32.mrb[6].mxu1  ;;  %v9264_v19 = vld [vmem:[#allocation2 + $0x6c] sm:$0xff]  }
 0x182   : > { %v7618_v32 = vpop.f32.mrb[7].mxu1 }
 0x183   : > { %v10260_v63 = vadd.f32 %v7618_v32, %v7617_v25 }
 0x184   : > { %8401 = vmatmul.mubr.bf16.gmra.mrb[80].mxu1 %v10145_v54  ;;  %v7484_v37 = vpop.f32.mrb[8].mxu0 }
 0x185   : > { %v7485_v41 = vpop.f32.mrb[9].mxu0  ;;  %8404 = vmatprep.mubr.bf16.mxu1 %v10149_v23 }
 0x186   : > { %v7487_v6 = vpop.f32.mrb[10].mxu0  ;;  %v10264_v51 = vadd.f32 %v7485_v41, %v7484_v37  ;;  %3005 = vmatmul.mubr.bf16.gmra.mrb[112].mxu0 %v9261_v52 }
 0x187   : > { %v7488_v42 = vpop.f32.mrb[11].mxu0  ;;  %v7620_v15 = vpop.f32.mrb[8].mxu1  ;;  %3012 = vmatprep.mubr.bf16.mxu0 %v9912_v4 }
 0x188   : > { %v7621_v34 = vpop.f32.mrb[9].mxu1  ;;  %v10267_v58 = vadd.f32 %v7488_v42, %v7487_v6 }
 0x189   : > { %v10269_v55 = vadd.f32 %v7621_v34, %v7620_v15  ;;  %v7623_v56 = vpop.f32.mrb[10].mxu1 }
 0x18a   : > { %v7624_v54 = vpop.f32.mrb[11].mxu1 }
 0x18b   : > { %v10271_v0 = vadd.f32 %v7624_v54, %v7623_v56 }
 0x18c   : > { %8405 = vmatmul.mubr.bf16.gmra.mrb[84].mxu1 %v10155_v59  ;;  %v7490_v23 = vpop.f32.mrb[12].mxu0  ;;  %v10282_v59 = vld [vmem:[#allocation2 + $0xd4] ss:$0 sps:$4 sm:$0x11]  }
 0x18d   : > { %v7491_v14 = vpop.f32.mrb[13].mxu0  ;;  %8408 = vmatprep.mubr.bf16.mxu1 %v10163_v13  ;;  %v1698_v8 = vrot.slane %v10282_v59, 1 }
 0x18e   : > { %v7493_v24 = vpop.f32.mrb[14].mxu0  ;;  %v10277_v4 = vadd.f32 %v7491_v14, %v7490_v23  ;;  %3013 = vmatmul.mubr.bf16.gmra.mrb[116].mxu0 %v9262_v3  ;;  %v9265_v23 = vld [vmem:[#allocation2 + $0x78] sm:$0xff]   ;;  %v12721_v3 = vld [vmem:[#allocation18_spill] sm:$0xff] }
 0x18f   : > { %v7494_v49 = vpop.f32.mrb[15].mxu0  ;;  %v7626_v40 = vpop.f32.mrb[12].mxu1  ;;  %3020 = vmatprep.mubr.bf16.mxu0 %v9938_v45  ;;  %v1697_v45 = vrot.slane %v7132_v10, 1 }
 0x190   : > { %v7627_v61 = vpop.f32.mrb[13].mxu1  ;;  %v10280_v30 = vadd.f32 %v7494_v49, %v7493_v24 }
 0x191   : > { %v10285_v13 = vadd.f32 %v7627_v61, %v7626_v40  ;;  %v7629_v38 = vpop.f32.mrb[14].mxu1 }
 0x192   : > { %v7630_v47 = vpop.f32.mrb[15].mxu1 }
 0x193   : > { %v10287_v11 = vadd.f32 %v7630_v47, %v7629_v38 }
 0x194   : > { %8409 = vmatmul.mubr.bf16.gmra.mrb[88].mxu1 %v10179_v53  ;;  %v7496_v20 = vpop.f32.mrb[16].mxu0  ;;  %v1699_v53 = vsel %vm1645_vm10, %v1697_v45, %v1698_v8  ;;  %v9266_v45 = vld [vmem:[#allocation2 + $0x84] sm:$0xff]  }
 0x195   : > { %v7497_v33 = vpop.f32.mrb[17].mxu0  ;;  %8412 = vmatprep.mubr.bf16.mxu1 %v10186_v2 }
 0x196   : > { %v7499_v27 = vpop.f32.mrb[18].mxu0  ;;  %v10292_v26 = vadd.f32 %v7497_v33, %v7496_v20  ;;  %3021 = vmatmul.mubr.bf16.gmra.mrb[120].mxu0 %v9263_v50 }
 0x197   : > { %v7500_v35 = vpop.f32.mrb[19].mxu0  ;;  %v7632_v29 = vpop.f32.mrb[16].mxu1  ;;  %3028 = vmatprep.mubr.bf16.mxu0 %v9951_v7 }
 0x198   : > { %v7633_v22 = vpop.f32.mrb[17].mxu1  ;;  %v10295_v16 = vadd.f32 %v7500_v35, %v7499_v27  ;;  %v12722_v35 = vld [vmem:[#allocation19_spill] sm:$0xff] }
 0x199   : > { %v10298_v18 = vadd.f32 %v7633_v22, %v7632_v29  ;;  %v7635_v2 = vpop.f32.mrb[18].mxu1 }
 0x19a   : > { %v7636_v1 = vpop.f32.mrb[19].mxu1 }
 0x19b   : > { %v10300_v12 = vadd.f32 %v7636_v1, %v7635_v2 }
 0x19c   : > { %8413 = vmatmul.mubr.bf16.gmra.mrb[92].mxu1 %v1699_v53 }
 0x19d   : > { %v7502_v31 = vpop.f32.mrb[20].mxu0 }
 0x19e   : > { %3029 = vmatmul.mubr.bf16.gmra.mrb[124].mxu0 %v9264_v19  ;;  %v7503_v25 = vpop.f32.mrb[21].mxu0 }
 0x19f   : > { %v7638_v32 = vpop.f32.mrb[20].mxu1  ;;  %v7505_v37 = vpop.f32.mrb[22].mxu0  ;;  %3036 = vmatprep.mubr.bf16.mxu0 %v9983_v5  ;;  %v10303_v41 = vadd.f32 %v7503_v25, %v7502_v31 }
 0x1a0   : > { %v7639_v7 = vpop.f32.mrb[21].mxu1  ;;  %v7506_v6 = vpop.f32.mrb[23].mxu0 }
 0x1a1   : > { %v10305_v52 = vadd.f32 %v7639_v7, %v7638_v32  ;;  %v7641_v42 = vpop.f32.mrb[22].mxu1  ;;  %v10307_v34 = vadd.f32 %v7506_v6, %v7505_v37  ;;  %v9267_v37 = vld [vmem:[#allocation2 + $0x90] sm:$0xff]  }
 0x1a2   : > { %v7642_v15 = vpop.f32.mrb[23].mxu1 }
 0x1a3   : > { %v10309_v56 = vadd.f32 %v7642_v15, %v7641_v42 }
 0x1a5   : > { %v7508_v54 = vpop.f32.mrb[24].mxu0 }
 0x1a6   : > { %3037 = vmatmul.mubr.bf16.gmra.mrb[128].mxu0 %v9265_v23  ;;  %v7509_v14 = vpop.f32.mrb[25].mxu0 }
 0x1a7   : > { %v7644_v24 = vpop.f32.mrb[24].mxu1  ;;  %v7511_v60 = vpop.f32.mrb[26].mxu0  ;;  %3044 = vmatprep.mubr.bf16.mxu0 %v12721_v3  ;;  %v10312_v49 = vadd.f32 %v7509_v14, %v7508_v54  ;;  %v12723_v54 = vld [vmem:[#allocation20_spill] sm:$0xff] }
 0x1a8   : > { %v7645_v5 = vpop.f32.mrb[25].mxu1  ;;  %v7512_v40 = vpop.f32.mrb[27].mxu0 }
 0x1a9   : > { %v10314_v61 = vadd.f32 %v7645_v5, %v7644_v24  ;;  %v7647_v10 = vpop.f32.mrb[26].mxu1  ;;  %v10316_v47 = vadd.f32 %v7512_v40, %v7511_v60 }
 0x1aa   : > { %v7648_v38 = vpop.f32.mrb[27].mxu1 }
 0x1ab   : > { %v10318_v20 = vadd.f32 %v7648_v38, %v7647_v10  ;;  %v9268_v38 = vld [vmem:[#allocation2 + $0x9c] sm:$0xff]  }
 0x1ad   : > { %v7514_v33 = vpop.f32.mrb[28].mxu0 }
 0x1ae   : > { %3045 = vmatmul.mubr.bf16.gmra.mrb[132].mxu0 %v9266_v45  ;;  %v7515_v8 = vpop.f32.mrb[29].mxu0 }
 0x1af   : > { %v7650_v27 = vpop.f32.mrb[28].mxu1  ;;  %v7517_v50 = vpop.f32.mrb[30].mxu0  ;;  %3052 = vmatprep.mubr.bf16.mxu0 %v12722_v35  ;;  %v10321_v22 = vadd.f32 %v7515_v8, %v7514_v33 }
 0x1b0   : > { %v7651_v29 = vpop.f32.mrb[29].mxu1  ;;  %v7518_v53 = vpop.f32.mrb[31].mxu0 }
 0x1b1   : > { %v10323_v2 = vadd.f32 %v7651_v29, %v7650_v27  ;;  %v7653_v1 = vpop.f32.mrb[30].mxu1  ;;  %v10325_v19 = vadd.f32 %v7518_v53, %v7517_v50  ;;  %v12724_v50 = vld [vmem:[#allocation21_spill] sm:$0xff] }
 0x1b2   : > { %v7654_v31 = vpop.f32.mrb[31].mxu1 }
 0x1b3   : > { %v10327_v25 = vadd.f32 %v7654_v31, %v7653_v1  ;;  %v1083_v31 = vld [vmem:[#allocation2 + $0xcc] sm:$0xf] }
 0x1b5   : > { %v7520_v32 = vpop.f32.mrb[32].mxu0 }
 0x1b6   : > { %3053 = vmatmul.mubr.bf16.gmra.mrb[136].mxu0 %v9267_v37  ;;  %v7521_v7 = vpop.f32.mrb[33].mxu0 }
 0x1b7   : > { %v7656_v6 = vpop.f32.mrb[32].mxu1  ;;  %v10329_v42 = vadd.f32 %v7521_v7, %v7520_v32  ;;  %v7523_v15 = vpop.f32.mrb[34].mxu0  ;;  %3060 = vmatprep.mubr.bf16.mxu0 %v12723_v54  ;;  %v9269_v54 = vld [vmem:[#allocation2 + $0xa8] sm:$0xff]  }
 0x1b8   : > { %v7657_v23 = vpop.f32.mrb[33].mxu1  ;;  %v7524_v14 = vpop.f32.mrb[35].mxu0 }
 0x1b9   : > { %v10332_v24 = vadd.f32 %v7657_v23, %v7656_v6  ;;  %v7659_v60 = vpop.f32.mrb[34].mxu1  ;;  %v10334_v3 = vadd.f32 %v7524_v14, %v7523_v15  ;;  %v7113_v6 = vcombine.low %v1083_v31, %v10275_v44 }
 0x1ba   : > { %v7660_v5 = vpop.f32.mrb[35].mxu1 }
 0x1bb   : > { %v10336_v40 = vadd.f32 %v7660_v5, %v7659_v60 }
 0x1bd   : > { %v7526_v10 = vpop.f32.mrb[36].mxu0 }
 0x1be   : > { %3061 = vmatmul.mubr.bf16.gmra.mrb[140].mxu0 %v9268_v38  ;;  %v7527_v33 = vpop.f32.mrb[37].mxu0 }
 0x1bf   : > { %v7662_v45 = vpop.f32.mrb[36].mxu1  ;;  %v10338_v8 = vadd.f32 %v7527_v33, %v7526_v10  ;;  %v7529_v27 = vpop.f32.mrb[38].mxu0  ;;  %3068 = vmatprep.mubr.bf16.mxu0 %v12724_v50  ;;  %v12725_v10 = vld [vmem:[#allocation22_spill] sm:$0xff] }
 0x1c0   : > { %v7663_v35 = vpop.f32.mrb[37].mxu1  ;;  %v7530_v29 = vpop.f32.mrb[39].mxu0 }
 0x1c1   : > { %v10341_v53 = vadd.f32 %v7663_v35, %v7662_v45  ;;  %v7665_v1 = vpop.f32.mrb[38].mxu1  ;;  %v10343_v32 = vadd.f32 %v7530_v29, %v7529_v27  ;;  %v1564_v45 = vshll.u32 %v7113_v6, 16 }
 0x1c2   : > { %v7666_v37 = vpop.f32.mrb[39].mxu1 }
 0x1c3   : > { %v10345_v7 = vadd.f32 %v7666_v37, %v7665_v1  ;;  %v1562_v1 = vshrl.u32 %v7113_v6, 16  ;;  %v1566_v31 = vrot.slane %v1564_v45, 1  ;;  %v1569_v37 = vshll.u32 %v10282_v59, 16 }
 0x1c5   : > { %v7532_v15 = vpop.f32.mrb[40].mxu0 }
 0x1c6   : > { %3069 = vmatmul.mubr.bf16.gmra.mrb[144].mxu0 %v9269_v54  ;;  %v7533_v23 = vpop.f32.mrb[41].mxu0 }
 0x1c7   : > { %v7668_v14 = vpop.f32.mrb[40].mxu1  ;;  %v10348_v60 = vadd.f32 %v7533_v23, %v7532_v15  ;;  %v7535_v5 = vpop.f32.mrb[42].mxu0  ;;  %3076 = vmatprep.mubr.bf16.mxu0 %v12725_v10  ;;  %v9270_v15 = vld [vmem:[#allocation2 + $0xb4] sm:$0xff]  }
 0x1c8   : > { %v7669_v38 = vpop.f32.mrb[41].mxu1  ;;  %v7536_v33 = vpop.f32.mrb[43].mxu0 }
 0x1c9   : > { %v10351_v27 = vadd.f32 %v7669_v38, %v7668_v14  ;;  %v7671_v50 = vpop.f32.mrb[42].mxu1  ;;  %v10353_v35 = vadd.f32 %v7536_v33, %v7535_v5  ;;  %v1567_v5 = vor.u32 %v1566_v31, %v1562_v1  ;;  %v1571_v33 = vrot.slane %v1569_v37, 1 }
 0x1ca   : > { %v7672_v29 = vpop.f32.mrb[43].mxu1 }
 0x1cb   : > { %12726 = vst [vmem:[#allocation18_spill] sm:$0xff] %v10353_v35  ;;  %v10355_v44 = vadd.f32 %v7672_v29, %v7671_v50 }
 0x1cd   : > { %12727 = vst [vmem:[#allocation19_spill] sm:$0xff] %v10355_v44  ;;  %v7538_v54 = vpop.f32.mrb[44].mxu0 }
 0x1ce   : > { %3077 = vmatmul.mubr.bf16.gmra.mrb[148].mxu0 %v9270_v15  ;;  %v7539_v10 = vpop.f32.mrb[45].mxu0  ;;  %v1572_v15 = vsel %vm1356_vm9, %v1567_v5, %v1571_v33 }
 0x1cf   : > { %v7674_v23 = vpop.f32.mrb[44].mxu1  ;;  %3084 = vmatprep.mubr.bf16.mxu0 %v10139_v39  ;;  %v10359_v14 = vadd.f32 %v7539_v10, %v7538_v54  ;;  %v7541_v38 = vpop.f32.mrb[46].mxu0 }
 0x1d0   : > { %v7675_v43 = vpop.f32.mrb[45].mxu1  ;;  %v7542_v6 = vpop.f32.mrb[47].mxu0 }
 0x1d1   : > { %v10361_v36 = vadd.f32 %v7675_v43, %v7674_v23  ;;  %v7677_v50 = vpop.f32.mrb[46].mxu1  ;;  %v10363_v29 = vadd.f32 %v7542_v6, %v7541_v38 }
 0x1d2   : > { %v7678_v45 = vpop.f32.mrb[47].mxu1 }
 0x1d3   : > { %v10365_v59 = vadd.f32 %v7678_v45, %v7677_v50  ;;  %v9093_v50 = vld [vmem:[#allocation2 + $0xcc] sm:$0xff]  }
 0x1d5   : > { %12728 = vst [vmem:[#allocation20_spill] sm:$0xff] %v10365_v59  ;;  %v7544_v39 = vpop.f32.mrb[48].mxu0 }
 0x1d6   : > { %3085 = vmatmul.mubr.bf16.gmra.mrb[152].mxu0 %v9271_v46  ;;  %v7545_v54 = vpop.f32.mrb[49].mxu0 }
 0x1d7   : > { %v7680_v44 = vpop.f32.mrb[48].mxu1  ;;  %3092 = vmatprep.mubr.bf16.mxu0 %v1572_v15  ;;  %v10368_v1 = vadd.f32 %v7545_v54, %v7544_v39  ;;  %v7547_v43 = vpop.f32.mrb[50].mxu0 }
 0x1d8   : > { %v7681_v10 = vpop.f32.mrb[49].mxu1  ;;  %v7548_v23 = vpop.f32.mrb[51].mxu0 }
 0x1d9   : > { %12729 = vst [vmem:[#allocation21_spill] sm:$0xff] %v10368_v1  ;;  %v10370_v31 = vadd.f32 %v7681_v10, %v7680_v44  ;;  %v7683_v37 = vpop.f32.mrb[50].mxu1  ;;  %v10372_v6 = vadd.f32 %v7548_v23, %v7547_v43 }
 0x1da   : > { %v7684_v38 = vpop.f32.mrb[51].mxu1 }
 0x1db   : > { %12730 = vst [vmem:[#allocation22_spill] sm:$0xff] %v10370_v31  ;;  %12731 = vst [vmem:[#allocation23_spill] sm:$0xff] %v10372_v6  ;;  %v10374_v45 = vadd.f32 %v7684_v38, %v7683_v37 }
 0x1dd   : > { %12732 = vst [vmem:[#allocation24_spill] sm:$0xff] %v10374_v45  ;;  %v7550_v46 = vpop.f32.mrb[52].mxu0 }
 0x1de   : > { %3093 = vmatmul.mubr.bf16.gmra.mrb[156].mxu0 %v9093_v50  ;;  %v7551_v33 = vpop.f32.mrb[53].mxu0 }
 0x1df   : > { %v7686_v5 = vpop.f32.mrb[52].mxu1  ;;  %v10376_v15 = vadd.f32 %v7551_v33, %v7550_v46  ;;  %v7553_v39 = vpop.f32.mrb[54].mxu0 }
 0x1e0   : > { %v7687_v59 = vpop.f32.mrb[53].mxu1  ;;  %v7554_v10 = vpop.f32.mrb[55].mxu0 }
 0x1e1   : > { %12733 = vst [vmem:[#allocation25_spill] sm:$0xff] %v10376_v15  ;;  %v10378_v54 = vadd.f32 %v7687_v59, %v7686_v5  ;;  %v7689_v44 = vpop.f32.mrb[54].mxu1  ;;  %v10380_v1 = vadd.f32 %v7554_v10, %v7553_v39 }
 0x1e2   : > { %v7690_v31 = vpop.f32.mrb[55].mxu1 }
 0x1e3   : > { %12734 = vst [vmem:[#allocation26_spill] sm:$0xff] %v10378_v54  ;;  %12735 = vst [vmem:[#allocation27_spill] sm:$0xff] %v10380_v1  ;;  %v10382_v43 = vadd.f32 %v7690_v31, %v7689_v44 }
 0x1e5   : > { %12736 = vst [vmem:[#allocation28_spill] sm:$0xff] %v10382_v43  ;;  %v7556_v23 = vpop.f32.mrb[56].mxu0 }
 0x1e6   : > { %v7557_v38 = vpop.f32.mrb[57].mxu0 }
 0x1e7   : > { %v7692_v37 = vpop.f32.mrb[56].mxu1  ;;  %v10384_v45 = vadd.f32 %v7557_v38, %v7556_v23  ;;  %v7559_v6 = vpop.f32.mrb[58].mxu0 }
 0x1e8   : > { %v7693_v50 = vpop.f32.mrb[57].mxu1  ;;  %v7560_v33 = vpop.f32.mrb[59].mxu0 }
 0x1e9   : > { %v10386_v35 = vadd.f32 %v7693_v50, %v7692_v37  ;;  %v7695_v46 = vpop.f32.mrb[58].mxu1  ;;  %v10388_v5 = vadd.f32 %v7560_v33, %v7559_v6 }
 0x1ea   : > { %v7696_v59 = vpop.f32.mrb[59].mxu1 }
 0x1eb   : > { %12737 = vst [vmem:[#allocation29_spill] sm:$0xff] %v10386_v35  ;;  %v10390_v54 = vadd.f32 %v7696_v59, %v7695_v46 }
 0x1ed   : > { %12738 = vst [vmem:[#allocation30_spill] sm:$0xff] %v10390_v54 }
 0x1ef   : > { %v7698_v39 = vpop.f32.mrb[60].mxu1 }
 0x1f0   : > { %v7699_v10 = vpop.f32.mrb[61].mxu1  ;;  %v7562_v43 = vpop.f32.mrb[60].mxu0 }
 0x1f1   : > { %v10392_v31 = vadd.f32 %v7699_v10, %v7698_v39  ;;  %v7701_v44 = vpop.f32.mrb[62].mxu1  ;;  %v7563_v15 = vpop.f32.mrb[61].mxu0 }
 0x1f2   : > { %v7702_v1 = vpop.f32.mrb[63].mxu1  ;;  %v10396_v38 = vadd.f32 %v7563_v15, %v7562_v43  ;;  %v7565_v37 = vpop.f32.mrb[62].mxu0 }
 0x1f3   : > { %v10394_v23 = vadd.f32 %v7702_v1, %v7701_v44  ;;  %v7566_v50 = vpop.f32.mrb[63].mxu0 }
 0x1f4   : > { %v10398_v35 = vadd.f32 %v7566_v50, %v7565_v37 }
 0x1f9   : > { %v8290_v6 = vpop.f32.mrb[64].mxu0 }
 0x1fa   : > { %v2163_v46 = vadd.f32 %v8290_v6, %v10253_v28  ;;  %v2154_v33 = vpop.f32.mrb[65].mxu0 }
 0x1fb   : > { %v2155_v59 = vadd.f32 %v10242_v17, %v2154_v33  ;;  %v8291_v39 = vpop.f32.mrb[66].mxu0 }
 0x1fc   : > { %v10403_v10 = vadd.f32 %v10258_v57, %v2163_v46  ;;  %v2166_v54 = vadd.f32 %v8291_v39, %v10256_v48  ;;  %v2157_v1 = vpop.f32.mrb[67].mxu0 }
 0x1fd   : > { %v10407_v15 = vadd.f32 %v10247_v9, %v2155_v59  ;;  %v2158_v43 = vadd.f32 %v10245_v21, %v2157_v1 }
 0x1fe   : > { %v10411_v44 = vadd.f32 %v10260_v63, %v2166_v54 }
 0x1ff   : > { %v10414_v28 = vadd.f32 %v10249_v62, %v2158_v43 }
 0x201   : > { %v8294_v37 = vpop.f32.mrb[68].mxu0 }
 0x202   : > { %v2179_v17 = vadd.f32 %v8294_v37, %v10277_v4  ;;  %v2170_v50 = vpop.f32.mrb[69].mxu0 }
 0x203   : > { %v2171_v57 = vadd.f32 %v10264_v51, %v2170_v50  ;;  %v8295_v6 = vpop.f32.mrb[70].mxu0 }
 0x204   : > { %v10419_v48 = vadd.f32 %v10285_v13, %v2179_v17  ;;  %v2182_v9 = vadd.f32 %v8295_v6, %v10280_v30  ;;  %v2173_v46 = vpop.f32.mrb[71].mxu0 }
 0x205   : > { %v10423_v21 = vadd.f32 %v10269_v55, %v2171_v57  ;;  %v2174_v63 = vadd.f32 %v10267_v58, %v2173_v46 }
 0x206   : > { %v10427_v62 = vadd.f32 %v10287_v11, %v2182_v9 }
 0x207   : > { %v10430_v4 = vadd.f32 %v10271_v0, %v2174_v63 }
 0x209   : > { %v8298_v54 = vpop.f32.mrb[72].mxu0 }
 0x20a   : > { %v2195_v51 = vadd.f32 %v8298_v54, %v10303_v41  ;;  %v2186_v33 = vpop.f32.mrb[73].mxu0 }
 0x20b   : > { %v2187_v13 = vadd.f32 %v10292_v26, %v2186_v33  ;;  %v8299_v59 = vpop.f32.mrb[74].mxu0 }
 0x20c   : > { %v10435_v30 = vadd.f32 %v10305_v52, %v2195_v51  ;;  %v2198_v55 = vadd.f32 %v8299_v59, %v10307_v34  ;;  %v2189_v39 = vpop.f32.mrb[75].mxu0  ;;  %v12741_v59 = vld [vmem:[#allocation19_spill] sm:$0xff] }
 0x20d   : > { %v10439_v58 = vadd.f32 %v10298_v18, %v2187_v13  ;;  %v2190_v11 = vadd.f32 %v10295_v16, %v2189_v39 }
 0x20e   : > { %v10443_v0 = vadd.f32 %v10309_v56, %v2198_v55 }
 0x20f   : > { %v10446_v41 = vadd.f32 %v10300_v12, %v2190_v11 }
 0x211   : > { %v8302_v1 = vpop.f32.mrb[76].mxu0 }
 0x212   : > { %v2211_v26 = vadd.f32 %v8302_v1, %v10321_v22  ;;  %v2202_v43 = vpop.f32.mrb[77].mxu0 }
 0x213   : > { %v2203_v52 = vadd.f32 %v10312_v49, %v2202_v43  ;;  %v8303_v37 = vpop.f32.mrb[78].mxu0 }
 0x214   : > { %v10451_v34 = vadd.f32 %v10323_v2, %v2211_v26  ;;  %v2214_v18 = vadd.f32 %v8303_v37, %v10325_v19  ;;  %v2205_v17 = vpop.f32.mrb[79].mxu0 }
 0x215   : > { %v10455_v16 = vadd.f32 %v10314_v61, %v2203_v52  ;;  %v2206_v56 = vadd.f32 %v10316_v47, %v2205_v17 }
 0x216   : > { %v10459_v12 = vadd.f32 %v10327_v25, %v2214_v18  ;;  %v12746_v18 = vld [vmem:[#allocation22_spill] sm:$0xff] }
 0x217   : > { %v10462_v22 = vadd.f32 %v10318_v20, %v2206_v56  ;;  %v12747_v56 = vld [vmem:[#allocation23_spill] sm:$0xff] }
 0x219   : > { %v8306_v50 = vpop.f32.mrb[80].mxu0 }
 0x21a   : > { %v2227_v49 = vadd.f32 %v8306_v50, %v10338_v8  ;;  %v2218_v57 = vpop.f32.mrb[81].mxu0 }
 0x21b   : > { %v2219_v2 = vadd.f32 %v10329_v42, %v2218_v57  ;;  %v8307_v6 = vpop.f32.mrb[82].mxu0 }
 0x21c   : > { %v10467_v19 = vadd.f32 %v10341_v53, %v2227_v49  ;;  %v2230_v61 = vadd.f32 %v8307_v6, %v10343_v32  ;;  %v2221_v9 = vpop.f32.mrb[83].mxu0  ;;  %v12748_v49 = vld [vmem:[#allocation28_spill] sm:$0xff] }
 0x21d   : > { %v10471_v47 = vadd.f32 %v10332_v24, %v2219_v2  ;;  %v2222_v25 = vadd.f32 %v10334_v3, %v2221_v9  ;;  %v12749_v2 = vld [vmem:[#allocation24_spill] sm:$0xff] }
 0x21e   : > { %v10475_v20 = vadd.f32 %v10345_v7, %v2230_v61  ;;  %v12739_v7 = vld [vmem:[#allocation18_spill] sm:$0xff] }
 0x21f   : > { %v10478_v8 = vadd.f32 %v10336_v40, %v2222_v25  ;;  %v12740_v40 = vld [vmem:[#allocation20_spill] sm:$0xff] }
 0x221   : > { %v8310_v46 = vpop.f32.mrb[84].mxu0 }
 0x222   : > { %v2243_v42 = vadd.f32 %v8310_v46, %v10359_v14  ;;  %v2234_v63 = vpop.f32.mrb[85].mxu0 }
 0x223   : > { %v2235_v53 = vadd.f32 %v10348_v60, %v2234_v63  ;;  %v8311_v54 = vpop.f32.mrb[86].mxu0  ;;  %v12742_v60 = vld [vmem:[#allocation25_spill] sm:$0xff] }
 0x224   : > { %v10483_v32 = vadd.f32 %v10361_v36, %v2243_v42  ;;  %v2246_v24 = vadd.f32 %v8311_v54, %v10363_v29  ;;  %v2237_v51 = vpop.f32.mrb[87].mxu0  ;;  %v12743_v36 = vld [vmem:[#allocation21_spill] sm:$0xff]  ;;  %v12744_v29 = vld [vmem:[#allocation26_spill] sm:$0xff] }
 0x225   : > { %v10487_v3 = vadd.f32 %v10351_v27, %v2235_v53  ;;  %v2238_v33 = vadd.f32 %v12739_v7, %v2237_v51  ;;  %v12745_v27 = vld [vmem:[#allocation27_spill] sm:$0xff] }
 0x226   : > { %v10491_v13 = vadd.f32 %v12740_v40, %v2246_v24  ;;  %v12750_v24 = vld [vmem:[#allocation29_spill] sm:$0xff] }
 0x227   : > { %v10494_v14 = vadd.f32 %v12741_v59, %v2238_v33 }
 0x229   : > { %v8314_v55 = vpop.f32.mrb[88].mxu0 }
 0x22a   : > { %v2259_v39 = vadd.f32 %v8314_v55, %v12742_v60  ;;  %v2250_v11 = vpop.f32.mrb[89].mxu0 }
 0x22b   : > { %v2251_v1 = vadd.f32 %v12743_v36, %v2250_v11  ;;  %v8315_v26 = vpop.f32.mrb[90].mxu0 }
 0x22c   : > { %v10499_v43 = vadd.f32 %v12744_v29, %v2259_v39  ;;  %v2262_v52 = vadd.f32 %v8315_v26, %v12745_v27  ;;  %v2253_v37 = vpop.f32.mrb[91].mxu0 }
 0x22d   : > { %v10503_v17 = vadd.f32 %v12746_v18, %v2251_v1  ;;  %v2254_v50 = vadd.f32 %v12747_v56, %v2253_v37 }
 0x22e   : > { %v10507_v57 = vadd.f32 %v12748_v49, %v2262_v52 }
 0x22f   : > { %v10510_v6 = vadd.f32 %v12749_v2, %v2254_v50 }
 0x231   : > { %v8318_v61 = vpop.f32.mrb[92].mxu0 }
 0x232   : > { %v2275_v9 = vadd.f32 %v8318_v61, %v10396_v38  ;;  %v2266_v25 = vpop.f32.mrb[93].mxu0  ;;  %v12751_v38 = vld [vmem:[#allocation30_spill] sm:$0xff] }
 0x233   : > { %v2267_v46 = vadd.f32 %v10384_v45, %v2266_v25  ;;  %v8319_v42 = vpop.f32.mrb[94].mxu0 }
 0x234   : > { %v10515_v63 = vadd.f32 %v10392_v31, %v2275_v9  ;;  %v2278_v53 = vadd.f32 %v8319_v42, %v10398_v35  ;;  %v2269_v54 = vpop.f32.mrb[95].mxu0 }
 0x235   : > { %v10519_v51 = vadd.f32 %v12750_v24, %v2267_v46  ;;  %v2270_v7 = vadd.f32 %v10388_v5, %v2269_v54 }
 0x236   : > { %v10523_v33 = vadd.f32 %v10394_v23, %v2278_v53 }
 0x237   : > { %v8386_v40 = vpop.f32.mrb[64].mxu1  ;;  %v10526_v59 = vadd.f32 %v12751_v38, %v2270_v7 }
 0x238   : > { %v3135_v45 = vpop.f32.mrb[65].mxu1 }
 0x239   : > { %v8387_v55 = vpop.f32.mrb[66].mxu1  ;;  %v7744_v60 = vpop.f32.mrb[96].mxu0 }
 0x23a   : > { %v3138_v31 = vpop.f32.mrb[67].mxu1  ;;  %v7745_v39 = vpop.f32.mrb[97].mxu0 }
 0x23b   : > { %v7746_v11 = vadd.f32 %v7745_v39, %v7744_v60  ;;  %v7747_v35 = vpop.f32.mrb[98].mxu0 }
 0x23c   : > { %v7748_v36 = vpop.f32.mrb[99].mxu0 }
 0x23d   : > { %v8566_v1 = vadd.f32 %v7746_v11, %v10407_v15  ;;  %v7749_v26 = vadd.f32 %v7748_v36, %v7747_v35 }
 0x23f   : > { %v8390_v29 = vpop.f32.mrb[68].mxu1  ;;  %v10529_v5 = vadd.f32 %v8566_v1, %v3135_v45  ;;  %v8574_v23 = vadd.f32 %v7749_v26, %v10414_v28 }
 0x240   : > { %v3151_v27 = vpop.f32.mrb[69].mxu1 }
 0x241   : > { %v8391_v52 = vpop.f32.mrb[70].mxu1  ;;  %v10532_v37 = vadd.f32 %v8574_v23, %v3138_v31  ;;  %v7750_v18 = vpop.f32.mrb[100].mxu0 }
 0x242   : > { %v3154_v56 = vpop.f32.mrb[71].mxu1  ;;  %v7751_v50 = vpop.f32.mrb[101].mxu0 }
 0x243   : > { %v7752_v49 = vadd.f32 %v7751_v50, %v7750_v18  ;;  %v7753_v2 = vpop.f32.mrb[102].mxu0 }
 0x244   : > { %v7754_v61 = vpop.f32.mrb[103].mxu0 }
 0x245   : > { %v8562_v9 = vadd.f32 %v7752_v49, %v10403_v10  ;;  %v7755_v25 = vadd.f32 %v7754_v61, %v7753_v2 }
 0x247   : > { %v10535_v15 = vpop.f32.mrb[72].mxu1  ;;  %v10537_v46 = vadd.f32 %v8562_v9, %v8386_v40  ;;  %v8570_v42 = vadd.f32 %v7755_v25, %v10411_v44 }
 0x248   : > { %v3167_v28 = vpop.f32.mrb[73].mxu1 }
 0x249   : > { %v10540_v53 = vpop.f32.mrb[74].mxu1  ;;  %v10542_v54 = vadd.f32 %v8570_v42, %v8387_v55  ;;  %v7756_v24 = vpop.f32.mrb[104].mxu0 }
 0x24a   : > { %v3170_v7 = vpop.f32.mrb[75].mxu1  ;;  %v7757_v38 = vpop.f32.mrb[105].mxu0 }
 0x24b   : > { %v7758_v45 = vadd.f32 %v7757_v38, %v7756_v24  ;;  %v7759_v60 = vpop.f32.mrb[106].mxu0 }
 0x24c   : > { %v7760_v31 = vpop.f32.mrb[107].mxu0 }
 0x24d   : > { %v8582_v10 = vadd.f32 %v7758_v45, %v10423_v21  ;;  %v7761_v39 = vadd.f32 %v7760_v31, %v7759_v60  ;;  %v3332_v31 = vmul.f32 %v10532_v37, %v10532_v37 }
 0x24f   : > { %v10545_v11 = vpop.f32.mrb[76].mxu1  ;;  %v10547_v40 = vadd.f32 %v8582_v10, %v3151_v27  ;;  %v8590_v44 = vadd.f32 %v7761_v39, %v10430_v4 }
 0x250   : > { %v10550_v35 = vpop.f32.mrb[77].mxu1 }
 0x251   : > { %12752 = vst [vmem:[#allocation18_spill] sm:$0xff] %v10547_v40  ;;  %v10552_v36 = vpop.f32.mrb[78].mxu1  ;;  %v10554_v55 = vadd.f32 %v8590_v44, %v3154_v56  ;;  %v7762_v1 = vpop.f32.mrb[108].mxu0  ;;  %v3333_v44 = vmul.f32 %v10537_v46, %v10537_v46 }
 0x252   : > { %v10556_v26 = vpop.f32.mrb[79].mxu1  ;;  %v7763_v23 = vpop.f32.mrb[109].mxu0 }
 0x253   : > { %12753 = vst [vmem:[#allocation20_spill] sm:$0xff] %v10554_v55  ;;  %v7764_v18 = vadd.f32 %v7763_v23, %v7762_v1  ;;  %v7765_v50 = vpop.f32.mrb[110].mxu0 }
 0x254   : > { %v7766_v21 = vpop.f32.mrb[111].mxu0 }
 0x255   : > { %v8578_v49 = vadd.f32 %v7764_v18, %v10419_v48  ;;  %v7767_v2 = vadd.f32 %v7766_v21, %v7765_v50 }
 0x257   : > { %v10559_v27 = vpop.f32.mrb[80].mxu1  ;;  %v10561_v61 = vadd.f32 %v8578_v49, %v8390_v29  ;;  %v8586_v4 = vadd.f32 %v7767_v2, %v10427_v62  ;;  %v3331_v62 = vmul.f32 %v10529_v5, %v10529_v5 }
 0x258   : > { %v10564_v9 = vpop.f32.mrb[81].mxu1 }
 0x259   : > { %12754 = vst [vmem:[#allocation19_spill] sm:$0xff] %v10561_v61  ;;  %v10566_v56 = vpop.f32.mrb[82].mxu1  ;;  %v10568_v25 = vadd.f32 %v8586_v4, %v8391_v52  ;;  %v7768_v42 = vpop.f32.mrb[112].mxu0  ;;  %v3294_v52 = vadd.f32 %v10532_v37, %v10529_v5 }
 0x25a   : > { %v10570_v24 = vpop.f32.mrb[83].mxu1  ;;  %v7769_v38 = vpop.f32.mrb[113].mxu0 }
 0x25b   : > { %12755 = vst [vmem:[#allocation25_spill] sm:$0xff] %v10568_v25  ;;  %v7770_v45 = vadd.f32 %v7769_v38, %v7768_v42  ;;  %v7771_v60 = vpop.f32.mrb[114].mxu0  ;;  %v3295_v21 = vadd.f32 %v10537_v46, %v3294_v52 }
 0x25c   : > { %v7772_v48 = vpop.f32.mrb[115].mxu0 }
 0x25d   : > { %v8598_v29 = vadd.f32 %v7770_v45, %v10439_v58  ;;  %v7773_v10 = vadd.f32 %v7772_v48, %v7771_v60  ;;  %v3363_v58 = vadd.f32 %v3332_v31, %v3331_v62  ;;  %v3296_v48 = vadd.f32 %v10542_v54, %v3295_v21 }
 0x25e   : > { %v3335_v31 = vmul.f32 %v10547_v40, %v10547_v40 }
 0x25f   : > { %v10577_v39 = vpop.f32.mrb[84].mxu1  ;;  %v10583_v1 = vadd.f32 %v8598_v29, %v3167_v28  ;;  %v8606_v23 = vadd.f32 %v7773_v10, %v10446_v41  ;;  %v3364_v38 = vadd.f32 %v3363_v58, %v3333_v44  ;;  %v3334_v28 = vmul.f32 %v10542_v54, %v10542_v54 }
 0x260   : > { %v10586_v18 = vpop.f32.mrb[85].mxu1  ;;  %v3297_v52 = vadd.f32 %v10547_v40, %v3296_v48  ;;  %v3338_v40 = vmul.f32 %v10568_v25, %v10568_v25 }
 0x261   : > { %v10588_v50 = vpop.f32.mrb[86].mxu1  ;;  %v10591_v49 = vadd.f32 %v8606_v23, %v3170_v7  ;;  %v7774_v2 = vpop.f32.mrb[116].mxu0  ;;  %v3365_v62 = vadd.f32 %v3364_v38, %v3334_v28 }
 0x262   : > { %v10593_v4 = vpop.f32.mrb[87].mxu1  ;;  %v7775_v42 = vpop.f32.mrb[117].mxu0 }
 0x263   : > { %v7776_v45 = vadd.f32 %v7775_v42, %v7774_v2  ;;  %v7777_v60 = vpop.f32.mrb[118].mxu0  ;;  %v3366_v21 = vadd.f32 %v3365_v62, %v3335_v31  ;;  %v3336_v42 = vmul.f32 %v10554_v55, %v10554_v55 }
 0x264   : > { %v7778_v41 = vpop.f32.mrb[119].mxu0 }
 0x265   : > { %v8594_v29 = vadd.f32 %v7776_v45, %v10435_v30  ;;  %v7779_v7 = vadd.f32 %v7778_v41, %v7777_v60 }
 0x267   : > { %v10601_v10 = vpop.f32.mrb[88].mxu1  ;;  %v10605_v44 = vadd.f32 %v8594_v29, %v10535_v15  ;;  %v8602_v23 = vadd.f32 %v7779_v7, %v10443_v0  ;;  %v3298_v15 = vadd.f32 %v10554_v55, %v3297_v52  ;;  %v3337_v0 = vmul.f32 %v10561_v61, %v10561_v61 }
 0x268   : > { %v10608_v58 = vpop.f32.mrb[89].mxu1  ;;  %v3367_v29 = vadd.f32 %v3366_v21, %v3336_v42 }
 0x269   : > { %v10610_v2 = vpop.f32.mrb[90].mxu1  ;;  %v10615_v30 = vadd.f32 %v8602_v23, %v10540_v53  ;;  %v7780_v45 = vpop.f32.mrb[120].mxu0  ;;  %v3299_v31 = vadd.f32 %v10561_v61, %v3298_v15 }
 0x26a   : > { %v10617_v38 = vpop.f32.mrb[91].mxu1  ;;  %v7781_v28 = vpop.f32.mrb[121].mxu0  ;;  %v3368_v23 = vadd.f32 %v3367_v29, %v3337_v0 }
 0x26b   : > { %v7782_v60 = vadd.f32 %v7781_v28, %v7780_v45  ;;  %v7783_v41 = vpop.f32.mrb[122].mxu0  ;;  %v3300_v21 = vadd.f32 %v10568_v25, %v3299_v31  ;;  %v3340_v31 = vmul.f32 %v10591_v49, %v10591_v49 }
 0x26c   : > { %v7784_v48 = vpop.f32.mrb[123].mxu0 }
 0x26d   : > { %v8614_v7 = vadd.f32 %v7782_v60, %v10455_v16  ;;  %v7785_v62 = vadd.f32 %v7784_v48, %v7783_v41  ;;  %v3339_v16 = vmul.f32 %v10583_v1, %v10583_v1  ;;  %v3301_v41 = vadd.f32 %v10583_v1, %v3300_v21 }
 0x26f   : > { %v10624_v53 = vpop.f32.mrb[92].mxu1  ;;  %v10629_v52 = vadd.f32 %v8614_v7, %v10550_v35  ;;  %v8622_v55 = vadd.f32 %v7785_v62, %v10462_v22  ;;  %v3369_v35 = vadd.f32 %v3368_v23, %v3338_v40 }
 0x270   : > { %v10632_v45 = vpop.f32.mrb[93].mxu1 }
 0x271   : > { %v10634_v28 = vpop.f32.mrb[94].mxu1  ;;  %v10640_v42 = vadd.f32 %v8622_v55, %v10556_v26  ;;  %v7786_v15 = vpop.f32.mrb[124].mxu0  ;;  %v3370_v7 = vadd.f32 %v3369_v35, %v3339_v16  ;;  %v3302_v55 = vadd.f32 %v10591_v49, %v3301_v41  ;;  %v3341_v26 = vmul.f32 %v10605_v44, %v10605_v44 }
 0x272   : > { %v10642_v0 = vpop.f32.mrb[95].mxu1  ;;  %v7787_v60 = vpop.f32.mrb[125].mxu0  ;;  %v3342_v35 = vmul.f32 %v10615_v30, %v10615_v30 }
 0x273   : > { %v7788_v22 = vadd.f32 %v7787_v60, %v7786_v15  ;;  %v7789_v48 = vpop.f32.mrb[126].mxu0  ;;  %v3371_v23 = vadd.f32 %v3370_v7, %v3340_v31  ;;  %v3303_v21 = vadd.f32 %v10605_v44, %v3302_v55 }
 0x274   : > { %v7790_v29 = vpop.f32.mrb[127].mxu0 }
 0x275   : > { %v8610_v62 = vadd.f32 %v7788_v22, %v10451_v34  ;;  %v7791_v25 = vadd.f32 %v7790_v29, %v7789_v48  ;;  %v3372_v34 = vadd.f32 %v3371_v23, %v3341_v26  ;;  %v3344_v26 = vmul.f32 %v10640_v42, %v10640_v42 }
 0x277   : > { %v10652_v61 = vadd.f32 %v8610_v62, %v10545_v11  ;;  %v8618_v40 = vadd.f32 %v7791_v25, %v10459_v12  ;;  %v3304_v11 = vadd.f32 %v10615_v30, %v3303_v21  ;;  %v3343_v12 = vmul.f32 %v10629_v52, %v10629_v52 }
 0x278   : > { %v3373_v7 = vadd.f32 %v3372_v34, %v3342_v35 }
 0x279   : > { %v10657_v16 = vadd.f32 %v8618_v40, %v10552_v36  ;;  %v7792_v15 = vpop.f32.mrb[128].mxu0  ;;  %v3305_v36 = vadd.f32 %v10629_v52, %v3304_v11 }
 0x27a   : > { %v7793_v60 = vpop.f32.mrb[129].mxu0  ;;  %v3374_v55 = vadd.f32 %v3373_v7, %v3343_v12 }
 0x27b   : > { %v7794_v41 = vadd.f32 %v7793_v60, %v7792_v15  ;;  %v7795_v22 = vpop.f32.mrb[130].mxu0  ;;  %v3345_v15 = vmul.f32 %v10652_v61, %v10652_v61 }
 0x27c   : > { %v7796_v48 = vpop.f32.mrb[131].mxu0  ;;  %v3375_v35 = vadd.f32 %v3374_v55, %v3344_v26 }
 0x27d   : > { %v8630_v25 = vadd.f32 %v7794_v41, %v10471_v47  ;;  %v7797_v29 = vadd.f32 %v7796_v48, %v7795_v22  ;;  %v3306_v47 = vadd.f32 %v10640_v42, %v3305_v36 }
 0x27e   : > { %v3376_v48 = vadd.f32 %v3375_v35, %v3345_v15 }
 0x27f   : > { %v10667_v31 = vadd.f32 %v8630_v25, %v10564_v9  ;;  %v8638_v62 = vadd.f32 %v7797_v29, %v10478_v8  ;;  %v3307_v8 = vadd.f32 %v10652_v61, %v3306_v47 }
 0x281   : > { %v10673_v40 = vadd.f32 %v8638_v62, %v10570_v24  ;;  %v7798_v23 = vpop.f32.mrb[132].mxu0  ;;  %v3346_v24 = vmul.f32 %v10657_v16, %v10657_v16  ;;  %v3308_v25 = vadd.f32 %v10657_v16, %v3307_v8  ;;  %v3347_v29 = vmul.f32 %v10667_v31, %v10667_v31 }
 0x282   : > { %v7799_v21 = vpop.f32.mrb[133].mxu0 }
 0x283   : > { %v7800_v60 = vadd.f32 %v7799_v21, %v7798_v23  ;;  %v7801_v34 = vpop.f32.mrb[134].mxu0  ;;  %v3377_v62 = vadd.f32 %v3376_v48, %v3346_v24  ;;  %v3309_v55 = vadd.f32 %v10667_v31, %v3308_v25 }
 0x284   : > { %v7802_v9 = vpop.f32.mrb[135].mxu0 }
 0x285   : > { %v8626_v41 = vadd.f32 %v7800_v60, %v10467_v19  ;;  %v7803_v22 = vadd.f32 %v7802_v9, %v7801_v34  ;;  %v3310_v60 = vadd.f32 %v10673_v40, %v3309_v55 }
 0x287   : > { %v10683_v11 = vadd.f32 %v8626_v41, %v10559_v27  ;;  %v8634_v12 = vadd.f32 %v7803_v22, %v10475_v20  ;;  %v3378_v27 = vadd.f32 %v3377_v62, %v3347_v29  ;;  %v3348_v20 = vmul.f32 %v10673_v40, %v10673_v40 }
 0x289   : > { %v10690_v7 = vadd.f32 %v8634_v12, %v10566_v56  ;;  %v7804_v36 = vpop.f32.mrb[136].mxu0  ;;  %v3349_v56 = vmul.f32 %v10683_v11, %v10683_v11  ;;  %v3379_v35 = vadd.f32 %v3378_v27, %v3348_v20  ;;  %v3311_v8 = vadd.f32 %v10683_v11, %v3310_v60 }
 0x28a   : > { %v7805_v19 = vpop.f32.mrb[137].mxu0 }
 0x28b   : > { %v7806_v26 = vadd.f32 %v7805_v19, %v7804_v36  ;;  %v7807_v23 = vpop.f32.mrb[138].mxu0  ;;  %v3350_v24 = vmul.f32 %v10690_v7, %v10690_v7 }
 0x28c   : > { %v7808_v21 = vpop.f32.mrb[139].mxu0 }
 0x28d   : > { %v8646_v47 = vadd.f32 %v7806_v26, %v10487_v3  ;;  %v7809_v15 = vadd.f32 %v7808_v21, %v7807_v23  ;;  %v3380_v3 = vadd.f32 %v3379_v35, %v3349_v56 }
 0x28f   : > { %v10700_v34 = vadd.f32 %v8646_v47, %v10586_v18  ;;  %v8654_v9 = vadd.f32 %v7809_v15, %v10494_v14  ;;  %v3312_v18 = vadd.f32 %v10690_v7, %v3311_v8  ;;  %v3381_v62 = vadd.f32 %v3380_v3, %v3350_v24 }
 0x291   : > { %v10705_v41 = vadd.f32 %v8654_v9, %v10593_v4  ;;  %v7810_v22 = vpop.f32.mrb[140].mxu0  ;;  %v3351_v14 = vmul.f32 %v10700_v34, %v10700_v34  ;;  %v3313_v4 = vadd.f32 %v10700_v34, %v3312_v18 }
 0x292   : > { %v7811_v48 = vpop.f32.mrb[141].mxu0 }
 0x293   : > { %v7812_v12 = vadd.f32 %v7811_v48, %v7810_v22  ;;  %v7813_v25 = vpop.f32.mrb[142].mxu0  ;;  %v3382_v23 = vadd.f32 %v3381_v62, %v3351_v14  ;;  %v3352_v21 = vmul.f32 %v10705_v41, %v10705_v41 }
 0x294   : > { %v7814_v29 = vpop.f32.mrb[143].mxu0 }
 0x295   : > { %v8642_v36 = vadd.f32 %v7812_v12, %v10483_v32  ;;  %v7815_v19 = vadd.f32 %v7814_v29, %v7813_v25  ;;  %v3314_v32 = vadd.f32 %v10705_v41, %v3313_v4  ;;  %v3383_v9 = vadd.f32 %v3382_v23, %v3352_v21 }
 0x297   : > { %v10715_v55 = vadd.f32 %v8642_v36, %v10577_v39  ;;  %v8650_v26 = vadd.f32 %v7815_v19, %v10491_v13 }
 0x299   : > { %v10721_v27 = vadd.f32 %v8650_v26, %v10588_v50  ;;  %v7816_v20 = vpop.f32.mrb[144].mxu0  ;;  %v3353_v15 = vmul.f32 %v10715_v55, %v10715_v55  ;;  %v3315_v13 = vadd.f32 %v10715_v55, %v3314_v32 }
 0x29a   : > { %v7817_v47 = vpop.f32.mrb[145].mxu0 }
 0x29b   : > { %v7818_v60 = vadd.f32 %v7817_v47, %v7816_v20  ;;  %v7819_v56 = vpop.f32.mrb[146].mxu0  ;;  %v3384_v22 = vadd.f32 %v3383_v9, %v3353_v15  ;;  %v3354_v50 = vmul.f32 %v10721_v27, %v10721_v27  ;;  %v3316_v24 = vadd.f32 %v10721_v27, %v3315_v13 }
 0x29c   : > { %v7820_v39 = vpop.f32.mrb[147].mxu0 }
 0x29d   : > { %v8662_v35 = vadd.f32 %v7818_v60, %v10503_v17  ;;  %v7821_v8 = vadd.f32 %v7820_v39, %v7819_v56  ;;  %v3385_v18 = vadd.f32 %v3384_v22, %v3354_v50 }
 0x29f   : > { %v10731_v48 = vadd.f32 %v8662_v35, %v10608_v58  ;;  %v8670_v3 = vadd.f32 %v7821_v8, %v10510_v6 }
 0x2a1   : > { %v3355_v12 = vmul.f32 %v10731_v48, %v10731_v48  ;;  %v10738_v25 = vadd.f32 %v8670_v3, %v10617_v38  ;;  %v7822_v29 = vpop.f32.mrb[148].mxu0  ;;  %v3317_v14 = vadd.f32 %v10731_v48, %v3316_v24 }
 0x2a2   : > { %v7823_v17 = vpop.f32.mrb[149].mxu0 }
 0x2a3   : > { %v7824_v36 = vadd.f32 %v7823_v17, %v7822_v29  ;;  %v7825_v19 = vpop.f32.mrb[150].mxu0  ;;  %v3386_v58 = vadd.f32 %v3385_v18, %v3355_v12  ;;  %v3356_v6 = vmul.f32 %v10738_v25, %v10738_v25  ;;  %v3318_v23 = vadd.f32 %v10738_v25, %v3317_v14 }
 0x2a4   : > { %v7826_v62 = vpop.f32.mrb[151].mxu0 }
 0x2a5   : > { %v8658_v4 = vadd.f32 %v7824_v36, %v10499_v43  ;;  %v7827_v26 = vadd.f32 %v7826_v62, %v7825_v19  ;;  %v3387_v20 = vadd.f32 %v3386_v58, %v3356_v6 }
 0x2a7   : > { %v10746_v38 = vadd.f32 %v8658_v4, %v10601_v10  ;;  %v8666_v21 = vadd.f32 %v7827_v26, %v10507_v57 }
 0x2a9   : > { %v3319_v47 = vadd.f32 %v10746_v38, %v3318_v23  ;;  %v3357_v32 = vmul.f32 %v10746_v38, %v10746_v38  ;;  %v10753_v15 = vadd.f32 %v8666_v21, %v10610_v2  ;;  %v7828_v60 = vpop.f32.mrb[152].mxu0  ;;  %v9096_v21 = vld [vmem:[#allocation9 + $0x140] sm:$0xff]  }
 0x2aa   : > { %v7829_v56 = vpop.f32.mrb[153].mxu0  ;;  %8416 = vmatprep.subr.bf16.mxu1 %v9096_v21 }
 0x2ab   : > { %v3388_v43 = vadd.f32 %v3387_v20, %v3357_v32  ;;  %v3320_v39 = vadd.f32 %v10753_v15, %v3319_v47  ;;  %v3358_v10 = vmul.f32 %v10753_v15, %v10753_v15  ;;  %v7830_v9 = vadd.f32 %v7829_v56, %v7828_v60  ;;  %v7831_v13 = vpop.f32.mrb[154].mxu0  ;;  %8417 = vmatpush3.bf16.msra.mxu1 %v9096_v21  ;;  %v9094_v60 = vld [vmem:[#allocation9 + $0x100] sm:$0xff]  }
 0x2ac   : > { %v7832_v57 = vpop.f32.mrb[155].mxu0  ;;  %7864 = vmatprep.subr.bf16.mxu0 %v9094_v60  ;;  %v9110_v21 = vld [vmem:[#allocation9 + $0xe0] sm:$0xff]   ;;  %v9115_v60 = vld [vmem:[#allocation9 + $0xf0] sm:$0xff]  }
 0x2ad   : > { %v3389_v35 = vadd.f32 %v3388_v43, %v3358_v10  ;;  %v8678_v8 = vadd.f32 %v7830_v9, %v10519_v51  ;;  %v7833_v22 = vadd.f32 %v7832_v57, %v7831_v13  ;;  %v9100_v9 = vld [vmem:[#allocation9 + $0x150] sm:$0xff]   ;;  %v9098_v13 = vld [vmem:[#allocation9 + $0x108] sm:$0xff]  }
 0x2af   : > { %v10760_v50 = vadd.f32 %v8678_v8, %v10632_v45  ;;  %v8686_v2 = vadd.f32 %v7833_v22, %v10526_v59  ;;  %v9099_v8 = vld [vmem:[#allocation9 + $0xc8] sm:$0xff]  }
 0x2b1   : > { %v3321_v3 = vadd.f32 %v10760_v50, %v3320_v39  ;;  %v3359_v24 = vmul.f32 %v10760_v50, %v10760_v50  ;;  %v10767_v12 = vadd.f32 %v8686_v2, %v10642_v0  ;;  %v7834_v29 = vpop.f32.mrb[156].mxu0  ;;  %v9095_v39 = vld [vmem:[#allocation9 + $0xc0] sm:$0xff]  }
 0x2b2   : > { %v7835_v17 = vpop.f32.mrb[157].mxu0  ;;  %7865 = vmatpush3.bf16.msra.mxu0 %v9095_v39  ;;  %v9123_v39 = vld [vmem:[#allocation9 + $0xf8] sm:$0xff]  }
 0x2b3   : > { %v3390_v18 = vadd.f32 %v3389_v35, %v3359_v24  ;;  %v3322_v14 = vadd.f32 %v10767_v12, %v3321_v3  ;;  %v3360_v51 = vmul.f32 %v10767_v12, %v10767_v12  ;;  %v7836_v45 = vadd.f32 %v7835_v17, %v7834_v29  ;;  %v7837_v36 = vpop.f32.mrb[158].mxu0  ;;  %7866 = vmatprep.subr.bf16.mxu0 %v9098_v13  ;;  %v9101_v3 = vld [vmem:[#allocation9 + $0x158] sm:$0xff]   ;;  %v9102_v24 = vld [vmem:[#allocation9 + $0x110] sm:$0xff]  }
 0x2b4   : > { %v7838_v19 = vpop.f32.mrb[159].mxu0 }
 0x2b5   : > { %v3391_v59 = vadd.f32 %v3390_v18, %v3360_v51  ;;  %v8674_v62 = vadd.f32 %v7836_v45, %v10515_v63  ;;  %v7839_v58 = vadd.f32 %v7838_v19, %v7837_v36  ;;  %v9103_v18 = vld [vmem:[#allocation9 + $0xd0] sm:$0xff]   ;;  %v9104_v45 = vld [vmem:[#allocation9 + $0x160] sm:$0xff]   ;;  %v9106_v36 = vld [vmem:[#allocation9 + $0x118] sm:$0xff]  }
 0x2b6   : > { %7867 = vmatpush3.bf16.msra.mxu0 %v9099_v8 }
 0x2b7   : > { %v10774_v6 = vadd.f32 %v8674_v62, %v10624_v53  ;;  %v8682_v0 = vadd.f32 %v7839_v58, %v10523_v33  ;;  %v9097_v33 = vld [vmem:[#allocation9 + $0x148] sm:$0xff]   ;;  %7868 = vmatprep.subr.bf16.mxu0 %v9102_v24  ;;  %v9107_v62 = vld [vmem:[#allocation9 + $0xd8] sm:$0xff]   ;;  %v12757_v24 = vld [vmem:[#allocation20_spill] sm:$0xff] }
 0x2b8   : > { %8418 = vmatprep.subr.bf16.mxu1 %v9097_v33  ;;  %v9105_v58 = vld [vmem:[#allocation9 + $0x168] sm:$0xff]  }
 0x2b9   : > { %v3323_v4 = vadd.f32 %v10774_v6, %v3322_v14  ;;  %v3361_v26 = vmul.f32 %v10774_v6, %v10774_v6  ;;  %v10781_v23 = vadd.f32 %v8682_v0, %v10634_v28  ;;  %8419 = vmatpush3.bf16.msra.mxu1 %v9097_v33  ;;  %v9109_v0 = vld [vmem:[#allocation9 + $0x120] sm:$0xff]   ;;  %v9114_v33 = vld [vmem:[#allocation9 + $0x130] sm:$0xff]  }
 0x2ba   : > { %8420 = vmatprep.subr.bf16.mxu1 %v9100_v9  ;;  %7869 = vmatpush3.bf16.msra.mxu0 %v9103_v18 }
 0x2bb   : > { %v3392_v20 = vadd.f32 %v3391_v59, %v3361_v26  ;;  %v3324_v47 = vadd.f32 %v10781_v23, %v3323_v4  ;;  %v3362_v63 = vmul.f32 %v10781_v23, %v10781_v23  ;;  %7870 = vmatprep.subr.bf16.mxu0 %v9106_v36  ;;  %v9108_v26 = vld [vmem:[#allocation9 + $0x170] sm:$0xff]  }
 0x2bd   : > { %v3325_v53 = vrot.slane %v3324_v47, 4  ;;  %v3393_v32 = vadd.f32 %v3392_v20, %v3362_v63  ;;  %8421 = vmatpush3.bf16.msra.mxu1 %v9100_v9  ;;  %v9112_v20 = vld [vmem:[#allocation9 + $0x128] sm:$0xff]  }
 0x2be   : > { %8422 = vmatprep.subr.bf16.mxu1 %v9101_v3  ;;  %7871 = vmatpush3.bf16.msra.mxu0 %v9107_v62 }
 0x2bf   : > { %v3326_v56 = vadd.f32 %v3325_v53, %v3324_v47  ;;  %v3394_v43 = vrot.slane %v3393_v32, 4  ;;  %7872 = vmatprep.subr.bf16.mxu0 %v9109_v0  ;;  %v9111_v53 = vld [vmem:[#allocation9 + $0x178] sm:$0xff]  }
 0x2c1   : > { %v3327_v28 = vrot.slane %v3326_v56, 2  ;;  %v3395_v10 = vadd.f32 %v3394_v43, %v3393_v32  ;;  %8423 = vmatpush3.bf16.msra.mxu1 %v9101_v3  ;;  %v9113_v32 = vld [vmem:[#allocation9 + $0xe8] sm:$0xff]   ;;  %v9120_v43 = vld [vmem:[#allocation9 + $0x138] sm:$0xff]  }
 0x2c2   : > { %8424 = vmatprep.subr.bf16.mxu1 %v9104_v45  ;;  %7873 = vmatpush3.bf16.msra.mxu0 %v9110_v21 }
 0x2c3   : > { %v3328_v57 = vadd.f32 %v3327_v28, %v3326_v56  ;;  %v3396_v35 = vrot.slane %v3395_v10, 2  ;;  %7874 = vmatprep.subr.bf16.mxu0 %v9112_v20  ;;  %v9119_v56 = vld [vmem:[#allocation9 + $0x80] sm:$0xff]  }
 0x2c5   : > { %v3329_v22 = vrot.slane %v3328_v57, 1  ;;  %v3397_v2 = vadd.f32 %v3396_v35, %v3395_v10  ;;  %8425 = vmatpush3.bf16.msra.mxu1 %v9104_v45 }
 0x2c6   : > { %8426 = vmatprep.subr.bf16.mxu1 %v9105_v58  ;;  %7875 = vmatpush3.bf16.msra.mxu0 %v9113_v32 }
 0x2c7   : > { %v3330_v29 = vadd.f32 %v3329_v22, %v3328_v57  ;;  %v3398_v17 = vrot.slane %v3397_v2, 1  ;;  %7876 = vmatprep.subr.bf16.mxu0 %v9114_v33 }
 0x2c9   : > { %v3399_v14 = vadd.f32 %v3398_v17, %v3397_v2  ;;  %v3400_v51 = vmul.f32 0.00390625, %v3330_v29  ;;  %8427 = vmatpush3.bf16.msra.mxu1 %v9105_v58  ;;  %v12756_v2 = vld [vmem:[#allocation18_spill] sm:$0xff] }
 0x2ca   : > { %8428 = vmatprep.subr.bf16.mxu1 %v9108_v26  ;;  %7877 = vmatpush3.bf16.msra.mxu0 %v9115_v60 }
 0x2cb   : > { %v3401_v19 = vmul.f32 0.00390625, %v3399_v14  ;;  %v3402_v59 = vmul.f32 %v3400_v51, %v3400_v51  ;;  %7878 = vmatprep.subr.bf16.mxu0 %v9120_v43  ;;  %v4037_v43 = vld [vmem:[#allocation3 + $0x8] sm:$0x1] }
 0x2cd   : > { %v3403_v4 = vsub.f32 %v3401_v19, %v3402_v59  ;;  %8429 = vmatpush3.bf16.msra.mxu1 %v9108_v26 }
 0x2ce   : > { %8430 = vmatprep.subr.bf16.mxu1 %v9111_v53  ;;  %7879 = vmatpush3.bf16.msra.mxu0 %v9123_v39 }
 0x2cf   : > { %v3404_v47 = vmax.f32 %v3403_v4, 0.0 }
 0x2d1   : > { %v3405_v63 = vadd.f32 1e-05, %v3404_v47  ;;  %8431 = vmatpush3.bf16.msra.mxu1 %v9111_v53 }
 0x2d2   : > { %8464 = vmatprep.subr.bf16.mxu1 %v9119_v56 }
 0x2d3   : > { %9238 = vrsqrt.f32 %v3405_v63 }
 0x2dd   : > { %v9239_v28 = vpop.eup %9238 }
 0x2de   : > { %v3437_v10 = vmul.f32 %v9239_v28, %v10774_v6  ;;  %v3438_v9 = vmul.f32 %v9239_v28, %v10781_v23  ;;  %v10788_v13 = vmul.f32 %v9239_v28, %v3400_v51  ;;  %v10791_v57 = vmul.f32 %v9239_v28, %v10529_v5  ;;  %v12758_v5 = vld [vmem:[#allocation19_spill] sm:$0xff] }
 0x2df   : > { %v10794_v35 = vmul.f32 %v9239_v28, %v10532_v37  ;;  %v10797_v8 = vmul.f32 %v9239_v28, %v10537_v46  ;;  %v10800_v22 = vmul.f32 %v9239_v28, %v10542_v54  ;;  %v10803_v3 = vmul.f32 %v9239_v28, %v12756_v2  ;;  %v12759_v37 = vld [vmem:[#allocation25_spill] sm:$0xff] }
 0x2e0   : > { %v3470_v6 = vsub.f32 %v3437_v10, %v10788_v13  ;;  %v3471_v23 = vsub.f32 %v3438_v9, %v10788_v13  ;;  %v10808_v29 = vmul.f32 %v9239_v28, %v12757_v24  ;;  %v10811_v17 = vmul.f32 %v9239_v28, %v12758_v5 }
 0x2e1   : > { %v10814_v18 = vmul.f32 %v9239_v28, %v12759_v37  ;;  %v10817_v46 = vmul.f32 %v9239_v28, %v10583_v1  ;;  %v10820_v54 = vmul.f32 %v9239_v28, %v10591_v49  ;;  %v10823_v14 = vmul.f32 %v9239_v28, %v10605_v44 }
 0x2e2   : > { %v3502_v51 = vmax.f32 %v3470_v6, 0.0  ;;  %v3503_v45 = vmax.f32 %v3471_v23, 0.0  ;;  %v10826_v36 = vmul.f32 %v9239_v28, %v10615_v30  ;;  %v10829_v19 = vmul.f32 %v9239_v28, %v10629_v52 }
 0x2e3   : > { %v10832_v59 = vmul.f32 %v9239_v28, %v10640_v42  ;;  %v10835_v1 = vmul.f32 %v9239_v28, %v10652_v61  ;;  %v10838_v49 = vmul.f32 %v9239_v28, %v10657_v16  ;;  %v10841_v44 = vmul.f32 %v9239_v28, %v10667_v31 }
 0x2e4   : > { %v10843_v62 = vpack.c.bf16 %v3502_v51, %v3502_v51  ;;  %v7454_v58 = vpack.c.bf16 %v3503_v45, %v3503_v45  ;;  %v10846_v30 = vmul.f32 %v9239_v28, %v10673_v40  ;;  %v10849_v52 = vmul.f32 %v9239_v28, %v10683_v11 }
 0x2e5   : > { %v10852_v42 = vmul.f32 %v9239_v28, %v10690_v7  ;;  %v10855_v61 = vmul.f32 %v9239_v28, %v10700_v34  ;;  %v10858_v16 = vmul.f32 %v9239_v28, %v10705_v41  ;;  %v10861_v31 = vmul.f32 %v9239_v28, %v10715_v55 }
 0x2e6   : > { %v3856_v0 = vshrl.u32 %v10843_v62, 16  ;;  %v3864_v4 = vshrl.u32 %v7454_v58, 16  ;;  %v3867_v40 = vshll.u32 %v7454_v58, 16  ;;  %v10865_v26 = vmul.f32 %v9239_v28, %v10721_v27 }
 0x2e7   : > { %v10868_v11 = vmul.f32 %v9239_v28, %v10731_v48  ;;  %v10871_v7 = vmul.f32 %v9239_v28, %v10738_v25  ;;  %v10874_v34 = vmul.f32 %v9239_v28, %v10746_v38  ;;  %v10877_v41 = vmul.f32 %v9239_v28, %v10753_v15  ;;  %v4030_v48 = vld [vmem:[#allocation3 + $0xc8] sm:$0x1] }
 0x2e8   : > { %v10879_v55 = vrot.slane %v3856_v0, 7  ;;  %v3866_v21 = vrot.slane %v3864_v4, 7  ;;  %v10882_v20 = vmul.f32 %v9239_v28, %v10760_v50  ;;  %v10885_v27 = vmul.f32 %v9239_v28, %v10767_v12 }
 0x2e9   : > { %v3440_v25 = vsub.f32 %v10791_v57, %v10788_v13  ;;  %v3441_v38 = vsub.f32 %v10794_v35, %v10788_v13  ;;  %v3442_v15 = vsub.f32 %v10797_v8, %v10788_v13  ;;  %v3443_v12 = vsub.f32 %v10800_v22, %v10788_v13 }
 0x2ea   : > { %v3862_v63 = vrot.slane %v10879_v55, 4  ;;  %v3869_v53 = vor.u32 %v3867_v40, %v3866_v21  ;;  %v3871_v50 = vrot.slane %v3866_v21, 4  ;;  %v3444_v32 = vsub.f32 %v10803_v3, %v10788_v13 }
 0x2eb   : > { %v3445_v33 = vsub.f32 %v10808_v29, %v10788_v13  ;;  %v3446_v60 = vsub.f32 %v10811_v17, %v10788_v13  ;;  %v3447_v56 = vsub.f32 %v10814_v18, %v10788_v13  ;;  %v3448_v9 = vsub.f32 %v10817_v46, %v10788_v13 }
 0x2ec   : > { %v3870_v39 = vsel %vm9690_vm5, %v3862_v63, %v3869_v53  ;;  %v4031_v10 = vsel %vm9705_vm7, %v3871_v50, %v4030_v48  ;;  %v3449_v57 = vsub.f32 %v10820_v54, %v10788_v13  ;;  %v3450_v35 = vsub.f32 %v10823_v14, %v10788_v13 }
 0x2ed   : > { %4029 = vst [vmem:[#allocation3 + $0xc4] sm:$0xf] %v3870_v39  ;;  %4032 = vst [vmem:[#allocation3 + $0xc8] sm:$0x1] %v4031_v10  ;;  %v3451_v8 = vsub.f32 %v10826_v36, %v10788_v13  ;;  %v3452_v22 = vsub.f32 %v10829_v19, %v10788_v13  ;;  %v3453_v2 = vsub.f32 %v10832_v59, %v10788_v13  ;;  %v3472_v59 = vmax.f32 %v3440_v25, 0.0 }
 0x2ee   : > { %v3454_v3 = vsub.f32 %v10835_v1, %v10788_v13  ;;  %v3455_v6 = vsub.f32 %v10838_v49, %v10788_v13  ;;  %v3456_v23 = vsub.f32 %v10841_v44, %v10788_v13  ;;  %v3457_v24 = vsub.f32 %v10846_v30, %v10788_v13 }
 0x2ef   : > { %v3458_v29 = vsub.f32 %v10849_v52, %v10788_v13  ;;  %v3459_v5 = vsub.f32 %v10852_v42, %v10788_v13  ;;  %v3460_v17 = vsub.f32 %v10855_v61, %v10788_v13  ;;  %v3461_v37 = vsub.f32 %v10858_v16, %v10788_v13 }
 0x2f0   : > { %v3462_v18 = vsub.f32 %v10861_v31, %v10788_v13  ;;  %v3463_v46 = vsub.f32 %v10865_v26, %v10788_v13  ;;  %v3464_v54 = vsub.f32 %v10868_v11, %v10788_v13  ;;  %v3465_v14 = vsub.f32 %v10871_v7, %v10788_v13 }
 0x2f1   : > { %v3466_v51 = vsub.f32 %v10874_v34, %v10788_v13  ;;  %v3467_v45 = vsub.f32 %v10877_v41, %v10788_v13  ;;  %v3468_v36 = vsub.f32 %v10882_v20, %v10788_v13  ;;  %v3469_v19 = vsub.f32 %v10885_v27, %v10788_v13 }
 0x2f2   : > { %v3473_v1 = vmax.f32 %v3441_v38, 0.0  ;;  %v3474_v49 = vmax.f32 %v3442_v15, 0.0  ;;  %v3475_v44 = vmax.f32 %v3443_v12, 0.0  ;;  %v3476_v58 = vmax.f32 %v3444_v32, 0.0 }
 0x2f3   : > { %v3477_v30 = vmax.f32 %v3445_v33, 0.0  ;;  %v3478_v52 = vmax.f32 %v3446_v60, 0.0  ;;  %v3479_v42 = vmax.f32 %v3447_v56, 0.0  ;;  %v3480_v16 = vmax.f32 %v3448_v9, 0.0 }
 0x2f4   : > { %v4208_v61 = vld [vmem:[#allocation3 + $0xc4] sm:$0x8]  ;;  %v3481_v31 = vmax.f32 %v3449_v57, 0.0  ;;  %v10953_v0 = vpack.c.bf16 %v3472_v59, %v3472_v59  ;;  %v10955_v4 = vpack.c.bf16 %v3473_v1, %v3473_v1  ;;  %v4330_v26 = vld [vmem:[#allocation3 + $0xc8] sm:$0x1]  ;;  %v3482_v11 = vmax.f32 %v3450_v35, 0.0 }
 0x2f5   : > { %v7271_v40 = vrot.slane %v4208_v61, 11  ;;  %v3483_v7 = vmax.f32 %v3451_v8, 0.0  ;;  %v3484_v13 = vmax.f32 %v3452_v22, 0.0  ;;  %v3485_v34 = vmax.f32 %v3453_v2, 0.0 }
 0x2f6   : > { %v3486_v41 = vmax.f32 %v3454_v3, 0.0  ;;  %v3487_v21 = vmax.f32 %v3455_v6, 0.0  ;;  %v3488_v20 = vmax.f32 %v3456_v23, 0.0  ;;  %v3489_v25 = vmax.f32 %v3457_v24, 0.0 }
 0x2f7   : > { %v4331_v48 = vsel %vm9738_vm8, %v7271_v40, %v4330_v26  ;;  %v3490_v38 = vmax.f32 %v3458_v29, 0.0  ;;  %v3491_v15 = vmax.f32 %v3459_v5, 0.0  ;;  %v3492_v63 = vmax.f32 %v3460_v17, 0.0 }
 0x2f8   : > { %4332 = vst [vmem:[#allocation3 + $0xc8] sm:$0x1] %v4331_v48  ;;  %v3493_v53 = vmax.f32 %v3461_v37, 0.0  ;;  %v3494_v50 = vmax.f32 %v3462_v18, 0.0  ;;  %v3495_v12 = vmax.f32 %v3463_v46, 0.0  ;;  %v3496_v32 = vmax.f32 %v3464_v54, 0.0 }
 0x2f9   : > { %v3497_v33 = vmax.f32 %v3465_v14, 0.0  ;;  %v3498_v60 = vmax.f32 %v3466_v51, 0.0  ;;  %v3499_v56 = vmax.f32 %v3467_v45, 0.0  ;;  %v3500_v39 = vmax.f32 %v3468_v36, 0.0 }
 0x2fa   : > { %v3501_v10 = vmax.f32 %v3469_v19, 0.0  ;;  %v7425_v9 = vpack.c.bf16 %v3474_v49, %v3474_v49  ;;  %v7426_v57 = vpack.c.bf16 %v3475_v44, %v3475_v44  ;;  %v7427_v35 = vpack.c.bf16 %v3476_v58, %v3476_v58 }
 0x2fb   : > { %v7428_v8 = vpack.c.bf16 %v3477_v30, %v3477_v30  ;;  %v10959_v22 = vpack.c.bf16 %v3478_v52, %v3478_v52  ;;  %v10961_v2 = vpack.c.bf16 %v3479_v42, %v3479_v42  ;;  %v10963_v3 = vpack.c.bf16 %v3480_v16, %v3480_v16 }
 0x2fc   : > { %v10965_v6 = vpack.c.bf16 %v3481_v31, %v3481_v31  ;;  %v10967_v23 = vpack.c.bf16 %v3482_v11, %v3482_v11  ;;  %v10969_v24 = vpack.c.bf16 %v3483_v7, %v3483_v7  ;;  %v10971_v29 = vpack.c.bf16 %v3484_v13, %v3484_v13 }
 0x2fd   : > { %v10973_v5 = vpack.c.bf16 %v3485_v34, %v3485_v34  ;;  %v10975_v17 = vpack.c.bf16 %v3486_v41, %v3486_v41  ;;  %v10977_v37 = vpack.c.bf16 %v3487_v21, %v3487_v21  ;;  %v10979_v18 = vpack.c.bf16 %v3488_v20, %v3488_v20 }
 0x2fe   : > { %v10981_v46 = vpack.c.bf16 %v3489_v25, %v3489_v25  ;;  %v10983_v54 = vpack.c.bf16 %v3490_v38, %v3490_v38  ;;  %v10985_v14 = vpack.c.bf16 %v3491_v15, %v3491_v15  ;;  %v10987_v51 = vpack.c.bf16 %v3492_v63, %v3492_v63 }
 0x2ff   : > { %v10989_v45 = vpack.c.bf16 %v3493_v53, %v3493_v53  ;;  %v10991_v36 = vpack.c.bf16 %v3494_v50, %v3494_v50  ;;  %v10993_v19 = vpack.c.bf16 %v3495_v12, %v3495_v12  ;;  %v10995_v59 = vpack.c.bf16 %v3496_v32, %v3496_v32  ;;  %v3967_v12 = vld [vmem:[#allocation3 + $0x5c] sm:$0x1] }
 0x300   : > { %v10997_v1 = vpack.c.bf16 %v3497_v33, %v3497_v33  ;;  %v10999_v49 = vpack.c.bf16 %v3498_v60, %v3498_v60  ;;  %v11001_v44 = vpack.c.bf16 %v3499_v56, %v3499_v56  ;;  %v11003_v58 = vpack.c.bf16 %v3500_v39, %v3500_v39 }
 0x301   : > { %v11005_v30 = vpack.c.bf16 %v3501_v10, %v3501_v10  ;;  %v3601_v52 = vshrl.u32 %v10953_v0, 16  ;;  %v3604_v42 = vshll.u32 %v10953_v0, 16  ;;  %v3609_v61 = vshrl.u32 %v10955_v4, 16 }
 0x302   : > { %v3612_v16 = vshll.u32 %v10955_v4, 16  ;;  %v3618_v31 = vshrl.u32 %v7425_v9, 16  ;;  %v3621_v40 = vshll.u32 %v7425_v9, 16  ;;  %v3626_v11 = vshrl.u32 %v7426_v57, 16  ;;  %v3974_v4 = vld [vmem:[#allocation3 + $0x68] sm:$0x1] }
 0x303   : > { %v3603_v26 = vrot.slane %v3601_v52, 7  ;;  %v3629_v7 = vshll.u32 %v7426_v57, 16  ;;  %v3635_v13 = vshrl.u32 %v7427_v35, 16  ;;  %v11011_v34 = vrot.slane %v3609_v61, 7  ;;  %v3963_v61 = vld [vmem:[#allocation3 + $0x54] sm:$0xf] }
 0x304   : > { %v3620_v41 = vrot.slane %v3618_v31, 7  ;;  %v3638_v21 = vshll.u32 %v7427_v35, 16  ;;  %v3643_v20 = vshrl.u32 %v7428_v8, 16  ;;  %v11015_v38 = vrot.slane %v3626_v11, 7 }
 0x305   : > { %v11013_v48 = vor.u32 %v3604_v42, %v3603_v26  ;;  %v3607_v25 = vrot.slane %v3603_v26, 4  ;;  %v3637_v0 = vrot.slane %v3635_v13, 7  ;;  %v3614_v15 = vor.u32 %v3612_v16, %v11011_v34 }
 0x306   : > { %v11019_v63 = vor.u32 %v3621_v40, %v3620_v41  ;;  %v3624_v53 = vrot.slane %v3620_v41, 4  ;;  %v3631_v50 = vor.u32 %v3629_v7, %v11015_v38  ;;  %v11027_v56 = vrot.slane %v3643_v20, 7 }
 0x307   : > { %v11023_v32 = vor.u32 %v3638_v21, %v3637_v0  ;;  %v3641_v33 = vrot.slane %v3637_v0, 4  ;;  %v3615_v60 = vsel %vm9690_vm5, %v3607_v25, %v3614_v15  ;;  %v3646_v39 = vshll.u32 %v7428_v8, 16  ;;  %v3956_v21 = vld [vmem:[#allocation3 + $0x48] sm:$0xf] }
 0x308   : > { %v3652_v10 = vshrl.u32 %v10959_v22, 16  ;;  %v3632_v9 = vsel %vm9690_vm5, %v3624_v53, %v3631_v50  ;;  %v3655_v57 = vshll.u32 %v10959_v22, 16  ;;  %v3660_v35 = vshrl.u32 %v10961_v2, 16  ;;  %3924 = vst [vmem:[#allocation3 + $0x10] sm:$0xf] %v3615_v60 }
 0x309   : > { %v3663_v52 = vshll.u32 %v10961_v2, 16  ;;  %v3648_v42 = vor.u32 %v3646_v39, %v11027_v56  ;;  %v3669_v31 = vshrl.u32 %v10963_v3, 16  ;;  %3931 = vst [vmem:[#allocation3 + $0x1c] sm:$0xf] %v3632_v9  ;;  %4036 = vst [vmem:[#allocation3 + $0x4] sm:$0xf] %v3632_v9 }
 0x30a   : > { %v3654_v16 = vrot.slane %v3652_v10, 7  ;;  %v11038_v8 = vrot.slane %v3660_v35, 7  ;;  %v3672_v40 = vshll.u32 %v10963_v3, 16  ;;  %v3677_v22 = vshrl.u32 %v10965_v6, 16 }
 0x30b   : > { %v3680_v26 = vshll.u32 %v10965_v6, 16  ;;  %v3649_v2 = vsel %vm9690_vm5, %v3641_v33, %v3648_v42  ;;  %v3671_v13 = vrot.slane %v3669_v31, 7  ;;  %v3686_v25 = vshrl.u32 %v10967_v23, 16  ;;  %v3953_v33 = vld [vmem:[#allocation3 + $0x44] sm:$0x1] }
 0x30c   : > { %v11045_v11 = vor.u32 %v3655_v57, %v3654_v16  ;;  %v3658_v7 = vrot.slane %v3654_v16, 4  ;;  %v3665_v41 = vor.u32 %v3663_v52, %v11038_v8  ;;  %v11049_v20 = vrot.slane %v3677_v22, 7  ;;  %3938 = vst [vmem:[#allocation3 + $0x28] sm:$0xf] %v3649_v2  ;;  %v9185_v22 = vld [vmem:[#allocation9 + $0x40] sm:$0xff]  }
 0x30d   : > { %v11052_v3 = vor.u32 %v3672_v40, %v3671_v13  ;;  %v3675_v0 = vrot.slane %v3671_v13, 4  ;;  %v3689_v6 = vshll.u32 %v10967_v23, 16  ;;  %v3694_v15 = vshrl.u32 %v10969_v24, 16  ;;  %8000 = vmatprep.subr.bf16.mxu0 %v9185_v22 }
 0x30e   : > { %v3666_v53 = vsel %vm9690_vm5, %v3658_v7, %v3665_v41  ;;  %v3682_v50 = vor.u32 %v3680_v26, %v11049_v20  ;;  %v3688_v60 = vrot.slane %v3686_v25, 7  ;;  %v3697_v10 = vshll.u32 %v10969_v24, 16 }
 0x30f   : > { %v11060_v39 = vrot.slane %v3694_v15, 7  ;;  %v3703_v9 = vshrl.u32 %v10971_v29, 16  ;;  %v3706_v57 = vshll.u32 %v10971_v29, 16  ;;  %3945 = vst [vmem:[#allocation3 + $0x34] sm:$0xf] %v3666_v53  ;;  %v3711_v42 = vshrl.u32 %v10973_v5, 16 }
 0x310   : > { %v3683_v23 = vsel %vm9690_vm5, %v3675_v0, %v3682_v50  ;;  %v11067_v35 = vor.u32 %v3689_v6, %v3688_v60  ;;  %v3692_v52 = vrot.slane %v3688_v60, 4  ;;  %v3714_v24 = vshll.u32 %v10973_v5, 16  ;;  %v3946_v6 = vld [vmem:[#allocation3 + $0x38] sm:$0x1] }
 0x311   : > { %v3699_v16 = vor.u32 %v3697_v10, %v11060_v39  ;;  %v3705_v40 = vrot.slane %v3703_v9, 7  ;;  %3952 = vst [vmem:[#allocation3 + $0x40] sm:$0xf] %v3683_v23  ;;  %v11073_v26 = vrot.slane %v3711_v42, 7  ;;  %v3720_v29 = vshrl.u32 %v10975_v17, 16 }
 0x312   : > { %v3723_v2 = vshll.u32 %v10975_v17, 16  ;;  %v3728_v7 = vshrl.u32 %v10977_v37, 16  ;;  %v3731_v0 = vshll.u32 %v10977_v37, 16  ;;  %v3737_v17 = vshrl.u32 %v10979_v18, 16 }
 0x313   : > { %v3700_v13 = vsel %vm9690_vm5, %v3692_v52, %v3699_v16  ;;  %v11080_v41 = vor.u32 %v3706_v57, %v3705_v40  ;;  %v3709_v25 = vrot.slane %v3705_v40, 4  ;;  %v3716_v5 = vor.u32 %v3714_v24, %v11073_v26  ;;  %v3942_v52 = vld [vmem:[#allocation3 + $0x30] sm:$0xf] }
 0x314   : > { %v3722_v15 = vrot.slane %v3720_v29, 7  ;;  %v11085_v53 = vrot.slane %v3728_v7, 7  ;;  %3959 = vst [vmem:[#allocation3 + $0x4c] sm:$0xf] %v3700_v13  ;;  %v3740_v50 = vshll.u32 %v10979_v18, 16  ;;  %v3745_v60 = vshrl.u32 %v10981_v46, 16 }
 0x315   : > { %v3748_v10 = vshll.u32 %v10981_v46, 16  ;;  %v3717_v37 = vsel %vm9690_vm5, %v3709_v25, %v3716_v5  ;;  %v3739_v42 = vrot.slane %v3737_v17, 7  ;;  %v3754_v40 = vshrl.u32 %v10983_v54, 16  ;;  %v3939_v13 = vld [vmem:[#allocation3 + $0x2c] sm:$0x1] }
 0x316   : > { %v11093_v9 = vor.u32 %v3723_v2, %v3722_v15  ;;  %v3726_v57 = vrot.slane %v3722_v15, 4  ;;  %v3733_v23 = vor.u32 %v3731_v0, %v11085_v53  ;;  %v11097_v16 = vrot.slane %v3745_v60, 7  ;;  %3966 = vst [vmem:[#allocation3 + $0x58] sm:$0xf] %v3717_v37 }
 0x317   : > { %v3757_v46 = vshll.u32 %v10983_v54, 16  ;;  %v3762_v24 = vshrl.u32 %v10985_v14, 16  ;;  %v3765_v22 = vshll.u32 %v10985_v14, 16  ;;  %v11105_v29 = vor.u32 %v3740_v50, %v3739_v42 }
 0x318   : > { %v3734_v18 = vsel %vm9690_vm5, %v3726_v57, %v3733_v23  ;;  %v3743_v2 = vrot.slane %v3739_v42, 4  ;;  %v3750_v7 = vor.u32 %v3748_v10, %v11097_v16  ;;  %v3756_v25 = vrot.slane %v3754_v40, 7 }
 0x319   : > { %3973 = vst [vmem:[#allocation3 + $0x64] sm:$0xf] %v3734_v18  ;;  %v11109_v0 = vrot.slane %v3762_v24, 7  ;;  %v3771_v5 = vshrl.u32 %v10987_v51, 16  ;;  %v3774_v15 = vshll.u32 %v10987_v51, 16  ;;  %v3779_v14 = vshrl.u32 %v10989_v45, 16 }
 0x31a   : > { %v3751_v54 = vsel %vm9690_vm5, %v3743_v2, %v3750_v7  ;;  %v3782_v17 = vshll.u32 %v10989_v45, 16  ;;  %v3788_v50 = vshrl.u32 %v10991_v36, 16  ;;  %v11118_v60 = vor.u32 %v3757_v46, %v3756_v25 }
 0x31b   : > { %v3760_v10 = vrot.slane %v3756_v25, 4  ;;  %v3767_v37 = vor.u32 %v3765_v22, %v11109_v0  ;;  %3980 = vst [vmem:[#allocation3 + $0x70] sm:$0xf] %v3751_v54  ;;  %v3773_v23 = vrot.slane %v3771_v5, 7  ;;  %v11122_v42 = vrot.slane %v3779_v14, 7 }
 0x31c   : > { %v3790_v51 = vrot.slane %v3788_v50, 7  ;;  %v3791_v40 = vshll.u32 %v10991_v36, 16  ;;  %v3796_v45 = vshrl.u32 %v10993_v19, 16  ;;  %v3799_v46 = vshll.u32 %v10993_v19, 16 }
 0x31d   : > { %v3768_v18 = vsel %vm9690_vm5, %v3760_v10, %v3767_v37  ;;  %v3805_v24 = vshrl.u32 %v10995_v59, 16  ;;  %v11130_v2 = vor.u32 %v3774_v15, %v3773_v23  ;;  %v3777_v22 = vrot.slane %v3773_v23, 4 }
 0x31e   : > { %v3784_v7 = vor.u32 %v3782_v17, %v11122_v42  ;;  %3987 = vst [vmem:[#allocation3 + $0x7c] sm:$0xf] %v3768_v18  ;;  %v11134_v5 = vor.u32 %v3791_v40, %v3790_v51  ;;  %v3794_v36 = vrot.slane %v3790_v51, 4  ;;  %v11136_v54 = vrot.slane %v3796_v45, 7 }
 0x31f   : > { %v3807_v14 = vrot.slane %v3805_v24, 7  ;;  %v3808_v19 = vshll.u32 %v10995_v59, 16  ;;  %v3813_v15 = vshrl.u32 %v10997_v1, 16  ;;  %v3816_v10 = vshll.u32 %v10997_v1, 16  ;;  %v3921_v24 = vld [vmem:[#allocation3 + $0xc] sm:$0xf] }
 0x320   : > { %v3785_v50 = vsel %vm9690_vm5, %v3777_v22, %v3784_v7  ;;  %v3801_v17 = vor.u32 %v3799_v46, %v11136_v54  ;;  %v3822_v40 = vshrl.u32 %v10999_v49, 16  ;;  %v3825_v45 = vshll.u32 %v10999_v49, 16  ;;  %v3925_v22 = vld [vmem:[#allocation3 + $0x14] sm:$0x1]  ;;  %v3928_v7 = vld [vmem:[#allocation3 + $0x18] sm:$0xf] }
 0x321   : > { %v3811_v23 = vrot.slane %v3807_v14, 4  ;;  %3994 = vst [vmem:[#allocation3 + $0x88] sm:$0xf] %v3785_v50  ;;  %v11146_v51 = vor.u32 %v3808_v19, %v3807_v14  ;;  %v11148_v18 = vrot.slane %v3813_v15, 7  ;;  %v3830_v59 = vshrl.u32 %v11001_v44, 16 }
 0x322   : > { %v3802_v1 = vsel %vm9690_vm5, %v3794_v36, %v3801_v17  ;;  %v3824_v46 = vrot.slane %v3822_v40, 7  ;;  %v3833_v37 = vshll.u32 %v11001_v44, 16  ;;  %v3839_v25 = vshrl.u32 %v11003_v58, 16  ;;  %v3932_v50 = vld [vmem:[#allocation3 + $0x20] sm:$0x1] }
 0x323   : > { %v3935_v14 = vld [vmem:[#allocation3 + $0x24] sm:$0xf]  ;;  %v3818_v19 = vor.u32 %v3816_v10, %v11148_v18  ;;  %v11158_v49 = vrot.slane %v3830_v59, 7  ;;  %v3842_v57 = vshll.u32 %v11003_v58, 16  ;;  %4001 = vst [vmem:[#allocation3 + $0x94] sm:$0xf] %v3802_v1  ;;  %v3922_v58 = vsel %vm9697_vm6, %v11013_v48, %v3921_v24 }
 0x324   : > { %v3949_v36 = vld [vmem:[#allocation3 + $0x3c] sm:$0xf]  ;;  %v11161_v17 = vor.u32 %v3825_v45, %v3824_v46  ;;  %v3828_v44 = vrot.slane %v3824_v46, 4  ;;  %v3841_v40 = vrot.slane %v3839_v25, 7  ;;  %v3847_v31 = vshrl.u32 %v11005_v30, 16 }
 0x325   : > { %v3960_v10 = vld [vmem:[#allocation3 + $0x50] sm:$0x1]  ;;  %v3819_v59 = vsel %vm9690_vm5, %v3811_v23, %v3818_v19  ;;  %v3835_v15 = vor.u32 %v3833_v37, %v11158_v49  ;;  %v3850_v1 = vshll.u32 %v11005_v30, 16  ;;  %v3970_v45 = vld [vmem:[#allocation3 + $0x60] sm:$0xf]  ;;  %v12764_v27 = vshll.u32 %v10843_v62, 16 }
 0x326   : > { %12763 = vst [vmem:[#allocation21_spill] sm:$0xff] %v11161_v17  ;;  %v11169_v46 = vor.u32 %v3842_v57, %v3841_v40  ;;  %v3845_v25 = vrot.slane %v3841_v40, 4  ;;  %v11171_v47 = vrot.slane %v3847_v31, 7  ;;  %4008 = vst [vmem:[#allocation3 + $0xa0] sm:$0xf] %v3819_v59  ;;  %v12766_v57 = vrot.slane %v11011_v34, 4 }
 0x327   : > { %v11176_v17 = vor.u32 %v12764_v27, %v10879_v55  ;;  %v3977_v37 = vld [vmem:[#allocation3 + $0x6c] sm:$0xf]  ;;  %v3981_v23 = vld [vmem:[#allocation3 + $0x74] sm:$0x1]  ;;  %v3836_v30 = vsel %vm9690_vm5, %v3828_v44, %v3835_v15  ;;  %v3929_v62 = vsel %vm9697_vm6, %v11019_v63, %v3928_v7  ;;  %v3984_v55 = vld [vmem:[#allocation3 + $0x78] sm:$0xf]  ;;  %v3936_v24 = vsel %vm9697_vm6, %v11023_v32, %v3935_v14 }
 0x328   : > { %v3926_v31 = vsel %vm9705_vm7, %v12766_v57, %v3925_v22  ;;  %v3988_v27 = vld [vmem:[#allocation3 + $0x80] sm:$0x1]  ;;  %v3852_v40 = vor.u32 %v3850_v1, %v11171_v47  ;;  %v3854_v59 = vrot.slane %v11171_v47, 4  ;;  %3923 = vst [vmem:[#allocation3 + $0xc] sm:$0xf] %v3922_v58  ;;  %v12767_v48 = vrot.slane %v11015_v38, 4 }
 0x329   : > { %3927 = vst [vmem:[#allocation3 + $0x14] sm:$0x1] %v3926_v31  ;;  %3930 = vst [vmem:[#allocation3 + $0x18] sm:$0xf] %v3929_v62  ;;  %v3991_v22 = vld [vmem:[#allocation3 + $0x84] sm:$0xf]  ;;  %v3943_v1 = vsel %vm9697_vm6, %v11045_v11, %v3942_v52  ;;  %v3950_v14 = vsel %vm9697_vm6, %v11052_v3, %v3949_v36  ;;  %v3957_v3 = vsel %vm9697_vm6, %v11067_v35, %v3956_v21 }
 0x32a   : > { %v3933_v34 = vsel %vm9705_vm7, %v12767_v48, %v3932_v50  ;;  %4015 = vst [vmem:[#allocation3 + $0xac] sm:$0xf] %v3836_v30  ;;  %v3995_v7 = vld [vmem:[#allocation3 + $0x8c] sm:$0x1]  ;;  %v3998_v15 = vld [vmem:[#allocation3 + $0x90] sm:$0xf] }
 0x32b   : > { %3934 = vst [vmem:[#allocation3 + $0x20] sm:$0x1] %v3933_v34  ;;  %3937 = vst [vmem:[#allocation3 + $0x24] sm:$0xf] %v3936_v24  ;;  %v12768_v44 = vrot.slane %v11027_v56, 4  ;;  %v12769_v50 = vrot.slane %v11038_v8, 4 }
 0x32c   : > { %v11213_v30 = vld [vmem:[#allocation3] sm:$0xf]  ;;  %v4002_v57 = vld [vmem:[#allocation3 + $0x98] sm:$0x1]  ;;  %v4005_v56 = vld [vmem:[#allocation3 + $0x9c] sm:$0xf] }
 0x32d   : > { %v3940_v58 = vsel %vm9705_vm7, %v12768_v44, %v3939_v13  ;;  %v3947_v32 = vsel %vm9705_vm7, %v12769_v50, %v3946_v6  ;;  %v3853_v13 = vsel %vm9690_vm5, %v3845_v25, %v3852_v40  ;;  %3944 = vst [vmem:[#allocation3 + $0x30] sm:$0xf] %v3943_v1  ;;  %3951 = vst [vmem:[#allocation3 + $0x3c] sm:$0xf] %v3950_v14  ;;  %v12770_v8 = vrot.slane %v11049_v20, 4 }
 0x32e   : > { %3941 = vst [vmem:[#allocation3 + $0x2c] sm:$0x1] %v3940_v58  ;;  %3948 = vst [vmem:[#allocation3 + $0x38] sm:$0x1] %v3947_v32  ;;  %v12771_v6 = vrot.slane %v11060_v39, 4  ;;  %v3964_v20 = vsel %vm9697_vm6, %v11080_v41, %v3963_v61  ;;  %v3971_v39 = vsel %vm9697_vm6, %v11093_v9, %v3970_v45  ;;  %v12773_v35 = vrot.slane %v11085_v53, 4 }
 0x32f   : > { %v3954_v11 = vsel %vm9705_vm7, %v12770_v8, %v3953_v33  ;;  %v4009_v36 = vld [vmem:[#allocation3 + $0xa4] sm:$0x1]  ;;  %v4012_v25 = vld [vmem:[#allocation3 + $0xa8] sm:$0xf]  ;;  %v4016_v31 = vld [vmem:[#allocation3 + $0xb0] sm:$0x1] }
 0x330   : > { %v3961_v52 = vsel %vm9705_vm7, %v12771_v6, %v3960_v10  ;;  %3955 = vst [vmem:[#allocation3 + $0x44] sm:$0x1] %v3954_v11  ;;  %3958 = vst [vmem:[#allocation3 + $0x48] sm:$0xf] %v3957_v3  ;;  %v12772_v33 = vrot.slane %v11073_v26, 4  ;;  %v3975_v10 = vsel %vm9705_vm7, %v12773_v35, %v3974_v4  ;;  %v12774_v61 = vrot.slane %v11097_v16, 4 }
 0x331   : > { %3962 = vst [vmem:[#allocation3 + $0x50] sm:$0x1] %v3961_v52  ;;  %4022 = vst [vmem:[#allocation3 + $0xb8] sm:$0xf] %v3853_v13  ;;  %v4019_v62 = vld [vmem:[#allocation3 + $0xb4] sm:$0xf]  ;;  %v3985_v4 = vsel %vm9697_vm6, %v11118_v60, %v3984_v55  ;;  %v3992_v16 = vsel %vm9697_vm6, %v11130_v2, %v3991_v22  ;;  %v4034_v22 = vsel %vm9697_vm6, %v11019_v63, %v11213_v30 }
 0x332   : > { %v3968_v21 = vsel %vm9705_vm7, %v12772_v33, %v3967_v12  ;;  %4044 = vst [vmem:[#allocation3 + $0xd0] sm:$0xf] %v3853_v13  ;;  %v4023_v40 = vld [vmem:[#allocation3 + $0xbc] sm:$0x1]  ;;  %v4026_v48 = vld [vmem:[#allocation3 + $0xc0] sm:$0xf]  ;;  %v3978_v12 = vsel %vm9697_vm6, %v11105_v29, %v3977_v37  ;;  %v3982_v26 = vsel %vm9705_vm7, %v12774_v61, %v3981_v23 }
 0x333   : > { %3965 = vst [vmem:[#allocation3 + $0x54] sm:$0xf] %v3964_v20  ;;  %3969 = vst [vmem:[#allocation3 + $0x5c] sm:$0x1] %v3968_v21  ;;  %v12775_v41 = vrot.slane %v11109_v0, 4  ;;  %v12776_v29 = vrot.slane %v11122_v42, 4  ;;  %v3999_v0 = vsel %vm9697_vm6, %v11134_v5, %v3998_v15  ;;  %v4006_v42 = vsel %vm9697_vm6, %v11146_v51, %v4005_v56 }
 0x334   : > { %3972 = vst [vmem:[#allocation3 + $0x60] sm:$0xf] %v3971_v39  ;;  %3976 = vst [vmem:[#allocation3 + $0x68] sm:$0x1] %v3975_v10  ;;  %v4041_v9 = vld [vmem:[#allocation3 + $0xcc] sm:$0xf]  ;;  %v4020_v51 = vsel %vm9697_vm6, %v11169_v46, %v4019_v62 }
 0x335   : > { %v3989_v53 = vsel %vm9705_vm7, %v12775_v41, %v3988_v27  ;;  %v4045_v45 = vld [vmem:[#allocation3 + $0xd4] sm:$0x1]  ;;  %3979 = vst [vmem:[#allocation3 + $0x6c] sm:$0xf] %v3978_v12  ;;  %3983 = vst [vmem:[#allocation3 + $0x74] sm:$0x1] %v3982_v26  ;;  %v3996_v60 = vsel %vm9705_vm7, %v12776_v29, %v3995_v7 }
 0x336   : > { %3986 = vst [vmem:[#allocation3 + $0x78] sm:$0xf] %v3985_v4  ;;  %3990 = vst [vmem:[#allocation3 + $0x80] sm:$0x1] %v3989_v53  ;;  %v12777_v37 = vrot.slane %v11136_v54, 4  ;;  %v12778_v2 = vrot.slane %v11148_v18, 4  ;;  %v4024_v18 = vsel %vm9705_vm7, %v3854_v59, %v4023_v40  ;;  %v4046_v63 = vsel %vm9705_vm7, %v3854_v59, %v4045_v45 }
 0x337   : > { %3993 = vst [vmem:[#allocation3 + $0x84] sm:$0xf] %v3992_v16  ;;  %3997 = vst [vmem:[#allocation3 + $0x8c] sm:$0x1] %v3996_v60  ;;  %v12779_v27 = vld [vmem:[#allocation21_spill] sm:$0xff]  ;;  %v12780_v54 = vrot.slane %v11158_v49, 4  ;;  %v4027_v49 = vsel %vm9697_vm6, %v11176_v17, %v4026_v48  ;;  %v4042_v17 = vsel %vm9697_vm6, %v11169_v46, %v4041_v9 }
 0x338   : > { %v4003_v23 = vsel %vm9705_vm7, %v12777_v37, %v4002_v57  ;;  %4000 = vst [vmem:[#allocation3 + $0x90] sm:$0xf] %v3999_v0  ;;  %v4010_v55 = vsel %vm9705_vm7, %v12778_v2, %v4009_v36  ;;  %v4013_v5 = vsel %vm9697_vm6, %v12779_v27, %v4012_v25  ;;  %v11284_v24 = vld [vmem:[#allocation3 + $0x4] sm:$0x8]  ;;  %4007 = vst [vmem:[#allocation3 + $0x9c] sm:$0xf] %v4006_v42 }
 0x339   : > { %4004 = vst [vmem:[#allocation3 + $0x98] sm:$0x1] %v4003_v23  ;;  %v4017_v34 = vsel %vm9705_vm7, %v12780_v54, %v4016_v31  ;;  %4011 = vst [vmem:[#allocation3 + $0xa4] sm:$0x1] %v4010_v55  ;;  %v4049_v7 = vld [vmem:[#allocation3 + $0xc] sm:$0x2] }
 0x33a   : > { %4014 = vst [vmem:[#allocation3 + $0xa8] sm:$0xf] %v4013_v5  ;;  %4018 = vst [vmem:[#allocation3 + $0xb0] sm:$0x1] %v4017_v34  ;;  %v4050_v15 = vld [vmem:[#allocation3 + $0x18] sm:$0x2] }
 0x33b   : > { %v4141_v44 = vld [vmem:[#allocation3 + $0xc] sm:$0x1]  ;;  %4021 = vst [vmem:[#allocation3 + $0xb4] sm:$0xf] %v4020_v51  ;;  %4025 = vst [vmem:[#allocation3 + $0xbc] sm:$0x1] %v4024_v18 }
 0x33c   : > { %4028 = vst [vmem:[#allocation3 + $0xc0] sm:$0xf] %v4027_v49  ;;  %4035 = vst [vmem:[#allocation3] sm:$0xf] %v4034_v22  ;;  %v12781_v58 = vrot.slane %v11015_v38, 4  ;;  %v7238_v32 = vrot.slane %v4049_v7, 9 }
 0x33d   : > { %v4051_v50 = vld [vmem:[#allocation3 + $0x24] sm:$0x2]  ;;  %v4144_v14 = vld [vmem:[#allocation3 + $0x18] sm:$0x1]  ;;  %4043 = vst [vmem:[#allocation3 + $0xcc] sm:$0xf] %v4042_v17 }
 0x33e   : > { %v4038_v1 = vsel %vm9705_vm7, %v12781_v58, %v4037_v43  ;;  %4047 = vst [vmem:[#allocation3 + $0xd4] sm:$0x1] %v4046_v63  ;;  %v4052_v30 = vld [vmem:[#allocation3 + $0x30] sm:$0x2]  ;;  %v4053_v38 = vld [vmem:[#allocation3 + $0x3c] sm:$0x2]  ;;  %v4142_v46 = vsel %vm9705_vm7, %v7238_v32, %v4141_v44 }
 0x33f   : > { %4039 = vst [vmem:[#allocation3 + $0x8] sm:$0x1] %v4038_v1  ;;  %v7239_v57 = vrot.slane %v4050_v15, 9  ;;  %v7240_v56 = vrot.slane %v4051_v50, 9  ;;  %v4054_v13 = vld [vmem:[#allocation3 + $0x48] sm:$0x2] }
 0x340   : > { %v7241_v8 = vrot.slane %v4052_v30, 9  ;;  %v7242_v11 = vrot.slane %v4053_v38, 9  ;;  %v4147_v47 = vld [vmem:[#allocation3 + $0x24] sm:$0x1]  ;;  %v4055_v19 = vld [vmem:[#allocation3 + $0x54] sm:$0x2] }
 0x341   : > { %v4056_v3 = vld [vmem:[#allocation3 + $0x60] sm:$0x2]  ;;  %v7243_v59 = vrot.slane %v4054_v13, 9  ;;  %4143 = vst [vmem:[#allocation3 + $0xc] sm:$0x1] %v4142_v46  ;;  %v4145_v6 = vsel %vm9705_vm7, %v7239_v57, %v4144_v14  ;;  %v4148_v52 = vsel %vm9705_vm7, %v7240_v56, %v4147_v47  ;;  %v7255_v43 = vrot.slane %v11284_v24, 11 }
 0x342   : > { %v4057_v36 = vld [vmem:[#allocation3 + $0x6c] sm:$0x2]  ;;  %v4058_v25 = vld [vmem:[#allocation3 + $0x78] sm:$0x2]  ;;  %v7244_v31 = vrot.slane %v4055_v19, 9  ;;  %v7245_v20 = vrot.slane %v4056_v3, 9 }
 0x343   : > { %4146 = vst [vmem:[#allocation3 + $0x18] sm:$0x1] %v4145_v6  ;;  %4149 = vst [vmem:[#allocation3 + $0x24] sm:$0x1] %v4148_v52  ;;  %v4059_v33 = vld [vmem:[#allocation3 + $0x84] sm:$0x2] }
 0x344   : > { %v4060_v21 = vld [vmem:[#allocation3 + $0x90] sm:$0x2]  ;;  %v7246_v39 = vrot.slane %v4057_v36, 9  ;;  %v7247_v35 = vrot.slane %v4058_v25, 9  ;;  %v4061_v10 = vld [vmem:[#allocation3 + $0x9c] sm:$0x2] }
 0x345   : > { %v11318_v62 = vld [vmem:[#allocation3 + $0xa8] sm:$0x2]  ;;  %v7248_v40 = vrot.slane %v4059_v33, 9  ;;  %v7249_v48 = vrot.slane %v4060_v21, 9  ;;  %v4048_v12 = vld [vmem:[#allocation3] sm:$0x2] }
 0x346   : > { %v4063_v61 = vld [vmem:[#allocation3 + $0xb4] sm:$0x2]  ;;  %v4064_v26 = vld [vmem:[#allocation3 + $0xc0] sm:$0x2]  ;;  %v11320_v4 = vld [vmem:[#allocation3 + $0xcc] sm:$0x2] }
 0x347   : > { %v7237_v41 = vrot.slane %v4048_v12, 9  ;;  %v7250_v53 = vrot.slane %v4061_v10, 9  ;;  %v7251_v9 = vrot.slane %v11318_v62, 9  ;;  %v7252_v45 = vrot.slane %v4063_v61, 9  ;;  %v4138_v60 = vld [vmem:[#allocation3] sm:$0x1] }
 0x348   : > { %v7253_v16 = vrot.slane %v4064_v26, 9  ;;  %v7254_v29 = vrot.slane %v11320_v4, 9  ;;  %v4150_v0 = vld [vmem:[#allocation3 + $0x30] sm:$0x1]  ;;  %v4153_v42 = vld [vmem:[#allocation3 + $0x3c] sm:$0x1] }
 0x349   : > { %v4139_v37 = vsel %vm9705_vm7, %v7237_v41, %v4138_v60  ;;  %v4151_v23 = vsel %vm9705_vm7, %v7241_v8, %v4150_v0  ;;  %v4156_v2 = vld [vmem:[#allocation3 + $0x48] sm:$0x1]  ;;  %v4159_v55 = vld [vmem:[#allocation3 + $0x54] sm:$0x1]  ;;  %v11328_v27 = vld [vmem:[#allocation3 + $0x10] sm:$0x8]  ;;  %v4154_v34 = vsel %vm9705_vm7, %v7242_v11, %v4153_v42 }
 0x34a   : > { %v11330_v5 = vld [vmem:[#allocation3 + $0x1c] sm:$0x8]  ;;  %v11332_v54 = vld [vmem:[#allocation3 + $0x28] sm:$0x8]  ;;  %4140 = vst [vmem:[#allocation3] sm:$0x1] %v4139_v37  ;;  %v4157_v51 = vsel %vm9705_vm7, %v7243_v59, %v4156_v2  ;;  %v4160_v18 = vsel %vm9705_vm7, %v7244_v31, %v4159_v55 }
 0x34b   : > { %4152 = vst [vmem:[#allocation3 + $0x30] sm:$0x1] %v4151_v23  ;;  %v4162_v49 = vld [vmem:[#allocation3 + $0x60] sm:$0x1]  ;;  %v4165_v22 = vld [vmem:[#allocation3 + $0x6c] sm:$0x1] }
 0x34c   : > { %v4168_v7 = vld [vmem:[#allocation3 + $0x78] sm:$0x1]  ;;  %v11340_v15 = vld [vmem:[#allocation3 + $0x34] sm:$0x8]  ;;  %v11342_v44 = vld [vmem:[#allocation3 + $0x40] sm:$0x8]  ;;  %v4163_v17 = vsel %vm9705_vm7, %v7245_v20, %v4162_v49  ;;  %v4166_v63 = vsel %vm9705_vm7, %v7246_v39, %v4165_v22 }
 0x34d   : > { %v11344_v58 = vld [vmem:[#allocation3 + $0x4c] sm:$0x8]  ;;  %v11346_v1 = vld [vmem:[#allocation3 + $0x58] sm:$0x8]  ;;  %4155 = vst [vmem:[#allocation3 + $0x3c] sm:$0x1] %v4154_v34  ;;  %v4169_v50 = vsel %vm9705_vm7, %v7247_v35, %v4168_v7 }
 0x34e   : > { %4158 = vst [vmem:[#allocation3 + $0x48] sm:$0x1] %v4157_v51  ;;  %4161 = vst [vmem:[#allocation3 + $0x54] sm:$0x1] %v4160_v18  ;;  %v4171_v32 = vld [vmem:[#allocation3 + $0x84] sm:$0x1] }
 0x34f   : > { %v4174_v14 = vld [vmem:[#allocation3 + $0x90] sm:$0x1]  ;;  %v4177_v30 = vld [vmem:[#allocation3 + $0x9c] sm:$0x1]  ;;  %v11354_v38 = vld [vmem:[#allocation3 + $0x64] sm:$0x8]  ;;  %v4172_v8 = vsel %vm9705_vm7, %v7248_v40, %v4171_v32 }
 0x350   : > { %v11356_v57 = vld [vmem:[#allocation3 + $0x70] sm:$0x8]  ;;  %v11358_v56 = vld [vmem:[#allocation3 + $0x7c] sm:$0x8]  ;;  %v11360_v13 = vld [vmem:[#allocation3 + $0x88] sm:$0x8]  ;;  %v4175_v11 = vsel %vm9705_vm7, %v7249_v48, %v4174_v14  ;;  %v4178_v46 = vsel %vm9705_vm7, %v7250_v53, %v4177_v30 }
 0x351   : > { %4164 = vst [vmem:[#allocation3 + $0x60] sm:$0x1] %v4163_v17  ;;  %4167 = vst [vmem:[#allocation3 + $0x6c] sm:$0x1] %v4166_v63  ;;  %v4180_v47 = vld [vmem:[#allocation3 + $0xa8] sm:$0x1] }
 0x352   : > { %4170 = vst [vmem:[#allocation3 + $0x78] sm:$0x1] %v4169_v50  ;;  %v4183_v19 = vld [vmem:[#allocation3 + $0xb4] sm:$0x1]  ;;  %v4186_v3 = vld [vmem:[#allocation3 + $0xc0] sm:$0x1]  ;;  %v4181_v52 = vsel %vm9705_vm7, %v7251_v9, %v4180_v47 }
 0x353   : > { %v11368_v59 = vld [vmem:[#allocation3 + $0x94] sm:$0x8]  ;;  %v11370_v6 = vld [vmem:[#allocation3 + $0xa0] sm:$0x8]  ;;  %4173 = vst [vmem:[#allocation3 + $0x84] sm:$0x1] %v4172_v8  ;;  %v4184_v36 = vsel %vm9705_vm7, %v7252_v45, %v4183_v19  ;;  %v4187_v25 = vsel %vm9705_vm7, %v7253_v16, %v4186_v3 }
 0x354   : > { %4176 = vst [vmem:[#allocation3 + $0x90] sm:$0x1] %v4175_v11  ;;  %4179 = vst [vmem:[#allocation3 + $0x9c] sm:$0x1] %v4178_v46  ;;  %v4189_v31 = vld [vmem:[#allocation3 + $0xcc] sm:$0x1] }
 0x355   : > { %v11378_v20 = vld [vmem:[#allocation3 + $0xac] sm:$0x8]  ;;  %v11380_v33 = vld [vmem:[#allocation3 + $0xb8] sm:$0x8]  ;;  %4182 = vst [vmem:[#allocation3 + $0xa8] sm:$0x1] %v4181_v52  ;;  %v4190_v21 = vsel %vm9705_vm7, %v7254_v29, %v4189_v31 }
 0x356   : > { %4185 = vst [vmem:[#allocation3 + $0xb4] sm:$0x1] %v4184_v36  ;;  %4188 = vst [vmem:[#allocation3 + $0xc0] sm:$0x1] %v4187_v25  ;;  %v11384_v39 = vld [vmem:[#allocation3 + $0xd0] sm:$0x8] }
 0x357   : > { %v7256_v35 = vrot.slane %v11328_v27, 11  ;;  %v7257_v10 = vrot.slane %v11330_v5, 11  ;;  %v7258_v62 = vrot.slane %v11332_v54, 11  ;;  %4191 = vst [vmem:[#allocation3 + $0xcc] sm:$0x1] %v4190_v21  ;;  %v7259_v40 = vrot.slane %v11340_v15, 11 }
 0x358   : > { %v7260_v48 = vrot.slane %v11342_v44, 11  ;;  %v7261_v12 = vrot.slane %v11344_v58, 11  ;;  %v7262_v61 = vrot.slane %v11346_v1, 11  ;;  %v4282_v26 = vld [vmem:[#allocation3 + $0x8] sm:$0x1]  ;;  %v7263_v28 = vrot.slane %v11354_v38, 11 }
 0x359   : > { %v7264_v4 = vrot.slane %v11356_v57, 11  ;;  %v7265_v41 = vrot.slane %v11358_v56, 11  ;;  %v7266_v53 = vrot.slane %v11360_v13, 11  ;;  %v4285_v9 = vld [vmem:[#allocation3 + $0x14] sm:$0x1]  ;;  %v7267_v45 = vrot.slane %v11368_v59, 11 }
 0x35a   : > { %v7268_v16 = vrot.slane %v11370_v6, 11  ;;  %v7269_v29 = vrot.slane %v11378_v20, 11  ;;  %v7270_v60 = vrot.slane %v11380_v33, 11  ;;  %v4288_v0 = vld [vmem:[#allocation3 + $0x20] sm:$0x1]  ;;  %v7272_v37 = vrot.slane %v11384_v39, 11 }
 0x35b   : > { %v4283_v42 = vsel %vm9738_vm8, %v7255_v43, %v4282_v26  ;;  %v4286_v2 = vsel %vm9738_vm8, %v7256_v35, %v4285_v9  ;;  %v4289_v55 = vsel %vm9738_vm8, %v7257_v10, %v4288_v0  ;;  %v4291_v27 = vld [vmem:[#allocation3 + $0x2c] sm:$0x1]  ;;  %v4294_v5 = vld [vmem:[#allocation3 + $0x38] sm:$0x1]  ;;  %v4297_v34 = vld [vmem:[#allocation3 + $0x44] sm:$0x1] }
 0x35c   : > { %4284 = vst [vmem:[#allocation3 + $0x8] sm:$0x1] %v4283_v42  ;;  %4287 = vst [vmem:[#allocation3 + $0x14] sm:$0x1] %v4286_v2  ;;  %v4292_v54 = vsel %vm9738_vm8, %v7258_v62, %v4291_v27  ;;  %v4295_v24 = vsel %vm9738_vm8, %v7259_v40, %v4294_v5  ;;  %v4300_v51 = vld [vmem:[#allocation3 + $0x50] sm:$0x1]  ;;  %v4298_v49 = vsel %vm9738_vm8, %v7260_v48, %v4297_v34 }
 0x35d   : > { %4290 = vst [vmem:[#allocation3 + $0x20] sm:$0x1] %v4289_v55  ;;  %v4303_v43 = vld [vmem:[#allocation3 + $0x5c] sm:$0x1]  ;;  %v4376_v18 = vld [vmem:[#allocation3 + $0x10] sm:$0xf]  ;;  %v4301_v22 = vsel %vm9738_vm8, %v7261_v12, %v4300_v51 }
 0x35e   : > { %4293 = vst [vmem:[#allocation3 + $0x2c] sm:$0x1] %v4292_v54  ;;  %4296 = vst [vmem:[#allocation3 + $0x38] sm:$0x1] %v4295_v24  ;;  %v4304_v7 = vsel %vm9738_vm8, %v7262_v61, %v4303_v43  ;;  %v4306_v15 = vld [vmem:[#allocation3 + $0x68] sm:$0x1] }
 0x35f   : > { %v4309_v44 = vld [vmem:[#allocation3 + $0x74] sm:$0x1]  ;;  %v4312_v58 = vld [vmem:[#allocation3 + $0x80] sm:$0x1]  ;;  %v4379_v1 = vld [vmem:[#allocation3 + $0x1c] sm:$0xf]  ;;  %v4307_v63 = vsel %vm9738_vm8, %v7263_v28, %v4306_v15 }
 0x360   : > { %v4382_v17 = vld [vmem:[#allocation3 + $0x28] sm:$0xf]  ;;  %4299 = vst [vmem:[#allocation3 + $0x44] sm:$0x1] %v4298_v49  ;;  %4302 = vst [vmem:[#allocation3 + $0x50] sm:$0x1] %v4301_v22  ;;  %v4310_v50 = vsel %vm9738_vm8, %v7264_v4, %v4309_v44  ;;  %v4313_v32 = vsel %vm9738_vm8, %v7265_v41, %v4312_v58 }
 0x361   : > { %4305 = vst [vmem:[#allocation3 + $0x5c] sm:$0x1] %v4304_v7  ;;  %v4315_v14 = vld [vmem:[#allocation3 + $0x8c] sm:$0x1]  ;;  %v4318_v30 = vld [vmem:[#allocation3 + $0x98] sm:$0x1] }
 0x362   : > { %v4321_v38 = vld [vmem:[#allocation3 + $0xa4] sm:$0x1]  ;;  %4308 = vst [vmem:[#allocation3 + $0x68] sm:$0x1] %v4307_v63  ;;  %4311 = vst [vmem:[#allocation3 + $0x74] sm:$0x1] %v4310_v50  ;;  %v4316_v57 = vsel %vm9738_vm8, %v7266_v53, %v4315_v14  ;;  %v4319_v56 = vsel %vm9738_vm8, %v7267_v45, %v4318_v30 }
 0x363   : > { %4314 = vst [vmem:[#allocation3 + $0x80] sm:$0x1] %v4313_v32  ;;  %v4322_v13 = vsel %vm9738_vm8, %v7268_v16, %v4321_v38  ;;  %v4324_v8 = vld [vmem:[#allocation3 + $0xb0] sm:$0x1]  ;;  %v4327_v11 = vld [vmem:[#allocation3 + $0xbc] sm:$0x1] }
 0x364   : > { %v4333_v46 = vld [vmem:[#allocation3 + $0xd4] sm:$0x1]  ;;  %4317 = vst [vmem:[#allocation3 + $0x8c] sm:$0x1] %v4316_v57  ;;  %4320 = vst [vmem:[#allocation3 + $0x98] sm:$0x1] %v4319_v56  ;;  %v4325_v47 = vsel %vm9738_vm8, %v7269_v29, %v4324_v8  ;;  %v4328_v19 = vsel %vm9738_vm8, %v7270_v60, %v4327_v11 }
 0x365   : > { %4323 = vst [vmem:[#allocation3 + $0xa4] sm:$0x1] %v4322_v13  ;;  %v4334_v3 = vsel %vm9738_vm8, %v7272_v37, %v4333_v46  ;;  %v4375_v59 = vld [vmem:[#allocation3 + $0xc] sm:$0xf]  ;;  %v4428_v52 = vld [vmem:[#allocation3 + $0x18] sm:$0xe] }
 0x366   : > { %v4427_v6 = vld [vmem:[#allocation3 + $0xc] sm:$0xe]  ;;  %4326 = vst [vmem:[#allocation3 + $0xb0] sm:$0x1] %v4325_v47  ;;  %4329 = vst [vmem:[#allocation3 + $0xbc] sm:$0x1] %v4328_v19  ;;  %v7293_v31 = vcombine.low %v4375_v59, %v4376_v18  ;;  %v7329_v20 = vcombine.low %v4428_v52, %v4379_v1 }
 0x367   : > { %4335 = vst [vmem:[#allocation3 + $0xd4] sm:$0x1] %v4334_v3  ;;  %v7328_v36 = vcombine.low %v4427_v6, %v4376_v18  ;;  %v4429_v25 = vld [vmem:[#allocation3 + $0x24] sm:$0xe]  ;;  %v4378_v39 = vld [vmem:[#allocation3 + $0x18] sm:$0xf] }
 0x368   : > { %v4381_v33 = vld [vmem:[#allocation3 + $0x24] sm:$0xf]  ;;  %v7330_v21 = vcombine.low %v4429_v25, %v4382_v17  ;;  %v9117_v35 = vld [vmem:[#allocation3 + $0x14] ss:$0 sps:$4 sm:$0x11]   ;;  %v7295_v40 = vcombine.low %v4378_v39, %v4379_v1  ;;  %v4990_v4 = vrot.slane %v7329_v20, 1 }
 0x369   : > { %v4987_v10 = vrot.slane %v7328_v36, 1  ;;  %v9121_v62 = vld [vmem:[#allocation3 + $0x20] ss:$0 sps:$4 sm:$0x11]   ;;  %v4385_v48 = vld [vmem:[#allocation3 + $0x34] sm:$0xf]  ;;  %v11438_v26 = vcombine.low %v4381_v33, %v4382_v17 }
 0x36a   : > { %v4430_v12 = vld [vmem:[#allocation3 + $0x30] sm:$0xe]  ;;  %v4988_v61 = vrot.slane %v9117_v35, 1  ;;  %v11440_v28 = vld [vmem:[#allocation3 + $0x2c] ss:$0 sps:$4 sm:$0x11]  }
 0x36b   : > { %v4991_v41 = vrot.slane %v9121_v62, 1  ;;  %v4993_v53 = vrot.slane %v7330_v21, 1  ;;  %v4711_v9 = vshll.u32 %v7293_v31, 16  ;;  %v4994_v16 = vrot.slane %v11440_v28, 1  ;;  %v9129_v0 = vld [vmem:[#allocation9 + $0x88] sm:$0xff]   ;;  %v9272_v51 = vld [vmem:[#allocation9 + $0x80] sm:$0xff]  }
 0x36c   : > { %v11443_v45 = vsel %vm1645_vm10, %v4987_v10, %v4988_v61  ;;  %v4709_v29 = vshrl.u32 %v7293_v31, 16  ;;  %v4716_v60 = vshll.u32 %v9117_v35, 16  ;;  %v11446_v37 = vld [vmem:[#allocation3 + $0x40] sm:$0xf]  ;;  %v4723_v2 = vshll.u32 %v7295_v40, 16  ;;  %v9137_v58 = vld [vmem:[#allocation9 + $0x90] sm:$0xff]  }
 0x36d   : > { %8432 = vmatprep.mubr.bf16.mxu1 %v11443_v45  ;;  %v11450_v23 = vsel %vm1645_vm10, %v4990_v4, %v4991_v41  ;;  %v4713_v42 = vrot.slane %v4711_v9, 1  ;;  %v4728_v55 = vshll.u32 %v9121_v62, 16  ;;  %v11452_v27 = vld [vmem:[#allocation3 + $0x38] ss:$0 sps:$4 sm:$0x11]   ;;  %v11456_v5 = vsel %vm1645_vm10, %v4993_v53, %v4994_v16  ;;  %v11466_v17 = vld [vmem:[#allocation3 + $0xc] sm:$0xff]  }
 0x36e   : > { %8433 = vmatmul.mubr.bf16.vlgmr.msra.gmra.mrb[96].mxu1 %v11450_v23  ;;  %v4721_v54 = vshrl.u32 %v7295_v40, 16  ;;  %v4384_v24 = vld [vmem:[#allocation3 + $0x30] sm:$0xf]  ;;  %v7331_v34 = vcombine.low %v4430_v12, %v4385_v48  ;;  %v4718_v18 = vrot.slane %v4716_v60, 1  ;;  %v4725_v49 = vrot.slane %v4723_v2, 1  ;;  %12783 = vst [vmem:[#allocation26_spill] sm:$0xff] %v11466_v17 }
 0x36f   : > { %8465 = vmatpush3.bf16.msra.mxu1 %v9272_v51  ;;  %8436 = vmatprep.mubr.bf16.mxu1 %v11456_v5  ;;  %v4714_v43 = vor.u32 %v4713_v42, %v4709_v29  ;;  %v4431_v22 = vld [vmem:[#allocation3 + $0x3c] sm:$0xe]  ;;  %v11459_v7 = vld [vmem:[#allocation3 + $0x44] ss:$0 sps:$4 sm:$0x11]   ;;  %v4735_v44 = vshll.u32 %v11438_v26, 16  ;;  %v11470_v30 = vcombine.low %v4384_v24, %v4385_v48 }
 0x370   : > { %8466 = vmatprep.subr.bf16.mxu1 %v9129_v0  ;;  %v7332_v15 = vcombine.low %v4431_v22, %v11446_v37  ;;  %v4726_v63 = vor.u32 %v4725_v49, %v4721_v54  ;;  %v4730_v50 = vrot.slane %v4728_v55, 1  ;;  %v4997_v32 = vrot.slane %v11452_v27, 1  ;;  %v9186_v14 = vld [vmem:[#allocation9] sm:$0xff]   ;;  %v11473_v56 = vld [vmem:[#allocation3 + $0x4c] sm:$0xf]  ;;  %v9145_v13 = vld [vmem:[#allocation9 + $0x98] sm:$0xff]  }
 0x371   : > { %v11464_v1 = vsel %vm1356_vm9, %v4714_v43, %v4718_v18  ;;  %v4996_v38 = vrot.slane %v7331_v34, 1  ;;  %v5000_v57 = vrot.slane %v11459_v7, 1  ;;  %v9193_v8 = vld [vmem:[#allocation9 + $0x48] sm:$0xff]   ;;  %v4733_v47 = vshrl.u32 %v11438_v26, 16  ;;  %v11480_v3 = vld [vmem:[#allocation3 + $0x58] sm:$0xf] }
 0x372   : > { %5329 = vmatprep.mubr.bf16.mxu0 %v11464_v1  ;;  %v11477_v11 = vsel %vm1356_vm9, %v4726_v63, %v4730_v50  ;;  %v4999_v46 = vrot.slane %v7332_v15, 1  ;;  %v4737_v19 = vrot.slane %v4735_v44, 1  ;;  %v9194_v59 = vld [vmem:[#allocation9 + $0x8] sm:$0xff]   ;;  %v4432_v6 = vld [vmem:[#allocation3 + $0x48] sm:$0xe]  ;;  %v4740_v36 = vshll.u32 %v11440_v28, 16 }
 0x373   : > { %5330 = vmatmul.mubr.bf16.vlgmr.msra.gmra.mrb[160].mxu0 %v11466_v17  ;;  %8467 = vmatpush3.bf16.msra.mxu1 %v9129_v0  ;;  %v11484_v52 = vsel %vm1645_vm10, %v4996_v38, %v4997_v32  ;;  %v11487_v25 = vld [vmem:[#allocation3 + $0x50] ss:$0 sps:$4 sm:$0x11]   ;;  %v4433_v31 = vld [vmem:[#allocation3 + $0x54] sm:$0xe]  ;;  %v9201_v21 = vld [vmem:[#allocation9 + $0x50] sm:$0xff]   ;;  %v7333_v10 = vcombine.low %v4432_v6, %v11473_v56 }
 0x374   : > { %5337 = vmatprep.mubr.bf16.mxu0 %v11477_v11  ;;  %8468 = vmatprep.subr.bf16.mxu1 %v9137_v58  ;;  %v11491_v20 = vsel %vm1645_vm10, %v4999_v46, %v5000_v57  ;;  %v11493_v33 = vld [vmem:[#allocation3 + $0x5c] ss:$0 sps:$4 sm:$0x11]   ;;  %v4738_v35 = vor.u32 %v4737_v19, %v4733_v47  ;;  %v4747_v62 = vshll.u32 %v11470_v30, 16  ;;  %v7334_v48 = vcombine.low %v4433_v31, %v11480_v3  ;;  %v11504_v41 = vld [vmem:[#allocation3 + $0x64] sm:$0xf] }
 0x375   : > { %8001 = vmatpush3.bf16.msra.mxu0 %v9186_v14  ;;  %v4387_v39 = vld [vmem:[#allocation3 + $0x3c] sm:$0xf]  ;;  %v4742_v61 = vrot.slane %v4740_v36, 1  ;;  %v5003_v26 = vrot.slane %v11487_v25, 1  ;;  %v5006_v4 = vrot.slane %v11493_v33, 1  ;;  %v5002_v9 = vrot.slane %v7333_v10, 1 }
 0x376   : > { %8437 = vmatmul.mubr.bf16.gmra.mrb[100].mxu1 %v11484_v52  ;;  %8002 = vmatprep.subr.bf16.mxu0 %v9193_v8  ;;  %v11498_v40 = vld [vmem:[#allocation3 + $0x18] sm:$0xff]   ;;  %v7301_v28 = vcombine.low %v4387_v39, %v11446_v37  ;;  %v4745_v16 = vshrl.u32 %v11470_v30, 16  ;;  %v4749_v29 = vrot.slane %v4747_v62, 1  ;;  %v11511_v60 = vld [vmem:[#allocation3 + $0x70] sm:$0xf]  ;;  %v9161_v0 = vld [vmem:[#allocation9 + $0xa8] sm:$0xff]  }
 0x377   : > { %8440 = vmatprep.mubr.bf16.mxu1 %v11491_v20  ;;  %8469 = vmatpush3.bf16.msra.mxu1 %v9137_v58  ;;  %v9153_v12 = vld [vmem:[#allocation9 + $0xa0] sm:$0xff]   ;;  %v11508_v53 = vsel %vm1356_vm9, %v4738_v35, %v4742_v61  ;;  %v5005_v37 = vrot.slane %v7334_v48, 1  ;;  %v4434_v42 = vld [vmem:[#allocation3 + $0x60] sm:$0xe]  ;;  %v11517_v55 = vsel %vm1645_vm10, %v5002_v9, %v5003_v26  ;;  %v4752_v54 = vshll.u32 %v11452_v27, 16  ;;  %v9169_v27 = vld [vmem:[#allocation9 + $0xb0] sm:$0xff]  }
 0x378   : > { %8470 = vmatprep.subr.bf16.mxu1 %v9145_v13  ;;  %v11514_v2 = vld [vmem:[#allocation3 + $0x68] ss:$0 sps:$4 sm:$0x11]   ;;  %v4435_v24 = vld [vmem:[#allocation3 + $0x6c] sm:$0xe]  ;;  %v4750_v43 = vor.u32 %v4749_v29, %v4745_v16  ;;  %v7335_v18 = vcombine.low %v4434_v42, %v11504_v41  ;;  %v4759_v49 = vshll.u32 %v7301_v28, 16 }
 0x379   : > { %8003 = vmatpush3.bf16.msra.mxu0 %v9194_v59  ;;  %v11520_v34 = vld [vmem:[#allocation3 + $0x74] ss:$0 sps:$4 sm:$0x11]   ;;  %v11524_v51 = vsel %vm1645_vm10, %v5005_v37, %v5006_v4  ;;  %v4390_v22 = vld [vmem:[#allocation3 + $0x48] sm:$0xf]  ;;  %v7336_v15 = vcombine.low %v4435_v24, %v11511_v60  ;;  %v4754_v58 = vrot.slane %v4752_v54, 1 }
 0x37a   : > { %8004 = vmatprep.subr.bf16.mxu0 %v9201_v21  ;;  %v11529_v44 = vld [vmem:[#allocation3 + $0x24] sm:$0xff]   ;;  %v5009_v63 = vrot.slane %v11514_v2, 1  ;;  %v5012_v50 = vrot.slane %v11520_v34, 1  ;;  %v11533_v32 = vld [vmem:[#allocation3 + $0x7c] sm:$0xf]  ;;  %v9177_v14 = vld [vmem:[#allocation9 + $0xb8] sm:$0xff]   ;;  %v7303_v30 = vcombine.low %v4390_v22, %v11473_v56 }
 0x37b   : > { %5338 = vmatmul.mubr.bf16.gmra.mrb[164].mxu0 %v11498_v40  ;;  %8471 = vmatpush3.bf16.msra.mxu1 %v9145_v13  ;;  %v11538_v38 = vsel %vm1356_vm9, %v4750_v43, %v4754_v58  ;;  %v5008_v57 = vrot.slane %v7335_v18, 1  ;;  %v4761_v13 = vrot.slane %v4759_v49, 1  ;;  %v5011_v8 = vrot.slane %v7336_v15, 1  ;;  %v4436_v47 = vld [vmem:[#allocation3 + $0x78] sm:$0xe] }
 0x37c   : > { %5345 = vmatprep.mubr.bf16.mxu0 %v11508_v53  ;;  %8472 = vmatprep.subr.bf16.mxu1 %v9153_v12  ;;  %12784 = vst [vmem:[#allocation27_spill] sm:$0xff] %v11538_v38  ;;  %v4757_v46 = vshrl.u32 %v7301_v28, 16  ;;  %v11541_v19 = vld [vmem:[#allocation3 + $0x88] sm:$0xf]  ;;  %v4764_v56 = vshll.u32 %v11459_v7, 16  ;;  %v7337_v35 = vcombine.low %v4436_v47, %v11533_v32  ;;  %v4771_v10 = vshll.u32 %v7303_v30, 16 }
 0x37d   : > { %v11544_v59 = vsel %vm1645_vm10, %v5008_v57, %v5009_v63  ;;  %v11547_v6 = vld [vmem:[#allocation3 + $0x80] ss:$0 sps:$4 sm:$0x11]   ;;  %v4437_v36 = vld [vmem:[#allocation3 + $0x84] sm:$0xe]  ;;  %v11551_v31 = vsel %vm1645_vm10, %v5011_v8, %v5012_v50  ;;  %v9187_v48 = vld [vmem:[#allocation9 + $0x1c0] sm:$0xff]  }
 0x37e   : > { %8441 = vmatmul.mubr.bf16.gmra.mrb[104].mxu1 %v11517_v55  ;;  %v11553_v21 = vld [vmem:[#allocation3 + $0x8c] ss:$0 sps:$4 sm:$0x11]   ;;  %v4762_v39 = vor.u32 %v4761_v13, %v4757_v46  ;;  %v4393_v62 = vld [vmem:[#allocation3 + $0x54] sm:$0xf]  ;;  %v7338_v7 = vcombine.low %v4437_v36, %v11541_v19  ;;  %v4766_v61 = vrot.slane %v4764_v56, 1 }
 0x37f   : > { %8444 = vmatprep.mubr.bf16.mxu1 %v11524_v51  ;;  %8473 = vmatpush3.bf16.msra.mxu1 %v9153_v12  ;;  %v11558_v12 = vld [vmem:[#allocation3 + $0x30] sm:$0xff]   ;;  %v5015_v26 = vrot.slane %v11547_v6, 1  ;;  %v5018_v4 = vrot.slane %v11553_v21, 1  ;;  %v7305_v16 = vcombine.low %v4393_v62, %v11480_v3  ;;  %v4773_v37 = vrot.slane %v4771_v10, 1  ;;  %v11569_v42 = vld [vmem:[#allocation3 + $0xa0] sm:$0xf] }
 0x380   : > { %8474 = vmatprep.subr.bf16.mxu1 %v9161_v0  ;;  %12785 = vst [vmem:[#allocation22_spill] sm:$0xff] %v11558_v12  ;;  %v11561_v28 = vld [vmem:[#allocation3 + $0x94] sm:$0xf]  ;;  %v4438_v9 = vld [vmem:[#allocation3 + $0x90] sm:$0xe]  ;;  %v11567_v29 = vsel %vm1356_vm9, %v4762_v39, %v4766_v61  ;;  %v5017_v24 = vrot.slane %v7338_v7, 1 }
 0x381   : > { %12786 = vst [vmem:[#allocation23_spill] sm:$0xff] %v11567_v29  ;;  %v4439_v54 = vld [vmem:[#allocation3 + $0x9c] sm:$0xe]  ;;  %v4769_v43 = vshrl.u32 %v7303_v30, 16  ;;  %v4776_v18 = vshll.u32 %v11487_v25, 16  ;;  %v7339_v22 = vcombine.low %v4438_v9, %v11561_v28  ;;  %v4783_v63 = vshll.u32 %v7305_v16, 16 }
 0x382   : > { %v11576_v49 = vld [vmem:[#allocation3 + $0x98] ss:$0 sps:$4 sm:$0x11]   ;;  %v11579_v15 = vld [vmem:[#allocation3 + $0xa4] ss:$0 sps:$4 sm:$0x11]   ;;  %v7340_v58 = vcombine.low %v4439_v54, %v11569_v42 }
 0x383   : > { %5346 = vmatmul.mubr.bf16.gmra.mrb[168].mxu0 %v11529_v44  ;;  %8475 = vmatpush3.bf16.msra.mxu1 %v9161_v0  ;;  %v5014_v0 = vrot.slane %v7337_v35, 1  ;;  %v4774_v25 = vor.u32 %v4773_v37, %v4769_v43  ;;  %v4396_v50 = vld [vmem:[#allocation3 + $0x60] sm:$0xf]  ;;  %v4778_v30 = vrot.slane %v4776_v18, 1  ;;  %v5020_v57 = vrot.slane %v7339_v22, 1  ;;  %v9202_v46 = vld [vmem:[#allocation9 + $0x10] sm:$0xff]  }
 0x384   : > { %5353 = vmatprep.mubr.bf16.mxu0 %v11538_v38  ;;  %8476 = vmatprep.subr.bf16.mxu1 %v9169_v27  ;;  %v5021_v13 = vrot.slane %v11576_v49, 1  ;;  %v4781_v8 = vshrl.u32 %v7305_v16, 16  ;;  %v5023_v47 = vrot.slane %v7340_v58, 1  ;;  %v5024_v56 = vrot.slane %v11579_v15, 1  ;;  %v11591_v36 = vld [vmem:[#allocation3 + $0xac] sm:$0xf] }
 0x385   : > { %v11574_v3 = vsel %vm1645_vm10, %v5014_v0, %v5015_v26  ;;  %v11594_v39 = vcombine.low %v4396_v50, %v11504_v41  ;;  %v11598_v35 = vsel %vm1356_vm9, %v4774_v25, %v4778_v30  ;;  %v4785_v10 = vrot.slane %v4783_v63, 1  ;;  %v4440_v62 = vld [vmem:[#allocation3 + $0xa8] sm:$0xe]  ;;  %v11600_v7 = vld [vmem:[#allocation3 + $0xb0] ss:$0 sps:$4 sm:$0x11]   ;;  %8005 = vmatpush3.bf16.msra.mxu0 %v9202_v46 }
 0x386   : > { %8445 = vmatmul.mubr.bf16.gmra.mrb[108].mxu1 %v11544_v59  ;;  %12788 = vst [vmem:[#allocation24_spill] sm:$0xff] %v11598_v35  ;;  %v4441_v61 = vld [vmem:[#allocation3 + $0xb4] sm:$0xe]  ;;  %v11606_v26 = vsel %vm1645_vm10, %v5020_v57, %v5021_v13  ;;  %v4788_v41 = vshll.u32 %v11493_v33, 16  ;;  %v11611_v16 = vsel %vm1645_vm10, %v5023_v47, %v5024_v56  ;;  %v11617_v54 = vld [vmem:[#allocation3 + $0x4] sm:$0xf]  ;;  %v7341_v22 = vcombine.low %v4440_v62, %v11591_v36 }
 0x387   : > { %8448 = vmatprep.mubr.bf16.mxu1 %v11551_v31  ;;  %8477 = vmatpush3.bf16.msra.mxu1 %v9169_v27  ;;  %v11583_v27 = vsel %vm1645_vm10, %v5017_v24, %v5018_v4  ;;  %v4372_v4 = vld [vmem:[#allocation3] sm:$0xf]  ;;  %v9209_v9 = vld [vmem:[#allocation9 + $0x58] sm:$0xff]   ;;  %v11613_v0 = vld [vmem:[#allocation3 + $0xbc] ss:$0 sps:$4 sm:$0x11]   ;;  %v4786_v33 = vor.u32 %v4785_v10, %v4781_v8 }
 0x388   : > { %8478 = vmatprep.subr.bf16.mxu1 %v9177_v14  ;;  %v11615_v37 = vld [vmem:[#allocation3 + $0xc8] ss:$0 sps:$4 sm:$0x11]   ;;  %v9210_v24 = vld [vmem:[#allocation9 + $0x18] sm:$0xff]   ;;  %v4399_v43 = vld [vmem:[#allocation3 + $0x6c] sm:$0xf]  ;;  %8006 = vmatprep.subr.bf16.mxu0 %v9209_v9  ;;  %v7291_v63 = vcombine.low %v4372_v4, %v11617_v54 }
 0x389   : > { %v11620_v18 = vld [vmem:[#allocation3 + $0x48] sm:$0xff]   ;;  %v4795_v58 = vshll.u32 %v11594_v39, 16  ;;  %8007 = vmatpush3.bf16.msra.mxu0 %v9210_v24  ;;  %v9214_v50 = vld [vmem:[#allocation9 + $0x60] sm:$0xff]   ;;  %v4790_v57 = vrot.slane %v4788_v41, 1  ;;  %v5027_v13 = vrot.slane %v11600_v7, 1  ;;  %v9217_v47 = vld [vmem:[#allocation9 + $0x68] sm:$0xff]   ;;  %v11630_v8 = vcombine.low %v4399_v43, %v11511_v60 }
 0x38a   : > { %12789 = vst [vmem:[#allocation29_spill] sm:$0xff] %v11620_v18  ;;  %v9215_v30 = vld [vmem:[#allocation9 + $0x20] sm:$0xff]   ;;  %v11627_v46 = vld [vmem:[#allocation3 + $0x8] ss:$0 sps:$4 sm:$0x11]   ;;  %v5030_v56 = vrot.slane %v11613_v0, 1  ;;  %8008 = vmatprep.subr.bf16.mxu0 %v9214_v50 }
 0x38b   : > { %5354 = vmatmul.mubr.bf16.gmra.mrb[172].mxu0 %v11558_v12  ;;  %8479 = vmatpush3.bf16.msra.mxu1 %v9177_v14  ;;  %v11587_v14 = vld [vmem:[#allocation3 + $0x3c] sm:$0xff]   ;;  %v11633_v10 = vld [vmem:[#allocation3 + $0xc4] sm:$0xf]  ;;  %v11637_v62 = vsel %vm1356_vm9, %v4786_v33, %v4790_v57  ;;  %v4797_v41 = vrot.slane %v4795_v58, 1  ;;  %v4800_v4 = vshll.u32 %v11514_v2, 16  ;;  %v4793_v60 = vshrl.u32 %v11594_v39, 16 }
 0x38c   : > { %5361 = vmatprep.mubr.bf16.mxu0 %v11567_v29  ;;  %8136 = vmatprep.subr.bf16.mxu1 %v9187_v48  ;;  %12787 = vst [vmem:[#allocation28_spill] sm:$0xff] %v11587_v14  ;;  %v11603_v48 = vld [vmem:[#allocation3 + $0xb8] sm:$0xf]  ;;  %12790 = vst [vmem:[#allocation30_spill] sm:$0xff] %v11637_v62  ;;  %v4442_v9 = vld [vmem:[#allocation3 + $0xc0] sm:$0xe] }
 0x38d   : > { %v7342_v25 = vcombine.low %v4441_v61, %v11603_v48  ;;  %v5026_v61 = vrot.slane %v7341_v22, 1  ;;  %v5033_v43 = vrot.slane %v11615_v37, 1  ;;  %8009 = vmatpush3.bf16.msra.mxu0 %v9215_v30  ;;  %v4699_v50 = vshll.u32 %v7291_v63, 16  ;;  %v4426_v33 = vld [vmem:[#allocation3] sm:$0xe]  ;;  %v9221_v22 = vld [vmem:[#allocation9 + $0x70] sm:$0xff]  }
 0x38e   : > { %8449 = vmatmul.mubr.bf16.gmra.mrb[112].mxu1 %v11574_v3  ;;  %8010 = vmatprep.subr.bf16.mxu0 %v9217_v47  ;;  %v4704_v58 = vshll.u32 %v11627_v46, 16  ;;  %v4402_v2 = vld [vmem:[#allocation3 + $0x78] sm:$0xf]  ;;  %v7343_v39 = vcombine.low %v4442_v9, %v11633_v10  ;;  %v4697_v57 = vshrl.u32 %v7291_v63, 16  ;;  %v4807_v47 = vshll.u32 %v11630_v8, 16  ;;  %v9224_v29 = vld [vmem:[#allocation9 + $0x78] sm:$0xff]  }
 0x38f   : > { %8452 = vmatprep.mubr.bf16.mxu1 %v11583_v27  ;;  %v5029_v24 = vrot.slane %v7342_v25, 1  ;;  %v4701_v30 = vrot.slane %v4699_v50, 1  ;;  %v11656_v12 = vld [vmem:[#allocation3 + $0xd0] sm:$0xf]  ;;  %v7327_v17 = vcombine.low %v4426_v33, %v11617_v54  ;;  %v4443_v63 = vld [vmem:[#allocation3 + $0xcc] sm:$0xe]  ;;  %v7311_v50 = vcombine.low %v4402_v2, %v11533_v32 }
 0x390   : > { %v11659_v9 = vld [vmem:[#allocation3 + $0xd4] ss:$0 sps:$4 sm:$0x11]   ;;  %v5032_v38 = vrot.slane %v7343_v39, 1  ;;  %v7344_v54 = vcombine.low %v4443_v63, %v11656_v12  ;;  %v4812_v2 = vshll.u32 %v11520_v34, 16 }
 0x391   : > { %v11649_v25 = vsel %vm1645_vm10, %v5029_v24, %v5030_v56  ;;  %v4702_v56 = vor.u32 %v4701_v30, %v4697_v57  ;;  %v4706_v24 = vrot.slane %v4704_v58, 1  ;;  %v5036_v33 = vrot.slane %v11659_v9, 1  ;;  %v9225_v32 = vld [vmem:[#allocation9 + $0x38] sm:$0xff]  }
 0x392   : > { %v4805_v58 = vshrl.u32 %v11630_v8, 16  ;;  %v5035_v39 = vrot.slane %v7344_v54, 1  ;;  %v9195_v54 = vld [vmem:[#allocation9 + $0x1d0] sm:$0xff]  }
 0x393   : > { %5362 = vmatmul.mubr.bf16.gmra.mrb[176].mxu0 %v11587_v14  ;;  %v9222_v14 = vld [vmem:[#allocation9 + $0x30] sm:$0xff]  }
 0x394   : > { %5369 = vmatprep.mubr.bf16.mxu0 %v11598_v35  ;;  %v9219_v35 = vld [vmem:[#allocation9 + $0x28] sm:$0xff]  }
 0x395   : > { %8011 = vmatpush3.bf16.msra.mxu0 %v9219_v35  ;;  %v4809_v35 = vrot.slane %v4807_v47, 1  ;;  %v9190_v47 = vld [vmem:[#allocation9 + $0x1c8] sm:$0xff]  }
 0x396   : > { %8453 = vmatmul.mubr.bf16.gmra.mrb[116].mxu1 %v11606_v26  ;;  %8012 = vmatprep.subr.bf16.mxu0 %v9221_v22  ;;  %v4984_v22 = vrot.slane %v7327_v17, 1  ;;  %v11681_v17 = vsel %vm1645_vm10, %v5035_v39, %v5036_v33  ;;  %v11694_v33 = vld [vmem:[#allocation3 + $0x6c] sm:$0xff]   ;;  %v4836_v39 = vshll.u32 %v11553_v21, 16 }
 0x397   : > { %8456 = vmatprep.mubr.bf16.mxu1 %v11611_v16  ;;  %v4810_v30 = vor.u32 %v4809_v35, %v4805_v58  ;;  %v4408_v35 = vld [vmem:[#allocation3 + $0x90] sm:$0xf] }
 0x398   : > { %v9198_v58 = vld [vmem:[#allocation9 + $0x1d8] sm:$0xff]  }
 0x399   : > { %8013 = vmatpush3.bf16.msra.mxu0 %v9222_v14  ;;  %v4405_v14 = vld [vmem:[#allocation3 + $0x84] sm:$0xf] }
 0x39a   : > { %8014 = vmatprep.subr.bf16.mxu0 %v9224_v29  ;;  %v7313_v8 = vcombine.low %v4405_v14, %v11541_v19  ;;  %v9188_v29 = vld [vmem:[#allocation9 + $0x180] sm:$0xff]   ;;  %v9191_v19 = vld [vmem:[#allocation9 + $0x188] sm:$0xff]  }
 0x39b   : > { %5370 = vmatmul.mubr.bf16.gmra.mrb[180].mxu0 %v11620_v18  ;;  %v11644_v18 = vsel %vm1645_vm10, %v5026_v61, %v5027_v13  ;;  %v4798_v13 = vor.u32 %v4797_v41, %v4793_v60  ;;  %v4802_v61 = vrot.slane %v4800_v4, 1  ;;  %v4985_v41 = vrot.slane %v11627_v46, 1  ;;  %v9203_v14 = vld [vmem:[#allocation9 + $0x1e0] sm:$0xff]  }
 0x39c   : > { %5377 = vmatprep.mubr.bf16.mxu0 %v11637_v62  ;;  %v11653_v62 = vld [vmem:[#allocation3 + $0x54] sm:$0xff]   ;;  %v11664_v4 = vsel %vm1356_vm9, %v4702_v56, %v4706_v24  ;;  %v11674_v46 = vsel %vm1645_vm10, %v5032_v38, %v5033_v43  ;;  %v11683_v38 = vld [vmem:[#allocation3 + $0x60] sm:$0xff]   ;;  %v4814_v43 = vrot.slane %v4812_v2, 1  ;;  %v4817_v56 = vshrl.u32 %v7311_v50, 16 }
 0x39d   : > { %v11668_v60 = vsel %vm1356_vm9, %v4798_v13, %v4802_v61  ;;  %v4986_v57 = vsel %vm1645_vm10, %v4984_v22, %v4985_v41  ;;  %v4819_v13 = vshll.u32 %v7311_v50, 16  ;;  %8015 = vmatpush3.bf16.msra.mxu0 %v9225_v32  ;;  %v4824_v24 = vshll.u32 %v11547_v6, 16  ;;  %v9196_v50 = vld [vmem:[#allocation9 + $0x190] sm:$0xff]  }
 0x39e   : > { %8457 = vmatmul.mubr.bf16.gmra.mrb[120].mxu1 %v11644_v18  ;;  %v11688_v34 = vsel %vm1356_vm9, %v4810_v30, %v4814_v43  ;;  %v4831_v41 = vshll.u32 %v7313_v8, 16  ;;  %v7315_v32 = vcombine.low %v4408_v35, %v11561_v28  ;;  %v4829_v2 = vshrl.u32 %v7313_v8, 16  ;;  %v9199_v30 = vld [vmem:[#allocation9 + $0x198] sm:$0xff]   ;;  %v11705_v43 = vld [vmem:[#allocation3 + $0x78] sm:$0xff]   ;;  %v4414_v35 = vld [vmem:[#allocation3 + $0xa8] sm:$0xf] }
 0x39f   : > { %8460 = vmatprep.mubr.bf16.mxu1 %v11649_v25  ;;  %v4821_v61 = vrot.slane %v4819_v13, 1  ;;  %v4826_v22 = vrot.slane %v4824_v24, 1  ;;  %v4411_v13 = vld [vmem:[#allocation3 + $0x9c] sm:$0xf] }
 0x3a0   : > { %v4841_v24 = vshrl.u32 %v7315_v32, 16 }
 0x3a1   : > { %v4822_v63 = vor.u32 %v4821_v61, %v4817_v56  ;;  %v7317_v61 = vcombine.low %v4411_v13, %v11569_v42  ;;  %v9206_v56 = vld [vmem:[#allocation9 + $0x1e8] sm:$0xff]   ;;  %v4417_v13 = vld [vmem:[#allocation3 + $0xb4] sm:$0xf] }
 0x3a3   : > { %5378 = vmatmul.mubr.bf16.gmra.mrb[184].mxu0 %v11653_v62  ;;  %v11699_v6 = vsel %vm1356_vm9, %v4822_v63, %v4826_v22  ;;  %v4848_v63 = vshll.u32 %v11576_v49, 16  ;;  %v11716_v22 = vld [vmem:[#allocation3 + $0x84] sm:$0xff]  }
 0x3a4   : > { %5385 = vmatprep.mubr.bf16.mxu0 %v11668_v60 }
 0x3a6   : > { %8461 = vmatmul.mubr.bf16.gmra.mrb[124].mxu1 %v11674_v46 }
 0x3a7   : > { %8480 = vmatprep.mubr.bf16.mxu1 %v4986_v57  ;;  %v4843_v57 = vshll.u32 %v7315_v32, 16 }
 0x3a9   : > { %v4845_v8 = vrot.slane %v4843_v57, 1 }
 0x3ab   : > { %5386 = vmatmul.mubr.bf16.gmra.mrb[188].mxu0 %v11683_v38  ;;  %v4846_v42 = vor.u32 %v4845_v8, %v4841_v24  ;;  %v4872_v24 = vshll.u32 %v11600_v7, 16 }
 0x3ac   : > { %5393 = vmatprep.mubr.bf16.mxu0 %v11688_v34 }
 0x3ae   : > { %8481 = vmatmul.mubr.bf16.vlgmr.msra.gmra.mrb[96].mxu1 %v11443_v45  ;;  %v4833_v45 = vrot.slane %v4831_v41, 1  ;;  %v9207_v41 = vld [vmem:[#allocation9 + $0x1a8] sm:$0xff]  }
 0x3af   : > { %8137 = vmatpush3.bf16.msra.mxu1 %v9188_v29  ;;  %8484 = vmatprep.mubr.bf16.mxu1 %v11450_v23  ;;  %v4838_v29 = vrot.slane %v4836_v39, 1  ;;  %v4853_v39 = vshrl.u32 %v7317_v61, 16 }
 0x3b0   : > { %8138 = vmatprep.subr.bf16.mxu1 %v9190_v47  ;;  %v4834_v28 = vor.u32 %v4833_v45, %v4829_v2  ;;  %v9204_v47 = vld [vmem:[#allocation9 + $0x1a0] sm:$0xff]   ;;  %v4850_v45 = vrot.slane %v4848_v63, 1  ;;  %v9216_v2 = vld [vmem:[#allocation9 + $0x1f8] sm:$0xff]  }
 0x3b2   : > { %v11710_v21 = vsel %vm1356_vm9, %v4834_v28, %v4838_v29  ;;  %v11721_v49 = vsel %vm1356_vm9, %v4846_v42, %v4850_v45  ;;  %v4860_v28 = vshll.u32 %v11579_v15, 16  ;;  %v11727_v29 = vld [vmem:[#allocation3 + $0x90] sm:$0xff]  }
 0x3b3   : > { %5394 = vmatmul.mubr.bf16.gmra.mrb[192].mxu0 %v11694_v33  ;;  %8139 = vmatpush3.bf16.msra.mxu1 %v9191_v19  ;;  %v4855_v19 = vshll.u32 %v7317_v61, 16 }
 0x3b4   : > { %5401 = vmatprep.mubr.bf16.mxu0 %v11699_v6  ;;  %8140 = vmatprep.subr.bf16.mxu1 %v9195_v54  ;;  %v9211_v54 = vld [vmem:[#allocation9 + $0x1f0] sm:$0xff]   ;;  %v4862_v8 = vrot.slane %v4860_v28, 1 }
 0x3b5   : > { %v4857_v32 = vrot.slane %v4855_v19, 1  ;;  %v11738_v19 = vld [vmem:[#allocation3 + $0x9c] sm:$0xff]  }
 0x3b6   : > { %8485 = vmatmul.mubr.bf16.gmra.mrb[100].mxu1 %v11456_v5 }
 0x3b7   : > { %8488 = vmatprep.mubr.bf16.mxu1 %v11484_v52  ;;  %8141 = vmatpush3.bf16.msra.mxu1 %v9196_v50  ;;  %v7319_v50 = vcombine.low %v4414_v35, %v11591_v36  ;;  %v4858_v36 = vor.u32 %v4857_v32, %v4853_v39 }
 0x3b8   : > { %8142 = vmatprep.subr.bf16.mxu1 %v9198_v58  ;;  %v9212_v58 = vld [vmem:[#allocation9 + $0x1b0] sm:$0xff]  }
 0x3b9   : > { %v4867_v57 = vshll.u32 %v7319_v50, 16  ;;  %v11732_v15 = vsel %vm1356_vm9, %v4858_v36, %v4862_v8 }
 0x3bb   : > { %5402 = vmatmul.mubr.bf16.gmra.mrb[196].mxu0 %v11705_v43  ;;  %8143 = vmatpush3.bf16.msra.mxu1 %v9199_v30  ;;  %v9218_v30 = vld [vmem:[#allocation9 + $0x1b8] sm:$0xff]   ;;  %v4869_v61 = vrot.slane %v4867_v57, 1 }
 0x3bc   : > { %5409 = vmatprep.mubr.bf16.mxu0 %v11710_v21  ;;  %8144 = vmatprep.subr.bf16.mxu1 %v9203_v14  ;;  %v9223_v14 = vld [vmem:[#allocation9 + $0x200] sm:$0xff]  }
 0x3be   : > { %8489 = vmatmul.mubr.bf16.gmra.mrb[104].mxu1 %v11491_v20 }
 0x3bf   : > { %8492 = vmatprep.mubr.bf16.mxu1 %v11517_v55  ;;  %8145 = vmatpush3.bf16.msra.mxu1 %v9204_v47  ;;  %v7321_v47 = vcombine.low %v4417_v13, %v11603_v48  ;;  %v4420_v48 = vld [vmem:[#allocation3 + $0xc0] sm:$0xf] }
 0x3c0   : > { %8146 = vmatprep.subr.bf16.mxu1 %v9206_v56  ;;  %v4865_v56 = vshrl.u32 %v7319_v50, 16  ;;  %v7323_v35 = vcombine.low %v4420_v48, %v11633_v10  ;;  %v4884_v50 = vshll.u32 %v11613_v0, 16  ;;  %v4896_v0 = vshll.u32 %v11615_v37, 16  ;;  %v11768_v37 = vld [vmem:[#allocation3 + $0xc0] sm:$0xff]   ;;  %v12793_v48 = vld [vmem:[#allocation22_spill] sm:$0xff] }
 0x3c1   : > { %v4879_v42 = vshll.u32 %v7321_v47, 16  ;;  %v4877_v7 = vshrl.u32 %v7321_v47, 16  ;;  %v9227_v47 = vld [vmem:[#allocation9 + $0x208] sm:$0xff]  }
 0x3c2   : > { %v4870_v63 = vor.u32 %v4869_v61, %v4865_v56  ;;  %v4886_v10 = vrot.slane %v4884_v50, 1  ;;  %v4889_v36 = vshrl.u32 %v7323_v35, 16  ;;  %v4898_v13 = vrot.slane %v4896_v0, 1  ;;  %v9228_v61 = vld [vmem:[#allocation9 + $0x210] sm:$0xff]   ;;  %v9226_v56 = vld [vmem:[#allocation3] sm:$0xff]   ;;  %v12798_v50 = vld [vmem:[#allocation30_spill] sm:$0xff] }
 0x3c3   : > { %5410 = vmatmul.mubr.bf16.gmra.mrb[200].mxu0 %v11716_v22  ;;  %8147 = vmatpush3.bf16.msra.mxu1 %v9207_v41  ;;  %v4874_v41 = vrot.slane %v4872_v24, 1  ;;  %v4881_v45 = vrot.slane %v4879_v42, 1  ;;  %v9229_v24 = vld [vmem:[#allocation9 + $0x218] sm:$0xff]   ;;  %v12792_v42 = vld [vmem:[#allocation26_spill] sm:$0xff] }
 0x3c4   : > { %5417 = vmatprep.mubr.bf16.mxu0 %v11721_v49  ;;  %8148 = vmatprep.subr.bf16.mxu1 %v9211_v54 }
 0x3c5   : > { %v11743_v54 = vsel %vm1356_vm9, %v4870_v63, %v4874_v41  ;;  %v4882_v32 = vor.u32 %v4881_v45, %v4877_v7  ;;  %v12791_v63 = vld [vmem:[#allocation27_spill] sm:$0xff]  ;;  %v12795_v45 = vld [vmem:[#allocation28_spill] sm:$0xff] }
 0x3c6   : > { %8493 = vmatmul.mubr.bf16.gmra.mrb[108].mxu1 %v11524_v51  ;;  %v12794_v41 = vld [vmem:[#allocation23_spill] sm:$0xff]  ;;  %v12796_v7 = vld [vmem:[#allocation24_spill] sm:$0xff] }
 0x3c7   : > { %8496 = vmatprep.mubr.bf16.mxu1 %v11544_v59  ;;  %8149 = vmatpush3.bf16.msra.mxu1 %v9212_v58  ;;  %v4891_v58 = vshll.u32 %v7323_v35, 16  ;;  %v11753_v39 = vsel %vm1356_vm9, %v4882_v32, %v4886_v10  ;;  %v9233_v35 = vld [vmem:[#allocation9 + $0x238] sm:$0xff]  }
 0x3c8   : > { %8150 = vmatprep.subr.bf16.mxu1 %v9216_v2  ;;  %v11749_v2 = vld [vmem:[#allocation3 + $0xa8] sm:$0xff]  }
 0x3c9   : > { %v4893_v28 = vrot.slane %v4891_v58, 1 }
 0x3cb   : > { %5418 = vmatmul.mubr.bf16.gmra.mrb[204].mxu0 %v11727_v29  ;;  %8151 = vmatpush3.bf16.msra.mxu1 %v9218_v30  ;;  %v4894_v57 = vor.u32 %v4893_v28, %v4889_v36  ;;  %v11759_v30 = vld [vmem:[#allocation3 + $0xb4] sm:$0xff]  }
 0x3cc   : > { %5425 = vmatprep.mubr.bf16.mxu0 %v11732_v15  ;;  %8512 = vmatprep.subr.bf16.mxu1 %v9223_v14 }
 0x3cd   : > { %v11763_v8 = vsel %vm1356_vm9, %v4894_v57, %v4898_v13  ;;  %v4908_v13 = vshll.u32 %v11659_v9, 16 }
 0x3ce   : > { %8497 = vmatmul.mubr.bf16.gmra.mrb[112].mxu1 %v11551_v31 }
 0x3cf   : > { %8500 = vmatprep.mubr.bf16.mxu1 %v11574_v3 }
 0x3d3   : > { %5426 = vmatmul.mubr.bf16.gmra.mrb[208].mxu0 %v11738_v19 }
 0x3d4   : > { %5433 = vmatprep.mubr.bf16.mxu0 %v11743_v54 }
 0x3d6   : > { %8501 = vmatmul.mubr.bf16.gmra.mrb[116].mxu1 %v11583_v27 }
 0x3d7   : > { %8504 = vmatprep.mubr.bf16.mxu1 %v11606_v26 }
 0x3db   : > { %5434 = vmatmul.mubr.bf16.gmra.mrb[212].mxu0 %v11749_v2 }
 0x3dc   : > { %5441 = vmatprep.mubr.bf16.mxu0 %v11753_v39 }
 0x3de   : > { %8505 = vmatmul.mubr.bf16.gmra.mrb[120].mxu1 %v11611_v16 }
 0x3df   : > { %8508 = vmatprep.mubr.bf16.mxu1 %v11644_v18 }
 0x3e3   : > { %5442 = vmatmul.mubr.bf16.gmra.mrb[216].mxu0 %v11759_v30 }
 0x3e4   : > { %5449 = vmatprep.mubr.bf16.mxu0 %v11763_v8 }
 0x3e6   : > { %8509 = vmatmul.mubr.bf16.gmra.mrb[124].mxu1 %v11649_v25 }
 0x3e7   : > { %6310 = vmatprep.mubr.bf16.mxu1 %v11477_v11 }
 0x3eb   : > { %5450 = vmatmul.mubr.bf16.gmra.mrb[220].mxu0 %v11768_v37 }
 0x3ec   : > { %5795 = vmatprep.mubr.bf16.mxu0 %v11664_v4  ;;  %v9230_v4 = vld [vmem:[#allocation9 + $0x220] sm:$0xff]  }
 0x3ee   : > { %6311 = vmatmul.mubr.bf16.vlgmr.msra.gmra.mrb[128].mxu1 %v11498_v40 }
 0x3ef   : > { %8513 = vmatpush3.bf16.msra.mxu1 %v9223_v14  ;;  %6318 = vmatprep.mubr.bf16.mxu1 %v11508_v53  ;;  %v9231_v14 = vld [vmem:[#allocation9 + $0x228] sm:$0xff]  }
 0x3f0   : > { %8514 = vmatprep.subr.bf16.mxu1 %v9227_v47 }
 0x3f3   : > { %5796 = vmatmul.mubr.bf16.vlgmr.msra.gmra.mrb[224].mxu0 %v9226_v56  ;;  %8515 = vmatpush3.bf16.msra.mxu1 %v9227_v47 }
 0x3f4   : > { %5803 = vmatprep.mubr.bf16.mxu0 %v11464_v1  ;;  %8516 = vmatprep.subr.bf16.mxu1 %v9228_v61  ;;  %v9232_v1 = vld [vmem:[#allocation9 + $0x230] sm:$0xff]  }
 0x3f6   : > { %6319 = vmatmul.mubr.bf16.gmra.mrb[132].mxu1 %v11529_v44 }
 0x3f7   : > { %6326 = vmatprep.mubr.bf16.mxu1 %v12791_v63  ;;  %8517 = vmatpush3.bf16.msra.mxu1 %v9228_v61 }
 0x3f8   : > { %8518 = vmatprep.subr.bf16.mxu1 %v9229_v24 }
 0x3fb   : > { %5804 = vmatmul.mubr.bf16.gmra.mrb[228].mxu0 %v12792_v42  ;;  %8519 = vmatpush3.bf16.msra.mxu1 %v9229_v24 }
 0x3fc   : > { %5811 = vmatprep.mubr.bf16.mxu0 %v11477_v11  ;;  %8520 = vmatprep.subr.bf16.mxu1 %v9230_v4  ;;  %v12797_v11 = vld [vmem:[#allocation29_spill] sm:$0xff] }
 0x3fe   : > { %6327 = vmatmul.mubr.bf16.gmra.mrb[136].mxu1 %v12793_v48 }
 0x3ff   : > { %6334 = vmatprep.mubr.bf16.mxu1 %v12794_v41  ;;  %8521 = vmatpush3.bf16.msra.mxu1 %v9230_v4 }
 0x400   : > { %8522 = vmatprep.subr.bf16.mxu1 %v9231_v14 }
 0x403   : > { %5812 = vmatmul.mubr.bf16.gmra.mrb[232].mxu0 %v11498_v40  ;;  %8523 = vmatpush3.bf16.msra.mxu1 %v9231_v14 }
 0x404   : > { %5819 = vmatprep.mubr.bf16.mxu0 %v11508_v53  ;;  %8524 = vmatprep.subr.bf16.mxu1 %v9232_v1 }
 0x406   : > { %6335 = vmatmul.mubr.bf16.gmra.mrb[140].mxu1 %v12795_v45 }
 0x407   : > { %6342 = vmatprep.mubr.bf16.mxu1 %v12796_v7  ;;  %8525 = vmatpush3.bf16.msra.mxu1 %v9232_v1 }
 0x408   : > { %8526 = vmatprep.subr.bf16.mxu1 %v9233_v35 }
 0x40b   : > { %5820 = vmatmul.mubr.bf16.gmra.mrb[236].mxu0 %v11529_v44  ;;  %8527 = vmatpush3.bf16.msra.mxu1 %v9233_v35 }
 0x40c   : > { %5827 = vmatprep.mubr.bf16.mxu0 %v12791_v63 }
 0x40e   : > { %6343 = vmatmul.mubr.bf16.gmra.mrb[144].mxu1 %v12797_v11 }
 0x40f   : > { %6350 = vmatprep.mubr.bf16.mxu1 %v12798_v50 }
 0x413   : > { %5828 = vmatmul.mubr.bf16.gmra.mrb[240].mxu0 %v12793_v48 }
 0x414   : > { %5835 = vmatprep.mubr.bf16.mxu0 %v12794_v41 }
 0x416   : > { %6351 = vmatmul.mubr.bf16.gmra.mrb[148].mxu1 %v11653_v62 }
 0x417   : > { %6358 = vmatprep.mubr.bf16.mxu1 %v11668_v60 }
 0x41b   : > { %5836 = vmatmul.mubr.bf16.gmra.mrb[244].mxu0 %v12795_v45 }
 0x41c   : > { %5843 = vmatprep.mubr.bf16.mxu0 %v12796_v7 }
 0x41e   : > { %6359 = vmatmul.mubr.bf16.gmra.mrb[152].mxu1 %v11683_v38 }
 0x41f   : > { %6366 = vmatprep.mubr.bf16.mxu1 %v11688_v34 }
 0x423   : > { %5844 = vmatmul.mubr.bf16.gmra.mrb[248].mxu0 %v12797_v11 }
 0x424   : > { %5851 = vmatprep.mubr.bf16.mxu0 %v12798_v50 }
 0x426   : > { %6367 = vmatmul.mubr.bf16.gmra.mrb[156].mxu1 %v11694_v33 }
 0x427   : > { %6374 = vmatprep.mubr.bf16.mxu1 %v11699_v6 }
 0x42b   : > { %5852 = vmatmul.mubr.bf16.gmra.mrb[252].mxu0 %v11653_v62 }
 0x42c   : > { %5859 = vmatprep.mubr.bf16.mxu0 %v11668_v60 }
 0x42e   : > { %6375 = vmatmul.mubr.bf16.gmra.mrb[160].mxu1 %v11705_v43 }
 0x42f   : > { %6382 = vmatprep.mubr.bf16.mxu1 %v11710_v21 }
 0x433   : > { %5860 = vmatmul.mubr.bf16.gmra.mrb[0].mxu0 %v11683_v38 }
 0x434   : > { %5867 = vmatprep.mubr.bf16.mxu0 %v11688_v34  ;;  %v4423_v34 = vld [vmem:[#allocation3 + $0xcc] sm:$0xf] }
 0x436   : > { %6383 = vmatmul.mubr.bf16.gmra.mrb[164].mxu1 %v11716_v22 }
 0x437   : > { %6390 = vmatprep.mubr.bf16.mxu1 %v11721_v49 }
 0x43b   : > { %5868 = vmatmul.mubr.bf16.gmra.mrb[4].mxu0 %v11694_v33 }
 0x43c   : > { %5875 = vmatprep.mubr.bf16.mxu0 %v11699_v6  ;;  %v7325_v6 = vcombine.low %v4423_v34, %v11656_v12 }
 0x43e   : > { %6391 = vmatmul.mubr.bf16.gmra.mrb[168].mxu1 %v11727_v29  ;;  %v4903_v28 = vshll.u32 %v7325_v6, 16  ;;  %v4901_v57 = vshrl.u32 %v7325_v6, 16 }
 0x43f   : > { %6398 = vmatprep.mubr.bf16.mxu1 %v11732_v15 }
 0x443   : > { %5876 = vmatmul.mubr.bf16.gmra.mrb[8].mxu0 %v11705_v43 }
 0x444   : > { %5883 = vmatprep.mubr.bf16.mxu0 %v11710_v21 }
 0x446   : > { %v7880_v40 = vpop.f32.mrb[160].mxu0  ;;  %6399 = vmatmul.mubr.bf16.gmra.mrb[172].mxu1 %v11738_v19 }
 0x447   : > { %v7881_v53 = vpop.f32.mrb[161].mxu0  ;;  %6406 = vmatprep.mubr.bf16.mxu1 %v11743_v54 }
 0x448   : > { %v11817_v44 = vadd.f32 %v7881_v53, %v7880_v40  ;;  %v7883_v62 = vpop.f32.mrb[162].mxu0 }
 0x449   : > { %v7884_v60 = vpop.f32.mrb[163].mxu0 }
 0x44a   : > { %v11819_v38 = vadd.f32 %v7884_v60, %v7883_v62 }
 0x44b   : > { %5884 = vmatmul.mubr.bf16.gmra.mrb[12].mxu0 %v11716_v22 }
 0x44c   : > { %5891 = vmatprep.mubr.bf16.mxu0 %v11721_v49  ;;  %v4905_v49 = vrot.slane %v4903_v28, 1 }
 0x44e   : > { %v7886_v33 = vpop.f32.mrb[164].mxu0  ;;  %6407 = vmatmul.mubr.bf16.gmra.mrb[176].mxu1 %v11749_v2  ;;  %v4906_v56 = vor.u32 %v4905_v49, %v4901_v57 }
 0x44f   : > { %v7887_v43 = vpop.f32.mrb[165].mxu0  ;;  %6414 = vmatprep.mubr.bf16.mxu1 %v11753_v39 }
 0x450   : > { %v11826_v21 = vadd.f32 %v7887_v43, %v7886_v33  ;;  %v7889_v32 = vpop.f32.mrb[166].mxu0 }
 0x451   : > { %v7890_v58 = vpop.f32.mrb[167].mxu0 }
 0x452   : > { %v11828_v10 = vadd.f32 %v7890_v58, %v7889_v32 }
 0x453   : > { %5892 = vmatmul.mubr.bf16.gmra.mrb[16].mxu0 %v11727_v29  ;;  %v4910_v29 = vrot.slane %v4908_v13, 1 }
 0x454   : > { %5899 = vmatprep.mubr.bf16.mxu0 %v11732_v15 }
 0x456   : > { %v7892_v22 = vpop.f32.mrb[168].mxu0  ;;  %6415 = vmatmul.mubr.bf16.gmra.mrb[180].mxu1 %v11759_v30 }
 0x457   : > { %v7893_v36 = vpop.f32.mrb[169].mxu0  ;;  %6422 = vmatprep.mubr.bf16.mxu1 %v11763_v8  ;;  %v4911_v8 = vsel %vm1356_vm9, %v4906_v56, %v4910_v29 }
 0x458   : > { %v11834_v12 = vadd.f32 %v7893_v36, %v7892_v22  ;;  %v7895_v0 = vpop.f32.mrb[170].mxu0 }
 0x459   : > { %v7896_v47 = vpop.f32.mrb[171].mxu0 }
 0x45a   : > { %v11837_v61 = vadd.f32 %v7896_v47, %v7895_v0 }
 0x45b   : > { %5900 = vmatmul.mubr.bf16.gmra.mrb[20].mxu0 %v11738_v19  ;;  %v9236_v19 = vld [vmem:[#allocation3 + $0xcc] sm:$0xff]  }
 0x45c   : > { %5907 = vmatprep.mubr.bf16.mxu0 %v11743_v54 }
 0x45e   : > { %v7898_v15 = vpop.f32.mrb[172].mxu0  ;;  %6423 = vmatmul.mubr.bf16.gmra.mrb[184].mxu1 %v11768_v37 }
 0x45f   : > { %v7899_v24 = vpop.f32.mrb[173].mxu0  ;;  %6430 = vmatprep.mubr.bf16.mxu1 %v4911_v8 }
 0x460   : > { %v11843_v63 = vadd.f32 %v7899_v24, %v7898_v15  ;;  %v7901_v4 = vpop.f32.mrb[174].mxu0 }
 0x461   : > { %v7902_v9 = vpop.f32.mrb[175].mxu0 }
 0x462   : > { %v11845_v42 = vadd.f32 %v7902_v9, %v7901_v4 }
 0x463   : > { %5908 = vmatmul.mubr.bf16.gmra.mrb[24].mxu0 %v11749_v2 }
 0x464   : > { %5915 = vmatprep.mubr.bf16.mxu0 %v11753_v39 }
 0x466   : > { %v7904_v54 = vpop.f32.mrb[176].mxu0  ;;  %6431 = vmatmul.mubr.bf16.gmra.mrb[188].mxu1 %v9236_v19 }
 0x467   : > { %v7905_v14 = vpop.f32.mrb[177].mxu0  ;;  %8528 = vmatprep.mubr.bf16.mxu1 %v11450_v23 }
 0x468   : > { %v11850_v37 = vadd.f32 %v7905_v14, %v7904_v54  ;;  %v7907_v48 = vpop.f32.mrb[178].mxu0 }
 0x469   : > { %v7908_v41 = vpop.f32.mrb[179].mxu0 }
 0x46a   : > { %v11852_v1 = vadd.f32 %v7908_v41, %v7907_v48 }
 0x46b   : > { %5916 = vmatmul.mubr.bf16.gmra.mrb[28].mxu0 %v11759_v30 }
 0x46e   : > { %v7910_v35 = vpop.f32.mrb[180].mxu0  ;;  %8529 = vmatmul.mubr.bf16.vlgmr.msra.gmra.mrb[96].mxu1 %v11456_v5 }
 0x46f   : > { %v7911_v2 = vpop.f32.mrb[181].mxu0  ;;  %8532 = vmatprep.mubr.bf16.mxu1 %v11484_v52 }
 0x470   : > { %v11857_v39 = vadd.f32 %v7911_v2, %v7910_v35  ;;  %v7913_v45 = vpop.f32.mrb[182].mxu0 }
 0x471   : > { %v7914_v7 = vpop.f32.mrb[183].mxu0 }
 0x472   : > { %v11859_v11 = vadd.f32 %v7914_v7, %v7913_v45 }
 0x476   : > { %v7916_v23 = vpop.f32.mrb[184].mxu0  ;;  %8533 = vmatmul.mubr.bf16.gmra.mrb[100].mxu1 %v11491_v20 }
 0x477   : > { %v7917_v50 = vpop.f32.mrb[185].mxu0  ;;  %8536 = vmatprep.mubr.bf16.mxu1 %v11517_v55 }
 0x478   : > { %v11863_v40 = vadd.f32 %v7917_v50, %v7916_v23  ;;  %v7919_v30 = vpop.f32.mrb[186].mxu0 }
 0x479   : > { %v7920_v53 = vpop.f32.mrb[187].mxu0 }
 0x47a   : > { %v11865_v5 = vadd.f32 %v7920_v53, %v7919_v30 }
 0x47e   : > { %v7922_v62 = vpop.f32.mrb[188].mxu0  ;;  %8537 = vmatmul.mubr.bf16.gmra.mrb[104].mxu1 %v11524_v51 }
 0x47f   : > { %v7923_v52 = vpop.f32.mrb[189].mxu0  ;;  %8540 = vmatprep.mubr.bf16.mxu1 %v11544_v59 }
 0x480   : > { %v11869_v60 = vadd.f32 %v7923_v52, %v7922_v62  ;;  %v7925_v34 = vpop.f32.mrb[190].mxu0 }
 0x481   : > { %v7926_v33 = vpop.f32.mrb[191].mxu0 }
 0x482   : > { %v11871_v20 = vadd.f32 %v7926_v33, %v7925_v34 }
 0x486   : > { %v7928_v6 = vpop.f32.mrb[192].mxu0  ;;  %8541 = vmatmul.mubr.bf16.gmra.mrb[108].mxu1 %v11551_v31 }
 0x487   : > { %v7929_v55 = vpop.f32.mrb[193].mxu0  ;;  %8544 = vmatprep.mubr.bf16.mxu1 %v11574_v3 }
 0x488   : > { %v11875_v43 = vadd.f32 %v7929_v55, %v7928_v6  ;;  %v7931_v32 = vpop.f32.mrb[194].mxu0 }
 0x489   : > { %v7932_v58 = vpop.f32.mrb[195].mxu0 }
 0x48a   : > { %v11877_v51 = vadd.f32 %v7932_v58, %v7931_v32 }
 0x48e   : > { %v7934_v28 = vpop.f32.mrb[196].mxu0  ;;  %8545 = vmatmul.mubr.bf16.gmra.mrb[112].mxu1 %v11583_v27 }
 0x48f   : > { %v7935_v59 = vpop.f32.mrb[197].mxu0  ;;  %8548 = vmatprep.mubr.bf16.mxu1 %v11606_v26 }
 0x490   : > { %v11881_v22 = vadd.f32 %v7935_v59, %v7934_v28  ;;  %v7937_v49 = vpop.f32.mrb[198].mxu0 }
 0x491   : > { %v7938_v36 = vpop.f32.mrb[199].mxu0 }
 0x492   : > { %v11883_v31 = vadd.f32 %v7938_v36, %v7937_v49 }
 0x496   : > { %v7940_v0 = vpop.f32.mrb[200].mxu0  ;;  %8549 = vmatmul.mubr.bf16.gmra.mrb[116].mxu1 %v11611_v16 }
 0x497   : > { %v7941_v3 = vpop.f32.mrb[201].mxu0  ;;  %8552 = vmatprep.mubr.bf16.mxu1 %v11644_v18 }
 0x498   : > { %v11887_v57 = vadd.f32 %v7941_v3, %v7940_v0  ;;  %v7943_v13 = vpop.f32.mrb[202].mxu0 }
 0x499   : > { %v7944_v47 = vpop.f32.mrb[203].mxu0 }
 0x49a   : > { %v11889_v27 = vadd.f32 %v7944_v47, %v7943_v13 }
 0x49e   : > { %v7946_v56 = vpop.f32.mrb[204].mxu0  ;;  %8553 = vmatmul.mubr.bf16.gmra.mrb[120].mxu1 %v11649_v25 }
 0x49f   : > { %v7947_v26 = vpop.f32.mrb[205].mxu0  ;;  %8556 = vmatprep.mubr.bf16.mxu1 %v11674_v46 }
 0x4a0   : > { %v11893_v29 = vadd.f32 %v7947_v26, %v7946_v56  ;;  %v7949_v15 = vpop.f32.mrb[206].mxu0 }
 0x4a1   : > { %v7950_v8 = vpop.f32.mrb[207].mxu0 }
 0x4a2   : > { %v11895_v16 = vadd.f32 %v7950_v8, %v7949_v15 }
 0x4a6   : > { %v7952_v24 = vpop.f32.mrb[208].mxu0  ;;  %8557 = vmatmul.mubr.bf16.gmra.mrb[124].mxu1 %v11681_v17 }
 0x4a7   : > { %v7953_v18 = vpop.f32.mrb[209].mxu0 }
 0x4a8   : > { %v11898_v4 = vadd.f32 %v7953_v18, %v7952_v24  ;;  %v7955_v9 = vpop.f32.mrb[210].mxu0 }
 0x4a9   : > { %v7956_v19 = vpop.f32.mrb[211].mxu0 }
 0x4aa   : > { %v11900_v54 = vadd.f32 %v7956_v19, %v7955_v9 }
 0x4ae   : > { %v7958_v25 = vpop.f32.mrb[212].mxu0 }
 0x4af   : > { %v7959_v14 = vpop.f32.mrb[213].mxu0 }
 0x4b0   : > { %v11902_v48 = vadd.f32 %v7959_v14, %v7958_v25  ;;  %v7961_v46 = vpop.f32.mrb[214].mxu0 }
 0x4b1   : > { %v7962_v41 = vpop.f32.mrb[215].mxu0 }
 0x4b2   : > { %v11904_v35 = vadd.f32 %v7962_v41, %v7961_v46 }
 0x4b6   : > { %v7964_v2 = vpop.f32.mrb[216].mxu0 }
 0x4b7   : > { %v7965_v45 = vpop.f32.mrb[217].mxu0 }
 0x4b8   : > { %v11906_v7 = vadd.f32 %v7965_v45, %v7964_v2  ;;  %v7967_v17 = vpop.f32.mrb[218].mxu0 }
 0x4b9   : > { %v7968_v23 = vpop.f32.mrb[219].mxu0 }
 0x4ba   : > { %v11908_v50 = vadd.f32 %v7968_v23, %v7967_v17 }
 0x4be   : > { %v7970_v30 = vpop.f32.mrb[220].mxu0 }
 0x4bf   : > { %v7971_v53 = vpop.f32.mrb[221].mxu0 }
 0x4c0   : > { %v11910_v62 = vadd.f32 %v7971_v53, %v7970_v30  ;;  %v7973_v52 = vpop.f32.mrb[222].mxu0 }
 0x4c1   : > { %v7974_v34 = vpop.f32.mrb[223].mxu0  ;;  %v8152_v33 = vpop.f32.mrb[128].mxu1 }
 0x4c2   : > { %v11912_v6 = vadd.f32 %v7974_v34, %v7973_v52  ;;  %v8153_v55 = vpop.f32.mrb[129].mxu1 }
 0x4c3   : > { %v8154_v32 = vadd.f32 %v8153_v55, %v8152_v33  ;;  %v8155_v58 = vpop.f32.mrb[130].mxu1 }
 0x4c4   : > { %v8156_v28 = vpop.f32.mrb[131].mxu1 }
 0x4c5   : > { %v8157_v59 = vadd.f32 %v8156_v28, %v8155_v58 }
 0x4c6   : > { %v8016_v49 = vpop.f32.mrb[224].mxu0 }
 0x4c7   : > { %v8017_v36 = vpop.f32.mrb[225].mxu0 }
 0x4c8   : > { %v8018_v0 = vadd.f32 %v8017_v36, %v8016_v49  ;;  %v8019_v3 = vpop.f32.mrb[226].mxu0 }
 0x4c9   : > { %v8020_v13 = vpop.f32.mrb[227].mxu0  ;;  %v8158_v47 = vpop.f32.mrb[132].mxu1 }
 0x4ca   : > { %v8691_v56 = vadd.f32 %v8018_v0, %v11817_v44  ;;  %v8021_v26 = vadd.f32 %v8020_v13, %v8019_v3  ;;  %v8159_v15 = vpop.f32.mrb[133].mxu1 }
 0x4cb   : > { %v8160_v8 = vadd.f32 %v8159_v15, %v8158_v47  ;;  %v8161_v24 = vpop.f32.mrb[134].mxu1 }
 0x4cc   : > { %v8697_v18 = vadd.f32 %v8021_v26, %v11819_v38  ;;  %v8162_v9 = vpop.f32.mrb[135].mxu1  ;;  %v11916_v19 = vadd.f32 %v8691_v56, %v8154_v32 }
 0x4cd   : > { %v8163_v25 = vadd.f32 %v8162_v9, %v8161_v24 }
 0x4ce   : > { %v8022_v14 = vpop.f32.mrb[228].mxu0  ;;  %v11918_v46 = vadd.f32 %v8697_v18, %v8157_v59 }
 0x4cf   : > { %v8023_v41 = vpop.f32.mrb[229].mxu0 }
 0x4d0   : > { %v8024_v2 = vadd.f32 %v8023_v41, %v8022_v14  ;;  %v8025_v45 = vpop.f32.mrb[230].mxu0 }
 0x4d1   : > { %v8026_v17 = vpop.f32.mrb[231].mxu0  ;;  %v8164_v23 = vpop.f32.mrb[136].mxu1 }
 0x4d2   : > { %v8688_v44 = vadd.f32 %v8024_v2, %v11826_v21  ;;  %v8027_v30 = vadd.f32 %v8026_v17, %v8025_v45  ;;  %v8165_v53 = vpop.f32.mrb[137].mxu1 }
 0x4d3   : > { %v8166_v52 = vadd.f32 %v8165_v53, %v8164_v23  ;;  %v8167_v34 = vpop.f32.mrb[138].mxu1 }
 0x4d4   : > { %v8694_v38 = vadd.f32 %v8027_v30, %v11828_v10  ;;  %v8168_v33 = vpop.f32.mrb[139].mxu1  ;;  %v11922_v55 = vadd.f32 %v8688_v44, %v8160_v8 }
 0x4d5   : > { %v8169_v32 = vadd.f32 %v8168_v33, %v8167_v34 }
 0x4d6   : > { %v8028_v58 = vpop.f32.mrb[232].mxu0  ;;  %v11924_v28 = vadd.f32 %v8694_v38, %v8163_v25 }
 0x4d7   : > { %v8029_v59 = vpop.f32.mrb[233].mxu0 }
 0x4d8   : > { %v8030_v49 = vadd.f32 %v8029_v59, %v8028_v58  ;;  %v8031_v36 = vpop.f32.mrb[234].mxu0 }
 0x4d9   : > { %v8032_v0 = vpop.f32.mrb[235].mxu0  ;;  %v8170_v3 = vpop.f32.mrb[140].mxu1 }
 0x4da   : > { %v8703_v21 = vadd.f32 %v8030_v49, %v11834_v12  ;;  %v8033_v13 = vadd.f32 %v8032_v0, %v8031_v36  ;;  %v8171_v47 = vpop.f32.mrb[141].mxu1 }
 0x4db   : > { %v8172_v56 = vadd.f32 %v8171_v47, %v8170_v3  ;;  %v8173_v26 = vpop.f32.mrb[142].mxu1 }
 0x4dc   : > { %v8709_v10 = vadd.f32 %v8033_v13, %v11837_v61  ;;  %v8174_v15 = vpop.f32.mrb[143].mxu1  ;;  %v11928_v8 = vadd.f32 %v8703_v21, %v8166_v52 }
 0x4dd   : > { %v8175_v24 = vadd.f32 %v8174_v15, %v8173_v26 }
 0x4de   : > { %v8034_v18 = vpop.f32.mrb[236].mxu0  ;;  %v11930_v9 = vadd.f32 %v8709_v10, %v8169_v32 }
 0x4df   : > { %v8035_v25 = vpop.f32.mrb[237].mxu0 }
 0x4e0   : > { %v8036_v14 = vadd.f32 %v8035_v25, %v8034_v18  ;;  %v8037_v41 = vpop.f32.mrb[238].mxu0 }
 0x4e1   : > { %v8038_v2 = vpop.f32.mrb[239].mxu0  ;;  %v8176_v45 = vpop.f32.mrb[144].mxu1 }
 0x4e2   : > { %v8700_v12 = vadd.f32 %v8036_v14, %v11843_v63  ;;  %v8039_v17 = vadd.f32 %v8038_v2, %v8037_v41  ;;  %v8177_v23 = vpop.f32.mrb[145].mxu1 }
 0x4e3   : > { %v8178_v44 = vadd.f32 %v8177_v23, %v8176_v45  ;;  %v8179_v30 = vpop.f32.mrb[146].mxu1 }
 0x4e4   : > { %v8706_v61 = vadd.f32 %v8039_v17, %v11845_v42  ;;  %v8180_v53 = vpop.f32.mrb[147].mxu1  ;;  %v11934_v52 = vadd.f32 %v8700_v12, %v8172_v56 }
 0x4e5   : > { %v8181_v34 = vadd.f32 %v8180_v53, %v8179_v30 }
 0x4e6   : > { %v8040_v38 = vpop.f32.mrb[240].mxu0  ;;  %v11936_v33 = vadd.f32 %v8706_v61, %v8175_v24 }
 0x4e7   : > { %v8041_v32 = vpop.f32.mrb[241].mxu0 }
 0x4e8   : > { %v8042_v58 = vadd.f32 %v8041_v32, %v8040_v38  ;;  %v8043_v59 = vpop.f32.mrb[242].mxu0 }
 0x4e9   : > { %v8044_v49 = vpop.f32.mrb[243].mxu0  ;;  %v8182_v36 = vpop.f32.mrb[148].mxu1 }
 0x4ea   : > { %v8715_v63 = vadd.f32 %v8042_v58, %v11850_v37  ;;  %v8045_v0 = vadd.f32 %v8044_v49, %v8043_v59  ;;  %v8183_v3 = vpop.f32.mrb[149].mxu1 }
 0x4eb   : > { %v8184_v21 = vadd.f32 %v8183_v3, %v8182_v36  ;;  %v8185_v13 = vpop.f32.mrb[150].mxu1 }
 0x4ec   : > { %v8721_v42 = vadd.f32 %v8045_v0, %v11852_v1  ;;  %v8186_v47 = vpop.f32.mrb[151].mxu1  ;;  %v11940_v56 = vadd.f32 %v8715_v63, %v8178_v44 }
 0x4ed   : > { %v8187_v26 = vadd.f32 %v8186_v47, %v8185_v13 }
 0x4ee   : > { %v8046_v10 = vpop.f32.mrb[244].mxu0  ;;  %v11942_v15 = vadd.f32 %v8721_v42, %v8181_v34 }
 0x4ef   : > { %v8047_v24 = vpop.f32.mrb[245].mxu0 }
 0x4f0   : > { %v8048_v18 = vadd.f32 %v8047_v24, %v8046_v10  ;;  %v8049_v25 = vpop.f32.mrb[246].mxu0 }
 0x4f1   : > { %v8050_v14 = vpop.f32.mrb[247].mxu0  ;;  %v8188_v41 = vpop.f32.mrb[152].mxu1 }
 0x4f2   : > { %v8712_v37 = vadd.f32 %v8048_v18, %v11857_v39  ;;  %v8051_v2 = vadd.f32 %v8050_v14, %v8049_v25  ;;  %v8189_v45 = vpop.f32.mrb[153].mxu1 }
 0x4f3   : > { %v8190_v12 = vadd.f32 %v8189_v45, %v8188_v41  ;;  %v8191_v17 = vpop.f32.mrb[154].mxu1 }
 0x4f4   : > { %v8718_v1 = vadd.f32 %v8051_v2, %v11859_v11  ;;  %v8192_v23 = vpop.f32.mrb[155].mxu1  ;;  %v11946_v44 = vadd.f32 %v8712_v37, %v8184_v21 }
 0x4f5   : > { %v8193_v30 = vadd.f32 %v8192_v23, %v8191_v17 }
 0x4f6   : > { %v8052_v61 = vpop.f32.mrb[248].mxu0  ;;  %v11948_v53 = vadd.f32 %v8718_v1, %v8187_v26 }
 0x4f7   : > { %v8053_v34 = vpop.f32.mrb[249].mxu0 }
 0x4f8   : > { %v8054_v38 = vadd.f32 %v8053_v34, %v8052_v61  ;;  %v8055_v32 = vpop.f32.mrb[250].mxu0 }
 0x4f9   : > { %v8056_v58 = vpop.f32.mrb[251].mxu0  ;;  %v8194_v59 = vpop.f32.mrb[156].mxu1 }
 0x4fa   : > { %v8727_v39 = vadd.f32 %v8054_v38, %v11863_v40  ;;  %v8057_v49 = vadd.f32 %v8056_v58, %v8055_v32  ;;  %v8195_v36 = vpop.f32.mrb[157].mxu1 }
 0x4fb   : > { %v8196_v63 = vadd.f32 %v8195_v36, %v8194_v59  ;;  %v8197_v0 = vpop.f32.mrb[158].mxu1 }
 0x4fc   : > { %v8733_v11 = vadd.f32 %v8057_v49, %v11865_v5  ;;  %v8198_v3 = vpop.f32.mrb[159].mxu1  ;;  %v11952_v21 = vadd.f32 %v8727_v39, %v8190_v12 }
 0x4fd   : > { %v8199_v13 = vadd.f32 %v8198_v3, %v8197_v0 }
 0x4fe   : > { %v8058_v42 = vpop.f32.mrb[252].mxu0  ;;  %v11954_v47 = vadd.f32 %v8733_v11, %v8193_v30 }
 0x4ff   : > { %v8059_v26 = vpop.f32.mrb[253].mxu0 }
 0x500   : > { %v8060_v10 = vadd.f32 %v8059_v26, %v8058_v42  ;;  %v8061_v24 = vpop.f32.mrb[254].mxu0 }
 0x501   : > { %v8062_v18 = vpop.f32.mrb[255].mxu0  ;;  %v8200_v25 = vpop.f32.mrb[160].mxu1 }
 0x502   : > { %v8724_v40 = vadd.f32 %v8060_v10, %v11869_v60  ;;  %v8063_v14 = vadd.f32 %v8062_v18, %v8061_v24  ;;  %v8201_v41 = vpop.f32.mrb[161].mxu1 }
 0x503   : > { %v8202_v37 = vadd.f32 %v8201_v41, %v8200_v25  ;;  %v8203_v2 = vpop.f32.mrb[162].mxu1 }
 0x504   : > { %v8730_v5 = vadd.f32 %v8063_v14, %v11871_v20  ;;  %v8204_v45 = vpop.f32.mrb[163].mxu1  ;;  %v11958_v12 = vadd.f32 %v8724_v40, %v8196_v63 }
 0x505   : > { %v8205_v17 = vadd.f32 %v8204_v45, %v8203_v2 }
 0x506   : > { %v8064_v1 = vpop.f32.mrb[0].mxu0  ;;  %v11960_v23 = vadd.f32 %v8730_v5, %v8199_v13 }
 0x507   : > { %v8065_v30 = vpop.f32.mrb[1].mxu0 }
 0x508   : > { %v8066_v61 = vadd.f32 %v8065_v30, %v8064_v1  ;;  %v8067_v34 = vpop.f32.mrb[2].mxu0 }
 0x509   : > { %v8068_v38 = vpop.f32.mrb[3].mxu0  ;;  %v8206_v32 = vpop.f32.mrb[164].mxu1 }
 0x50a   : > { %v8739_v60 = vadd.f32 %v8066_v61, %v11875_v43  ;;  %v8069_v58 = vadd.f32 %v8068_v38, %v8067_v34  ;;  %v8207_v59 = vpop.f32.mrb[165].mxu1 }
 0x50b   : > { %v8208_v39 = vadd.f32 %v8207_v59, %v8206_v32  ;;  %v8209_v49 = vpop.f32.mrb[166].mxu1 }
 0x50c   : > { %v8745_v20 = vadd.f32 %v8069_v58, %v11877_v51  ;;  %v8210_v36 = vpop.f32.mrb[167].mxu1  ;;  %v11964_v63 = vadd.f32 %v8739_v60, %v8202_v37 }
 0x50d   : > { %v8211_v0 = vadd.f32 %v8210_v36, %v8209_v49 }
 0x50e   : > { %v8070_v11 = vpop.f32.mrb[4].mxu0  ;;  %v11966_v3 = vadd.f32 %v8745_v20, %v8205_v17 }
 0x50f   : > { %v8071_v13 = vpop.f32.mrb[5].mxu0 }
 0x510   : > { %v8072_v42 = vadd.f32 %v8071_v13, %v8070_v11  ;;  %v8073_v26 = vpop.f32.mrb[6].mxu0 }
 0x511   : > { %v8074_v10 = vpop.f32.mrb[7].mxu0  ;;  %v8212_v24 = vpop.f32.mrb[168].mxu1 }
 0x512   : > { %v8736_v43 = vadd.f32 %v8072_v42, %v11881_v22  ;;  %v8075_v18 = vadd.f32 %v8074_v10, %v8073_v26  ;;  %v8213_v25 = vpop.f32.mrb[169].mxu1 }
 0x513   : > { %v8214_v40 = vadd.f32 %v8213_v25, %v8212_v24  ;;  %v8215_v14 = vpop.f32.mrb[170].mxu1 }
 0x514   : > { %v8742_v51 = vadd.f32 %v8075_v18, %v11883_v31  ;;  %v8216_v41 = vpop.f32.mrb[171].mxu1  ;;  %v11970_v37 = vadd.f32 %v8736_v43, %v8208_v39 }
 0x515   : > { %v8217_v2 = vadd.f32 %v8216_v41, %v8215_v14 }
 0x516   : > { %v8076_v5 = vpop.f32.mrb[8].mxu0  ;;  %v11972_v45 = vadd.f32 %v8742_v51, %v8211_v0 }
 0x517   : > { %v8077_v17 = vpop.f32.mrb[9].mxu0 }
 0x518   : > { %v8078_v1 = vadd.f32 %v8077_v17, %v8076_v5  ;;  %v8079_v30 = vpop.f32.mrb[10].mxu0 }
 0x519   : > { %v8080_v61 = vpop.f32.mrb[11].mxu0  ;;  %v8218_v34 = vpop.f32.mrb[172].mxu1 }
 0x51a   : > { %v8751_v22 = vadd.f32 %v8078_v1, %v11887_v57  ;;  %v8081_v38 = vadd.f32 %v8080_v61, %v8079_v30  ;;  %v8219_v32 = vpop.f32.mrb[173].mxu1 }
 0x51b   : > { %v8220_v60 = vadd.f32 %v8219_v32, %v8218_v34  ;;  %v8221_v58 = vpop.f32.mrb[174].mxu1 }
 0x51c   : > { %v8757_v31 = vadd.f32 %v8081_v38, %v11889_v27  ;;  %v8222_v59 = vpop.f32.mrb[175].mxu1  ;;  %v11976_v39 = vadd.f32 %v8751_v22, %v8214_v40 }
 0x51d   : > { %v8223_v49 = vadd.f32 %v8222_v59, %v8221_v58 }
 0x51e   : > { %v8082_v20 = vpop.f32.mrb[12].mxu0  ;;  %v11978_v36 = vadd.f32 %v8757_v31, %v8217_v2 }
 0x51f   : > { %v8083_v0 = vpop.f32.mrb[13].mxu0 }
 0x520   : > { %v8084_v11 = vadd.f32 %v8083_v0, %v8082_v20  ;;  %v8085_v13 = vpop.f32.mrb[14].mxu0 }
 0x521   : > { %v8086_v42 = vpop.f32.mrb[15].mxu0  ;;  %v8224_v26 = vpop.f32.mrb[176].mxu1 }
 0x522   : > { %v8748_v57 = vadd.f32 %v8084_v11, %v11893_v29  ;;  %v8087_v10 = vadd.f32 %v8086_v42, %v8085_v13  ;;  %v8225_v24 = vpop.f32.mrb[177].mxu1 }
 0x523   : > { %v8226_v43 = vadd.f32 %v8225_v24, %v8224_v26  ;;  %v8227_v18 = vpop.f32.mrb[178].mxu1 }
 0x524   : > { %v8754_v27 = vadd.f32 %v8087_v10, %v11895_v16  ;;  %v8228_v25 = vpop.f32.mrb[179].mxu1  ;;  %v11982_v40 = vadd.f32 %v8748_v57, %v8220_v60 }
 0x525   : > { %v8229_v14 = vadd.f32 %v8228_v25, %v8227_v18 }
 0x526   : > { %v8088_v51 = vpop.f32.mrb[16].mxu0  ;;  %v11984_v41 = vadd.f32 %v8754_v27, %v8223_v49 }
 0x527   : > { %v8089_v2 = vpop.f32.mrb[17].mxu0 }
 0x528   : > { %v8090_v5 = vadd.f32 %v8089_v2, %v8088_v51  ;;  %v8091_v17 = vpop.f32.mrb[18].mxu0 }
 0x529   : > { %v8092_v1 = vpop.f32.mrb[19].mxu0  ;;  %v8230_v30 = vpop.f32.mrb[180].mxu1 }
 0x52a   : > { %v8763_v29 = vadd.f32 %v8090_v5, %v11898_v4  ;;  %v8093_v61 = vadd.f32 %v8092_v1, %v8091_v17  ;;  %v8231_v34 = vpop.f32.mrb[181].mxu1 }
 0x52b   : > { %v8232_v22 = vadd.f32 %v8231_v34, %v8230_v30  ;;  %v8233_v38 = vpop.f32.mrb[182].mxu1 }
 0x52c   : > { %v8769_v16 = vadd.f32 %v8093_v61, %v11900_v54  ;;  %v8234_v32 = vpop.f32.mrb[183].mxu1  ;;  %v11988_v60 = vadd.f32 %v8763_v29, %v8226_v43 }
 0x52d   : > { %v8235_v58 = vadd.f32 %v8234_v32, %v8233_v38 }
 0x52e   : > { %v8094_v31 = vpop.f32.mrb[20].mxu0  ;;  %v11990_v59 = vadd.f32 %v8769_v16, %v8229_v14 }
 0x52f   : > { %v8095_v49 = vpop.f32.mrb[21].mxu0 }
 0x530   : > { %v8096_v20 = vadd.f32 %v8095_v49, %v8094_v31  ;;  %v8097_v0 = vpop.f32.mrb[22].mxu0 }
 0x531   : > { %v8098_v11 = vpop.f32.mrb[23].mxu0  ;;  %v8236_v13 = vpop.f32.mrb[184].mxu1 }
 0x532   : > { %v8760_v4 = vadd.f32 %v8096_v20, %v11902_v48  ;;  %v8099_v42 = vadd.f32 %v8098_v11, %v8097_v0  ;;  %v8237_v26 = vpop.f32.mrb[185].mxu1 }
 0x533   : > { %v8238_v57 = vadd.f32 %v8237_v26, %v8236_v13  ;;  %v8239_v10 = vpop.f32.mrb[186].mxu1 }
 0x534   : > { %v8766_v54 = vadd.f32 %v8099_v42, %v11904_v35  ;;  %v8240_v24 = vpop.f32.mrb[187].mxu1  ;;  %v11994_v43 = vadd.f32 %v8760_v4, %v8232_v22 }
 0x535   : > { %v8241_v18 = vadd.f32 %v8240_v24, %v8239_v10 }
 0x536   : > { %v8100_v27 = vpop.f32.mrb[24].mxu0  ;;  %v11996_v25 = vadd.f32 %v8766_v54, %v8235_v58 }
 0x537   : > { %v8101_v14 = vpop.f32.mrb[25].mxu0 }
 0x538   : > { %v8102_v51 = vadd.f32 %v8101_v14, %v8100_v27  ;;  %v8103_v2 = vpop.f32.mrb[26].mxu0 }
 0x539   : > { %v8104_v5 = vpop.f32.mrb[27].mxu0  ;;  %v8242_v17 = vpop.f32.mrb[188].mxu1 }
 0x53a   : > { %v8775_v48 = vadd.f32 %v8102_v51, %v11906_v7  ;;  %v8105_v1 = vadd.f32 %v8104_v5, %v8103_v2  ;;  %v8243_v30 = vpop.f32.mrb[189].mxu1 }
 0x53b   : > { %v8244_v29 = vadd.f32 %v8243_v30, %v8242_v17  ;;  %v8245_v61 = vpop.f32.mrb[190].mxu1 }
 0x53c   : > { %v8781_v35 = vadd.f32 %v8105_v1, %v11908_v50  ;;  %v8246_v34 = vpop.f32.mrb[191].mxu1  ;;  %v12000_v22 = vadd.f32 %v8775_v48, %v8238_v57 }
 0x53d   : > { %v8247_v38 = vadd.f32 %v8246_v34, %v8245_v61 }
 0x53e   : > { %v8106_v16 = vpop.f32.mrb[28].mxu0  ;;  %v12002_v32 = vadd.f32 %v8781_v35, %v8241_v18 }
 0x53f   : > { %v8107_v58 = vpop.f32.mrb[29].mxu0 }
 0x540   : > { %v8108_v31 = vadd.f32 %v8107_v58, %v8106_v16  ;;  %v8109_v49 = vpop.f32.mrb[30].mxu0 }
 0x541   : > { %v8110_v20 = vpop.f32.mrb[31].mxu0  ;;  %v8530_v0 = vpop.f32.mrb[96].mxu1 }
 0x542   : > { %v8772_v7 = vadd.f32 %v8108_v31, %v11910_v62  ;;  %v8111_v11 = vadd.f32 %v8110_v20, %v8109_v49  ;;  %v12006_v13 = vadd.f32 %v11922_v55, %v8530_v0  ;;  %v6473_v4 = vpop.f32.mrb[97].mxu1 }
 0x543   : > { %v12009_v50 = vadd.f32 %v11916_v19, %v6473_v4  ;;  %v8531_v42 = vpop.f32.mrb[98].mxu1 }
 0x544   : > { %v8778_v26 = vadd.f32 %v8111_v11, %v11912_v6  ;;  %v12013_v57 = vadd.f32 %v11924_v28, %v8531_v42  ;;  %v6476_v10 = vpop.f32.mrb[99].mxu1  ;;  %v12015_v54 = vadd.f32 %v8772_v7, %v8244_v29  ;;  %v6671_v28 = vmul.f32 %v12006_v13, %v12006_v13 }
 0x545   : > { %v12018_v24 = vadd.f32 %v11918_v46, %v6476_v10  ;;  %v6669_v55 = vmul.f32 %v12009_v50, %v12009_v50 }
 0x546   : > { %v12020_v62 = vadd.f32 %v8778_v26, %v8247_v38  ;;  %v6672_v2 = vmul.f32 %v12013_v57, %v12013_v57 }
 0x547   : > { %v6632_v19 = vadd.f32 %v12018_v24, %v12009_v50  ;;  %v6670_v6 = vmul.f32 %v12018_v24, %v12018_v24 }
 0x549   : > { %v6633_v18 = vadd.f32 %v12006_v13, %v6632_v19  ;;  %v6701_v27 = vadd.f32 %v6670_v6, %v6669_v55  ;;  %v8534_v14 = vpop.f32.mrb[100].mxu1 }
 0x54a   : > { %v12032_v46 = vadd.f32 %v11934_v52, %v8534_v14  ;;  %v6489_v51 = vpop.f32.mrb[101].mxu1 }
 0x54b   : > { %v6702_v5 = vadd.f32 %v6701_v27, %v6671_v28  ;;  %v12037_v17 = vadd.f32 %v11928_v8, %v6489_v51  ;;  %v6634_v48 = vadd.f32 %v12013_v57, %v6633_v18  ;;  %v8535_v1 = vpop.f32.mrb[102].mxu1 }
 0x54c   : > { %v12041_v30 = vadd.f32 %v11936_v33, %v8535_v1  ;;  %v6492_v29 = vpop.f32.mrb[103].mxu1  ;;  %v6675_v33 = vmul.f32 %v12032_v46, %v12032_v46 }
 0x54d   : > { %v6635_v61 = vadd.f32 %v12037_v17, %v6634_v48  ;;  %v6673_v52 = vmul.f32 %v12037_v17, %v12037_v17  ;;  %v6703_v35 = vadd.f32 %v6702_v5, %v6672_v2  ;;  %v12047_v34 = vadd.f32 %v11930_v9, %v6492_v29 }
 0x54e   : > { %v6676_v9 = vmul.f32 %v12041_v30, %v12041_v30 }
 0x54f   : > { %v6704_v38 = vadd.f32 %v6703_v35, %v6673_v52  ;;  %v6636_v8 = vadd.f32 %v12047_v34, %v6635_v61  ;;  %v6674_v16 = vmul.f32 %v12047_v34, %v12047_v34 }
 0x551   : > { %v6637_v58 = vadd.f32 %v12032_v46, %v6636_v8  ;;  %v6705_v31 = vadd.f32 %v6704_v38, %v6674_v16  ;;  %v8538_v49 = vpop.f32.mrb[104].mxu1 }
 0x552   : > { %v12056_v20 = vadd.f32 %v11946_v44, %v8538_v49  ;;  %v6505_v0 = vpop.f32.mrb[105].mxu1 }
 0x553   : > { %v6706_v7 = vadd.f32 %v6705_v31, %v6675_v33  ;;  %v12061_v11 = vadd.f32 %v11940_v56, %v6505_v0  ;;  %v6638_v4 = vadd.f32 %v12041_v30, %v6637_v58  ;;  %v8539_v42 = vpop.f32.mrb[106].mxu1 }
 0x554   : > { %v12065_v26 = vadd.f32 %v11948_v53, %v8539_v42  ;;  %v6508_v10 = vpop.f32.mrb[107].mxu1  ;;  %v6679_v53 = vmul.f32 %v12056_v20, %v12056_v20 }
 0x555   : > { %v6639_v55 = vadd.f32 %v12061_v11, %v6638_v4  ;;  %v6677_v44 = vmul.f32 %v12061_v11, %v12061_v11  ;;  %v6707_v19 = vadd.f32 %v6706_v7, %v6676_v9  ;;  %v12071_v6 = vadd.f32 %v11942_v15, %v6508_v10 }
 0x556   : > { %v6680_v15 = vmul.f32 %v12065_v26, %v12065_v26 }
 0x557   : > { %v6708_v28 = vadd.f32 %v6707_v19, %v6677_v44  ;;  %v6640_v56 = vadd.f32 %v12071_v6, %v6639_v55  ;;  %v6678_v18 = vmul.f32 %v12071_v6, %v12071_v6 }
 0x559   : > { %v6641_v27 = vadd.f32 %v12056_v20, %v6640_v56  ;;  %v6709_v14 = vadd.f32 %v6708_v28, %v6678_v18  ;;  %v8542_v51 = vpop.f32.mrb[108].mxu1 }
 0x55a   : > { %v12080_v2 = vadd.f32 %v11958_v12, %v8542_v51  ;;  %v6521_v5 = vpop.f32.mrb[109].mxu1 }
 0x55b   : > { %v6710_v48 = vadd.f32 %v6709_v14, %v6679_v53  ;;  %v12085_v1 = vadd.f32 %v11952_v21, %v6521_v5  ;;  %v6642_v29 = vadd.f32 %v12065_v26, %v6641_v27  ;;  %v8543_v61 = vpop.f32.mrb[110].mxu1 }
 0x55c   : > { %v12089_v52 = vadd.f32 %v11960_v23, %v8543_v61  ;;  %v6524_v35 = vpop.f32.mrb[111].mxu1  ;;  %v6683_v23 = vmul.f32 %v12080_v2, %v12080_v2 }
 0x55d   : > { %v6643_v38 = vadd.f32 %v12085_v1, %v6642_v29  ;;  %v6681_v12 = vmul.f32 %v12085_v1, %v12085_v1  ;;  %v6711_v8 = vadd.f32 %v6710_v48, %v6680_v15  ;;  %v12095_v16 = vadd.f32 %v11954_v47, %v6524_v35 }
 0x55e   : > { %v6684_v47 = vmul.f32 %v12089_v52, %v12089_v52 }
 0x55f   : > { %v6712_v33 = vadd.f32 %v6711_v8, %v6681_v12  ;;  %v6644_v21 = vadd.f32 %v12095_v16, %v6643_v38  ;;  %v6682_v58 = vmul.f32 %v12095_v16, %v12095_v16 }
 0x561   : > { %v6645_v31 = vadd.f32 %v12080_v2, %v6644_v21  ;;  %v6713_v49 = vadd.f32 %v6712_v33, %v6682_v58  ;;  %v8546_v0 = vpop.f32.mrb[112].mxu1 }
 0x562   : > { %v12104_v9 = vadd.f32 %v11970_v37, %v8546_v0  ;;  %v6537_v7 = vpop.f32.mrb[113].mxu1 }
 0x563   : > { %v6714_v4 = vadd.f32 %v6713_v49, %v6683_v23  ;;  %v12109_v42 = vadd.f32 %v11964_v63, %v6537_v7  ;;  %v6646_v10 = vadd.f32 %v12089_v52, %v6645_v31  ;;  %v8547_v55 = vpop.f32.mrb[114].mxu1 }
 0x564   : > { %v12113_v44 = vadd.f32 %v11972_v45, %v8547_v55  ;;  %v6540_v19 = vpop.f32.mrb[115].mxu1  ;;  %v6687_v45 = vmul.f32 %v12104_v9, %v12104_v9 }
 0x565   : > { %v6647_v28 = vadd.f32 %v12109_v42, %v6646_v10  ;;  %v6685_v37 = vmul.f32 %v12109_v42, %v12109_v42  ;;  %v6715_v56 = vadd.f32 %v6714_v4, %v6684_v47  ;;  %v12119_v18 = vadd.f32 %v11966_v3, %v6540_v19 }
 0x566   : > { %v6688_v3 = vmul.f32 %v12113_v44, %v12113_v44 }
 0x567   : > { %v6716_v53 = vadd.f32 %v6715_v56, %v6685_v37  ;;  %v6648_v63 = vadd.f32 %v12119_v18, %v6647_v28  ;;  %v6686_v27 = vmul.f32 %v12119_v18, %v12119_v18 }
 0x569   : > { %v6649_v14 = vadd.f32 %v12104_v9, %v6648_v63  ;;  %v6717_v51 = vadd.f32 %v6716_v53, %v6686_v27  ;;  %v8550_v5 = vpop.f32.mrb[116].mxu1 }
 0x56a   : > { %v12128_v15 = vadd.f32 %v11982_v40, %v8550_v5  ;;  %v6553_v48 = vpop.f32.mrb[117].mxu1 }
 0x56b   : > { %v6718_v29 = vadd.f32 %v6717_v51, %v6687_v45  ;;  %v12133_v61 = vadd.f32 %v11976_v39, %v6553_v48  ;;  %v6650_v35 = vadd.f32 %v12113_v44, %v6649_v14  ;;  %v8551_v38 = vpop.f32.mrb[118].mxu1 }
 0x56c   : > { %v12137_v12 = vadd.f32 %v11984_v41, %v8551_v38  ;;  %v6556_v8 = vpop.f32.mrb[119].mxu1  ;;  %v6691_v41 = vmul.f32 %v12128_v15, %v12128_v15 }
 0x56d   : > { %v6651_v33 = vadd.f32 %v12133_v61, %v6650_v35  ;;  %v6689_v40 = vmul.f32 %v12133_v61, %v12133_v61  ;;  %v6719_v21 = vadd.f32 %v6718_v29, %v6688_v3  ;;  %v12143_v58 = vadd.f32 %v11978_v36, %v6556_v8 }
 0x56e   : > { %v6692_v36 = vmul.f32 %v12137_v12, %v12137_v12 }
 0x56f   : > { %v6720_v23 = vadd.f32 %v6719_v21, %v6689_v40  ;;  %v6652_v39 = vadd.f32 %v12143_v58, %v6651_v33  ;;  %v6690_v31 = vmul.f32 %v12143_v58, %v12143_v58 }
 0x571   : > { %v6653_v49 = vadd.f32 %v12128_v15, %v6652_v39  ;;  %v6721_v0 = vadd.f32 %v6720_v23, %v6690_v31  ;;  %v8554_v7 = vpop.f32.mrb[120].mxu1 }
 0x572   : > { %v12152_v47 = vadd.f32 %v11994_v43, %v8554_v7  ;;  %v6569_v4 = vpop.f32.mrb[121].mxu1 }
 0x573   : > { %v6722_v10 = vadd.f32 %v6721_v0, %v6691_v41  ;;  %v12157_v55 = vadd.f32 %v11988_v60, %v6569_v4  ;;  %v6654_v19 = vadd.f32 %v12137_v12, %v6653_v49  ;;  %v8555_v28 = vpop.f32.mrb[122].mxu1 }
 0x574   : > { %v12161_v37 = vadd.f32 %v11996_v25, %v8555_v28  ;;  %v6572_v56 = vpop.f32.mrb[123].mxu1  ;;  %v6695_v25 = vmul.f32 %v12152_v47, %v12152_v47 }
 0x575   : > { %v6655_v53 = vadd.f32 %v12157_v55, %v6654_v19  ;;  %v6693_v43 = vmul.f32 %v12157_v55, %v12157_v55  ;;  %v6723_v63 = vadd.f32 %v6722_v10, %v6692_v36  ;;  %v12167_v27 = vadd.f32 %v11990_v59, %v6572_v56 }
 0x576   : > { %v6696_v59 = vmul.f32 %v12161_v37, %v12161_v37 }
 0x577   : > { %v6724_v45 = vadd.f32 %v6723_v63, %v6693_v43  ;;  %v6656_v60 = vadd.f32 %v12167_v27, %v6655_v53  ;;  %v6694_v14 = vmul.f32 %v12167_v27, %v12167_v27 }
 0x579   : > { %v6657_v51 = vadd.f32 %v12152_v47, %v6656_v60  ;;  %v6725_v5 = vadd.f32 %v6724_v45, %v6694_v14  ;;  %v8558_v48 = vpop.f32.mrb[124].mxu1 }
 0x57a   : > { %v12176_v3 = vadd.f32 %v12015_v54, %v8558_v48  ;;  %v6585_v29 = vpop.f32.mrb[125].mxu1 }
 0x57b   : > { %v6726_v35 = vadd.f32 %v6725_v5, %v6695_v25  ;;  %v12181_v38 = vadd.f32 %v12000_v22, %v6585_v29  ;;  %v6658_v8 = vadd.f32 %v12161_v37, %v6657_v51  ;;  %v8559_v33 = vpop.f32.mrb[126].mxu1 }
 0x57c   : > { %v12185_v40 = vadd.f32 %v12020_v62, %v8559_v33  ;;  %v6588_v21 = vpop.f32.mrb[127].mxu1  ;;  %v6699_v62 = vmul.f32 %v12176_v3, %v12176_v3 }
 0x57d   : > { %v6659_v23 = vadd.f32 %v12181_v38, %v6658_v8  ;;  %v6697_v54 = vmul.f32 %v12181_v38, %v12181_v38  ;;  %v6727_v39 = vadd.f32 %v6726_v35, %v6696_v59  ;;  %v12191_v31 = vadd.f32 %v12002_v32, %v6588_v21  ;;  %v12207_v21 = vld [vmem:[%s9676_s5 + $0x8] sm:$0xf] }
 0x57e   : > { %v6700_v4 = vmul.f32 %v12185_v40, %v12185_v40 }
 0x57f   : > { %v6728_v41 = vadd.f32 %v6727_v39, %v6697_v54  ;;  %v6660_v22 = vadd.f32 %v12191_v31, %v6659_v23  ;;  %v6698_v49 = vmul.f32 %v12191_v31, %v12191_v31  ;;  %v12211_v54 = vld [vmem:[%s9676_s5] sm:$0xf]  ;;  %v12311_v39 = vld [vmem:[%s9676_s5 + $0x6c] sm:$0xf]  ;;  %v12319_v23 = vld [vmem:[%s9676_s5 + $0x78] sm:$0xf] }
 0x580   : > { %12807 = vst [vmem:[#allocation17_spill] sm:$0xff] %v12311_v39  ;;  %12808 = vst [vmem:[#allocation27_spill] sm:$0xff] %v12319_v23 }
 0x581   : > { %v6661_v0 = vadd.f32 %v12176_v3, %v6660_v22  ;;  %v6729_v7 = vadd.f32 %v6728_v41, %v6698_v49  ;;  %v12215_v41 = vld [vmem:[%s9676_s5 + $0xc] sm:$0xf]  ;;  %v12219_v49 = vld [vmem:[%s9676_s5 + $0x4] sm:$0xf] }
 0x582   : > { %v12315_v22 = vld [vmem:[%s9676_s5 + $0x64] sm:$0xf] }
 0x583   : > { %v6662_v36 = vadd.f32 %v12185_v40, %v6661_v0  ;;  %v6730_v10 = vadd.f32 %v6729_v7, %v6699_v62  ;;  %v12223_v0 = vld [vmem:[%s9676_s5 + $0x18] sm:$0xf]  ;;  %v12307_v62 = vld [vmem:[%s9676_s5 + $0x60] sm:$0xf] }
 0x584   : > { %v12287_v7 = vld [vmem:[%s9676_s5 + $0x58] sm:$0xf]  ;;  %12806 = vst [vmem:[#allocation21_spill] sm:$0xff] %v12307_v62  ;;  %v9304_v62 = vld [vmem:[%s9676_s5 + $0x74] sm:$0xf] }
 0x585   : > { %v6663_v32 = vrot.slane %v6662_v36, 4  ;;  %v6731_v19 = vadd.f32 %v6730_v10, %v6700_v4  ;;  %v12227_v4 = vld [vmem:[%s9676_s5 + $0x10] sm:$0xf]  ;;  %v12231_v10 = vld [vmem:[%s9676_s5 + $0x1c] sm:$0xf]  ;;  %12801 = vst [vmem:[#allocation19_spill] sm:$0xff] %v12287_v7 }
 0x587   : > { %v6664_v28 = vadd.f32 %v6663_v32, %v6662_v36  ;;  %v6732_v56 = vrot.slane %v6731_v19, 4  ;;  %v12283_v32 = vld [vmem:[%s9676_s5 + $0x44] sm:$0xf] }
 0x589   : > { %v6665_v53 = vrot.slane %v6664_v28, 2  ;;  %v6733_v43 = vadd.f32 %v6732_v56, %v6731_v19  ;;  %v12235_v19 = vld [vmem:[%s9676_s5 + $0x14] sm:$0xf]  ;;  %v12239_v56 = vld [vmem:[%s9676_s5 + $0x28] sm:$0xf] }
 0x58b   : > { %v6666_v63 = vadd.f32 %v6665_v53, %v6664_v28  ;;  %v6734_v45 = vrot.slane %v6733_v43, 2  ;;  %v12271_v53 = vld [vmem:[%s9676_s5 + $0x48] sm:$0xf] }
 0x58c   : > { %12799 = vst [vmem:[#allocation18_spill] sm:$0xff] %v12271_v53  ;;  %v6839_v53 = vunpack.c.l.bf16 %v9304_v62 }
 0x58d   : > { %v6667_v60 = vrot.slane %v6666_v63, 1  ;;  %v6735_v14 = vadd.f32 %v6734_v45, %v6733_v43  ;;  %v12243_v43 = vld [vmem:[%s9676_s5 + $0x20] sm:$0xf]  ;;  %v12247_v45 = vld [vmem:[%s9676_s5 + $0x2c] sm:$0xf] }
 0x58f   : > { %v6668_v25 = vadd.f32 %v6667_v60, %v6666_v63  ;;  %v6736_v51 = vrot.slane %v6735_v14, 1  ;;  %v12279_v63 = vld [vmem:[%s9676_s5 + $0x4c] sm:$0xf]  ;;  %v12303_v60 = vld [vmem:[%s9676_s5 + $0x68] sm:$0xf] }
 0x590   : > { %12800 = vst [vmem:[#allocation20_spill] sm:$0xff] %v12279_v63  ;;  %12805 = vst [vmem:[#allocation15_spill] sm:$0xff] %v12303_v60  ;;  %v12323_v63 = vld [vmem:[%s9676_s5 + $0x70] sm:$0xf]  ;;  %v12327_v60 = vld [vmem:[%s9676_s5 + $0x7c] sm:$0xf] }
 0x591   : > { %v6737_v5 = vadd.f32 %v6736_v51, %v6735_v14  ;;  %v12202_v48 = vmul.f32 0.00390625, %v6668_v25  ;;  %v12251_v14 = vld [vmem:[%s9676_s5 + $0x24] sm:$0xf]  ;;  %v12255_v51 = vld [vmem:[%s9676_s5 + $0x38] sm:$0xf] }
 0x592   : > { %v12275_v25 = vld [vmem:[%s9676_s5 + $0x40] sm:$0xf] }
 0x593   : > { %v6739_v29 = vmul.f32 0.00390625, %v6737_v5  ;;  %v6740_v59 = vmul.f32 %v12202_v48, %v12202_v48  ;;  %v12291_v5 = vld [vmem:[%s9676_s5 + $0x50] sm:$0xf] }
 0x594   : > { %12802 = vst [vmem:[#allocation25_spill] sm:$0xff] %v12291_v5 }
 0x595   : > { %v6741_v35 = vsub.f32 %v6739_v29, %v6740_v59  ;;  %v12259_v29 = vld [vmem:[%s9676_s5 + $0x30] sm:$0xf]  ;;  %v12295_v59 = vld [vmem:[%s9676_s5 + $0x5c] sm:$0xf] }
 0x596   : > { %12803 = vst [vmem:[#allocation14_spill] sm:$0xff] %v12295_v59 }
 0x597   : > { %v6742_v8 = vmax.f32 %v6741_v35, 0.0  ;;  %v12263_v35 = vld [vmem:[%s9676_s5 + $0x3c] sm:$0xf] }
 0x599   : > { %v6743_v33 = vadd.f32 1e-05, %v6742_v8  ;;  %v12299_v8 = vld [vmem:[%s9676_s5 + $0x54] sm:$0xf] }
 0x59a   : > { %12804 = vst [vmem:[#allocation16_spill] sm:$0xff] %v12299_v8 }
 0x59b   : > { %9240 = vrsqrt.f32 %v6743_v33  ;;  %v12267_v33 = vld [vmem:[%s9676_s5 + $0x34] sm:$0xf] }
 0x5a5   : > { %v9241_v5 = vpop.eup %9240 }
 0x5a6   : > { %v6774_v7 = vmul.f32 %v9241_v5, %v12191_v31  ;;  %v12334_v59 = vmul.f32 %v9241_v5, %v12202_v48  ;;  %v12337_v39 = vmul.f32 %v9241_v5, %v12009_v50  ;;  %v12340_v8 = vmul.f32 %v9241_v5, %v12018_v24 }
 0x5a7   : > { %v12343_v28 = vmul.f32 %v9241_v5, %v12006_v13  ;;  %v12346_v23 = vmul.f32 %v9241_v5, %v12013_v57  ;;  %v12349_v62 = vmul.f32 %v9241_v5, %v12037_v17  ;;  %v12352_v31 = vmul.f32 %v9241_v5, %v12047_v34 }
 0x5a8   : > { %v6807_v48 = vsub.f32 %v6774_v7, %v12334_v59  ;;  %v12356_v50 = vmul.f32 %v9241_v5, %v12032_v46  ;;  %v12359_v24 = vmul.f32 %v9241_v5, %v12041_v30  ;;  %v12362_v13 = vmul.f32 %v9241_v5, %v12061_v11 }
 0x5a9   : > { %v12365_v57 = vmul.f32 %v9241_v5, %v12071_v6  ;;  %v12368_v17 = vmul.f32 %v9241_v5, %v12056_v20  ;;  %v12371_v34 = vmul.f32 %v9241_v5, %v12065_v26  ;;  %v12374_v7 = vmul.f32 %v9241_v5, %v12085_v1 }
 0x5aa   : > { %v6871_v46 = vadd.f32 %v6839_v53, %v6807_v48  ;;  %v12377_v36 = vmul.f32 %v9241_v5, %v12095_v16  ;;  %v12380_v30 = vmul.f32 %v9241_v5, %v12080_v2  ;;  %v12383_v11 = vmul.f32 %v9241_v5, %v12089_v52 }
 0x5ab   : > { %v12386_v6 = vmul.f32 %v9241_v5, %v12109_v42  ;;  %v12389_v20 = vmul.f32 %v9241_v5, %v12119_v18  ;;  %v12392_v26 = vmul.f32 %v9241_v5, %v12104_v9  ;;  %v12395_v1 = vmul.f32 %v9241_v5, %v12113_v44 }
 0x5ac   : > { %6903 = vst [vmem:[%s12397_s20 + $0xe8] sm:$0xff] %v6871_v46  ;;  %v12401_v2 = vmul.f32 %v9241_v5, %v12133_v61  ;;  %v12404_v52 = vmul.f32 %v9241_v5, %v12143_v58  ;;  %v12407_v16 = vmul.f32 %v9241_v5, %v12128_v15  ;;  %v12410_v42 = vmul.f32 %v9241_v5, %v12137_v12 }
 0x5ad   : > { %v12413_v9 = vmul.f32 %v9241_v5, %v12157_v55  ;;  %v12416_v44 = vmul.f32 %v9241_v5, %v12167_v27  ;;  %v12419_v18 = vmul.f32 %v9241_v5, %v12152_v47  ;;  %v12422_v61 = vmul.f32 %v9241_v5, %v12161_v37 }
 0x5ae   : > { %v12425_v58 = vmul.f32 %v9241_v5, %v12181_v38  ;;  %v12428_v15 = vmul.f32 %v9241_v5, %v12176_v3  ;;  %v12431_v12 = vmul.f32 %v9241_v5, %v12185_v40  ;;  %v6778_v55 = vsub.f32 %v12337_v39, %v12334_v59 }
 0x5af   : > { %v6779_v27 = vsub.f32 %v12340_v8, %v12334_v59  ;;  %v6780_v47 = vsub.f32 %v12343_v28, %v12334_v59  ;;  %v6781_v37 = vsub.f32 %v12346_v23, %v12334_v59  ;;  %v6782_v38 = vsub.f32 %v12349_v62, %v12334_v59 }
 0x5b0   : > { %v6783_v3 = vsub.f32 %v12352_v31, %v12334_v59  ;;  %v6784_v40 = vsub.f32 %v12356_v50, %v12334_v59  ;;  %v6785_v39 = vsub.f32 %v12359_v24, %v12334_v59  ;;  %v6786_v53 = vsub.f32 %v12362_v13, %v12334_v59 }
 0x5b1   : > { %v6787_v28 = vsub.f32 %v12365_v57, %v12334_v59  ;;  %v6788_v23 = vsub.f32 %v12368_v17, %v12334_v59  ;;  %v6789_v5 = vsub.f32 %v12371_v34, %v12334_v59  ;;  %v6790_v8 = vsub.f32 %v12374_v7, %v12334_v59 }
 0x5b2   : > { %v6791_v62 = vsub.f32 %v12377_v36, %v12334_v59  ;;  %v6792_v31 = vsub.f32 %v12380_v30, %v12334_v59  ;;  %v6793_v48 = vsub.f32 %v12383_v11, %v12334_v59  ;;  %v6794_v50 = vsub.f32 %v12386_v6, %v12334_v59 }
 0x5b3   : > { %v6795_v24 = vsub.f32 %v12389_v20, %v12334_v59  ;;  %v6796_v13 = vsub.f32 %v12392_v26, %v12334_v59  ;;  %v6797_v57 = vsub.f32 %v12395_v1, %v12334_v59  ;;  %v6798_v36 = vsub.f32 %v12401_v2, %v12334_v59 }
 0x5b4   : > { %v6799_v17 = vsub.f32 %v12404_v52, %v12334_v59  ;;  %v6800_v34 = vsub.f32 %v12407_v16, %v12334_v59  ;;  %v6801_v7 = vsub.f32 %v12410_v42, %v12334_v59  ;;  %v6802_v46 = vsub.f32 %v12413_v9, %v12334_v59 }
 0x5b5   : > { %v6803_v30 = vsub.f32 %v12416_v44, %v12334_v59  ;;  %v6804_v11 = vsub.f32 %v12419_v18, %v12334_v59  ;;  %v6805_v6 = vsub.f32 %v12422_v61, %v12334_v59  ;;  %v6806_v20 = vsub.f32 %v12425_v58, %v12334_v59 }
 0x5b6   : > { %v6808_v26 = vsub.f32 %v12428_v15, %v12334_v59  ;;  %v6809_v1 = vsub.f32 %v12431_v12, %v12334_v59  ;;  %v12809_v2 = vunpack.c.l.bf16 %v12211_v54  ;;  %v12810_v16 = vunpack.c.l.bf16 %v12219_v49 }
 0x5b7   : > { %v12811_v9 = vunpack.c.l.bf16 %v12207_v21  ;;  %v12812_v18 = vunpack.c.l.bf16 %v12215_v41  ;;  %v12813_v58 = vunpack.c.l.bf16 %v12227_v4  ;;  %v12814_v59 = vunpack.c.l.bf16 %v12235_v19 }
 0x5b8   : > { %v6842_v52 = vadd.f32 %v12809_v2, %v6778_v55  ;;  %v6843_v42 = vadd.f32 %v12810_v16, %v6779_v27  ;;  %v12815_v12 = vunpack.c.l.bf16 %v12223_v0  ;;  %v12816_v55 = vunpack.c.l.bf16 %v12231_v10  ;;  %v12835_v2 = vld [vmem:[#allocation19_spill] sm:$0xff]  ;;  %v12837_v16 = vld [vmem:[#allocation14_spill] sm:$0xff] }
 0x5b9   : > { %v6844_v44 = vadd.f32 %v12811_v9, %v6780_v47  ;;  %v6845_v61 = vadd.f32 %v12812_v18, %v6781_v37  ;;  %v6846_v15 = vadd.f32 %v12813_v58, %v6782_v38  ;;  %v6847_v54 = vadd.f32 %v12814_v59, %v6783_v3  ;;  %v12839_v9 = vld [vmem:[#allocation21_spill] sm:$0xff] }
 0x5ba   : > { %v6848_v49 = vadd.f32 %v12815_v12, %v6784_v40  ;;  %v6849_v27 = vadd.f32 %v12816_v55, %v6785_v39  ;;  %v12817_v21 = vunpack.c.l.bf16 %v12243_v43  ;;  %v12818_v41 = vunpack.c.l.bf16 %v12251_v14  ;;  %6874 = vst [vmem:[%s12397_s20] sm:$0xff] %v6842_v52  ;;  %6875 = vst [vmem:[%s12397_s20 + $0x8] sm:$0xff] %v6843_v42 }
 0x5bb   : > { %v12819_v4 = vunpack.c.l.bf16 %v12239_v56  ;;  %v12820_v0 = vunpack.c.l.bf16 %v12247_v45  ;;  %v12821_v38 = vunpack.c.l.bf16 %v12259_v29  ;;  %v12822_v14 = vunpack.c.l.bf16 %v12267_v33  ;;  %6876 = vst [vmem:[%s12397_s20 + $0x10] sm:$0xff] %v6844_v44  ;;  %6877 = vst [vmem:[%s12397_s20 + $0x18] sm:$0xff] %v6845_v61  ;;  %v12842_v61 = vld [vmem:[#allocation15_spill] sm:$0xff] }
 0x5bc   : > { %v6850_v47 = vadd.f32 %v12817_v21, %v6786_v53  ;;  %v6851_v37 = vadd.f32 %v12818_v41, %v6787_v28  ;;  %6878 = vst [vmem:[%s12397_s20 + $0x20] sm:$0xff] %v6846_v15  ;;  %6879 = vst [vmem:[%s12397_s20 + $0x28] sm:$0xff] %v6847_v54  ;;  %v12823_v56 = vunpack.c.l.bf16 %v12255_v51  ;;  %v12824_v45 = vunpack.c.l.bf16 %v12263_v35  ;;  %v12827_v51 = vld [vmem:[#allocation18_spill] sm:$0xff]  ;;  %v12844_v15 = vld [vmem:[#allocation17_spill] sm:$0xff] }
 0x5bd   : > { %v6852_v19 = vadd.f32 %v12819_v4, %v6788_v23  ;;  %v6853_v10 = vadd.f32 %v12820_v0, %v6789_v5  ;;  %v6854_v43 = vadd.f32 %v12821_v38, %v6790_v8  ;;  %v6855_v3 = vadd.f32 %v12822_v14, %v6791_v62  ;;  %6880 = vst [vmem:[%s12397_s20 + $0x30] sm:$0xff] %v6848_v49  ;;  %v12829_v5 = vld [vmem:[#allocation20_spill] sm:$0xff]  ;;  %v12831_v62 = vld [vmem:[#allocation25_spill] sm:$0xff] }
 0x5be   : > { %v6856_v40 = vadd.f32 %v12823_v56, %v6792_v31  ;;  %v6857_v39 = vadd.f32 %v12824_v45, %v6793_v48  ;;  %v12825_v29 = vunpack.c.l.bf16 %v12275_v25  ;;  %v12826_v33 = vunpack.c.l.bf16 %v12283_v32  ;;  %6881 = vst [vmem:[%s12397_s20 + $0x38] sm:$0xff] %v6849_v27  ;;  %6882 = vst [vmem:[%s12397_s20 + $0x40] sm:$0xff] %v6850_v47  ;;  %v12833_v48 = vld [vmem:[#allocation16_spill] sm:$0xff] }
 0x5bf   : > { %6883 = vst [vmem:[%s12397_s20 + $0x48] sm:$0xff] %v6851_v37  ;;  %v12828_v35 = vunpack.c.l.bf16 %v12827_v51  ;;  %v12830_v25 = vunpack.c.l.bf16 %v12829_v5  ;;  %v12832_v31 = vunpack.c.l.bf16 %v12831_v62  ;;  %6884 = vst [vmem:[%s12397_s20 + $0x50] sm:$0xff] %v6852_v19  ;;  %v12836_v52 = vunpack.c.l.bf16 %v12835_v2 }
 0x5c0   : > { %v6858_v53 = vadd.f32 %v12825_v29, %v6794_v50  ;;  %v6859_v28 = vadd.f32 %v12826_v33, %v6795_v24  ;;  %v12834_v50 = vunpack.c.l.bf16 %v12833_v48  ;;  %6885 = vst [vmem:[%s12397_s20 + $0x58] sm:$0xff] %v6853_v10  ;;  %6886 = vst [vmem:[%s12397_s20 + $0x60] sm:$0xff] %v6854_v43  ;;  %v12838_v42 = vunpack.c.l.bf16 %v12837_v16 }
 0x5c1   : > { %v6860_v23 = vadd.f32 %v12828_v35, %v6796_v13  ;;  %v6861_v8 = vadd.f32 %v12830_v25, %v6797_v57  ;;  %v6862_v32 = vadd.f32 %v12832_v31, %v6798_v36  ;;  %6887 = vst [vmem:[%s12397_s20 + $0x68] sm:$0xff] %v6855_v3  ;;  %v6864_v13 = vadd.f32 %v12836_v52, %v6800_v34 }
 0x5c2   : > { %v6863_v24 = vadd.f32 %v12834_v50, %v6799_v17  ;;  %v6865_v57 = vadd.f32 %v12838_v42, %v6801_v7  ;;  %v12840_v44 = vunpack.c.l.bf16 %v12839_v9  ;;  %v12841_v18 = vunpack.c.l.bf16 %v12315_v22  ;;  %6888 = vst [vmem:[%s12397_s20 + $0x70] sm:$0xff] %v6856_v40  ;;  %6889 = vst [vmem:[%s12397_s20 + $0x78] sm:$0xff] %v6857_v39 }
 0x5c3   : > { %6890 = vst [vmem:[%s12397_s20 + $0x80] sm:$0xff] %v6858_v53  ;;  %6891 = vst [vmem:[%s12397_s20 + $0x88] sm:$0xff] %v6859_v28  ;;  %v12843_v58 = vunpack.c.l.bf16 %v12842_v61  ;;  %v12845_v7 = vunpack.c.l.bf16 %v12844_v15 }
 0x5c4   : > { %v6866_v36 = vadd.f32 %v12840_v44, %v6802_v46  ;;  %v6867_v17 = vadd.f32 %v12841_v18, %v6803_v30  ;;  %v12846_v46 = vunpack.c.l.bf16 %v12323_v63  ;;  %v12847_v30 = vld [vmem:[#allocation27_spill] sm:$0xff]  ;;  %6892 = vst [vmem:[%s12397_s20 + $0x90] sm:$0xff] %v6860_v23  ;;  %6893 = vst [vmem:[%s12397_s20 + $0x98] sm:$0xff] %v6861_v8  ;;  %v12849_v63 = vunpack.c.l.bf16 %v12327_v60 }
 0x5c5   : > { %v6868_v34 = vadd.f32 %v12843_v58, %v6804_v11  ;;  %v6869_v59 = vadd.f32 %v12845_v7, %v6805_v6  ;;  %v12848_v54 = vunpack.c.l.bf16 %v12847_v30  ;;  %6894 = vst [vmem:[%s12397_s20 + $0xa0] sm:$0xff] %v6862_v32  ;;  %6895 = vst [vmem:[%s12397_s20 + $0xa8] sm:$0xff] %v6863_v24 }
 0x5c6   : > { %v6870_v22 = vadd.f32 %v12846_v46, %v6806_v20  ;;  %v6873_v11 = vadd.f32 %v12849_v63, %v6809_v1  ;;  %6896 = vst [vmem:[%s12397_s20 + $0xb0] sm:$0xff] %v6864_v13  ;;  %6897 = vst [vmem:[%s12397_s20 + $0xb8] sm:$0xff] %v6865_v57 }
 0x5c7   : > { %v6872_v12 = vadd.f32 %v12848_v54, %v6808_v26  ;;  %6898 = vst [vmem:[%s12397_s20 + $0xc0] sm:$0xff] %v6866_v36  ;;  %6899 = vst [vmem:[%s12397_s20 + $0xc8] sm:$0xff] %v6867_v17 }
 0x5c8   : > { %6900 = vst [vmem:[%s12397_s20 + $0xd0] sm:$0xff] %v6868_v34  ;;  %6901 = vst [vmem:[%s12397_s20 + $0xd8] sm:$0xff] %v6869_v59 }
 0x5c9   : > { %6902 = vst [vmem:[%s12397_s20 + $0xe0] sm:$0xff] %v6870_v22  ;;  %6904 = vst [vmem:[%s12397_s20 + $0xf0] sm:$0xff] %v6872_v12 }
 0x5ca   : > { %6905 = vst [vmem:[%s12397_s20 + $0xf8] sm:$0xff] %v6873_v11 }
 0x5cb   : > { %9404 = shalt.err (!%p9401_p1)
}
 0x5cc   : > { %s9405_s17 = scalar_lea.hbm %s12582_s27, 4096  ;;  %s9409_s30 = scalar_lea.hbm %s12642_s3, 8192 }
 0x5cd   : > { %p9406_p13 = scmp.ne.s32.totalorder %s12582_s27, %s9405_s17  ;;  %p9410_p4 = scmp.lt.u32.totalorder %s12582_s27, %s12642_s3 }
 0x5ce   : > { %p9411_p5 = scmp.lt.u32.totalorder %s9409_s30, %s9405_s17  ;;  %p9413_p11 = scmp.lt.u32.totalorder %s9405_s17, %s12582_s27 }
 0x5cf   : > { %p9407_p6 = pnand %p9406_p13, %p12850_p0 }
 0x5d0   : > { %p9412_p8 = por %p9411_p5, %p9410_p4 }
 0x5d1   : > { %p9408_p10 = pneg %p9407_p6 }
 0x5d2   : > { %p9414_p2 = por %p9413_p11, %p9412_p8 }
 0x5d4   : > { %p9415_p3 = pnand %p9414_p2, %p9408_p10 }
 0x5d6   : > { %9418 = shalt.err (!%p9415_p3)
}
 0x5d7   : > { %s9469_s18 = smov 128   ;;  %s9470_s20 = smov 8  }
 0x5d8   : > { %8890 = dma.vmem_to_hbm [thread:$0]  (%p12850_p0), %s12584_s8, 4096, %s12582_s27, %s6907_s28, %s9469_s18, %s9469_s18, %s9470_s20  }
 0x5d9 PF: > { %s6935_s7 = sand.u32 1, %s9449_s12   ;;  %p12851_p7 = scmp.ne.s32.totalorder %s12690_s19, 0 }
 0x5da   : > { %p12852_p9 = scmp.ge.s32.totalorder %s9461_s15, 2  ;;  %s6936_s16 = scalar_lea.sflag [#allocation6], %s6935_s7 }
 0x5dc   : > { %p8904_p12 = pnand %p12852_p9, %p12851_p7 }
 0x5de   : > { %9444 = dma.done.wait (!%p8904_p12), %s6936_s16, 4096  }
 0x5df   : > { %9446 = vsyncadd (!%p8904_p12), %s6936_s16, 4294963200  ;;  %p17_p1 = scmp.ge.s32.totalorder %s9607_s23, 4   ;;  %s12853_s12 = smov %s9453_s13 }
 0x5e0   : > { %s12854_s13 = smov %s9457_s14  ;;  %s12855_s14 = smov %s9623_s9 }
 0x5e1   : > { %s12856_s15 = smov %s9607_s23  ;;  %19 = sbr.rel (!%p17_p1) target bundleno = 6 (0x6), region = 93 }
 0x5e8   :  { %6941 = vsyncpa [#allocation5], 1 }
 0x5e9   :  { %6943 = vsyncpa [#allocation5 + $0x1], 1 }
 0x5ea   :  { %6944 = vsyncpa [#allocation8], 1 }
 0x5eb   :  { %6945 = vsyncpa [#allocation6], 1 }
 0x5ec   :  { %6947 = vsyncpa [#allocation6 + $0x1], 1 }

</bundles_post_ra>
